<compile_context>
chip_gen: v7x
topology: tpu7x:2x2x1
jax: 0.10.0
libtpu: 0.0.40
codegen_flags: <defaults>
</compile_context>

<pallas_src>
import functools

import jax
import jax.numpy as jnp
from jax.experimental import pallas as pl
from jax.experimental.pallas import tpu as pltpu


def _round_up(x, m):
    return ((x + m - 1) // m) * m


def _decoder_kernel(T, L, H, Bp,
                    emb_ref, venc_ref, mask_ref, h0_ref, c0_ref,
                    w_ih_ref, w_hh_ref, b_ref,
                    w_dv_ref, w_lo_ref, w_gen_ref, b_gen_ref,
                    logits_ref, attn_ref, ops_buf):
    f32 = jnp.float32

    # ---- loop-invariant loads & hoisted broadcasts (none of these repeat per step) ----
    venc = venc_ref[...]                       # (Bp, Sp, H) encoder memory
    mask3 = mask_ref[...][:, None, :]          # (Bp, 1, Sp) additive mask (0 / -1e30)
    w_dv = w_dv_ref[...]                       # (H, H)   dvlinin.weight.T
    w_lo = w_lo_ref[...]                       # (2H, H)  linout.weight.T
    w_lo_d = w_lo[0:H]                         # applied to decout
    w_lo_v = w_lo[H:2 * H]                     # applied to the attention context
    w_gen = w_gen_ref[...]                     # (H, Vp)  gen.weight.T (V padded to 128)

    w_ih_x, w_hh, b_lstm = [], [], []
    for l in range(L):
        w_ih_l = w_ih_ref[l]                   # (2H, 4H) gate-fused columns [i | f | g | o]
        w_ih_x.append(w_ih_l[0:H])             # weights applied to the layer's main input
        w_hh.append(w_hh_ref[l])               # (H, 4H)
        # Hoisted bias broadcast: JAX does not CSE broadcast_in_dim inside the unrolled loop.
        b_lstm.append(jnp.broadcast_to(b_ref[l], (Bp, 4 * H)))
    w_ih_op = w_ih_ref[0][H:2 * H]             # layer-0 weights applied to the input-feeding op

    h = [h0_ref[l] for l in range(L)]
    c = [c0_ref[l] for l in range(L)]
    op = jnp.zeros((Bp, H), f32)               # (Bp, H) input-feeding vector

    # TODO(synk): for large T, switch to lax.fori_loop with stacked (L,Bp,H) carries to
    # bound live ranges; T is small and static here so a full unroll is fine.
    for t in range(T):
        x = emb_ref[t]                         # (Bp, H) embedding of previous token
        for l in range(L):
            # Fused gate slab: lane-dense (Bp, 4H) matmuls, no concatenates.
            gates = jnp.dot(x, w_ih_x[l], preferred_element_type=f32)
            if l == 0:
                gates = gates + jnp.dot(op, w_ih_op, preferred_element_type=f32)
            gates = gates + jnp.dot(h[l], w_hh[l], preferred_element_type=f32)
            gates = gates + b_lstm[l]
            # Whole-slab activations (lane-dense EUP passes), then static gate slices.
            sig = jax.nn.sigmoid(gates)
            th = jnp.tanh(gates)
            i_g = sig[:, 0:H]
            f_g = sig[:, H:2 * H]
            g_g = th[:, 2 * H:3 * H]
            o_g = sig[:, 3 * H:4 * H]
            c[l] = f_g * c[l] + i_g * g_g
            h[l] = o_g * jnp.tanh(c[l])
            x = h[l]                           # layers l>0 take h directly
        decout = h[L - 1]

        # attention: vw = softmax(bmm(venc, dvlinin(decout)) + mask), on the MXU.
        vq = jnp.dot(decout, w_dv, preferred_element_type=f32)            # (Bp, H)
        s3 = jnp.einsum('bqh,bsh->bqs', vq[:, None, :], venc,
                        preferred_element_type=f32) + mask3               # (Bp, 1, Sp)
        s3 = s3 - jnp.max(s3, axis=-1, keepdims=True)
        e3 = jnp.exp(s3)
        # approx reciprocal -> EUP vrcp slot (otherwise idle); off the VALU chain.
        p3 = e3 * pl.reciprocal(jnp.sum(e3, axis=-1, keepdims=True), approx=True)
        attn_ref[t] = p3[:, 0, :]                                         # dense (Bp, Sp) store
        vcc = jnp.einsum('bqs,bsh->bqh', p3, venc,
                         preferred_element_type=f32)[:, 0, :]             # (Bp, H) context

        # op = tanh(linout(cat(decout, vcc))) as two split matmuls (no concat).
        op = jnp.tanh(jnp.dot(decout, w_lo_d, preferred_element_type=f32)
                      + jnp.dot(vcc, w_lo_v, preferred_element_type=f32))
        # Stash op_t; the vocab projection is deferred out of the recurrence.
        ops_buf[t * Bp:(t + 1) * Bp, :] = op
        # TODO(synk): nn.Dropout treated as identity (eval mode) to keep the kernel deterministic.

    # Deferred vocab projection: ONE well-shaped MXU matmul + one lane/sublane-dense store.
    # TODO(synk): at production V/H/T, tile this matmul over V (grid axis or emit_pipeline)
    # and stream logits per V-tile instead of keeping the whole slab VMEM-resident.
    logits_ref[...] = (jnp.dot(ops_buf[...], w_gen, preferred_element_type=f32)
                       + b_gen_ref[...])


def surface_forward(params, vencoding, h0, c0, mask, out_tokens):
    """Teacher-forced forward pass (the `out is not None` branch of surface.forward)."""
    B, S, H = vencoding.shape
    T = out_tokens.shape[1]
    L = h0.shape[0]
    V = params["w_gen"].shape[1]

    Bp = _round_up(B, 8)       # sublane tile
    Sp = _round_up(S, 128)     # lane tile (attention)
    Vp = _round_up(V, 128)     # lane tile (logits)

    # glue: previous-token sequence (BOS token = 3 at t=0) and embedding gather
    prev = jnp.concatenate([jnp.full((B, 1), 3, jnp.int32), out_tokens[:, :-1]], axis=1)
    emb_seq = jnp.transpose(params["emb"][prev], (1, 0, 2)).astype(jnp.float32)   # (T, B, H)
    emb_seq = jnp.pad(emb_seq, ((0, 0), (0, Bp - B), (0, 0)))
    venc_p = jnp.pad(vencoding.astype(jnp.float32), ((0, Bp - B), (0, Sp - S), (0, 0)))
    # finite large negative instead of -inf: robust to fully-masked (padded) rows
    mask_add = jnp.where(mask, -1e30, 0.0).astype(jnp.float32)                    # (B, S)
    mask_add = jnp.pad(mask_add, ((0, Bp - B), (0, Sp - S)), constant_values=-1e30)
    h0_p = jnp.pad(h0, ((0, 0), (0, Bp - B), (0, 0)))
    c0_p = jnp.pad(c0, ((0, 0), (0, Bp - B), (0, 0)))
    w_gen_p = jnp.pad(params["w_gen"], ((0, 0), (0, Vp - V)))
    b_gen_p = jnp.pad(params["b_gen"], ((0, 0), (0, Vp - V)))

    vmem = pl.BlockSpec(memory_space=pltpu.MemorySpace.VMEM)

    logits, attns = pl.pallas_call(
        functools.partial(_decoder_kernel, T, L, H, Bp),
        out_shape=(jax.ShapeDtypeStruct((T * Bp, Vp), jnp.float32),
                   jax.ShapeDtypeStruct((T, Bp, Sp), jnp.float32)),
        in_specs=[vmem] * 12,
        out_specs=(vmem, vmem),
        scratch_shapes=[pltpu.VMEM((T * Bp, H), jnp.float32)],   # op_t slab for deferred gen
        compiler_params=pltpu.CompilerParams(vmem_limit_bytes=32 * 1024 * 1024),
    )(emb_seq, venc_p, mask_add, h0_p, c0_p,
      params["w_ih"], params["w_hh"], params["b_lstm"],
      params["w_dv"], params["w_lo"], w_gen_p, b_gen_p)

    logits = logits.reshape(T, Bp, Vp)[:, :B, :V]
    attns = attns[:, :B, :S]
    # PyTorch convention: outputs (B, T, V); attns (T, B, S) == list of T tensors (B, S)
    return jnp.transpose(logits, (1, 0, 2)), attns


def surface_forward_ref(params, vencoding, h0, c0, mask, out_tokens):
    """Pure-JAX reference of the same math (for correctness checking)."""
    B, S, H = vencoding.shape
    T = out_tokens.shape[1]
    L = h0.shape[0]
    prev = jnp.concatenate([jnp.full((B, 1), 3, jnp.int32), out_tokens[:, :-1]], axis=1)
    emb_seq = params["emb"][prev]                              # (B, T, H)
    mask_add = jnp.where(mask, -jnp.inf, 0.0)
    h = [h0[l] for l in range(L)]
    c = [c0[l] for l in range(L)]
    op = jnp.zeros((B, H), jnp.float32)
    logits_all, attn_all = [], []
    for t in range(T):
        layer_in = jnp.concatenate([emb_seq[:, t], op], axis=1)        # (B, 2H)
        for l in range(L):
            gates = (layer_in @ params["w_ih"][l] + h[l] @ params["w_hh"][l]
                     + params["b_lstm"][l])                            # (B, 4H)
            i_g = jax.nn.sigmoid(gates[:, :H])
            f_g = jax.nn.sigmoid(gates[:, H:2 * H])
            g_g = jnp.tanh(gates[:, 2 * H:3 * H])
            o_g = jax.nn.sigmoid(gates[:, 3 * H:])
            c[l] = f_g * c[l] + i_g * g_g
            h[l] = o_g * jnp.tanh(c[l])
            # PyTorch LSTM layer l>0 takes an H-sized input; upper weight half is zero
            layer_in = jnp.concatenate([h[l], jnp.zeros_like(h[l])], axis=1)
        decout = h[L - 1]
        vq = decout @ params["w_dv"]
        scores = jnp.einsum("bsh,bh->bs", vencoding, vq) + mask_add
        p = jax.nn.softmax(scores, axis=-1)
        vcc = jnp.einsum("bs,bsh->bh", p, vencoding)
        op = jnp.tanh(jnp.concatenate([decout, vcc], axis=1) @ params["w_lo"])
        logits_all.append(op @ params["w_gen"] + params["b_gen"])
        attn_all.append(p)
    return jnp.stack(logits_all, axis=1), jnp.stack(attn_all, axis=0)


def init_params(key, V, H, L):
    """Gate-fused parameter layout: w_ih (L, 2H, 4H), w_hh (L, H, 4H), b (L, 1, 4H).

    Column block g*H:(g+1)*H of each slab holds gate g (PyTorch order i, f, g, o);
    rows :H of w_ih are the layer-input weights, rows H:2H the input-feeding (op)
    weights for layer 0 (zero for layers l>0, matching PyTorch's H-sized input).
    """
    ks = jax.random.split(key, 9)
    sc = 0.1
    emb = sc * jax.random.normal(ks[0], (V, H), jnp.float32)
    emb = emb.at[0].set(0.0)                                   # padding_idx=0
    w_ih = jnp.zeros((L, 2 * H, 4 * H), jnp.float32)
    w_hh = jnp.zeros((L, H, 4 * H), jnp.float32)
    b_lstm = jnp.zeros((L, 1, 4 * H), jnp.float32)
    for l in range(L):
        in_dim = 2 * H if l == 0 else H
        wih = sc * jax.random.normal(jax.random.fold_in(ks[1], l), (4 * H, in_dim), jnp.float32)
        whh = sc * jax.random.normal(jax.random.fold_in(ks[2], l), (4 * H, H), jnp.float32)
        bih = sc * jax.random.normal(jax.random.fold_in(ks[3], l), (4 * H,), jnp.float32)
        bhh = sc * jax.random.normal(jax.random.fold_in(ks[4], l), (4 * H,), jnp.float32)
        for g in range(4):
            w_ih = w_ih.at[l, :in_dim, g * H:(g + 1) * H].set(wih[g * H:(g + 1) * H, :].T)
            w_hh = w_hh.at[l, :, g * H:(g + 1) * H].set(whh[g * H:(g + 1) * H, :].T)
            b_lstm = b_lstm.at[l, 0, g * H:(g + 1) * H].set(
                bih[g * H:(g + 1) * H] + bhh[g * H:(g + 1) * H])
    w_dv = sc * jax.random.normal(ks[5], (H, H), jnp.float32)
    w_lo = sc * jax.random.normal(ks[6], (2 * H, H), jnp.float32)
    w_gen = sc * jax.random.normal(ks[7], (H, V), jnp.float32)
    b_gen = sc * jax.random.normal(ks[8], (1, V), jnp.float32)
    return dict(emb=emb, w_ih=w_ih, w_hh=w_hh, b_lstm=b_lstm,
                w_dv=w_dv, w_lo=w_lo, w_gen=w_gen, b_gen=b_gen)


if __name__ == "__main__":
    # args: vsz=64, hsz=32, layers=2, teacher-forced output length=6
    V, H, L = 64, 32, 2
    B, S, T = 4, 16, 6

    key = jax.random.PRNGKey(0)
    kp, kv, kh, kc, ko = jax.random.split(key, 5)
    params = init_params(kp, V, H, L)
    vencoding = jax.random.normal(kv, (B, S, H), jnp.float32)
    h0 = 0.1 * jax.random.normal(kh, (L, B, H), jnp.float32)
    c0 = 0.1 * jax.random.normal(kc, (L, B, H), jnp.float32)
    out_tokens = jax.random.randint(ko, (B, T), 1, V).astype(jnp.int32)
    valid_len = jnp.array([S, S - 3, S - 7, 5], jnp.int32)
    mask = jnp.arange(S)[None, :] >= valid_len[:, None]        # True = masked (padding)

    logits, attns = jax.block_until_ready(
        surface_forward(params, vencoding, h0, c0, mask, out_tokens))
    logits_ref, attns_ref = surface_forward_ref(params, vencoding, h0, c0, mask, out_tokens)

    assert logits.shape == (B, T, V) and attns.shape == (T, B, S)
    # tolerance relaxed from 1e-4 to 2e-3 because the kernel uses the EUP approximate
    # reciprocal for the softmax denominator (review suggestion); still tight for f32.
    assert jnp.allclose(logits, logits_ref, rtol=2e-3, atol=2e-3)
    assert jnp.allclose(attns, attns_ref, rtol=2e-3, atol=2e-3)
    print("KERNEL_OK")
</pallas_src>

<mosaic_0001>
module attributes {stable_mosaic.version = 11 : i64} {
  func.func @_decoder_kernel(%arg0: memref<6x8x32xf32, #tpu.memory_space<vmem>>, %arg1: memref<8x128x32xf32, #tpu.memory_space<vmem>>, %arg2: memref<8x128xf32, #tpu.memory_space<vmem>>, %arg3: memref<2x8x32xf32, #tpu.memory_space<vmem>>, %arg4: memref<2x8x32xf32, #tpu.memory_space<vmem>>, %arg5: memref<2x64x128xf32, #tpu.memory_space<vmem>>, %arg6: memref<2x32x128xf32, #tpu.memory_space<vmem>>, %arg7: memref<2x1x128xf32, #tpu.memory_space<vmem>>, %arg8: memref<32x32xf32, #tpu.memory_space<vmem>>, %arg9: memref<64x32xf32, #tpu.memory_space<vmem>>, %arg10: memref<32x128xf32, #tpu.memory_space<vmem>>, %arg11: memref<1x128xf32, #tpu.memory_space<vmem>>, %arg12: memref<48x128xf32, #tpu.memory_space<vmem>>, %arg13: memref<6x8x128xf32, #tpu.memory_space<vmem>>, %arg14: memref<48x32xf32, #tpu.memory_space<vmem>>) attributes {dimension_semantics = [], scalar_prefetch = 0 : i64, scratch_operands = 1 : i64, tpu.core_type = #tpu.core_type<tc>} {
    %c0 = arith.constant 0 : index
    %c0_0 = arith.constant 0 : index
    %c0_1 = arith.constant 0 : index
    %0 = vector.load %arg1[%c0, %c0_0, %c0_1] : memref<8x128x32xf32, #tpu.memory_space<vmem>>, vector<8x128x32xf32>
    %c0_2 = arith.constant 0 : index
    %c0_3 = arith.constant 0 : index
    %1 = vector.load %arg2[%c0_2, %c0_3] : memref<8x128xf32, #tpu.memory_space<vmem>>, vector<8x128xf32>
    %2 = vector.shape_cast %1 : vector<8x128xf32> to vector<8x1x128xf32>
    %c0_4 = arith.constant 0 : index
    %c0_5 = arith.constant 0 : index
    %3 = vector.load %arg8[%c0_4, %c0_5] : memref<32x32xf32, #tpu.memory_space<vmem>>, vector<32x32xf32>
    %c0_6 = arith.constant 0 : index
    %c0_7 = arith.constant 0 : index
    %4 = vector.load %arg9[%c0_6, %c0_7] : memref<64x32xf32, #tpu.memory_space<vmem>>, vector<64x32xf32>
    %5 = vector.extract_strided_slice %4 {offsets = [0, 0], sizes = [32, 32], strides = [1, 1]} : vector<64x32xf32> to vector<32x32xf32>
    %6 = vector.extract_strided_slice %4 {offsets = [32, 0], sizes = [32, 32], strides = [1, 1]} : vector<64x32xf32> to vector<32x32xf32>
    %c0_8 = arith.constant 0 : index
    %c0_9 = arith.constant 0 : index
    %7 = vector.load %arg10[%c0_8, %c0_9] : memref<32x128xf32, #tpu.memory_space<vmem>>, vector<32x128xf32>
    %c0_10 = arith.constant 0 : index
    %c0_11 = arith.constant 0 : index
    %c0_12 = arith.constant 0 : index
    %8 = vector.load %arg5[%c0_10, %c0_11, %c0_12] : memref<2x64x128xf32, #tpu.memory_space<vmem>>, vector<1x64x128xf32>
    %9 = vector.shape_cast %8 : vector<1x64x128xf32> to vector<64x128xf32>
    %10 = vector.extract_strided_slice %9 {offsets = [0, 0], sizes = [32, 128], strides = [1, 1]} : vector<64x128xf32> to vector<32x128xf32>
    %c0_13 = arith.constant 0 : index
    %c0_14 = arith.constant 0 : index
    %c0_15 = arith.constant 0 : index
    %11 = vector.load %arg6[%c0_13, %c0_14, %c0_15] : memref<2x32x128xf32, #tpu.memory_space<vmem>>, vector<1x32x128xf32>
    %12 = vector.shape_cast %11 : vector<1x32x128xf32> to vector<32x128xf32>
    %c0_16 = arith.constant 0 : index
    %c0_17 = arith.constant 0 : index
    %c0_18 = arith.constant 0 : index
    %13 = vector.load %arg7[%c0_16, %c0_17, %c0_18] : memref<2x1x128xf32, #tpu.memory_space<vmem>>, vector<1x1x128xf32>
    %14 = vector.shape_cast %13 : vector<1x1x128xf32> to vector<1x128xf32>
    %15 = vector.shape_cast %14 : vector<1x128xf32> to vector<1x128xf32>
    %16 = vector.broadcast %15 : vector<1x128xf32> to vector<8x128xf32>
    %c1 = arith.constant 1 : index
    %c0_19 = arith.constant 0 : index
    %c0_20 = arith.constant 0 : index
    %17 = vector.load %arg5[%c1, %c0_19, %c0_20] : memref<2x64x128xf32, #tpu.memory_space<vmem>>, vector<1x64x128xf32>
    %18 = vector.shape_cast %17 : vector<1x64x128xf32> to vector<64x128xf32>
    %19 = vector.extract_strided_slice %18 {offsets = [0, 0], sizes = [32, 128], strides = [1, 1]} : vector<64x128xf32> to vector<32x128xf32>
    %c1_21 = arith.constant 1 : index
    %c0_22 = arith.constant 0 : index
    %c0_23 = arith.constant 0 : index
    %20 = vector.load %arg6[%c1_21, %c0_22, %c0_23] : memref<2x32x128xf32, #tpu.memory_space<vmem>>, vector<1x32x128xf32>
    %21 = vector.shape_cast %20 : vector<1x32x128xf32> to vector<32x128xf32>
    %c1_24 = arith.constant 1 : index
    %c0_25 = arith.constant 0 : index
    %c0_26 = arith.constant 0 : index
    %22 = vector.load %arg7[%c1_24, %c0_25, %c0_26] : memref<2x1x128xf32, #tpu.memory_space<vmem>>, vector<1x1x128xf32>
    %23 = vector.shape_cast %22 : vector<1x1x128xf32> to vector<1x128xf32>
    %24 = vector.shape_cast %23 : vector<1x128xf32> to vector<1x128xf32>
    %25 = vector.broadcast %24 : vector<1x128xf32> to vector<8x128xf32>
    %c0_27 = arith.constant 0 : index
    %c0_28 = arith.constant 0 : index
    %c0_29 = arith.constant 0 : index
    %26 = vector.load %arg5[%c0_27, %c0_28, %c0_29] : memref<2x64x128xf32, #tpu.memory_space<vmem>>, vector<1x64x128xf32>
    %27 = vector.shape_cast %26 : vector<1x64x128xf32> to vector<64x128xf32>
    %28 = vector.extract_strided_slice %27 {offsets = [32, 0], sizes = [32, 128], strides = [1, 1]} : vector<64x128xf32> to vector<32x128xf32>
    %c0_30 = arith.constant 0 : index
    %c0_31 = arith.constant 0 : index
    %c0_32 = arith.constant 0 : index
    %29 = vector.load %arg3[%c0_30, %c0_31, %c0_32] : memref<2x8x32xf32, #tpu.memory_space<vmem>>, vector<1x8x32xf32>
    %30 = vector.shape_cast %29 : vector<1x8x32xf32> to vector<8x32xf32>
    %c1_33 = arith.constant 1 : index
    %c0_34 = arith.constant 0 : index
    %c0_35 = arith.constant 0 : index
    %31 = vector.load %arg3[%c1_33, %c0_34, %c0_35] : memref<2x8x32xf32, #tpu.memory_space<vmem>>, vector<1x8x32xf32>
    %32 = vector.shape_cast %31 : vector<1x8x32xf32> to vector<8x32xf32>
    %c0_36 = arith.constant 0 : index
    %c0_37 = arith.constant 0 : index
    %c0_38 = arith.constant 0 : index
    %33 = vector.load %arg4[%c0_36, %c0_37, %c0_38] : memref<2x8x32xf32, #tpu.memory_space<vmem>>, vector<1x8x32xf32>
    %34 = vector.shape_cast %33 : vector<1x8x32xf32> to vector<8x32xf32>
    %c1_39 = arith.constant 1 : index
    %c0_40 = arith.constant 0 : index
    %c0_41 = arith.constant 0 : index
    %35 = vector.load %arg4[%c1_39, %c0_40, %c0_41] : memref<2x8x32xf32, #tpu.memory_space<vmem>>, vector<1x8x32xf32>
    %36 = vector.shape_cast %35 : vector<1x8x32xf32> to vector<8x32xf32>
    %cst = arith.constant 0.000000e+00 : f32
    %37 = vector.broadcast %cst : f32 to vector<8x32xf32>
    %c0_42 = arith.constant 0 : index
    %c0_43 = arith.constant 0 : index
    %c0_44 = arith.constant 0 : index
    %38 = vector.load %arg0[%c0_42, %c0_43, %c0_44] : memref<6x8x32xf32, #tpu.memory_space<vmem>>, vector<1x8x32xf32>
    %39 = vector.shape_cast %38 : vector<1x8x32xf32> to vector<8x32xf32>
    %cst_45 = arith.constant dense<0.000000e+00> : vector<8x128xf32>
    %40 = tpu.matmul %39, %10, %cst_45 {dimension_numbers = #tpu.dot_dimension_numbers<[1], [0], [0], [1], [0, 0, 1, 1], [], []>} : vector<8x32xf32>, vector<32x128xf32>, vector<8x128xf32> -> vector<8x128xf32>
    %cst_46 = arith.constant dense<0.000000e+00> : vector<8x128xf32>
    %41 = tpu.matmul %37, %28, %cst_46 {dimension_numbers = #tpu.dot_dimension_numbers<[1], [0], [0], [1], [0, 0, 1, 1], [], []>} : vector<8x32xf32>, vector<32x128xf32>, vector<8x128xf32> -> vector<8x128xf32>
    %42 = arith.addf %40, %41 : vector<8x128xf32>
    %cst_47 = arith.constant dense<0.000000e+00> : vector<8x128xf32>
    %43 = tpu.matmul %30, %12, %cst_47 {dimension_numbers = #tpu.dot_dimension_numbers<[1], [0], [0], [1], [0, 0, 1, 1], [], []>} : vector<8x32xf32>, vector<32x128xf32>, vector<8x128xf32> -> vector<8x128xf32>
    %44 = arith.addf %42, %43 : vector<8x128xf32>
    %45 = arith.addf %44, %16 : vector<8x128xf32>
    %46 = arith.negf %45 : vector<8x128xf32>
    %47 = math.exp %46 : vector<8x128xf32>
    %cst_48 = arith.constant 1.000000e+00 : f32
    %48 = vector.broadcast %cst_48 : f32 to vector<8x128xf32>
    %49 = arith.addf %48, %47 : vector<8x128xf32>
    %50 = arith.divf %48, %49 : vector<8x128xf32>
    %51 = math.tanh %45 : vector<8x128xf32>
    %52 = vector.extract_strided_slice %50 {offsets = [0, 0], sizes = [8, 32], strides = [1, 1]} : vector<8x128xf32> to vector<8x32xf32>
    %53 = vector.extract_strided_slice %50 {offsets = [0, 32], sizes = [8, 32], strides = [1, 1]} : vector<8x128xf32> to vector<8x32xf32>
    %54 = vector.extract_strided_slice %51 {offsets = [0, 64], sizes = [8, 32], strides = [1, 1]} : vector<8x128xf32> to vector<8x32xf32>
    %55 = vector.extract_strided_slice %50 {offsets = [0, 96], sizes = [8, 32], strides = [1, 1]} : vector<8x128xf32> to vector<8x32xf32>
    %56 = arith.mulf %53, %34 : vector<8x32xf32>
    %57 = arith.mulf %52, %54 : vector<8x32xf32>
    %58 = arith.addf %56, %57 : vector<8x32xf32>
    %59 = math.tanh %58 : vector<8x32xf32>
    %60 = arith.mulf %55, %59 : vector<8x32xf32>
    %cst_49 = arith.constant dense<0.000000e+00> : vector<8x128xf32>
    %61 = tpu.matmul %60, %19, %cst_49 {dimension_numbers = #tpu.dot_dimension_numbers<[1], [0], [0], [1], [0, 0, 1, 1], [], []>} : vector<8x32xf32>, vector<32x128xf32>, vector<8x128xf32> -> vector<8x128xf32>
    %cst_50 = arith.constant dense<0.000000e+00> : vector<8x128xf32>
    %62 = tpu.matmul %32, %21, %cst_50 {dimension_numbers = #tpu.dot_dimension_numbers<[1], [0], [0], [1], [0, 0, 1, 1], [], []>} : vector<8x32xf32>, vector<32x128xf32>, vector<8x128xf32> -> vector<8x128xf32>
    %63 = arith.addf %61, %62 : vector<8x128xf32>
    %64 = arith.addf %63, %25 : vector<8x128xf32>
    %65 = arith.negf %64 : vector<8x128xf32>
    %66 = math.exp %65 : vector<8x128xf32>
    %cst_51 = arith.constant 1.000000e+00 : f32
    %67 = vector.broadcast %cst_51 : f32 to vector<8x128xf32>
    %68 = arith.addf %67, %66 : vector<8x128xf32>
    %69 = arith.divf %67, %68 : vector<8x128xf32>
    %70 = math.tanh %64 : vector<8x128xf32>
    %71 = vector.extract_strided_slice %69 {offsets = [0, 0], sizes = [8, 32], strides = [1, 1]} : vector<8x128xf32> to vector<8x32xf32>
    %72 = vector.extract_strided_slice %69 {offsets = [0, 32], sizes = [8, 32], strides = [1, 1]} : vector<8x128xf32> to vector<8x32xf32>
    %73 = vector.extract_strided_slice %70 {offsets = [0, 64], sizes = [8, 32], strides = [1, 1]} : vector<8x128xf32> to vector<8x32xf32>
    %74 = vector.extract_strided_slice %69 {offsets = [0, 96], sizes = [8, 32], strides = [1, 1]} : vector<8x128xf32> to vector<8x32xf32>
    %75 = arith.mulf %72, %36 : vector<8x32xf32>
    %76 = arith.mulf %71, %73 : vector<8x32xf32>
    %77 = arith.addf %75, %76 : vector<8x32xf32>
    %78 = math.tanh %77 : vector<8x32xf32>
    %79 = arith.mulf %74, %78 : vector<8x32xf32>
    %cst_52 = arith.constant dense<0.000000e+00> : vector<8x32xf32>
    %80 = tpu.matmul %79, %3, %cst_52 {dimension_numbers = #tpu.dot_dimension_numbers<[1], [0], [0], [1], [0, 0, 1, 1], [], []>} : vector<8x32xf32>, vector<32x32xf32>, vector<8x32xf32> -> vector<8x32xf32>
    %81 = vector.shape_cast %80 : vector<8x32xf32> to vector<8x1x32xf32>
    "tpu.trace_start"() <{level = 10 : i32, message = "bqh,bsh->bqs"}> : () -> ()
    %cst_53 = arith.constant dense<0.000000e+00> : vector<8x1x128xf32>
    %82 = tpu.matmul %81, %0, %cst_53 {dimension_numbers = #tpu.dot_dimension_numbers<[2], [2], [1], [1], [0, 0, 0, 1, 1, 1], [0], [0]>} : vector<8x1x32xf32>, vector<8x128x32xf32>, vector<8x1x128xf32> -> vector<8x1x128xf32>
    "tpu.trace_stop"() : () -> ()
    %83 = arith.addf %82, %2 : vector<8x1x128xf32>
    %cst_54 = arith.constant dense<0xFF800000> : vector<8x1xf32>
    %84 = vector.multi_reduction <maximumf>, %83, %cst_54 [2] : vector<8x1x128xf32> to vector<8x1xf32>
    %85 = vector.shape_cast %84 : vector<8x1xf32> to vector<8x1x1xf32>
    %86 = vector.broadcast %85 : vector<8x1x1xf32> to vector<8x1x128xf32>
    %87 = arith.subf %83, %86 : vector<8x1x128xf32>
    %88 = math.exp %87 : vector<8x1x128xf32>
    %cst_55 = arith.constant dense<0.000000e+00> : vector<8x1xf32>
    %89 = vector.multi_reduction <add>, %88, %cst_55 [2] : vector<8x1x128xf32> to vector<8x1xf32>
    %90 = vector.shape_cast %89 : vector<8x1xf32> to vector<8x1x1xf32>
    %91 = tpu.reciprocal %90 {approx = true} : vector<8x1x1xf32> -> vector<8x1x1xf32>
    %92 = vector.broadcast %91 : vector<8x1x1xf32> to vector<8x1x128xf32>
    %93 = arith.mulf %88, %92 : vector<8x1x128xf32>
    %94 = vector.shape_cast %93 : vector<8x1x128xf32> to vector<8x128xf32>
    %c0_56 = arith.constant 0 : index
    %c0_57 = arith.constant 0 : index
    %c0_58 = arith.constant 0 : index
    %95 = vector.load %arg13[%c0_56, %c0_57, %c0_58] : memref<6x8x128xf32, #tpu.memory_space<vmem>>, vector<1x8x128xf32>
    %96 = vector.shape_cast %95 : vector<1x8x128xf32> to vector<8x128xf32>
    %97 = vector.shape_cast %94 : vector<8x128xf32> to vector<1x8x128xf32>
    tpu.vector_store %arg13[%c0_56, %c0_57, %c0_58], %97 {strides = array<i32>} : memref<6x8x128xf32, #tpu.memory_space<vmem>>, vector<1x8x128xf32>,
    "tpu.trace_start"() <{level = 10 : i32, message = "bqs,bsh->bqh"}> : () -> ()
    %cst_59 = arith.constant dense<0.000000e+00> : vector<8x1x32xf32>
    %98 = tpu.matmul %93, %0, %cst_59 {dimension_numbers = #tpu.dot_dimension_numbers<[2], [1], [1], [2], [0, 0, 0, 1, 1, 2], [0], [0]>} : vector<8x1x128xf32>, vector<8x128x32xf32>, vector<8x1x32xf32> -> vector<8x1x32xf32>
    "tpu.trace_stop"() : () -> ()
    %99 = vector.shape_cast %98 : vector<8x1x32xf32> to vector<8x32xf32>
    %cst_60 = arith.constant dense<0.000000e+00> : vector<8x32xf32>
    %100 = tpu.matmul %79, %5, %cst_60 {dimension_numbers = #tpu.dot_dimension_numbers<[1], [0], [0], [1], [0, 0, 1, 1], [], []>} : vector<8x32xf32>, vector<32x32xf32>, vector<8x32xf32> -> vector<8x32xf32>
    %cst_61 = arith.constant dense<0.000000e+00> : vector<8x32xf32>
    %101 = tpu.matmul %99, %6, %cst_61 {dimension_numbers = #tpu.dot_dimension_numbers<[1], [0], [0], [1], [0, 0, 1, 1], [], []>} : vector<8x32xf32>, vector<32x32xf32>, vector<8x32xf32> -> vector<8x32xf32>
    %102 = arith.addf %100, %101 : vector<8x32xf32>
    %103 = math.tanh %102 : vector<8x32xf32>
    %c0_62 = arith.constant 0 : index
    %c0_63 = arith.constant 0 : index
    %104 = vector.load %arg14[%c0_62, %c0_63] : memref<48x32xf32, #tpu.memory_space<vmem>>, vector<8x32xf32>
    tpu.vector_store %arg14[%c0_62, %c0_63], %103 {strides = array<i32>} : memref<48x32xf32, #tpu.memory_space<vmem>>, vector<8x32xf32>,
    %c1_64 = arith.constant 1 : index
    %c0_65 = arith.constant 0 : index
    %c0_66 = arith.constant 0 : index
    %105 = vector.load %arg0[%c1_64, %c0_65, %c0_66] : memref<6x8x32xf32, #tpu.memory_space<vmem>>, vector<1x8x32xf32>
    %106 = vector.shape_cast %105 : vector<1x8x32xf32> to vector<8x32xf32>
    %cst_67 = arith.constant dense<0.000000e+00> : vector<8x128xf32>
    %107 = tpu.matmul %106, %10, %cst_67 {dimension_numbers = #tpu.dot_dimension_numbers<[1], [0], [0], [1], [0, 0, 1, 1], [], []>} : vector<8x32xf32>, vector<32x128xf32>, vector<8x128xf32> -> vector<8x128xf32>
    %cst_68 = arith.constant dense<0.000000e+00> : vector<8x128xf32>
    %108 = tpu.matmul %103, %28, %cst_68 {dimension_numbers = #tpu.dot_dimension_numbers<[1], [0], [0], [1], [0, 0, 1, 1], [], []>} : vector<8x32xf32>, vector<32x128xf32>, vector<8x128xf32> -> vector<8x128xf32>
    %109 = arith.addf %107, %108 : vector<8x128xf32>
    %cst_69 = arith.constant dense<0.000000e+00> : vector<8x128xf32>
    %110 = tpu.matmul %60, %12, %cst_69 {dimension_numbers = #tpu.dot_dimension_numbers<[1], [0], [0], [1], [0, 0, 1, 1], [], []>} : vector<8x32xf32>, vector<32x128xf32>, vector<8x128xf32> -> vector<8x128xf32>
    %111 = arith.addf %109, %110 : vector<8x128xf32>
    %112 = arith.addf %111, %16 : vector<8x128xf32>
    %113 = arith.negf %112 : vector<8x128xf32>
    %114 = math.exp %113 : vector<8x128xf32>
    %cst_70 = arith.constant 1.000000e+00 : f32
    %115 = vector.broadcast %cst_70 : f32 to vector<8x128xf32>
    %116 = arith.addf %115, %114 : vector<8x128xf32>
    %117 = arith.divf %115, %116 : vector<8x128xf32>
    %118 = math.tanh %112 : vector<8x128xf32>
    %119 = vector.extract_strided_slice %117 {offsets = [0, 0], sizes = [8, 32], strides = [1, 1]} : vector<8x128xf32> to vector<8x32xf32>
    %120 = vector.extract_strided_slice %117 {offsets = [0, 32], sizes = [8, 32], strides = [1, 1]} : vector<8x128xf32> to vector<8x32xf32>
    %121 = vector.extract_strided_slice %118 {offsets = [0, 64], sizes = [8, 32], strides = [1, 1]} : vector<8x128xf32> to vector<8x32xf32>
    %122 = vector.extract_strided_slice %117 {offsets = [0, 96], sizes = [8, 32], strides = [1, 1]} : vector<8x128xf32> to vector<8x32xf32>
    %123 = arith.mulf %120, %58 : vector<8x32xf32>
    %124 = arith.mulf %119, %121 : vector<8x32xf32>
    %125 = arith.addf %123, %124 : vector<8x32xf32>
    %126 = math.tanh %125 : vector<8x32xf32>
    %127 = arith.mulf %122, %126 : vector<8x32xf32>
    %cst_71 = arith.constant dense<0.000000e+00> : vector<8x128xf32>
    %128 = tpu.matmul %127, %19, %cst_71 {dimension_numbers = #tpu.dot_dimension_numbers<[1], [0], [0], [1], [0, 0, 1, 1], [], []>} : vector<8x32xf32>, vector<32x128xf32>, vector<8x128xf32> -> vector<8x128xf32>
    %cst_72 = arith.constant dense<0.000000e+00> : vector<8x128xf32>
    %129 = tpu.matmul %79, %21, %cst_72 {dimension_numbers = #tpu.dot_dimension_numbers<[1], [0], [0], [1], [0, 0, 1, 1], [], []>} : vector<8x32xf32>, vector<32x128xf32>, vector<8x128xf32> -> vector<8x128xf32>
    %130 = arith.addf %128, %129 : vector<8x128xf32>
    %131 = arith.addf %130, %25 : vector<8x128xf32>
    %132 = arith.negf %131 : vector<8x128xf32>
    %133 = math.exp %132 : vector<8x128xf32>
    %cst_73 = arith.constant 1.000000e+00 : f32
    %134 = vector.broadcast %cst_73 : f32 to vector<8x128xf32>
    %135 = arith.addf %134, %133 : vector<8x128xf32>
    %136 = arith.divf %134, %135 : vector<8x128xf32>
    %137 = math.tanh %131 : vector<8x128xf32>
    %138 = vector.extract_strided_slice %136 {offsets = [0, 0], sizes = [8, 32], strides = [1, 1]} : vector<8x128xf32> to vector<8x32xf32>
    %139 = vector.extract_strided_slice %136 {offsets = [0, 32], sizes = [8, 32], strides = [1, 1]} : vector<8x128xf32> to vector<8x32xf32>
    %140 = vector.extract_strided_slice %137 {offsets = [0, 64], sizes = [8, 32], strides = [1, 1]} : vector<8x128xf32> to vector<8x32xf32>
    %141 = vector.extract_strided_slice %136 {offsets = [0, 96], sizes = [8, 32], strides = [1, 1]} : vector<8x128xf32> to vector<8x32xf32>
    %142 = arith.mulf %139, %77 : vector<8x32xf32>
    %143 = arith.mulf %138, %140 : vector<8x32xf32>
    %144 = arith.addf %142, %143 : vector<8x32xf32>
    %145 = math.tanh %144 : vector<8x32xf32>
    %146 = arith.mulf %141, %145 : vector<8x32xf32>
    %cst_74 = arith.constant dense<0.000000e+00> : vector<8x32xf32>
    %147 = tpu.matmul %146, %3, %cst_74 {dimension_numbers = #tpu.dot_dimension_numbers<[1], [0], [0], [1], [0, 0, 1, 1], [], []>} : vector<8x32xf32>, vector<32x32xf32>, vector<8x32xf32> -> vector<8x32xf32>
    %148 = vector.shape_cast %147 : vector<8x32xf32> to vector<8x1x32xf32>
    "tpu.trace_start"() <{level = 10 : i32, message = "bqh,bsh->bqs"}> : () -> ()
    %cst_75 = arith.constant dense<0.000000e+00> : vector<8x1x128xf32>
    %149 = tpu.matmul %148, %0, %cst_75 {dimension_numbers = #tpu.dot_dimension_numbers<[2], [2], [1], [1], [0, 0, 0, 1, 1, 1], [0], [0]>} : vector<8x1x32xf32>, vector<8x128x32xf32>, vector<8x1x128xf32> -> vector<8x1x128xf32>
    "tpu.trace_stop"() : () -> ()
    %150 = arith.addf %149, %2 : vector<8x1x128xf32>
    %cst_76 = arith.constant dense<0xFF800000> : vector<8x1xf32>
    %151 = vector.multi_reduction <maximumf>, %150, %cst_76 [2] : vector<8x1x128xf32> to vector<8x1xf32>
    %152 = vector.shape_cast %151 : vector<8x1xf32> to vector<8x1x1xf32>
    %153 = vector.broadcast %152 : vector<8x1x1xf32> to vector<8x1x128xf32>
    %154 = arith.subf %150, %153 : vector<8x1x128xf32>
    %155 = math.exp %154 : vector<8x1x128xf32>
    %cst_77 = arith.constant dense<0.000000e+00> : vector<8x1xf32>
    %156 = vector.multi_reduction <add>, %155, %cst_77 [2] : vector<8x1x128xf32> to vector<8x1xf32>
    %157 = vector.shape_cast %156 : vector<8x1xf32> to vector<8x1x1xf32>
    %158 = tpu.reciprocal %157 {approx = true} : vector<8x1x1xf32> -> vector<8x1x1xf32>
    %159 = vector.broadcast %158 : vector<8x1x1xf32> to vector<8x1x128xf32>
    %160 = arith.mulf %155, %159 : vector<8x1x128xf32>
    %161 = vector.shape_cast %160 : vector<8x1x128xf32> to vector<8x128xf32>
    %c1_78 = arith.constant 1 : index
    %c0_79 = arith.constant 0 : index
    %c0_80 = arith.constant 0 : index
    %162 = vector.load %arg13[%c1_78, %c0_79, %c0_80] : memref<6x8x128xf32, #tpu.memory_space<vmem>>, vector<1x8x128xf32>
    %163 = vector.shape_cast %162 : vector<1x8x128xf32> to vector<8x128xf32>
    %164 = vector.shape_cast %161 : vector<8x128xf32> to vector<1x8x128xf32>
    tpu.vector_store %arg13[%c1_78, %c0_79, %c0_80], %164 {strides = array<i32>} : memref<6x8x128xf32, #tpu.memory_space<vmem>>, vector<1x8x128xf32>,
    "tpu.trace_start"() <{level = 10 : i32, message = "bqs,bsh->bqh"}> : () -> ()
    %cst_81 = arith.constant dense<0.000000e+00> : vector<8x1x32xf32>
    %165 = tpu.matmul %160, %0, %cst_81 {dimension_numbers = #tpu.dot_dimension_numbers<[2], [1], [1], [2], [0, 0, 0, 1, 1, 2], [0], [0]>} : vector<8x1x128xf32>, vector<8x128x32xf32>, vector<8x1x32xf32> -> vector<8x1x32xf32>
    "tpu.trace_stop"() : () -> ()
    %166 = vector.shape_cast %165 : vector<8x1x32xf32> to vector<8x32xf32>
    %cst_82 = arith.constant dense<0.000000e+00> : vector<8x32xf32>
    %167 = tpu.matmul %146, %5, %cst_82 {dimension_numbers = #tpu.dot_dimension_numbers<[1], [0], [0], [1], [0, 0, 1, 1], [], []>} : vector<8x32xf32>, vector<32x32xf32>, vector<8x32xf32> -> vector<8x32xf32>
    %cst_83 = arith.constant dense<0.000000e+00> : vector<8x32xf32>
    %168 = tpu.matmul %166, %6, %cst_83 {dimension_numbers = #tpu.dot_dimension_numbers<[1], [0], [0], [1], [0, 0, 1, 1], [], []>} : vector<8x32xf32>, vector<32x32xf32>, vector<8x32xf32> -> vector<8x32xf32>
    %169 = arith.addf %167, %168 : vector<8x32xf32>
    %170 = math.tanh %169 : vector<8x32xf32>
    %c8 = arith.constant 8 : index
    %c0_84 = arith.constant 0 : index
    %171 = vector.load %arg14[%c8, %c0_84] : memref<48x32xf32, #tpu.memory_space<vmem>>, vector<8x32xf32>
    tpu.vector_store %arg14[%c8, %c0_84], %170 {strides = array<i32>} : memref<48x32xf32, #tpu.memory_space<vmem>>, vector<8x32xf32>,
    %c2 = arith.constant 2 : index
    %c0_85 = arith.constant 0 : index
    %c0_86 = arith.constant 0 : index
    %172 = vector.load %arg0[%c2, %c0_85, %c0_86] : memref<6x8x32xf32, #tpu.memory_space<vmem>>, vector<1x8x32xf32>
    %173 = vector.shape_cast %172 : vector<1x8x32xf32> to vector<8x32xf32>
    %cst_87 = arith.constant dense<0.000000e+00> : vector<8x128xf32>
    %174 = tpu.matmul %173, %10, %cst_87 {dimension_numbers = #tpu.dot_dimension_numbers<[1], [0], [0], [1], [0, 0, 1, 1], [], []>} : vector<8x32xf32>, vector<32x128xf32>, vector<8x128xf32> -> vector<8x128xf32>
    %cst_88 = arith.constant dense<0.000000e+00> : vector<8x128xf32>
    %175 = tpu.matmul %170, %28, %cst_88 {dimension_numbers = #tpu.dot_dimension_numbers<[1], [0], [0], [1], [0, 0, 1, 1], [], []>} : vector<8x32xf32>, vector<32x128xf32>, vector<8x128xf32> -> vector<8x128xf32>
    %176 = arith.addf %174, %175 : vector<8x128xf32>
    %cst_89 = arith.constant dense<0.000000e+00> : vector<8x128xf32>
    %177 = tpu.matmul %127, %12, %cst_89 {dimension_numbers = #tpu.dot_dimension_numbers<[1], [0], [0], [1], [0, 0, 1, 1], [], []>} : vector<8x32xf32>, vector<32x128xf32>, vector<8x128xf32> -> vector<8x128xf32>
    %178 = arith.addf %176, %177 : vector<8x128xf32>
    %179 = arith.addf %178, %16 : vector<8x128xf32>
    %180 = arith.negf %179 : vector<8x128xf32>
    %181 = math.exp %180 : vector<8x128xf32>
    %cst_90 = arith.constant 1.000000e+00 : f32
    %182 = vector.broadcast %cst_90 : f32 to vector<8x128xf32>
    %183 = arith.addf %182, %181 : vector<8x128xf32>
    %184 = arith.divf %182, %183 : vector<8x128xf32>
    %185 = math.tanh %179 : vector<8x128xf32>
    %186 = vector.extract_strided_slice %184 {offsets = [0, 0], sizes = [8, 32], strides = [1, 1]} : vector<8x128xf32> to vector<8x32xf32>
    %187 = vector.extract_strided_slice %184 {offsets = [0, 32], sizes = [8, 32], strides = [1, 1]} : vector<8x128xf32> to vector<8x32xf32>
    %188 = vector.extract_strided_slice %185 {offsets = [0, 64], sizes = [8, 32], strides = [1, 1]} : vector<8x128xf32> to vector<8x32xf32>
    %189 = vector.extract_strided_slice %184 {offsets = [0, 96], sizes = [8, 32], strides = [1, 1]} : vector<8x128xf32> to vector<8x32xf32>
    %190 = arith.mulf %187, %125 : vector<8x32xf32>
    %191 = arith.mulf %186, %188 : vector<8x32xf32>
    %192 = arith.addf %190, %191 : vector<8x32xf32>
    %193 = math.tanh %192 : vector<8x32xf32>
    %194 = arith.mulf %189, %193 : vector<8x32xf32>
    %cst_91 = arith.constant dense<0.000000e+00> : vector<8x128xf32>
    %195 = tpu.matmul %194, %19, %cst_91 {dimension_numbers = #tpu.dot_dimension_numbers<[1], [0], [0], [1], [0, 0, 1, 1], [], []>} : vector<8x32xf32>, vector<32x128xf32>, vector<8x128xf32> -> vector<8x128xf32>
    %cst_92 = arith.constant dense<0.000000e+00> : vector<8x128xf32>
    %196 = tpu.matmul %146, %21, %cst_92 {dimension_numbers = #tpu.dot_dimension_numbers<[1], [0], [0], [1], [0, 0, 1, 1], [], []>} : vector<8x32xf32>, vector<32x128xf32>, vector<8x128xf32> -> vector<8x128xf32>
    %197 = arith.addf %195, %196 : vector<8x128xf32>
    %198 = arith.addf %197, %25 : vector<8x128xf32>
    %199 = arith.negf %198 : vector<8x128xf32>
    %200 = math.exp %199 : vector<8x128xf32>
    %cst_93 = arith.constant 1.000000e+00 : f32
    %201 = vector.broadcast %cst_93 : f32 to vector<8x128xf32>
    %202 = arith.addf %201, %200 : vector<8x128xf32>
    %203 = arith.divf %201, %202 : vector<8x128xf32>
    %204 = math.tanh %198 : vector<8x128xf32>
    %205 = vector.extract_strided_slice %203 {offsets = [0, 0], sizes = [8, 32], strides = [1, 1]} : vector<8x128xf32> to vector<8x32xf32>
    %206 = vector.extract_strided_slice %203 {offsets = [0, 32], sizes = [8, 32], strides = [1, 1]} : vector<8x128xf32> to vector<8x32xf32>
    %207 = vector.extract_strided_slice %204 {offsets = [0, 64], sizes = [8, 32], strides = [1, 1]} : vector<8x128xf32> to vector<8x32xf32>
    %208 = vector.extract_strided_slice %203 {offsets = [0, 96], sizes = [8, 32], strides = [1, 1]} : vector<8x128xf32> to vector<8x32xf32>
    %209 = arith.mulf %206, %144 : vector<8x32xf32>
    %210 = arith.mulf %205, %207 : vector<8x32xf32>
    %211 = arith.addf %209, %210 : vector<8x32xf32>
    %212 = math.tanh %211 : vector<8x32xf32>
    %213 = arith.mulf %208, %212 : vector<8x32xf32>
    %cst_94 = arith.constant dense<0.000000e+00> : vector<8x32xf32>
    %214 = tpu.matmul %213, %3, %cst_94 {dimension_numbers = #tpu.dot_dimension_numbers<[1], [0], [0], [1], [0, 0, 1, 1], [], []>} : vector<8x32xf32>, vector<32x32xf32>, vector<8x32xf32> -> vector<8x32xf32>
    %215 = vector.shape_cast %214 : vector<8x32xf32> to vector<8x1x32xf32>
    "tpu.trace_start"() <{level = 10 : i32, message = "bqh,bsh->bqs"}> : () -> ()
    %cst_95 = arith.constant dense<0.000000e+00> : vector<8x1x128xf32>
    %216 = tpu.matmul %215, %0, %cst_95 {dimension_numbers = #tpu.dot_dimension_numbers<[2], [2], [1], [1], [0, 0, 0, 1, 1, 1], [0], [0]>} : vector<8x1x32xf32>, vector<8x128x32xf32>, vector<8x1x128xf32> -> vector<8x1x128xf32>
    "tpu.trace_stop"() : () -> ()
    %217 = arith.addf %216, %2 : vector<8x1x128xf32>
    %cst_96 = arith.constant dense<0xFF800000> : vector<8x1xf32>
    %218 = vector.multi_reduction <maximumf>, %217, %cst_96 [2] : vector<8x1x128xf32> to vector<8x1xf32>
    %219 = vector.shape_cast %218 : vector<8x1xf32> to vector<8x1x1xf32>
    %220 = vector.broadcast %219 : vector<8x1x1xf32> to vector<8x1x128xf32>
    %221 = arith.subf %217, %220 : vector<8x1x128xf32>
    %222 = math.exp %221 : vector<8x1x128xf32>
    %cst_97 = arith.constant dense<0.000000e+00> : vector<8x1xf32>
    %223 = vector.multi_reduction <add>, %222, %cst_97 [2] : vector<8x1x128xf32> to vector<8x1xf32>
    %224 = vector.shape_cast %223 : vector<8x1xf32> to vector<8x1x1xf32>
    %225 = tpu.reciprocal %224 {approx = true} : vector<8x1x1xf32> -> vector<8x1x1xf32>
    %226 = vector.broadcast %225 : vector<8x1x1xf32> to vector<8x1x128xf32>
    %227 = arith.mulf %222, %226 : vector<8x1x128xf32>
    %228 = vector.shape_cast %227 : vector<8x1x128xf32> to vector<8x128xf32>
    %c2_98 = arith.constant 2 : index
    %c0_99 = arith.constant 0 : index
    %c0_100 = arith.constant 0 : index
    %229 = vector.load %arg13[%c2_98, %c0_99, %c0_100] : memref<6x8x128xf32, #tpu.memory_space<vmem>>, vector<1x8x128xf32>
    %230 = vector.shape_cast %229 : vector<1x8x128xf32> to vector<8x128xf32>
    %231 = vector.shape_cast %228 : vector<8x128xf32> to vector<1x8x128xf32>
    tpu.vector_store %arg13[%c2_98, %c0_99, %c0_100], %231 {strides = array<i32>} : memref<6x8x128xf32, #tpu.memory_space<vmem>>, vector<1x8x128xf32>,
    "tpu.trace_start"() <{level = 10 : i32, message = "bqs,bsh->bqh"}> : () -> ()
    %cst_101 = arith.constant dense<0.000000e+00> : vector<8x1x32xf32>
    %232 = tpu.matmul %227, %0, %cst_101 {dimension_numbers = #tpu.dot_dimension_numbers<[2], [1], [1], [2], [0, 0, 0, 1, 1, 2], [0], [0]>} : vector<8x1x128xf32>, vector<8x128x32xf32>, vector<8x1x32xf32> -> vector<8x1x32xf32>
    "tpu.trace_stop"() : () -> ()
    %233 = vector.shape_cast %232 : vector<8x1x32xf32> to vector<8x32xf32>
    %cst_102 = arith.constant dense<0.000000e+00> : vector<8x32xf32>
    %234 = tpu.matmul %213, %5, %cst_102 {dimension_numbers = #tpu.dot_dimension_numbers<[1], [0], [0], [1], [0, 0, 1, 1], [], []>} : vector<8x32xf32>, vector<32x32xf32>, vector<8x32xf32> -> vector<8x32xf32>
    %cst_103 = arith.constant dense<0.000000e+00> : vector<8x32xf32>
    %235 = tpu.matmul %233, %6, %cst_103 {dimension_numbers = #tpu.dot_dimension_numbers<[1], [0], [0], [1], [0, 0, 1, 1], [], []>} : vector<8x32xf32>, vector<32x32xf32>, vector<8x32xf32> -> vector<8x32xf32>
    %236 = arith.addf %234, %235 : vector<8x32xf32>
    %237 = math.tanh %236 : vector<8x32xf32>
    %c16 = arith.constant 16 : index
    %c0_104 = arith.constant 0 : index
    %238 = vector.load %arg14[%c16, %c0_104] : memref<48x32xf32, #tpu.memory_space<vmem>>, vector<8x32xf32>
    tpu.vector_store %arg14[%c16, %c0_104], %237 {strides = array<i32>} : memref<48x32xf32, #tpu.memory_space<vmem>>, vector<8x32xf32>,
    %c3 = arith.constant 3 : index
    %c0_105 = arith.constant 0 : index
    %c0_106 = arith.constant 0 : index
    %239 = vector.load %arg0[%c3, %c0_105, %c0_106] : memref<6x8x32xf32, #tpu.memory_space<vmem>>, vector<1x8x32xf32>
    %240 = vector.shape_cast %239 : vector<1x8x32xf32> to vector<8x32xf32>
    %cst_107 = arith.constant dense<0.000000e+00> : vector<8x128xf32>
    %241 = tpu.matmul %240, %10, %cst_107 {dimension_numbers = #tpu.dot_dimension_numbers<[1], [0], [0], [1], [0, 0, 1, 1], [], []>} : vector<8x32xf32>, vector<32x128xf32>, vector<8x128xf32> -> vector<8x128xf32>
    %cst_108 = arith.constant dense<0.000000e+00> : vector<8x128xf32>
    %242 = tpu.matmul %237, %28, %cst_108 {dimension_numbers = #tpu.dot_dimension_numbers<[1], [0], [0], [1], [0, 0, 1, 1], [], []>} : vector<8x32xf32>, vector<32x128xf32>, vector<8x128xf32> -> vector<8x128xf32>
    %243 = arith.addf %241, %242 : vector<8x128xf32>
    %cst_109 = arith.constant dense<0.000000e+00> : vector<8x128xf32>
    %244 = tpu.matmul %194, %12, %cst_109 {dimension_numbers = #tpu.dot_dimension_numbers<[1], [0], [0], [1], [0, 0, 1, 1], [], []>} : vector<8x32xf32>, vector<32x128xf32>, vector<8x128xf32> -> vector<8x128xf32>
    %245 = arith.addf %243, %244 : vector<8x128xf32>
    %246 = arith.addf %245, %16 : vector<8x128xf32>
    %247 = arith.negf %246 : vector<8x128xf32>
    %248 = math.exp %247 : vector<8x128xf32>
    %cst_110 = arith.constant 1.000000e+00 : f32
    %249 = vector.broadcast %cst_110 : f32 to vector<8x128xf32>
    %250 = arith.addf %249, %248 : vector<8x128xf32>
    %251 = arith.divf %249, %250 : vector<8x128xf32>
    %252 = math.tanh %246 : vector<8x128xf32>
    %253 = vector.extract_strided_slice %251 {offsets = [0, 0], sizes = [8, 32], strides = [1, 1]} : vector<8x128xf32> to vector<8x32xf32>
    %254 = vector.extract_strided_slice %251 {offsets = [0, 32], sizes = [8, 32], strides = [1, 1]} : vector<8x128xf32> to vector<8x32xf32>
    %255 = vector.extract_strided_slice %252 {offsets = [0, 64], sizes = [8, 32], strides = [1, 1]} : vector<8x128xf32> to vector<8x32xf32>
    %256 = vector.extract_strided_slice %251 {offsets = [0, 96], sizes = [8, 32], strides = [1, 1]} : vector<8x128xf32> to vector<8x32xf32>
    %257 = arith.mulf %254, %192 : vector<8x32xf32>
    %258 = arith.mulf %253, %255 : vector<8x32xf32>
    %259 = arith.addf %257, %258 : vector<8x32xf32>
    %260 = math.tanh %259 : vector<8x32xf32>
    %261 = arith.mulf %256, %260 : vector<8x32xf32>
    %cst_111 = arith.constant dense<0.000000e+00> : vector<8x128xf32>
    %262 = tpu.matmul %261, %19, %cst_111 {dimension_numbers = #tpu.dot_dimension_numbers<[1], [0], [0], [1], [0, 0, 1, 1], [], []>} : vector<8x32xf32>, vector<32x128xf32>, vector<8x128xf32> -> vector<8x128xf32>
    %cst_112 = arith.constant dense<0.000000e+00> : vector<8x128xf32>
    %263 = tpu.matmul %213, %21, %cst_112 {dimension_numbers = #tpu.dot_dimension_numbers<[1], [0], [0], [1], [0, 0, 1, 1], [], []>} : vector<8x32xf32>, vector<32x128xf32>, vector<8x128xf32> -> vector<8x128xf32>
    %264 = arith.addf %262, %263 : vector<8x128xf32>
    %265 = arith.addf %264, %25 : vector<8x128xf32>
    %266 = arith.negf %265 : vector<8x128xf32>
    %267 = math.exp %266 : vector<8x128xf32>
    %cst_113 = arith.constant 1.000000e+00 : f32
    %268 = vector.broadcast %cst_113 : f32 to vector<8x128xf32>
    %269 = arith.addf %268, %267 : vector<8x128xf32>
    %270 = arith.divf %268, %269 : vector<8x128xf32>
    %271 = math.tanh %265 : vector<8x128xf32>
    %272 = vector.extract_strided_slice %270 {offsets = [0, 0], sizes = [8, 32], strides = [1, 1]} : vector<8x128xf32> to vector<8x32xf32>
    %273 = vector.extract_strided_slice %270 {offsets = [0, 32], sizes = [8, 32], strides = [1, 1]} : vector<8x128xf32> to vector<8x32xf32>
    %274 = vector.extract_strided_slice %271 {offsets = [0, 64], sizes = [8, 32], strides = [1, 1]} : vector<8x128xf32> to vector<8x32xf32>
    %275 = vector.extract_strided_slice %270 {offsets = [0, 96], sizes = [8, 32], strides = [1, 1]} : vector<8x128xf32> to vector<8x32xf32>
    %276 = arith.mulf %273, %211 : vector<8x32xf32>
    %277 = arith.mulf %272, %274 : vector<8x32xf32>
    %278 = arith.addf %276, %277 : vector<8x32xf32>
    %279 = math.tanh %278 : vector<8x32xf32>
    %280 = arith.mulf %275, %279 : vector<8x32xf32>
    %cst_114 = arith.constant dense<0.000000e+00> : vector<8x32xf32>
    %281 = tpu.matmul %280, %3, %cst_114 {dimension_numbers = #tpu.dot_dimension_numbers<[1], [0], [0], [1], [0, 0, 1, 1], [], []>} : vector<8x32xf32>, vector<32x32xf32>, vector<8x32xf32> -> vector<8x32xf32>
    %282 = vector.shape_cast %281 : vector<8x32xf32> to vector<8x1x32xf32>
    "tpu.trace_start"() <{level = 10 : i32, message = "bqh,bsh->bqs"}> : () -> ()
    %cst_115 = arith.constant dense<0.000000e+00> : vector<8x1x128xf32>
    %283 = tpu.matmul %282, %0, %cst_115 {dimension_numbers = #tpu.dot_dimension_numbers<[2], [2], [1], [1], [0, 0, 0, 1, 1, 1], [0], [0]>} : vector<8x1x32xf32>, vector<8x128x32xf32>, vector<8x1x128xf32> -> vector<8x1x128xf32>
    "tpu.trace_stop"() : () -> ()
    %284 = arith.addf %283, %2 : vector<8x1x128xf32>
    %cst_116 = arith.constant dense<0xFF800000> : vector<8x1xf32>
    %285 = vector.multi_reduction <maximumf>, %284, %cst_116 [2] : vector<8x1x128xf32> to vector<8x1xf32>
    %286 = vector.shape_cast %285 : vector<8x1xf32> to vector<8x1x1xf32>
    %287 = vector.broadcast %286 : vector<8x1x1xf32> to vector<8x1x128xf32>
    %288 = arith.subf %284, %287 : vector<8x1x128xf32>
    %289 = math.exp %288 : vector<8x1x128xf32>
    %cst_117 = arith.constant dense<0.000000e+00> : vector<8x1xf32>
    %290 = vector.multi_reduction <add>, %289, %cst_117 [2] : vector<8x1x128xf32> to vector<8x1xf32>
    %291 = vector.shape_cast %290 : vector<8x1xf32> to vector<8x1x1xf32>
    %292 = tpu.reciprocal %291 {approx = true} : vector<8x1x1xf32> -> vector<8x1x1xf32>
    %293 = vector.broadcast %292 : vector<8x1x1xf32> to vector<8x1x128xf32>
    %294 = arith.mulf %289, %293 : vector<8x1x128xf32>
    %295 = vector.shape_cast %294 : vector<8x1x128xf32> to vector<8x128xf32>
    %c3_118 = arith.constant 3 : index
    %c0_119 = arith.constant 0 : index
    %c0_120 = arith.constant 0 : index
    %296 = vector.load %arg13[%c3_118, %c0_119, %c0_120] : memref<6x8x128xf32, #tpu.memory_space<vmem>>, vector<1x8x128xf32>
    %297 = vector.shape_cast %296 : vector<1x8x128xf32> to vector<8x128xf32>
    %298 = vector.shape_cast %295 : vector<8x128xf32> to vector<1x8x128xf32>
    tpu.vector_store %arg13[%c3_118, %c0_119, %c0_120], %298 {strides = array<i32>} : memref<6x8x128xf32, #tpu.memory_space<vmem>>, vector<1x8x128xf32>,
    "tpu.trace_start"() <{level = 10 : i32, message = "bqs,bsh->bqh"}> : () -> ()
    %cst_121 = arith.constant dense<0.000000e+00> : vector<8x1x32xf32>
    %299 = tpu.matmul %294, %0, %cst_121 {dimension_numbers = #tpu.dot_dimension_numbers<[2], [1], [1], [2], [0, 0, 0, 1, 1, 2], [0], [0]>} : vector<8x1x128xf32>, vector<8x128x32xf32>, vector<8x1x32xf32> -> vector<8x1x32xf32>
    "tpu.trace_stop"() : () -> ()
    %300 = vector.shape_cast %299 : vector<8x1x32xf32> to vector<8x32xf32>
    %cst_122 = arith.constant dense<0.000000e+00> : vector<8x32xf32>
    %301 = tpu.matmul %280, %5, %cst_122 {dimension_numbers = #tpu.dot_dimension_numbers<[1], [0], [0], [1], [0, 0, 1, 1], [], []>} : vector<8x32xf32>, vector<32x32xf32>, vector<8x32xf32> -> vector<8x32xf32>
    %cst_123 = arith.constant dense<0.000000e+00> : vector<8x32xf32>
    %302 = tpu.matmul %300, %6, %cst_123 {dimension_numbers = #tpu.dot_dimension_numbers<[1], [0], [0], [1], [0, 0, 1, 1], [], []>} : vector<8x32xf32>, vector<32x32xf32>, vector<8x32xf32> -> vector<8x32xf32>
    %303 = arith.addf %301, %302 : vector<8x32xf32>
    %304 = math.tanh %303 : vector<8x32xf32>
    %c24 = arith.constant 24 : index
    %c0_124 = arith.constant 0 : index
    %305 = vector.load %arg14[%c24, %c0_124] : memref<48x32xf32, #tpu.memory_space<vmem>>, vector<8x32xf32>
    tpu.vector_store %arg14[%c24, %c0_124], %304 {strides = array<i32>} : memref<48x32xf32, #tpu.memory_space<vmem>>, vector<8x32xf32>,
    %c4 = arith.constant 4 : index
    %c0_125 = arith.constant 0 : index
    %c0_126 = arith.constant 0 : index
    %306 = vector.load %arg0[%c4, %c0_125, %c0_126] : memref<6x8x32xf32, #tpu.memory_space<vmem>>, vector<1x8x32xf32>
    %307 = vector.shape_cast %306 : vector<1x8x32xf32> to vector<8x32xf32>
    %cst_127 = arith.constant dense<0.000000e+00> : vector<8x128xf32>
    %308 = tpu.matmul %307, %10, %cst_127 {dimension_numbers = #tpu.dot_dimension_numbers<[1], [0], [0], [1], [0, 0, 1, 1], [], []>} : vector<8x32xf32>, vector<32x128xf32>, vector<8x128xf32> -> vector<8x128xf32>
    %cst_128 = arith.constant dense<0.000000e+00> : vector<8x128xf32>
    %309 = tpu.matmul %304, %28, %cst_128 {dimension_numbers = #tpu.dot_dimension_numbers<[1], [0], [0], [1], [0, 0, 1, 1], [], []>} : vector<8x32xf32>, vector<32x128xf32>, vector<8x128xf32> -> vector<8x128xf32>
    %310 = arith.addf %308, %309 : vector<8x128xf32>
    %cst_129 = arith.constant dense<0.000000e+00> : vector<8x128xf32>
    %311 = tpu.matmul %261, %12, %cst_129 {dimension_numbers = #tpu.dot_dimension_numbers<[1], [0], [0], [1], [0, 0, 1, 1], [], []>} : vector<8x32xf32>, vector<32x128xf32>, vector<8x128xf32> -> vector<8x128xf32>
    %312 = arith.addf %310, %311 : vector<8x128xf32>
    %313 = arith.addf %312, %16 : vector<8x128xf32>
    %314 = arith.negf %313 : vector<8x128xf32>
    %315 = math.exp %314 : vector<8x128xf32>
    %cst_130 = arith.constant 1.000000e+00 : f32
    %316 = vector.broadcast %cst_130 : f32 to vector<8x128xf32>
    %317 = arith.addf %316, %315 : vector<8x128xf32>
    %318 = arith.divf %316, %317 : vector<8x128xf32>
    %319 = math.tanh %313 : vector<8x128xf32>
    %320 = vector.extract_strided_slice %318 {offsets = [0, 0], sizes = [8, 32], strides = [1, 1]} : vector<8x128xf32> to vector<8x32xf32>
    %321 = vector.extract_strided_slice %318 {offsets = [0, 32], sizes = [8, 32], strides = [1, 1]} : vector<8x128xf32> to vector<8x32xf32>
    %322 = vector.extract_strided_slice %319 {offsets = [0, 64], sizes = [8, 32], strides = [1, 1]} : vector<8x128xf32> to vector<8x32xf32>
    %323 = vector.extract_strided_slice %318 {offsets = [0, 96], sizes = [8, 32], strides = [1, 1]} : vector<8x128xf32> to vector<8x32xf32>
    %324 = arith.mulf %321, %259 : vector<8x32xf32>
    %325 = arith.mulf %320, %322 : vector<8x32xf32>
    %326 = arith.addf %324, %325 : vector<8x32xf32>
    %327 = math.tanh %326 : vector<8x32xf32>
    %328 = arith.mulf %323, %327 : vector<8x32xf32>
    %cst_131 = arith.constant dense<0.000000e+00> : vector<8x128xf32>
    %329 = tpu.matmul %328, %19, %cst_131 {dimension_numbers = #tpu.dot_dimension_numbers<[1], [0], [0], [1], [0, 0, 1, 1], [], []>} : vector<8x32xf32>, vector<32x128xf32>, vector<8x128xf32> -> vector<8x128xf32>
    %cst_132 = arith.constant dense<0.000000e+00> : vector<8x128xf32>
    %330 = tpu.matmul %280, %21, %cst_132 {dimension_numbers = #tpu.dot_dimension_numbers<[1], [0], [0], [1], [0, 0, 1, 1], [], []>} : vector<8x32xf32>, vector<32x128xf32>, vector<8x128xf32> -> vector<8x128xf32>
    %331 = arith.addf %329, %330 : vector<8x128xf32>
    %332 = arith.addf %331, %25 : vector<8x128xf32>
    %333 = arith.negf %332 : vector<8x128xf32>
    %334 = math.exp %333 : vector<8x128xf32>
    %cst_133 = arith.constant 1.000000e+00 : f32
    %335 = vector.broadcast %cst_133 : f32 to vector<8x128xf32>
    %336 = arith.addf %335, %334 : vector<8x128xf32>
    %337 = arith.divf %335, %336 : vector<8x128xf32>
    %338 = math.tanh %332 : vector<8x128xf32>
    %339 = vector.extract_strided_slice %337 {offsets = [0, 0], sizes = [8, 32], strides = [1, 1]} : vector<8x128xf32> to vector<8x32xf32>
    %340 = vector.extract_strided_slice %337 {offsets = [0, 32], sizes = [8, 32], strides = [1, 1]} : vector<8x128xf32> to vector<8x32xf32>
    %341 = vector.extract_strided_slice %338 {offsets = [0, 64], sizes = [8, 32], strides = [1, 1]} : vector<8x128xf32> to vector<8x32xf32>
    %342 = vector.extract_strided_slice %337 {offsets = [0, 96], sizes = [8, 32], strides = [1, 1]} : vector<8x128xf32> to vector<8x32xf32>
    %343 = arith.mulf %340, %278 : vector<8x32xf32>
    %344 = arith.mulf %339, %341 : vector<8x32xf32>
    %345 = arith.addf %343, %344 : vector<8x32xf32>
    %346 = math.tanh %345 : vector<8x32xf32>
    %347 = arith.mulf %342, %346 : vector<8x32xf32>
    %cst_134 = arith.constant dense<0.000000e+00> : vector<8x32xf32>
    %348 = tpu.matmul %347, %3, %cst_134 {dimension_numbers = #tpu.dot_dimension_numbers<[1], [0], [0], [1], [0, 0, 1, 1], [], []>} : vector<8x32xf32>, vector<32x32xf32>, vector<8x32xf32> -> vector<8x32xf32>
    %349 = vector.shape_cast %348 : vector<8x32xf32> to vector<8x1x32xf32>
    "tpu.trace_start"() <{level = 10 : i32, message = "bqh,bsh->bqs"}> : () -> ()
    %cst_135 = arith.constant dense<0.000000e+00> : vector<8x1x128xf32>
    %350 = tpu.matmul %349, %0, %cst_135 {dimension_numbers = #tpu.dot_dimension_numbers<[2], [2], [1], [1], [0, 0, 0, 1, 1, 1], [0], [0]>} : vector<8x1x32xf32>, vector<8x128x32xf32>, vector<8x1x128xf32> -> vector<8x1x128xf32>
    "tpu.trace_stop"() : () -> ()
    %351 = arith.addf %350, %2 : vector<8x1x128xf32>
    %cst_136 = arith.constant dense<0xFF800000> : vector<8x1xf32>
    %352 = vector.multi_reduction <maximumf>, %351, %cst_136 [2] : vector<8x1x128xf32> to vector<8x1xf32>
    %353 = vector.shape_cast %352 : vector<8x1xf32> to vector<8x1x1xf32>
    %354 = vector.broadcast %353 : vector<8x1x1xf32> to vector<8x1x128xf32>
    %355 = arith.subf %351, %354 : vector<8x1x128xf32>
    %356 = math.exp %355 : vector<8x1x128xf32>
    %cst_137 = arith.constant dense<0.000000e+00> : vector<8x1xf32>
    %357 = vector.multi_reduction <add>, %356, %cst_137 [2] : vector<8x1x128xf32> to vector<8x1xf32>
    %358 = vector.shape_cast %357 : vector<8x1xf32> to vector<8x1x1xf32>
    %359 = tpu.reciprocal %358 {approx = true} : vector<8x1x1xf32> -> vector<8x1x1xf32>
    %360 = vector.broadcast %359 : vector<8x1x1xf32> to vector<8x1x128xf32>
    %361 = arith.mulf %356, %360 : vector<8x1x128xf32>
    %362 = vector.shape_cast %361 : vector<8x1x128xf32> to vector<8x128xf32>
    %c4_138 = arith.constant 4 : index
    %c0_139 = arith.constant 0 : index
    %c0_140 = arith.constant 0 : index
    %363 = vector.load %arg13[%c4_138, %c0_139, %c0_140] : memref<6x8x128xf32, #tpu.memory_space<vmem>>, vector<1x8x128xf32>
    %364 = vector.shape_cast %363 : vector<1x8x128xf32> to vector<8x128xf32>
    %365 = vector.shape_cast %362 : vector<8x128xf32> to vector<1x8x128xf32>
    tpu.vector_store %arg13[%c4_138, %c0_139, %c0_140], %365 {strides = array<i32>} : memref<6x8x128xf32, #tpu.memory_space<vmem>>, vector<1x8x128xf32>,
    "tpu.trace_start"() <{level = 10 : i32, message = "bqs,bsh->bqh"}> : () -> ()
    %cst_141 = arith.constant dense<0.000000e+00> : vector<8x1x32xf32>
    %366 = tpu.matmul %361, %0, %cst_141 {dimension_numbers = #tpu.dot_dimension_numbers<[2], [1], [1], [2], [0, 0, 0, 1, 1, 2], [0], [0]>} : vector<8x1x128xf32>, vector<8x128x32xf32>, vector<8x1x32xf32> -> vector<8x1x32xf32>
    "tpu.trace_stop"() : () -> ()
    %367 = vector.shape_cast %366 : vector<8x1x32xf32> to vector<8x32xf32>
    %cst_142 = arith.constant dense<0.000000e+00> : vector<8x32xf32>
    %368 = tpu.matmul %347, %5, %cst_142 {dimension_numbers = #tpu.dot_dimension_numbers<[1], [0], [0], [1], [0, 0, 1, 1], [], []>} : vector<8x32xf32>, vector<32x32xf32>, vector<8x32xf32> -> vector<8x32xf32>
    %cst_143 = arith.constant dense<0.000000e+00> : vector<8x32xf32>
    %369 = tpu.matmul %367, %6, %cst_143 {dimension_numbers = #tpu.dot_dimension_numbers<[1], [0], [0], [1], [0, 0, 1, 1], [], []>} : vector<8x32xf32>, vector<32x32xf32>, vector<8x32xf32> -> vector<8x32xf32>
    %370 = arith.addf %368, %369 : vector<8x32xf32>
    %371 = math.tanh %370 : vector<8x32xf32>
    %c32 = arith.constant 32 : index
    %c0_144 = arith.constant 0 : index
    %372 = vector.load %arg14[%c32, %c0_144] : memref<48x32xf32, #tpu.memory_space<vmem>>, vector<8x32xf32>
    tpu.vector_store %arg14[%c32, %c0_144], %371 {strides = array<i32>} : memref<48x32xf32, #tpu.memory_space<vmem>>, vector<8x32xf32>,
    %c5 = arith.constant 5 : index
    %c0_145 = arith.constant 0 : index
    %c0_146 = arith.constant 0 : index
    %373 = vector.load %arg0[%c5, %c0_145, %c0_146] : memref<6x8x32xf32, #tpu.memory_space<vmem>>, vector<1x8x32xf32>
    %374 = vector.shape_cast %373 : vector<1x8x32xf32> to vector<8x32xf32>
    %cst_147 = arith.constant dense<0.000000e+00> : vector<8x128xf32>
    %375 = tpu.matmul %374, %10, %cst_147 {dimension_numbers = #tpu.dot_dimension_numbers<[1], [0], [0], [1], [0, 0, 1, 1], [], []>} : vector<8x32xf32>, vector<32x128xf32>, vector<8x128xf32> -> vector<8x128xf32>
    %cst_148 = arith.constant dense<0.000000e+00> : vector<8x128xf32>
    %376 = tpu.matmul %371, %28, %cst_148 {dimension_numbers = #tpu.dot_dimension_numbers<[1], [0], [0], [1], [0, 0, 1, 1], [], []>} : vector<8x32xf32>, vector<32x128xf32>, vector<8x128xf32> -> vector<8x128xf32>
    %377 = arith.addf %375, %376 : vector<8x128xf32>
    %cst_149 = arith.constant dense<0.000000e+00> : vector<8x128xf32>
    %378 = tpu.matmul %328, %12, %cst_149 {dimension_numbers = #tpu.dot_dimension_numbers<[1], [0], [0], [1], [0, 0, 1, 1], [], []>} : vector<8x32xf32>, vector<32x128xf32>, vector<8x128xf32> -> vector<8x128xf32>
    %379 = arith.addf %377, %378 : vector<8x128xf32>
    %380 = arith.addf %379, %16 : vector<8x128xf32>
    %381 = arith.negf %380 : vector<8x128xf32>
    %382 = math.exp %381 : vector<8x128xf32>
    %cst_150 = arith.constant 1.000000e+00 : f32
    %383 = vector.broadcast %cst_150 : f32 to vector<8x128xf32>
    %384 = arith.addf %383, %382 : vector<8x128xf32>
    %385 = arith.divf %383, %384 : vector<8x128xf32>
    %386 = math.tanh %380 : vector<8x128xf32>
    %387 = vector.extract_strided_slice %385 {offsets = [0, 0], sizes = [8, 32], strides = [1, 1]} : vector<8x128xf32> to vector<8x32xf32>
    %388 = vector.extract_strided_slice %385 {offsets = [0, 32], sizes = [8, 32], strides = [1, 1]} : vector<8x128xf32> to vector<8x32xf32>
    %389 = vector.extract_strided_slice %386 {offsets = [0, 64], sizes = [8, 32], strides = [1, 1]} : vector<8x128xf32> to vector<8x32xf32>
    %390 = vector.extract_strided_slice %385 {offsets = [0, 96], sizes = [8, 32], strides = [1, 1]} : vector<8x128xf32> to vector<8x32xf32>
    %391 = arith.mulf %388, %326 : vector<8x32xf32>
    %392 = arith.mulf %387, %389 : vector<8x32xf32>
    %393 = arith.addf %391, %392 : vector<8x32xf32>
    %394 = math.tanh %393 : vector<8x32xf32>
    %395 = arith.mulf %390, %394 : vector<8x32xf32>
    %cst_151 = arith.constant dense<0.000000e+00> : vector<8x128xf32>
    %396 = tpu.matmul %395, %19, %cst_151 {dimension_numbers = #tpu.dot_dimension_numbers<[1], [0], [0], [1], [0, 0, 1, 1], [], []>} : vector<8x32xf32>, vector<32x128xf32>, vector<8x128xf32> -> vector<8x128xf32>
    %cst_152 = arith.constant dense<0.000000e+00> : vector<8x128xf32>
    %397 = tpu.matmul %347, %21, %cst_152 {dimension_numbers = #tpu.dot_dimension_numbers<[1], [0], [0], [1], [0, 0, 1, 1], [], []>} : vector<8x32xf32>, vector<32x128xf32>, vector<8x128xf32> -> vector<8x128xf32>
    %398 = arith.addf %396, %397 : vector<8x128xf32>
    %399 = arith.addf %398, %25 : vector<8x128xf32>
    %400 = arith.negf %399 : vector<8x128xf32>
    %401 = math.exp %400 : vector<8x128xf32>
    %cst_153 = arith.constant 1.000000e+00 : f32
    %402 = vector.broadcast %cst_153 : f32 to vector<8x128xf32>
    %403 = arith.addf %402, %401 : vector<8x128xf32>
    %404 = arith.divf %402, %403 : vector<8x128xf32>
    %405 = math.tanh %399 : vector<8x128xf32>
    %406 = vector.extract_strided_slice %404 {offsets = [0, 0], sizes = [8, 32], strides = [1, 1]} : vector<8x128xf32> to vector<8x32xf32>
    %407 = vector.extract_strided_slice %404 {offsets = [0, 32], sizes = [8, 32], strides = [1, 1]} : vector<8x128xf32> to vector<8x32xf32>
    %408 = vector.extract_strided_slice %405 {offsets = [0, 64], sizes = [8, 32], strides = [1, 1]} : vector<8x128xf32> to vector<8x32xf32>
    %409 = vector.extract_strided_slice %404 {offsets = [0, 96], sizes = [8, 32], strides = [1, 1]} : vector<8x128xf32> to vector<8x32xf32>
    %410 = arith.mulf %407, %345 : vector<8x32xf32>
    %411 = arith.mulf %406, %408 : vector<8x32xf32>
    %412 = arith.addf %410, %411 : vector<8x32xf32>
    %413 = math.tanh %412 : vector<8x32xf32>
    %414 = arith.mulf %409, %413 : vector<8x32xf32>
    %cst_154 = arith.constant dense<0.000000e+00> : vector<8x32xf32>
    %415 = tpu.matmul %414, %3, %cst_154 {dimension_numbers = #tpu.dot_dimension_numbers<[1], [0], [0], [1], [0, 0, 1, 1], [], []>} : vector<8x32xf32>, vector<32x32xf32>, vector<8x32xf32> -> vector<8x32xf32>
    %416 = vector.shape_cast %415 : vector<8x32xf32> to vector<8x1x32xf32>
    "tpu.trace_start"() <{level = 10 : i32, message = "bqh,bsh->bqs"}> : () -> ()
    %cst_155 = arith.constant dense<0.000000e+00> : vector<8x1x128xf32>
    %417 = tpu.matmul %416, %0, %cst_155 {dimension_numbers = #tpu.dot_dimension_numbers<[2], [2], [1], [1], [0, 0, 0, 1, 1, 1], [0], [0]>} : vector<8x1x32xf32>, vector<8x128x32xf32>, vector<8x1x128xf32> -> vector<8x1x128xf32>
    "tpu.trace_stop"() : () -> ()
    %418 = arith.addf %417, %2 : vector<8x1x128xf32>
    %cst_156 = arith.constant dense<0xFF800000> : vector<8x1xf32>
    %419 = vector.multi_reduction <maximumf>, %418, %cst_156 [2] : vector<8x1x128xf32> to vector<8x1xf32>
    %420 = vector.shape_cast %419 : vector<8x1xf32> to vector<8x1x1xf32>
    %421 = vector.broadcast %420 : vector<8x1x1xf32> to vector<8x1x128xf32>
    %422 = arith.subf %418, %421 : vector<8x1x128xf32>
    %423 = math.exp %422 : vector<8x1x128xf32>
    %cst_157 = arith.constant dense<0.000000e+00> : vector<8x1xf32>
    %424 = vector.multi_reduction <add>, %423, %cst_157 [2] : vector<8x1x128xf32> to vector<8x1xf32>
    %425 = vector.shape_cast %424 : vector<8x1xf32> to vector<8x1x1xf32>
    %426 = tpu.reciprocal %425 {approx = true} : vector<8x1x1xf32> -> vector<8x1x1xf32>
    %427 = vector.broadcast %426 : vector<8x1x1xf32> to vector<8x1x128xf32>
    %428 = arith.mulf %423, %427 : vector<8x1x128xf32>
    %429 = vector.shape_cast %428 : vector<8x1x128xf32> to vector<8x128xf32>
    %c5_158 = arith.constant 5 : index
    %c0_159 = arith.constant 0 : index
    %c0_160 = arith.constant 0 : index
    %430 = vector.load %arg13[%c5_158, %c0_159, %c0_160] : memref<6x8x128xf32, #tpu.memory_space<vmem>>, vector<1x8x128xf32>
    %431 = vector.shape_cast %430 : vector<1x8x128xf32> to vector<8x128xf32>
    %432 = vector.shape_cast %429 : vector<8x128xf32> to vector<1x8x128xf32>
    tpu.vector_store %arg13[%c5_158, %c0_159, %c0_160], %432 {strides = array<i32>} : memref<6x8x128xf32, #tpu.memory_space<vmem>>, vector<1x8x128xf32>,
    "tpu.trace_start"() <{level = 10 : i32, message = "bqs,bsh->bqh"}> : () -> ()
    %cst_161 = arith.constant dense<0.000000e+00> : vector<8x1x32xf32>
    %433 = tpu.matmul %428, %0, %cst_161 {dimension_numbers = #tpu.dot_dimension_numbers<[2], [1], [1], [2], [0, 0, 0, 1, 1, 2], [0], [0]>} : vector<8x1x128xf32>, vector<8x128x32xf32>, vector<8x1x32xf32> -> vector<8x1x32xf32>
    "tpu.trace_stop"() : () -> ()
    %434 = vector.shape_cast %433 : vector<8x1x32xf32> to vector<8x32xf32>
    %cst_162 = arith.constant dense<0.000000e+00> : vector<8x32xf32>
    %435 = tpu.matmul %414, %5, %cst_162 {dimension_numbers = #tpu.dot_dimension_numbers<[1], [0], [0], [1], [0, 0, 1, 1], [], []>} : vector<8x32xf32>, vector<32x32xf32>, vector<8x32xf32> -> vector<8x32xf32>
    %cst_163 = arith.constant dense<0.000000e+00> : vector<8x32xf32>
    %436 = tpu.matmul %434, %6, %cst_163 {dimension_numbers = #tpu.dot_dimension_numbers<[1], [0], [0], [1], [0, 0, 1, 1], [], []>} : vector<8x32xf32>, vector<32x32xf32>, vector<8x32xf32> -> vector<8x32xf32>
    %437 = arith.addf %435, %436 : vector<8x32xf32>
    %438 = math.tanh %437 : vector<8x32xf32>
    %c40 = arith.constant 40 : index
    %c0_164 = arith.constant 0 : index
    %439 = vector.load %arg14[%c40, %c0_164] : memref<48x32xf32, #tpu.memory_space<vmem>>, vector<8x32xf32>
    tpu.vector_store %arg14[%c40, %c0_164], %438 {strides = array<i32>} : memref<48x32xf32, #tpu.memory_space<vmem>>, vector<8x32xf32>,
    %c0_165 = arith.constant 0 : index
    %c0_166 = arith.constant 0 : index
    %440 = vector.load %arg14[%c0_165, %c0_166] : memref<48x32xf32, #tpu.memory_space<vmem>>, vector<48x32xf32>
    %cst_167 = arith.constant dense<0.000000e+00> : vector<48x128xf32>
    %441 = tpu.matmul %440, %7, %cst_167 {dimension_numbers = #tpu.dot_dimension_numbers<[1], [0], [0], [1], [0, 0, 1, 1], [], []>} : vector<48x32xf32>, vector<32x128xf32>, vector<48x128xf32> -> vector<48x128xf32>
    %c0_168 = arith.constant 0 : index
    %c0_169 = arith.constant 0 : index
    %442 = vector.load %arg11[%c0_168, %c0_169] : memref<1x128xf32, #tpu.memory_space<vmem>>, vector<1x128xf32>
    %443 = vector.broadcast %442 : vector<1x128xf32> to vector<48x128xf32>
    %444 = arith.addf %441, %443 : vector<48x128xf32>
    %c0_170 = arith.constant 0 : index
    %c0_171 = arith.constant 0 : index
    %445 = vector.load %arg12[%c0_170, %c0_171] : memref<48x128xf32, #tpu.memory_space<vmem>>, vector<48x128xf32>
    tpu.vector_store %arg12[%c0_170, %c0_171], %444 {strides = array<i32>} : memref<48x128xf32, #tpu.memory_space<vmem>>, vector<48x128xf32>,
    return
  }
}

</mosaic_0001>

<bundles_post_ra>
// kernel: tpu_custom_call.1
= control target key start
LH: loop header
LB: loop body
LE: loop exit
PB: predicated region body
PF: predicated region fallthrough
CT: control target
= control target key end

     0   :  { %19 = vsyncpa [#allocation4], 0  ;;  %v27078_v3 = vmov 0.0|0.0   ;;  %vm22637_vm0 = vmmov 0   ;;  %v27053_v11 = vmov 0.0   ;;  %s27039_s0 = inlined_call_operand.vmem [shape: f32[6,8,32], index: 0, kind: input, shape index: {}]   ;;  %s27040_s1 = inlined_call_operand.vmem [shape: f32[8,128,32], index: 1, kind: input, shape index: {}]   ;;  %s27041_s2 = inlined_call_operand.vmem [shape: f32[8,128], index: 2, kind: input, shape index: {}]   ;;  %s27042_s3 = inlined_call_operand.vmem [shape: f32[2,8,32], index: 3, kind: input, shape index: {}]   ;;  %s27043_s4 = inlined_call_operand.vmem [shape: f32[2,8,32], index: 4, kind: input, shape index: {}]   ;;  %s27044_s5 = inlined_call_operand.vmem [shape: f32[2,64,128], index: 5, kind: input, shape index: {}]   ;;  %s27045_s6 = inlined_call_operand.vmem [shape: f32[2,32,128], index: 6, kind: input, shape index: {}]   ;;  %s27046_s7 = inlined_call_operand.vmem [shape: f32[2,1,128], index: 7, kind: input, shape index: {}]   ;;  %s27047_s8 = inlined_call_operand.vmem [shape: f32[32,32], index: 8, kind: input, shape index: {}]   ;;  %s27048_s9 = inlined_call_operand.vmem [shape: f32[64,32], index: 9, kind: input, shape index: {}]   ;;  %s27049_s10 = inlined_call_operand.vmem [shape: f32[32,128], index: 10, kind: input, shape index: {}]   ;;  %s27050_s11 = inlined_call_operand.vmem [shape: f32[1,128], index: 11, kind: input, shape index: {}]   ;;  %s27051_s12 = inlined_call_operand.hbm [shape: f32[48,128], index: 12, kind: output, shape index: {0}]   ;;  %s27052_s13 = inlined_call_operand.hbm [shape: f32[6,8,128], index: 13, kind: output, shape index: {1}]  }
   0x1   :  { %v252_v0 = vld [vmem:[%s27044_s5 + $0x20] sm:$0xff]  ;;  %v253_v1 = vld [vmem:[%s27044_s5 + $0x28] sm:$0xff]  ;;  %19271 = vmatprep.subr.bf16.mxu0 %v27078_v3  ;;  %19277 = vmatprep.subr.bf16.mxu1 %v27078_v3  ;;  %v254_v6 = vld [vmem:[%s27044_s5 + $0x30] sm:$0xff] }
   0x2   :  { %v248_v2 = vld [vmem:[%s27044_s5] sm:$0xff]  ;;  %v22726_v4 = vpack.c.bf16 %v253_v1, %v252_v0  ;;  %v249_v5 = vld [vmem:[%s27044_s5 + $0x8] sm:$0xff]  ;;  %v255_v7 = vld [vmem:[%s27044_s5 + $0x38] sm:$0xff]  ;;  %15374 = vmatprep.mubr.msk.f32.mxu0 %vm22637_vm0, %v27053_v11  ;;  %15385 = vmatprep.mubr.msk.f32.mxu1 %vm22637_vm0, %v27053_v11 }
   0x3   :  { %v22738_v8 = vpack.c.bf16 %v249_v5, %v248_v2  ;;  %v250_v9 = vld [vmem:[%s27044_s5 + $0x10] sm:$0xff]  ;;  %v251_v10 = vld [vmem:[%s27044_s5 + $0x18] sm:$0xff]  ;;  %v22751_v12 = vpack.c.bf16 %v255_v7, %v254_v6  ;;  %v256_v14 = vld [vmem:[%s27045_s6] sm:$0xff] }
   0x4   :  { %27248 = vst [vmem:[#allocation9_spill] sm:$0xff] %v22726_v4  ;;  %19273 = vmatpush3.bf16.msra.mxu0 %v22726_v4  ;;  %v22755_v13 = vpack.c.bf16 %v251_v10, %v250_v9  ;;  %v257_v15 = vld [vmem:[%s27045_s6 + $0x8] sm:$0xff] }
   0x5   :  { %27249 = vst [vmem:[#allocation10_spill] sm:$0xff] %v22738_v8  ;;  %27250 = vst [vmem:[#allocation11_spill] sm:$0xff] %v22751_v12  ;;  %19279 = vmatpush3.bf16.msra.mxu1 %v22738_v8  ;;  %19274 = vmatprep.subr.bf16.mxu0 %v27078_v3 }
   0x6   :  { %27251 = vst [vmem:[#allocation12_spill] sm:$0xff] %v22755_v13 }
   0x7   :  { %20 = vsyncpa [#allocation6], 0  ;;  %19280 = vmatprep.subr.bf16.mxu1 %v27078_v3  ;;  %v22765_v16 = vpack.c.bf16 %v257_v15, %v256_v14  ;;  %v291_v17 = vld [vmem:[%s27039_s0] sm:$0xff]  ;;  %vm292_vm1 = vcmask 261120   ;;  %v258_v18 = vld [vmem:[%s27045_s6 + $0x10] sm:$0xff]  ;;  %s22639_s21 = smov 64  }
   0x8   :  { %19276 = vmatpush3.bf16.msra.mxu0 %v22751_v12  ;;  %v259_v19 = vld [vmem:[%s27045_s6 + $0x18] sm:$0xff]  ;;  %v285_v21 = vld [vmem:[%s27042_s3] sm:$0xff]  ;;  %s22640_s24 = smov 32   ;;  %v12590_v45 = vld [vmem:[%s27045_s6 + $0x28] sm:$0xff]  ;;  %vm1804_vm3 = vcmask 1040384   ;;  %vm1902_vm4 = vcmask 1041409  }
   0x9   :  { %27252 = vst [vmem:[#allocation13_spill] sm:$0xff] %v22765_v16  ;;  %19282 = vmatpush3.bf16.msra.mxu1 %v22755_v13  ;;  %19283 = vmatprep.subr.bf16.mxu0 %v27078_v3  ;;  %v22782_v20 = vpack.c.bf16 %v259_v19, %v258_v18  ;;  %v12584_v27 = vld [vmem:[%s27046_s7] ss:$0 sm:$0xff]  ;;  %v12586_v48 = vld [vmem:[%s27044_s5 + $0x48] sm:$0xff]  ;;  %v12591_v49 = vld [vmem:[%s27045_s6 + $0x30] sm:$0xff]  ;;  %vm1905_vm5 = vcmask 1042434  }
   0xa   :  { %19289 = vmatprep.subr.bf16.mxu1 %v27078_v3  ;;  %v288_v33 = vld [vmem:[%s27043_s4] sm:$0xff]  ;;  %v12592_v50 = vld [vmem:[%s27045_s6 + $0x38] sm:$0xff]  ;;  %v12587_v52 = vld [vmem:[%s27044_s5 + $0x50] sm:$0xff]  ;;  %vm1908_vm6 = vcmask 1043459   ;;  %vm1911_vm7 = vcmask 1044484   ;;  %vm1914_vm8 = vcmask 1045509  }
   0xb   :  { %15375 = vmatmul.mubr.f32.vlgmr.msra.gmra.mrb[0].mxu0 %v27053_v11  ;;  %27253 = vst [vmem:[#allocation14_spill] sm:$0xff] %v22782_v20  ;;  %v12589_v44 = vld [vmem:[%s27045_s6 + $0x20] sm:$0xff]  ;;  %v12588_v53 = vld [vmem:[%s27044_s5 + $0x58] sm:$0xff]  ;;  %v22838_v54 = vpack.c.bf16 %v12592_v50, %v12591_v49  ;;  %v12595_v56 = vld [vmem:[%s27042_s3 + $0x8] sm:$0xff]  ;;  %vm1917_vm9 = vcmask 1046534   ;;  %vm1920_vm10 = vcmask 1047559  }
   0xc   :  { %15386 = vmatmul.mubr.msk.f32.vlgmr.msra.gmra.mrb[0].mxu1 %vm292_vm1, %v291_v17  ;;  %19285 = vmatpush3.bf16.msra.mxu0 %v22765_v16  ;;  %v12585_v46 = vld [vmem:[%s27044_s5 + $0x40] sm:$0xff]  ;;  %v22818_v47 = vpack.c.bf16 %v12590_v45, %v12589_v44  ;;  %v22842_v55 = vpack.c.bf16 %v12588_v53, %v12587_v52  ;;  %v12596_v60 = vld [vmem:[%s27043_s4 + $0x8] sm:$0xff]  ;;  %vm22904_vm2 = vmpackc.low %vm292_vm1, %vm292_vm1 }
   0xd   :  { %19286 = vmatprep.subr.bf16.mxu0 %v27078_v3  ;;  %15396 = vmatprep.mubr.msk.f32.mxu0 %vm22637_vm0, %v27053_v11  ;;  %v22829_v51 = vpack.c.bf16 %v12586_v48, %v12585_v46  ;;  %27257 = vst [vmem:[#allocation18_spill] sm:$0xff] %v22838_v54  ;;  %v12594_v0 = vld [vmem:[%s27046_s7 + $0x1] ss:$0 sm:$0xff]  ;;  %v51_v44 = vld [vmem:[%s27040_s1 + $0x30] sm:$0xff]  ;;  %v52_v45 = vld [vmem:[%s27040_s1 + $0x38] sm:$0xff] }
   0xe   :  { %15407 = vmatprep.mubr.msk.f32.mxu1 %vm22637_vm0, %v27053_v11  ;;  %27255 = vst [vmem:[#allocation16_spill] sm:$0xff] %v22818_v47  ;;  %19291 = vmatpush3.bf16.msra.mxu1 %v22818_v47  ;;  %27258 = vst [vmem:[#allocation19_spill] sm:$0xff] %v22842_v55  ;;  %v22945_v46 = vpack.c.bf16 %v52_v45, %v51_v44  ;;  %v53_v48 = vld [vmem:[%s27040_s1 + $0x40] sm:$0xff]  ;;  %v54_v49 = vld [vmem:[%s27040_s1 + $0x48] sm:$0xff] }
   0xf   :  { %27256 = vst [vmem:[#allocation17_spill] sm:$0xff] %v22829_v51  ;;  %19292 = vmatprep.subr.bf16.mxu1 %v27078_v3  ;;  %v22957_v50 = vpack.c.bf16 %v54_v49, %v53_v48  ;;  %v55_v52 = vld [vmem:[%s27040_s1 + $0x50] sm:$0xff]  ;;  %v56_v53 = vld [vmem:[%s27040_s1 + $0x58] sm:$0xff]  ;;  %v77_v49 = vld [vmem:[%s27040_s1 + $0x100] sm:$0xff] }
  0x10   :  { %19288 = vmatpush3.bf16.msra.mxu0 %v22782_v20  ;;  %27269 = vst [vmem:[#allocation28_spill] sm:$0xff] %v22945_v46  ;;  %v122_v47 = vld [vmem:[%s27040_s1 + $0x268] sm:$0xff]  ;;  %v123_v13 = vld [vmem:[%s27040_s1 + $0x270] sm:$0xff]  ;;  %v124_v8 = vld [vmem:[%s27040_s1 + $0x278] sm:$0xff] }
  0x11   :  { %19295 = vmatprep.subr.bf16.mxu0 %v27078_v3  ;;  %27270 = vst [vmem:[#allocation29_spill] sm:$0xff] %v22957_v50  ;;  %v145_v12 = vld [vmem:[%s27040_s1 + $0x320] sm:$0xff]  ;;  %v146_v4 = vld [vmem:[%s27040_s1 + $0x328] sm:$0xff] }
  0x12   :  { %19294 = vmatpush3.bf16.msra.mxu1 %v22838_v54  ;;  %v121_v54 = vld [vmem:[%s27040_s1 + $0x260] sm:$0xff] }
  0x13   :  { %15397 = vmatmul.mubr.msk.f32.vlgmr.msra.gmra.mrb[2].mxu0 %vm292_vm1, %v285_v21  ;;  %19301 = vmatprep.subr.bf16.mxu1 %v27078_v3 }
  0x14   :  { %15418 = vmatprep.mubr.msk.f32.mxu0 %vm22637_vm0, %v27053_v11  ;;  %19297 = vmatpush3.bf16.msra.mxu0 %v22829_v51 }
  0x15   :  { %19298 = vmatprep.subr.bf16.mxu0 %v27078_v3  ;;  %15408 = vmatmul.mubr.msk.f32.vlgmr.msra.gmra.mrb[2].mxu1 %vm292_vm1, %v12595_v56  ;;  %v22969_v56 = vpack.c.bf16 %v56_v53, %v55_v52  ;;  %v78_v52 = vld [vmem:[%s27040_s1 + $0x108] sm:$0xff] }
  0x16   :  { %15429 = vmatprep.mubr.msk.f32.mxu1 %vm22637_vm0, %v27053_v11 }
  0x17   :  { %27271 = vst [vmem:[#allocation30_spill] sm:$0xff] %v22969_v56 }
  0x18   :  { %19300 = vmatpush3.bf16.msra.mxu0 %v22842_v55 }
  0x19   :  { %19307 = vmatprep.subr.bf16.mxu0 %v27078_v3 }
  0xde   :  { %v362_v22 = vpop.f32.mrb[0].mxu0 }
  0xdf   :  { %v15376_v23 = vpop.f32.mrb[1].mxu0  ;;  %v435_v24 = vpop.f32.mrb[0].mxu1 }
  0xe0   :  { %v436_v25 = vadd.f32 %v435_v24, %v362_v22  ;;  %v15387_v26 = vpop.f32.mrb[1].mxu1  ;;  %v232_v24 = vld [vmem:[%s27047_s8] sm:$0xff] }
  0xe1   :  { %v234_v26 = vld [vmem:[%s27047_s8 + $0x10] sm:$0xff] }
  0xe6   :  { %v508_v28 = vpop.f32.mrb[2].mxu0 }
  0xe7   :  { %v512_v29 = vadd.f32 %v508_v28, %v436_v25  ;;  %v15398_v30 = vpop.f32.mrb[3].mxu0  ;;  %v233_v25 = vld [vmem:[%s27047_s8 + $0x8] sm:$0xff]  ;;  %v235_v28 = vld [vmem:[%s27047_s8 + $0x18] sm:$0xff] }
  0xe8   :  { %v611_v61 = vpop.f32.mrb[2].mxu1 }
  0xe9   :  { %v513_v31 = vadd.f32 %v12584_v27, %v512_v29  ;;  %v15409_v62 = vpop.f32.mrb[3].mxu1  ;;  %v22884_v27 = vpack.c.bf16 %v233_v25, %v232_v24  ;;  %v22890_v29 = vpack.c.bf16 %v235_v28, %v234_v26  ;;  %v71_v25 = vld [vmem:[%s27040_s1 + $0xd0] sm:$0xff]  ;;  %v72_v26 = vld [vmem:[%s27040_s1 + $0xd8] sm:$0xff] }
  0xea   :  { %v23071_v28 = vpack.c.bf16 %v72_v26, %v71_v25  ;;  %v81_v26 = vld [vmem:[%s27040_s1 + $0x120] sm:$0xff] }
  0xeb   :  { %22278 = vtanh.f32 %v513_v31  ;;  %v12599_v34 = vmul.f32 -1.442695, %v513_v31  ;;  %27261 = vst [vmem:[#allocation22_spill] sm:$0xff] %v22884_v27  ;;  %19303 = vmatpush3.bf16.msra.mxu1 %v22884_v27  ;;  %27262 = vst [vmem:[#allocation23_spill] sm:$0xff] %v22890_v29  ;;  %v45_v31 = vld [vmem:[%s27040_s1] sm:$0xff]  ;;  %v120_v27 = vld [vmem:[%s27040_s1 + $0x258] sm:$0xff] }
  0xec   :  { %19304 = vmatprep.subr.bf16.mxu1 %v27078_v3  ;;  %27280 = vst [vmem:[#allocation39_spill] sm:$0xff] %v23071_v28 }
  0xed   :  { %22280 = vpow2.f32 %v12599_v34 }
  0xef   :  { %19306 = vmatpush3.bf16.msra.mxu1 %v22890_v29  ;;  %v119_v29 = vld [vmem:[%s27040_s1 + $0x250] sm:$0xff] }
  0xf0   :  { %19339 = vmatprep.subr.bf16.mxu1 %v27078_v3 }
  0xf5   :  { %v22279_v32 = vpop.eup %22278 }
  0xf6   :  { %527 = vrot.lane.b32.xlu0 %v22279_v32, %s22639_s21  ;;  %v46_v32 = vld [vmem:[%s27040_s1 + $0x8] sm:$0xff] }
  0xf7   :  { %v22281_v35 = vpop.eup %22280  ;;  %v22908_v34 = vpack.c.bf16 %v46_v32, %v45_v31  ;;  %v74_v31 = vld [vmem:[%s27040_s1 + $0xe8] sm:$0xff] }
  0xf8   :  { %v517_v36 = vadd.f32 1.0, %v22281_v35  ;;  %v47_v35 = vld [vmem:[%s27040_s1 + $0x10] sm:$0xff] }
  0xf9   :  { %27266 = vst [vmem:[#allocation25_spill] sm:$0xff] %v22908_v34 }
  0xfa   :  { %522 = vrot.lane.b32.xlu0 %v288_v33, %s22640_s24  ;;  %22282 = vrcp.f32 %v517_v36  ;;  %v27263_v33 = vmov 0  ;;  %v48_v36 = vld [vmem:[%s27040_s1 + $0x18] sm:$0xff] }
  0xfb   :  { %v27264_v33 = vsel %vm22904_vm2, 4294967295, %v27263_v33 }
  0xfc   :  { %27265 = vst [vmem:[#allocation24_spill] sm:$0xff] %v27264_v33 }
 0x104   :  { %v22283_v37 = vpop.eup %22282 }
 0x168   :  { %v528_v38 = vpop.permute.xlu0 %527 }
 0x169   :  { %v530_v39 = vmul.f32 %v22283_v37, %v528_v38 }
 0x16b   :  { %532 = vrot.lane.b32.xlu1 %v530_v39, %s22640_s24 }
 0x16c   :  { %v523_v40 = vpop.permute.xlu0 %522 }
 0x16d   :  { %v525_v41 = vmul.f32 %v22283_v37, %v523_v40  ;;  %v49_v40 = vld [vmem:[%s27040_s1 + $0x20] sm:$0xff] }
 0x1dd   :  { %v533_v42 = vpop.permute.xlu1 %532 }
 0x1de   :  { %v22806_v43 = vadd.f32 %v533_v42, %v525_v41  ;;  %v50_v41 = vld [vmem:[%s27040_s1 + $0x28] sm:$0xff] }
 0x1df   :  { %v22933_v42 = vpack.c.bf16 %v50_v41, %v49_v40  ;;  %v179_v41 = vlaneseq }
 0x1e0   :  { %27254 = vst [vmem:[#allocation15_spill] sm:$0xff] %v22806_v43  ;;  %22284 = vtanh.f32 %v22806_v43  ;;  %v118_v43 = vld [vmem:[%s27040_s1 + $0x248] sm:$0xff] }
 0x1e1   :  { %27268 = vst [vmem:[#allocation27_spill] sm:$0xff] %v22933_v42  ;;  %v180_v45 = vshrl.u32 %v179_v41, 7  ;;  %v84_v41 = vld [vmem:[%s27040_s1 + $0x138] sm:$0xff] }
 0x1ea   :  { %v22285_v57 = vpop.eup %22284 }
 0x1eb   :  { %538 = vrot.lane.b32.xlu1 %v22285_v57, %s22639_s21  ;;  %v57_v57 = vld [vmem:[%s27040_s1 + $0x60] sm:$0xff] }
 0x25d   :  { %v539_v58 = vpop.permute.xlu1 %538 }
 0x25e   :  { %v541_v59 = vmul.f32 %v22283_v37, %v539_v58  ;;  %v22920_v37 = vpack.c.bf16 %v48_v36, %v47_v35  ;;  %v58_v58 = vld [vmem:[%s27040_s1 + $0x68] sm:$0xff]  ;;  %v75_v35 = vld [vmem:[%s27040_s1 + $0xf0] sm:$0xff]  ;;  %v76_v36 = vld [vmem:[%s27040_s1 + $0xf8] sm:$0xff] }
 0x260   :  { %616 = vrot.lane.b32.xlu0 %v541_v59, %s22640_s24  ;;  %27267 = vst [vmem:[#allocation26_spill] sm:$0xff] %v22920_v37  ;;  %v22981_v59 = vpack.c.bf16 %v58_v58, %v57_v57 }
 0x262   :  { %27272 = vst [vmem:[#allocation31_spill] sm:$0xff] %v22981_v59 }
 0x264   :  { %699 = vrot.lane.b32.xlu0 %v12596_v60, %s22640_s24  ;;  %v59_v60 = vld [vmem:[%s27040_s1 + $0x70] sm:$0xff] }
 0x2d2   :  { %v22861_v63 = vpop.permute.xlu0 %616 }
 0x2d3   :  { %27259 = vst [vmem:[#allocation20_spill] sm:$0xff] %v22861_v63  ;;  %15419 = vmatmul.mubr.msk.f32.vlgmr.msra.gmra.mrb[4].mxu0 %vm292_vm1, %v22861_v63  ;;  %v142_v63 = vld [vmem:[%s27040_s1 + $0x308] sm:$0xff] }
 0x2d4   :  { %15464 = vmatprep.mubr.msk.f32.mxu0 %vm22637_vm0, %v27053_v11  ;;  %19310 = vmatpush3.bf16.xpose.msk.msra.mxu0 %vm22904_vm2, %v22908_v34 }
 0x2d5   :  { %19311 = vmatprep.subr.bf16.mxu0 %v27078_v3 }
 0x2d6   :  { %v700_v19 = vpop.permute.xlu0 %699 }
 0x2dc   :  { %19314 = vmatpush3.bf16.xpose.msk.msra.mxu0 %vm22904_vm2, %v22920_v37 }
 0x2dd   :  { %19315 = vmatprep.subr.bf16.mxu0 %v27078_v3 }
 0x2e4   :  { %19318 = vmatpush3.bf16.xpose.msk.msra.mxu0 %vm22904_vm2, %v22933_v42 }
 0x2e5   :  { %19319 = vmatprep.subr.bf16.mxu0 %v27078_v3 }
 0x2ec   :  { %19322 = vmatpush3.bf16.xpose.msk.msra.mxu0 %vm22904_vm2, %v22945_v46 }
 0x2ed   :  { %19323 = vmatprep.subr.bf16.mxu0 %v27078_v3 }
 0x2f4   :  { %19326 = vmatpush3.bf16.xpose.msk.msra.mxu0 %vm22904_vm2, %v22957_v50 }
 0x2f5   :  { %19327 = vmatprep.subr.bf16.mxu0 %v27078_v3 }
 0x2fc   :  { %19330 = vmatpush3.bf16.xpose.msk.msra.mxu0 %vm22904_vm2, %v22969_v56 }
 0x2fd   :  { %19331 = vmatprep.subr.bf16.mxu0 %v27078_v3 }
 0x304   :  { %19334 = vmatpush3.bf16.xpose.msk.msra.mxu0 %vm22904_vm2, %v22981_v59 }
 0x305   :  { %19335 = vmatprep.subr.bf16.mxu0 %v27078_v3 }
 0x3a6   :  { %v686_v1 = vpop.f32.mrb[4].mxu0 }
 0x3a7   :  { %v687_v2 = vadd.f32 %v686_v1, %v611_v61  ;;  %v15420_v5 = vpop.f32.mrb[5].mxu0  ;;  %v60_v61 = vld [vmem:[%s27040_s1 + $0x78] sm:$0xff]  ;;  %v62_v1 = vld [vmem:[%s27040_s1 + $0x88] sm:$0xff] }
 0x3a8   :  { %v22993_v62 = vpack.c.bf16 %v60_v61, %v59_v60  ;;  %v93_v60 = vld [vmem:[%s27040_s1 + $0x180] sm:$0xff]  ;;  %v94_v61 = vld [vmem:[%s27040_s1 + $0x188] sm:$0xff] }
 0x3a9   :  { %v690_v6 = vadd.f32 %v12594_v0, %v687_v2  ;;  %v61_v0 = vld [vmem:[%s27040_s1 + $0x80] sm:$0xff] }
 0x3aa   :  { %27273 = vst [vmem:[#allocation32_spill] sm:$0xff] %v22993_v62  ;;  %19338 = vmatpush3.bf16.xpose.msk.msra.mxu0 %vm22904_vm2, %v22993_v62  ;;  %v23005_v2 = vpack.c.bf16 %v62_v1, %v61_v0  ;;  %v23119_v0 = vpack.c.bf16 %v78_v52, %v77_v49 }
 0x3ab   :  { %22286 = vtanh.f32 %v690_v6  ;;  %v12602_v9 = vmul.f32 -1.442695, %v690_v6  ;;  %19371 = vmatprep.subr.bf16.mxu0 %v27078_v3  ;;  %v63_v6 = vld [vmem:[%s27040_s1 + $0x90] sm:$0xff] }
 0x3ac   :  { %27274 = vst [vmem:[#allocation33_spill] sm:$0xff] %v23005_v2 }
 0x3ad   :  { %22288 = vpow2.f32 %v12602_v9 }
 0x3b5   :  { %v22287_v7 = vpop.eup %22286 }
 0x3b6   :  { %704 = vrot.lane.b32.xlu1 %v22287_v7, %s22639_s21  ;;  %v64_v7 = vld [vmem:[%s27040_s1 + $0x98] sm:$0xff] }
 0x3b7   :  { %v22289_v10 = vpop.eup %22288  ;;  %v23023_v9 = vpack.c.bf16 %v64_v7, %v63_v6  ;;  %v23124_v7 = vpack.c.bf16 %v94_v61, %v93_v60  ;;  %v101_v60 = vld [vmem:[%s27040_s1 + $0x1c0] sm:$0xff]  ;;  %v102_v61 = vld [vmem:[%s27040_s1 + $0x1c8] sm:$0xff] }
 0x3b8   :  { %v694_v14 = vadd.f32 1.0, %v22289_v10  ;;  %v65_v10 = vld [vmem:[%s27040_s1 + $0xa0] sm:$0xff] }
 0x3b9   :  { %27276 = vst [vmem:[#allocation35_spill] sm:$0xff] %v23023_v9 }
 0x3ba   :  { %22290 = vrcp.f32 %v694_v14  ;;  %v66_v14 = vld [vmem:[%s27040_s1 + $0xa8] sm:$0xff] }
 0x3c4   :  { %v22291_v15 = vpop.eup %22290 }
 0x3c5   :  { %v702_v21 = vmul.f32 %v22291_v15, %v700_v19 }
 0x428   :  { %v705_v17 = vpop.permute.xlu1 %704 }
 0x429   :  { %v707_v18 = vmul.f32 %v22291_v15, %v705_v17  ;;  %v67_v17 = vld [vmem:[%s27040_s1 + $0xb0] sm:$0xff] }
 0x42b   :  { %709 = vrot.lane.b32.xlu1 %v707_v18, %s22640_s24  ;;  %v68_v18 = vld [vmem:[%s27040_s1 + $0xb8] sm:$0xff] }
 0x42c   :  { %v23047_v19 = vpack.c.bf16 %v68_v18, %v67_v17  ;;  %v80_v17 = vld [vmem:[%s27040_s1 + $0x118] sm:$0xff]  ;;  %v95_v18 = vld [vmem:[%s27040_s1 + $0x190] sm:$0xff] }
 0x42e   :  { %27278 = vst [vmem:[#allocation37_spill] sm:$0xff] %v23047_v19 }
 0x49d   :  { %v710_v22 = vpop.permute.xlu1 %709 }
 0x49e   :  { %v22872_v23 = vadd.f32 %v710_v22, %v702_v21  ;;  %v69_v21 = vld [vmem:[%s27040_s1 + $0xc0] sm:$0xff]  ;;  %v70_v22 = vld [vmem:[%s27040_s1 + $0xc8] sm:$0xff] }
 0x49f   :  { %v23059_v24 = vpack.c.bf16 %v70_v22, %v69_v21  ;;  %v96_v21 = vld [vmem:[%s27040_s1 + $0x198] sm:$0xff] }
 0x4a0   :  { %27260 = vst [vmem:[#allocation21_spill] sm:$0xff] %v22872_v23  ;;  %22292 = vtanh.f32 %v22872_v23  ;;  %v23159_v25 = vpack.c.bf16 %v96_v21, %v95_v18  ;;  %v88_v18 = vld [vmem:[%s27040_s1 + $0x158] sm:$0xff]  ;;  %v103_v21 = vld [vmem:[%s27040_s1 + $0x1d0] sm:$0xff]  ;;  %v117_v23 = vld [vmem:[%s27040_s1 + $0x240] sm:$0xff] }
 0x4a1   :  { %27279 = vst [vmem:[#allocation38_spill] sm:$0xff] %v23059_v24 }
 0x4aa   :  { %v22293_v30 = vpop.eup %22292 }
 0x4ab   :  { %715 = vrot.lane.b32.xlu0 %v22293_v30, %s22639_s21  ;;  %v73_v30 = vld [vmem:[%s27040_s1 + $0xe0] sm:$0xff] }
 0x4ac   :  { %v23083_v32 = vpack.c.bf16 %v74_v31, %v73_v30  ;;  %v82_v30 = vld [vmem:[%s27040_s1 + $0x128] sm:$0xff]  ;;  %v97_v31 = vld [vmem:[%s27040_s1 + $0x1a0] sm:$0xff] }
 0x4ae   :  { %27281 = vst [vmem:[#allocation40_spill] sm:$0xff] %v23083_v32 }
 0x51d   :  { %v716_v38 = vpop.permute.xlu0 %715 }
 0x51e   :  { %v718_v39 = vmul.f32 %v22291_v15, %v716_v38  ;;  %v23035_v15 = vpack.c.bf16 %v66_v14, %v65_v10  ;;  %v23095_v38 = vpack.c.bf16 %v76_v36, %v75_v35  ;;  %v79_v14 = vld [vmem:[%s27040_s1 + $0x110] sm:$0xff]  ;;  %v98_v35 = vld [vmem:[%s27040_s1 + $0x1a8] sm:$0xff]  ;;  %v23181_v36 = vpack.c.bf16 %v82_v30, %v81_v26  ;;  %v104_v26 = vld [vmem:[%s27040_s1 + $0x1d8] sm:$0xff] }
 0x51f   :  { %v23157_v22 = vpack.c.bf16 %v80_v17, %v79_v14  ;;  %v23231_v14 = vpack.c.bf16 %v102_v61, %v101_v60  ;;  %v87_v17 = vld [vmem:[%s27040_s1 + $0x150] sm:$0xff]  ;;  %v92_v60 = vld [vmem:[%s27040_s1 + $0x178] sm:$0xff] }
 0x520   :  { %720 = vrot.lane.b32.xlu1 %v718_v39, %s22640_s24  ;;  %27277 = vst [vmem:[#allocation36_spill] sm:$0xff] %v23035_v15  ;;  %27282 = vst [vmem:[#allocation41_spill] sm:$0xff] %v23095_v38  ;;  %v22641_v39 = vmov 1966171168   ;;  %v23253_v30 = vpack.c.bf16 %v88_v18, %v87_v17  ;;  %v107_v61 = vld [vmem:[%s27040_s1 + $0x1f0] sm:$0xff]  ;;  %v108_v17 = vld [vmem:[%s27040_s1 + $0x1f8] sm:$0xff] }
 0x521   :  { %v177_v40 = vunpack.c.l.s4 %v22641_v39  ;;  %v23183_v39 = vpack.c.bf16 %v98_v35, %v97_v31  ;;  %v23255_v31 = vpack.c.bf16 %v104_v26, %v103_v21  ;;  %v89_v35 = vld [vmem:[%s27040_s1 + $0x160] sm:$0xff]  ;;  %v23303_v21 = vpack.c.bf16 %v108_v17, %v107_v61  ;;  %v127_v17 = vld [vmem:[%s27040_s1 + $0x290] sm:$0xff] }
 0x522   :  { %v109_v26 = vld [vmem:[%s27040_s1 + $0x200] sm:$0xff] }
 0x523   :  { %v178_v44 = vunpack.c.0.s8 %v177_v40  ;;  %v83_v40 = vld [vmem:[%s27040_s1 + $0x130] sm:$0xff] }
 0x524   :  { %v23205_v49 = vpack.c.bf16 %v84_v41, %v83_v40  ;;  %v90_v40 = vld [vmem:[%s27040_s1 + $0x168] sm:$0xff]  ;;  %v105_v41 = vld [vmem:[%s27040_s1 + $0x1e0] sm:$0xff] }
 0x525   :  { %v23101_v48 = vsub.s32 %v178_v44, %v180_v45  ;;  %v99_v44 = vld [vmem:[%s27040_s1 + $0x1b0] sm:$0xff]  ;;  %v100_v45 = vld [vmem:[%s27040_s1 + $0x1b8] sm:$0xff] }
 0x526   :  { %v23207_v52 = vpack.c.bf16 %v100_v45, %v99_v44  ;;  %v106_v44 = vld [vmem:[%s27040_s1 + $0x1e8] sm:$0xff]  ;;  %v23277_v45 = vpack.c.bf16 %v90_v40, %v89_v35  ;;  %v125_v40 = vld [vmem:[%s27040_s1 + $0x280] sm:$0xff] }
 0x527   :  { %27283 = vst [vmem:[#allocation42_spill] sm:$0xff] %v23101_v48  ;;  %v110_v35 = vld [vmem:[%s27040_s1 + $0x208] sm:$0xff] }
 0x592   :  { %v23007_v5 = vpop.permute.xlu1 %720 }
 0x593   :  { %27275 = vst [vmem:[#allocation34_spill] sm:$0xff] %v23007_v5  ;;  %15430 = vmatmul.mubr.msk.f32.vlgmr.msra.gmra.mrb[4].mxu1 %vm292_vm1, %v23007_v5 }
 0x594   :  { %19342 = vmatpush3.bf16.xpose.msk.msra.mxu1 %vm22904_vm2, %v23005_v2  ;;  %15499 = vmatprep.mubr.msk.f32.mxu1 %vm22637_vm0, %v27053_v11 }
 0x595   :  { %19343 = vmatprep.subr.bf16.mxu1 %v27078_v3 }
 0x59c   :  { %19346 = vmatpush3.bf16.xpose.msk.msra.mxu1 %vm22904_vm2, %v23023_v9 }
 0x59d   :  { %19347 = vmatprep.subr.bf16.mxu1 %v27078_v3 }
 0x5a4   :  { %19350 = vmatpush3.bf16.xpose.msk.msra.mxu1 %vm22904_vm2, %v23035_v15 }
 0x5a5   :  { %19351 = vmatprep.subr.bf16.mxu1 %v27078_v3 }
 0x5ac   :  { %19354 = vmatpush3.bf16.xpose.msk.msra.mxu1 %vm22904_vm2, %v23047_v19 }
 0x5ad   :  { %19355 = vmatprep.subr.bf16.mxu1 %v27078_v3 }
 0x5b4   :  { %19358 = vmatpush3.bf16.xpose.msk.msra.mxu1 %vm22904_vm2, %v23059_v24 }
 0x5b5   :  { %19359 = vmatprep.subr.bf16.mxu1 %v27078_v3 }
 0x5bc   :  { %19362 = vmatpush3.bf16.xpose.msk.msra.mxu1 %vm22904_vm2, %v23071_v28 }
 0x5bd   :  { %19363 = vmatprep.subr.bf16.mxu1 %v27078_v3 }
 0x5c4   :  { %19366 = vmatpush3.bf16.xpose.msk.msra.mxu1 %vm22904_vm2, %v23083_v32 }
 0x5c5   :  { %19367 = vmatprep.subr.bf16.mxu1 %v27078_v3 }
 0x5cc   :  { %19370 = vmatpush3.bf16.xpose.msk.msra.mxu1 %vm22904_vm2, %v23095_v38 }
 0x5cd   :  { %19403 = vmatprep.subr.bf16.mxu1 %v27078_v3 }
 0x666   :  { %v23109_v53 = vpop.f32.mrb[4].mxu1 }
 0x667   :  { %v802_v57 = vrot.slane %v23109_v53, %v23101_v48  ;;  %v15431_v58 = vpop.f32.mrb[5].mxu1 }
 0x668   :  { %v86_v58 = vld [vmem:[%s27040_s1 + $0x148] sm:$0xff] }
 0x669   :  { %v810_v1 = vcombine.high %v802_v57, %v802_v57  ;;  %v23122_v6 = vrot.slane %v802_v57, %v23101_v48  ;;  %v85_v57 = vld [vmem:[%s27040_s1 + $0x140] sm:$0xff] }
 0x66b   :  { %v23127_v10 = vrot.slane %v810_v1, %v23101_v48  ;;  %15465 = vmatmul.mubr.msk.f32.vlgmr.msra.gmra.mrb[6].mxu0 %vm292_vm1, %v23122_v6  ;;  %v23229_v1 = vpack.c.bf16 %v86_v58, %v85_v57  ;;  %v23279_v57 = vpack.c.bf16 %v106_v44, %v105_v41  ;;  %v91_v58 = vld [vmem:[%s27040_s1 + $0x170] sm:$0xff]  ;;  %v126_v41 = vld [vmem:[%s27040_s1 + $0x288] sm:$0xff]  ;;  %v23325_v44 = vpack.c.bf16 %v110_v35, %v109_v26  ;;  %v128_v26 = vld [vmem:[%s27040_s1 + $0x298] sm:$0xff] }
 0x66c   :  { %19374 = vmatpush3.bf16.xpose.msk.msra.mxu0 %vm22904_vm2, %v23119_v0  ;;  %15534 = vmatprep.mubr.msk.f32.mxu0 %vm22637_vm0, %v27053_v11  ;;  %v23301_v18 = vpack.c.bf16 %v92_v60, %v91_v58  ;;  %v840_v58 = vcombine.high %v23122_v6, %v23122_v6  ;;  %v23329_v60 = vpack.c.bf16 %v126_v41, %v125_v40  ;;  %v111_v6 = vld [vmem:[%s27040_s1 + $0x210] sm:$0xff]  ;;  %v113_v41 = vld [vmem:[%s27040_s1 + $0x220] sm:$0xff] }
 0x66d   :  { %15500 = vmatmul.mubr.msk.f32.vlgmr.msra.gmra.mrb[6].mxu1 %vm292_vm1, %v23127_v10  ;;  %19375 = vmatprep.subr.bf16.mxu0 %v27078_v3  ;;  %v842_v61 = vcombine.high %v23127_v10, %v23127_v10  ;;  %v112_v10 = vld [vmem:[%s27040_s1 + $0x218] sm:$0xff]  ;;  %v23361_v40 = vpack.c.bf16 %v128_v26, %v127_v17  ;;  %v115_v26 = vld [vmem:[%s27040_s1 + $0x230] sm:$0xff] }
 0x66e   :  { %19406 = vmatpush3.bf16.xpose.msk.msra.mxu1 %vm22904_vm2, %v23124_v7  ;;  %15569 = vmatprep.mubr.msk.f32.mxu1 %vm22637_vm0, %v27053_v11  ;;  %v23359_v35 = vpack.c.bf16 %v112_v10, %v111_v6  ;;  %v130_v6 = vld [vmem:[%s27040_s1 + $0x2a8] sm:$0xff] }
 0x66f   :  { %19407 = vmatprep.subr.bf16.mxu1 %v27078_v3 }
 0x674   :  { %19378 = vmatpush3.bf16.xpose.msk.msra.mxu0 %vm22904_vm2, %v23157_v22 }
 0x675   :  { %19379 = vmatprep.subr.bf16.mxu0 %v27078_v3 }
 0x676   :  { %19410 = vmatpush3.bf16.xpose.msk.msra.mxu1 %vm22904_vm2, %v23159_v25 }
 0x677   :  { %19411 = vmatprep.subr.bf16.mxu1 %v27078_v3 }
 0x67c   :  { %19382 = vmatpush3.bf16.xpose.msk.msra.mxu0 %vm22904_vm2, %v23181_v36 }
 0x67d   :  { %19383 = vmatprep.subr.bf16.mxu0 %v27078_v3 }
 0x67e   :  { %19414 = vmatpush3.bf16.xpose.msk.msra.mxu1 %vm22904_vm2, %v23183_v39 }
 0x67f   :  { %19415 = vmatprep.subr.bf16.mxu1 %v27078_v3 }
 0x684   :  { %19386 = vmatpush3.bf16.xpose.msk.msra.mxu0 %vm22904_vm2, %v23205_v49 }
 0x685   :  { %19387 = vmatprep.subr.bf16.mxu0 %v27078_v3 }
 0x686   :  { %19418 = vmatpush3.bf16.xpose.msk.msra.mxu1 %vm22904_vm2, %v23207_v52 }
 0x687   :  { %19419 = vmatprep.subr.bf16.mxu1 %v27078_v3 }
 0x68c   :  { %19390 = vmatpush3.bf16.xpose.msk.msra.mxu0 %vm22904_vm2, %v23229_v1 }
 0x68d   :  { %19391 = vmatprep.subr.bf16.mxu0 %v27078_v3 }
 0x68e   :  { %19422 = vmatpush3.bf16.xpose.msk.msra.mxu1 %vm22904_vm2, %v23231_v14 }
 0x68f   :  { %19423 = vmatprep.subr.bf16.mxu1 %v27078_v3 }
 0x694   :  { %19394 = vmatpush3.bf16.xpose.msk.msra.mxu0 %vm22904_vm2, %v23253_v30 }
 0x695   :  { %19395 = vmatprep.subr.bf16.mxu0 %v27078_v3 }
 0x696   :  { %19426 = vmatpush3.bf16.xpose.msk.msra.mxu1 %vm22904_vm2, %v23255_v31 }
 0x697   :  { %19427 = vmatprep.subr.bf16.mxu1 %v27078_v3 }
 0x69c   :  { %19398 = vmatpush3.bf16.xpose.msk.msra.mxu0 %vm22904_vm2, %v23277_v45 }
 0x69d   :  { %19399 = vmatprep.subr.bf16.mxu0 %v27078_v3 }
 0x69e   :  { %19430 = vmatpush3.bf16.xpose.msk.msra.mxu1 %vm22904_vm2, %v23279_v57 }
 0x69f   :  { %19431 = vmatprep.subr.bf16.mxu1 %v27078_v3 }
 0x6a4   :  { %19402 = vmatpush3.bf16.xpose.msk.msra.mxu0 %vm22904_vm2, %v23301_v18 }
 0x6a5   :  { %19435 = vmatprep.subr.bf16.mxu0 %v27078_v3 }
 0x6a6   :  { %19434 = vmatpush3.bf16.xpose.msk.msra.mxu1 %vm22904_vm2, %v23303_v21 }
 0x6a7   :  { %19467 = vmatprep.subr.bf16.mxu1 %v27078_v3 }
 0x6ab   :  { %15535 = vmatmul.mubr.msk.f32.vlgmr.msra.gmra.mrb[8].mxu0 %vm292_vm1, %v840_v58  ;;  %v114_v58 = vld [vmem:[%s27040_s1 + $0x228] sm:$0xff] }
 0x6ac   :  { %19438 = vmatpush3.bf16.xpose.msk.msra.mxu0 %vm22904_vm2, %v23325_v44  ;;  %15604 = vmatprep.mubr.msk.f32.mxu0 %vm22637_vm0, %v27053_v11  ;;  %v23383_v10 = vpack.c.bf16 %v114_v58, %v113_v41  ;;  %v131_v41 = vld [vmem:[%s27040_s1 + $0x2b0] sm:$0xff]  ;;  %v132_v58 = vld [vmem:[%s27040_s1 + $0x2b8] sm:$0xff] }
 0x6ad   :  { %15570 = vmatmul.mubr.msk.f32.vlgmr.msra.gmra.mrb[8].mxu1 %vm292_vm1, %v842_v61  ;;  %19439 = vmatprep.subr.bf16.mxu0 %v27078_v3  ;;  %v129_v61 = vld [vmem:[%s27040_s1 + $0x2a0] sm:$0xff] }
 0x6ae   :  { %19470 = vmatpush3.bf16.xpose.msk.msra.mxu1 %vm22904_vm2, %v23329_v60  ;;  %15639 = vmatprep.mubr.msk.f32.mxu1 %vm22637_vm0, %v27053_v11  ;;  %v23385_v17 = vpack.c.bf16 %v130_v6, %v129_v61  ;;  %v116_v11 = vld [vmem:[%s27040_s1 + $0x238] sm:$0xff]  ;;  %v23409_v6 = vpack.c.bf16 %v132_v58, %v131_v41  ;;  %v23431_v41 = vpack.c.bf16 %v118_v43, %v117_v23  ;;  %v135_v43 = vld [vmem:[%s27040_s1 + $0x2d0] sm:$0xff] }
 0x6af   :  { %19471 = vmatprep.subr.bf16.mxu1 %v27078_v3  ;;  %v23407_v61 = vpack.c.bf16 %v116_v11, %v115_v26  ;;  %v133_v11 = vld [vmem:[%s27040_s1 + $0x2c0] sm:$0xff]  ;;  %v134_v26 = vld [vmem:[%s27040_s1 + $0x2c8] sm:$0xff]  ;;  %v136_v23 = vld [vmem:[%s27040_s1 + $0x2d8] sm:$0xff] }
 0x6b0   :  { %v23433_v58 = vpack.c.bf16 %v134_v26, %v133_v11  ;;  %v23455_v11 = vpack.c.bf16 %v120_v27, %v119_v29  ;;  %v23457_v26 = vpack.c.bf16 %v136_v23, %v135_v43  ;;  %v137_v27 = vld [vmem:[%s27040_s1 + $0x2e0] sm:$0xff]  ;;  %v138_v29 = vld [vmem:[%s27040_s1 + $0x2e8] sm:$0xff]  ;;  %v23479_v43 = vpack.c.bf16 %v122_v47, %v121_v54  ;;  %v139_v54 = vld [vmem:[%s27040_s1 + $0x2f0] sm:$0xff] }
 0x6b1   :  { %v23481_v23 = vpack.c.bf16 %v138_v29, %v137_v27  ;;  %v795_v47 = vcombine.high %v23109_v53, %v23109_v53  ;;  %v140_v27 = vld [vmem:[%s27040_s1 + $0x2f8] sm:$0xff]  ;;  %v23505_v29 = vpack.c.bf16 %v124_v8, %v123_v13  ;;  %v141_v53 = vld [vmem:[%s27040_s1 + $0x300] sm:$0xff] }
 0x6b2   :  { %v23507_v55 = vpack.c.bf16 %v140_v27, %v139_v54  ;;  %v157_v13 = vld [vmem:[%s27040_s1 + $0x380] sm:$0xff]  ;;  %v23530_v54 = vpack.c.bf16 %v142_v63, %v141_v53  ;;  %v143_v63 = vld [vmem:[%s27040_s1 + $0x310] sm:$0xff]  ;;  %v144_v53 = vld [vmem:[%s27040_s1 + $0x318] sm:$0xff] }
 0x6b3   :  { %v809_v51 = vrot.slane %v795_v47, %v23101_v48  ;;  %v158_v47 = vld [vmem:[%s27040_s1 + $0x388] sm:$0xff] }
 0x6b4   :  { %19442 = vmatpush3.bf16.xpose.msk.msra.mxu0 %vm22904_vm2, %v23359_v35  ;;  %v23535_v20 = vpack.c.bf16 %v158_v47, %v157_v13  ;;  %v160_v13 = vld [vmem:[%s27040_s1 + $0x398] sm:$0xff]  ;;  %v23568_v47 = vpack.c.bf16 %v144_v53, %v143_v63  ;;  %v161_v63 = vld [vmem:[%s27040_s1 + $0x3a0] sm:$0xff]  ;;  %v162_v53 = vld [vmem:[%s27040_s1 + $0x3a8] sm:$0xff] }
 0x6b5   :  { %19443 = vmatprep.subr.bf16.mxu0 %v27078_v3  ;;  %v811_v8 = vcombine.high %v809_v51, %v809_v51  ;;  %v23533_v27 = vrot.slane %v809_v51, %v23101_v48  ;;  %v27285_v51 = vmov 0.0|0.0  }
 0x6b6   :  { %19474 = vmatpush3.bf16.xpose.msk.msra.mxu1 %vm22904_vm2, %v23361_v40  ;;  %27286 = vst [vmem:[#allocation43_spill] sm:$0xff] %v23568_v47 }
 0x6b7   :  { %19475 = vmatprep.subr.bf16.mxu1 %v27078_v3  ;;  %v23538_v16 = vrot.slane %v811_v8, %v23101_v48  ;;  %v159_v8 = vld [vmem:[%s27040_s1 + $0x390] sm:$0xff] }
 0x6b8   :  { %v23570_v5 = vpack.c.bf16 %v160_v13, %v159_v8  ;;  %v23592_v8 = vpack.c.bf16 %v146_v4, %v145_v12  ;;  %v23594_v13 = vpack.c.bf16 %v162_v53, %v161_v63  ;;  %v163_v4 = vld [vmem:[%s27040_s1 + $0x3b0] sm:$0xff]  ;;  %v164_v12 = vld [vmem:[%s27040_s1 + $0x3b8] sm:$0xff] }
 0x6b9   :  { %v23618_v53 = vpack.c.bf16 %v164_v12, %v163_v4 }
 0x6ba   :  { %27287 = vst [vmem:[#allocation44_spill] sm:$0xff] %v23570_v5  ;;  %27288 = vst [vmem:[#allocation45_spill] sm:$0xff] %v23592_v8 }
 0x6bb   :  { %27289 = vst [vmem:[#allocation46_spill] sm:$0xff] %v23594_v13  ;;  %27291 = vst [vmem:[#allocation48_spill] sm:$0xff] %v23618_v53 }
 0x6bc   :  { %19446 = vmatpush3.bf16.xpose.msk.msra.mxu0 %vm22904_vm2, %v23383_v10 }
 0x6bd   :  { %19447 = vmatprep.subr.bf16.mxu0 %v27078_v3 }
 0x6be   :  { %19478 = vmatpush3.bf16.xpose.msk.msra.mxu1 %vm22904_vm2, %v23385_v17 }
 0x6bf   :  { %19479 = vmatprep.subr.bf16.mxu1 %v27078_v3 }
 0x6c4   :  { %19450 = vmatpush3.bf16.xpose.msk.msra.mxu0 %vm22904_vm2, %v23407_v61 }
 0x6c5   :  { %19451 = vmatprep.subr.bf16.mxu0 %v27078_v3 }
 0x6c6   :  { %19482 = vmatpush3.bf16.xpose.msk.msra.mxu1 %vm22904_vm2, %v23409_v6 }
 0x6c7   :  { %19483 = vmatprep.subr.bf16.mxu1 %v27078_v3 }
 0x6cc   :  { %19454 = vmatpush3.bf16.xpose.msk.msra.mxu0 %vm22904_vm2, %v23431_v41 }
 0x6cd   :  { %19455 = vmatprep.subr.bf16.mxu0 %v27078_v3 }
 0x6ce   :  { %19486 = vmatpush3.bf16.xpose.msk.msra.mxu1 %vm22904_vm2, %v23433_v58 }
 0x6cf   :  { %19487 = vmatprep.subr.bf16.mxu1 %v27078_v3 }
 0x6d4   :  { %19458 = vmatpush3.bf16.xpose.msk.msra.mxu0 %vm22904_vm2, %v23455_v11 }
 0x6d5   :  { %19459 = vmatprep.subr.bf16.mxu0 %v27078_v3 }
 0x6d6   :  { %19490 = vmatpush3.bf16.xpose.msk.msra.mxu1 %vm22904_vm2, %v23457_v26 }
 0x6d7   :  { %19491 = vmatprep.subr.bf16.mxu1 %v27078_v3 }
 0x6dc   :  { %19462 = vmatpush3.bf16.xpose.msk.msra.mxu0 %vm22904_vm2, %v23479_v43 }
 0x6dd   :  { %19463 = vmatprep.subr.bf16.mxu0 %v27078_v3 }
 0x6de   :  { %19494 = vmatpush3.bf16.xpose.msk.msra.mxu1 %vm22904_vm2, %v23481_v23 }
 0x6df   :  { %19495 = vmatprep.subr.bf16.mxu1 %v27078_v3 }
 0x6e4   :  { %19466 = vmatpush3.bf16.xpose.msk.msra.mxu0 %vm22904_vm2, %v23505_v29 }
 0x6e5   :  { %19499 = vmatprep.subr.bf16.mxu0 %v27078_v3 }
 0x6e6   :  { %19498 = vmatpush3.bf16.xpose.msk.msra.mxu1 %vm22904_vm2, %v23507_v55 }
 0x6e7   :  { %19531 = vmatprep.subr.bf16.mxu1 %v27078_v3  ;;  %v27284_v3 = vmov 0.0  }
 0x6eb   :  { %15605 = vmatmul.mubr.msk.f32.vlgmr.msra.gmra.mrb[10].mxu0 %vm292_vm1, %v23533_v27 }
 0x6ec   :  { %19502 = vmatpush3.bf16.xpose.msk.msra.mxu0 %vm22904_vm2, %v23530_v54  ;;  %15674 = vmatprep.mubr.msk.f32.mxu0 %vm22637_vm0, %v27284_v3 }
 0x6ed   :  { %15640 = vmatmul.mubr.msk.f32.vlgmr.msra.gmra.mrb[10].mxu1 %vm292_vm1, %v23538_v16  ;;  %19503 = vmatprep.subr.bf16.mxu0 %v27285_v51 }
 0x6ee   :  { %19534 = vmatpush3.bf16.xpose.msk.msra.mxu1 %vm22904_vm2, %v23535_v20  ;;  %15709 = vmatprep.mubr.msk.f32.mxu1 %vm22637_vm0, %v27284_v3 }
 0x6ef   :  { %19535 = vmatprep.subr.bf16.mxu1 %v27285_v51 }
 0x6f4   :  { %19506 = vmatpush3.bf16.xpose.msk.msra.mxu0 %vm22904_vm2, %v23568_v47  ;;  %v148_v47 = vld [vmem:[%s27040_s1 + $0x338] sm:$0xff] }
 0x6f5   :  { %19507 = vmatprep.subr.bf16.mxu0 %v27285_v51 }
 0x6f6   :  { %19538 = vmatpush3.bf16.xpose.msk.msra.mxu1 %vm22904_vm2, %v23570_v5  ;;  %v147_v5 = vld [vmem:[%s27040_s1 + $0x330] sm:$0xff] }
 0x6f7   :  { %19539 = vmatprep.subr.bf16.mxu1 %v27285_v51  ;;  %v23616_v63 = vpack.c.bf16 %v148_v47, %v147_v5  ;;  %v165_v5 = vld [vmem:[%s27040_s1 + $0x3c0] sm:$0xff]  ;;  %v166_v47 = vld [vmem:[%s27040_s1 + $0x3c8] sm:$0xff] }
 0x6f8   :  { %v23642_v12 = vpack.c.bf16 %v166_v47, %v165_v5 }
 0x6f9   :  { %27290 = vst [vmem:[#allocation47_spill] sm:$0xff] %v23616_v63 }
 0x6fa   :  { %27293 = vst [vmem:[#allocation50_spill] sm:$0xff] %v23642_v12 }
 0x6fc   :  { %19510 = vmatpush3.bf16.xpose.msk.msra.mxu0 %vm22904_vm2, %v23592_v8  ;;  %v150_v8 = vld [vmem:[%s27040_s1 + $0x348] sm:$0xff] }
 0x6fd   :  { %19511 = vmatprep.subr.bf16.mxu0 %v27285_v51 }
 0x6fe   :  { %19542 = vmatpush3.bf16.xpose.msk.msra.mxu1 %vm22904_vm2, %v23594_v13  ;;  %v149_v13 = vld [vmem:[%s27040_s1 + $0x340] sm:$0xff] }
 0x6ff   :  { %19543 = vmatprep.subr.bf16.mxu1 %v27285_v51  ;;  %v23640_v4 = vpack.c.bf16 %v150_v8, %v149_v13  ;;  %v167_v8 = vld [vmem:[%s27040_s1 + $0x3d0] sm:$0xff]  ;;  %v168_v13 = vld [vmem:[%s27040_s1 + $0x3d8] sm:$0xff] }
 0x700   :  { %v23666_v47 = vpack.c.bf16 %v168_v13, %v167_v8 }
 0x701   :  { %27292 = vst [vmem:[#allocation49_spill] sm:$0xff] %v23640_v4 }
 0x702   :  { %27295 = vst [vmem:[#allocation52_spill] sm:$0xff] %v23666_v47 }
 0x704   :  { %19514 = vmatpush3.bf16.xpose.msk.msra.mxu0 %vm22904_vm2, %v23616_v63  ;;  %v152_v63 = vld [vmem:[%s27040_s1 + $0x358] sm:$0xff] }
 0x705   :  { %19515 = vmatprep.subr.bf16.mxu0 %v27285_v51 }
 0x706   :  { %19546 = vmatpush3.bf16.xpose.msk.msra.mxu1 %vm22904_vm2, %v23618_v53  ;;  %v151_v53 = vld [vmem:[%s27040_s1 + $0x350] sm:$0xff] }
 0x707   :  { %19547 = vmatprep.subr.bf16.mxu1 %v27285_v51  ;;  %v23664_v5 = vpack.c.bf16 %v152_v63, %v151_v53  ;;  %v169_v63 = vld [vmem:[%s27040_s1 + $0x3e0] sm:$0xff]  ;;  %v170_v53 = vld [vmem:[%s27040_s1 + $0x3e8] sm:$0xff] }
 0x708   :  { %v23690_v13 = vpack.c.bf16 %v170_v53, %v169_v63 }
 0x709   :  { %27294 = vst [vmem:[#allocation51_spill] sm:$0xff] %v23664_v5 }
 0x70a   :  { %27297 = vst [vmem:[#allocation54_spill] sm:$0xff] %v23690_v13 }
 0x70c   :  { %19518 = vmatpush3.bf16.xpose.msk.msra.mxu0 %vm22904_vm2, %v23640_v4  ;;  %v154_v4 = vld [vmem:[%s27040_s1 + $0x368] sm:$0xff] }
 0x70d   :  { %19519 = vmatprep.subr.bf16.mxu0 %v27285_v51 }
 0x70e   :  { %19550 = vmatpush3.bf16.xpose.msk.msra.mxu1 %vm22904_vm2, %v23642_v12  ;;  %v153_v12 = vld [vmem:[%s27040_s1 + $0x360] sm:$0xff] }
 0x70f   :  { %19551 = vmatprep.subr.bf16.mxu1 %v27285_v51  ;;  %v23688_v8 = vpack.c.bf16 %v154_v4, %v153_v12  ;;  %v171_v4 = vld [vmem:[%s27040_s1 + $0x3f0] sm:$0xff]  ;;  %v172_v12 = vld [vmem:[%s27040_s1 + $0x3f8] sm:$0xff] }
 0x710   :  { %v23714_v53 = vpack.c.bf16 %v172_v12, %v171_v4 }
 0x711   :  { %27296 = vst [vmem:[#allocation53_spill] sm:$0xff] %v23688_v8 }
 0x712   :  { %27299 = vst [vmem:[#allocation56_spill] sm:$0xff] %v23714_v53 }
 0x714   :  { %19522 = vmatpush3.bf16.xpose.msk.msra.mxu0 %vm22904_vm2, %v23664_v5  ;;  %v156_v5 = vld [vmem:[%s27040_s1 + $0x378] sm:$0xff] }
 0x715   :  { %19523 = vmatprep.subr.bf16.mxu0 %v27285_v51 }
 0x716   :  { %19554 = vmatpush3.bf16.xpose.msk.msra.mxu1 %vm22904_vm2, %v23666_v47  ;;  %v155_v47 = vld [vmem:[%s27040_s1 + $0x370] sm:$0xff] }
 0x717   :  { %19555 = vmatprep.subr.bf16.mxu1 %v27285_v51  ;;  %v23712_v63 = vpack.c.bf16 %v156_v5, %v155_v47  ;;  %v843_v5 = vcombine.high %v23538_v16, %v23538_v16  ;;  %v173_v16 = vld [vmem:[%s27041_s2] sm:$0xff] }
 0x719   :  { %27298 = vst [vmem:[#allocation55_spill] sm:$0xff] %v23712_v63 }
 0x71c   :  { %19526 = vmatpush3.bf16.xpose.msk.msra.mxu0 %vm22904_vm2, %v23688_v8 }
 0x71d   :  { %19527 = vmatprep.subr.bf16.mxu0 %v27285_v51 }
 0x71e   :  { %19558 = vmatpush3.bf16.xpose.msk.msra.mxu1 %vm22904_vm2, %v23690_v13  ;;  %v841_v13 = vcombine.high %v23533_v27, %v23533_v27  ;;  %v182_v27 = vrot.slane %v173_v16, %v23101_v48 }
 0x71f   :  { %19559 = vmatprep.subr.bf16.mxu1 %v27285_v51 }
 0x720   :  { %v190_v47 = vcombine.high %v182_v27, %v182_v27 }
 0x722   :  { %v23759_v4 = vrot.slane %v190_v47, %v23101_v48 }
 0x724   :  { %19530 = vmatpush3.bf16.xpose.msk.msra.mxu0 %vm22904_vm2, %v23712_v63  ;;  %27301 = vst [vmem:[#allocation58_spill] sm:$0xff] %v23759_v4 }
 0x725   :  { %19563 = vmatprep.subr.bf16.mxu0 %v27285_v51 }
 0x726   :  { %19562 = vmatpush3.bf16.xpose.msk.msra.mxu1 %vm22904_vm2, %v23714_v53 }
 0x727   :  { %19587 = vmatprep.subr.bf16.mxu1 %v27285_v51 }
 0x72b   :  { %15675 = vmatmul.mubr.msk.f32.vlgmr.msra.gmra.mrb[12].mxu0 %vm292_vm1, %v841_v13  ;;  %v23754_v13 = vrot.slane %v182_v27, %v23101_v48 }
 0x72c   :  { %19565 = vmatpush3.bf16.msra.mxu0 %v22908_v34  ;;  %15744 = vmatprep.mubr.msk.f32.mxu0 %vm22637_vm0, %v27284_v3 }
 0x72d   :  { %15710 = vmatmul.mubr.msk.f32.vlgmr.msra.gmra.mrb[12].mxu1 %vm292_vm1, %v843_v5  ;;  %19566 = vmatprep.subr.bf16.mxu0 %v27285_v51  ;;  %27300 = vst [vmem:[#allocation57_spill] sm:$0xff] %v23754_v13 }
 0x72e   :  { %19589 = vmatpush3.bf16.msra.mxu1 %v23005_v2  ;;  %15779 = vmatprep.mubr.msk.f32.mxu1 %vm22637_vm0, %v27284_v3 }
 0x72f   :  { %19590 = vmatprep.subr.bf16.mxu1 %v27285_v51 }
 0x730   :  { %19568 = vmatpush3.bf16.msra.mxu0 %v22920_v37 }
 0x731   :  { %19569 = vmatprep.subr.bf16.mxu0 %v27285_v51 }
 0x732   :  { %19592 = vmatpush3.bf16.msra.mxu1 %v23023_v9 }
 0x733   :  { %19593 = vmatprep.subr.bf16.mxu1 %v27285_v51 }
 0x734   :  { %19571 = vmatpush3.bf16.msra.mxu0 %v22933_v42 }
 0x735   :  { %19572 = vmatprep.subr.bf16.mxu0 %v27285_v51 }
 0x736   :  { %19595 = vmatpush3.bf16.msra.mxu1 %v23035_v15 }
 0x737   :  { %19596 = vmatprep.subr.bf16.mxu1 %v27285_v51 }
 0x738   :  { %19574 = vmatpush3.bf16.msra.mxu0 %v22945_v46 }
 0x739   :  { %19575 = vmatprep.subr.bf16.mxu0 %v27285_v51 }
 0x73a   :  { %19598 = vmatpush3.bf16.msra.mxu1 %v23047_v19 }
 0x73b   :  { %19599 = vmatprep.subr.bf16.mxu1 %v27285_v51 }
 0x73c   :  { %19577 = vmatpush3.bf16.msra.mxu0 %v22957_v50 }
 0x73d   :  { %19578 = vmatprep.subr.bf16.mxu0 %v27285_v51 }
 0x73e   :  { %v960_v12 = vpop.f32.mrb[6].mxu0  ;;  %19601 = vmatpush3.bf16.msra.mxu1 %v23059_v24 }
 0x73f   :  { %v961_v5 = vadd.f32 %v960_v12, %v23754_v13  ;;  %v15466_v15 = vpop.f32.mrb[7].mxu0  ;;  %19602 = vmatprep.subr.bf16.mxu1 %v27285_v51 }
 0x740   :  { %v1080_v27 = vpop.f32.mrb[6].mxu1  ;;  %19580 = vmatpush3.bf16.msra.mxu0 %v22969_v56  ;;  %v23786_v15 = vcombine.high %v23759_v4, %v23759_v4 }
 0x741   :  { %v1081_v19 = vadd.f32 %v1080_v27, %v23759_v4  ;;  %v15501_v9 = vpop.f32.mrb[7].mxu1  ;;  %v1805_v47 = vsel %vm1804_vm3, %v961_v5, -inf  ;;  %19581 = vmatprep.subr.bf16.mxu0 %v27285_v51 }
 0x742   :  { %1806 = vmax.xlane.f32.xlu0 %v1805_v47  ;;  %19604 = vmatpush3.bf16.msra.mxu1 %v23071_v28  ;;  %v23782_v9 = vcombine.high %v23754_v13, %v23754_v13  ;;  %27303 = vst [vmem:[#allocation60_spill] sm:$0xff] %v23786_v15  ;;  %v175_v13 = vcombine.high %v173_v16, %v173_v16 }
 0x743   :  { %v1808_v24 = vsel %vm1804_vm3, %v1081_v19, -inf  ;;  %19605 = vmatprep.subr.bf16.mxu1 %v27285_v51 }
 0x744   :  { %1809 = vmax.xlane.f32.xlu1 %v1808_v24  ;;  %19583 = vmatpush3.bf16.msra.mxu0 %v22981_v59  ;;  %27302 = vst [vmem:[#allocation59_spill] sm:$0xff] %v23782_v9 }
 0x745   :  { %19584 = vmatprep.subr.bf16.mxu0 %v27285_v51 }
 0x746   :  { %19607 = vmatpush3.bf16.msra.mxu1 %v23083_v32 }
 0x747   :  { %19608 = vmatprep.subr.bf16.mxu1 %v27285_v51 }
 0x748   :  { %19586 = vmatpush3.bf16.msra.mxu0 %v22993_v62  ;;  %v189_v62 = vrot.slane %v175_v13, %v23101_v48 }
 0x749   :  { %19611 = vmatprep.subr.bf16.mxu0 %v27285_v51 }
 0x74a   :  { %19610 = vmatpush3.bf16.msra.mxu1 %v23095_v38  ;;  %v191_v59 = vcombine.high %v189_v62, %v189_v62  ;;  %v23794_v4 = vrot.slane %v189_v62, %v23101_v48 }
 0x74b   :  { %19635 = vmatprep.subr.bf16.mxu1 %v27285_v51 }
 0x74c   :  { %27304 = vst [vmem:[#allocation61_spill] sm:$0xff] %v23794_v4 }
 0x77e   :  { %v1200_v24 = vpop.f32.mrb[8].mxu0 }
 0x77f   :  { %v1201_v12 = vadd.f32 %v1200_v24, %v23782_v9  ;;  %v15536_v27 = vpop.f32.mrb[9].mxu0  ;;  %v23797_v24 = vrot.slane %v191_v59, %v23101_v48 }
 0x780   :  { %v1320_v47 = vpop.f32.mrb[8].mxu1 }
 0x781   :  { %v1321_v32 = vadd.f32 %v1320_v47, %v23786_v15  ;;  %v15571_v28 = vpop.f32.mrb[9].mxu1  ;;  %v1811_v38 = vsel %vm1804_vm3, %v1201_v12, -inf  ;;  %27305 = vst [vmem:[#allocation62_spill] sm:$0xff] %v23797_v24 }
 0x782   :  { %1812 = vmax.xlane.f32.xlu0 %v1811_v38 }
 0x783   :  { %v1814_v2 = vsel %vm1804_vm3, %v1321_v32, -inf }
 0x786   :  { %1815 = vmax.xlane.f32.xlu0 %v1814_v2 }
 0x7be   :  { %v1440_v27 = vpop.f32.mrb[10].mxu0 }
 0x7bf   :  { %v1441_v47 = vadd.f32 %v1440_v27, %v23794_v4  ;;  %v15606_v28 = vpop.f32.mrb[11].mxu0 }
 0x7c0   :  { %v1560_v15 = vpop.f32.mrb[10].mxu1 }
 0x7c1   :  { %v1561_v38 = vadd.f32 %v1560_v15, %v23797_v24  ;;  %v15641_v9 = vpop.f32.mrb[11].mxu1  ;;  %v1817_v2 = vsel %vm1804_vm3, %v1441_v47, -inf  ;;  %v23807_v15 = vcombine.high %v23794_v4, %v23794_v4 }
 0x7c2   :  { %1818 = vmax.xlane.f32.xlu1 %v1817_v2 }
 0x7c3   :  { %v1820_v16 = vsel %vm1804_vm3, %v1561_v38, -inf  ;;  %27306 = vst [vmem:[#allocation63_spill] sm:$0xff] %v23807_v15 }
 0x7c4   :  { %1821 = vmax.xlane.f32.xlu0 %v1820_v16 }
 0x7cf   :  { %v1807_v13 = vpop.xlane.xlu0 %1806 }
 0x7d0   :  { %v1829_v62 = vsub.f32 %v961_v5, %v1807_v13  ;;  %v23811_v5 = vcombine.high %v23797_v24, %v23797_v24 }
 0x7d1   :  { %v1810_v56 = vpop.xlane.xlu1 %1809 }
 0x7d2   :  { %v1837_v50 = vmul.f32 1.442695, %v1829_v62  ;;  %v1830_v59 = vsub.f32 %v1081_v19, %v1810_v56  ;;  %27307 = vst [vmem:[#allocation64_spill] sm:$0xff] %v23811_v5 }
 0x7d4   :  { %22294 = vpow2.f32 %v1837_v50  ;;  %v1839_v48 = vmul.f32 1.442695, %v1830_v59 }
 0x7d6   :  { %22296 = vpow2.f32 %v1839_v48 }
 0x7de   :  { %v22295_v27 = vpop.eup %22294 }
 0x7df   :  { %v1853_v28 = vsel %vm1804_vm3, %v22295_v27, 0.0 }
 0x7e0   :  { %v22297_v46 = vpop.eup %22296  ;;  %1854 = vadd.xlane.f32.xlu1 %v1853_v28 }
 0x7e1   :  { %v1856_v9 = vsel %vm1804_vm3, %v22297_v46, 0.0 }
 0x7e2   :  { %1857 = vadd.xlane.f32.xlu0 %v1856_v9 }
 0x7fe   :  { %v1680_v56 = vpop.f32.mrb[12].mxu0 }
 0x7ff   :  { %v23814_v50 = vadd.f32 %v1680_v56, %v23807_v15  ;;  %v15676_v19 = vpop.f32.mrb[13].mxu0 }
 0x800   :  { %v1800_v48 = vpop.f32.mrb[12].mxu1 }
 0x801   :  { %v23817_v2 = vadd.f32 %v1800_v48, %v23811_v5  ;;  %v15711_v16 = vpop.f32.mrb[13].mxu1  ;;  %v1823_v13 = vsel %vm1804_vm3, %v23814_v50, -inf }
 0x802   :  { %1824 = vmax.xlane.f32.xlu1 %v1823_v13 }
 0x803   :  { %v1826_v62 = vsel %vm1804_vm3, %v23817_v2, -inf }
 0x804   :  { %1827 = vmax.xlane.f32.xlu0 %v1826_v62 }
 0x80f   :  { %v1813_v59 = vpop.xlane.xlu0 %1812 }
 0x810   :  { %v1831_v28 = vsub.f32 %v1201_v12, %v1813_v59 }
 0x812   :  { %v1841_v9 = vmul.f32 1.442695, %v1831_v28 }
 0x813   :  { %v1816_v24 = vpop.xlane.xlu0 %1815 }
 0x814   :  { %22298 = vpow2.f32 %v1841_v9  ;;  %v1832_v56 = vsub.f32 %v1321_v32, %v1816_v24 }
 0x816   :  { %v1843_v19 = vmul.f32 1.442695, %v1832_v56 }
 0x818   :  { %22300 = vpow2.f32 %v1843_v19 }
 0x81e   :  { %v23823_v15 = vpop.eup %22298 }
 0x81f   :  { %v1859_v48 = vsel %vm1804_vm3, %v23823_v15, 0.0 }
 0x820   :  { %1860 = vadd.xlane.f32.xlu1 %v1859_v48 }
 0x822   :  { %v23827_v16 = vpop.eup %22300 }
 0x823   :  { %v1862_v13 = vsel %vm1804_vm3, %v23827_v16, 0.0 }
 0x824   :  { %1863 = vadd.xlane.f32.xlu0 %v1862_v13 }
 0x84f   :  { %v1819_v62 = vpop.xlane.xlu1 %1818 }
 0x850   :  { %v1833_v12 = vsub.f32 %v1441_v47, %v1819_v62 }
 0x851   :  { %v1822_v59 = vpop.xlane.xlu0 %1821 }
 0x852   :  { %v1845_v28 = vmul.f32 1.442695, %v1833_v12  ;;  %v1834_v9 = vsub.f32 %v1561_v38, %v1822_v59 }
 0x854   :  { %22302 = vpow2.f32 %v1845_v28  ;;  %v1847_v32 = vmul.f32 1.442695, %v1834_v9 }
 0x856   :  { %22304 = vpow2.f32 %v1847_v32 }
 0x85e   :  { %v23831_v24 = vpop.eup %22302 }
 0x85f   :  { %v1865_v56 = vsel %vm1804_vm3, %v23831_v24, 0.0 }
 0x860   :  { %v23835_v19 = vpop.eup %22304  ;;  %1866 = vadd.xlane.f32.xlu1 %v1865_v56 }
 0x861   :  { %v1868_v48 = vsel %vm1804_vm3, %v23835_v19, 0.0 }
 0x862   :  { %1869 = vadd.xlane.f32.xlu0 %v1868_v48 }
 0x86d   :  { %v1855_v13 = vpop.xlane.xlu1 %1854 }
 0x86e   :  { %22306 = vrcp.f32 %v1855_v13 }
 0x86f   :  { %v1858_v47 = vpop.xlane.xlu0 %1857 }
 0x870   :  { %22308 = vrcp.f32 %v1858_v47 }
 0x878   :  { %v22307_v38 = vpop.eup %22306 }
 0x879   :  { %v1885_v62 = vmul.f32 %v22307_v38, %v22295_v27 }
 0x87a   :  { %v22309_v12 = vpop.eup %22308 }
 0x87b   :  { %15745 = vmatmul.mubr.f32.vlgmr.msra.gmra.mrb[14].mxu0 %v1885_v62  ;;  %v1886_v59 = vmul.f32 %v22309_v12, %v22297_v46 }
 0x87c   :  { %19613 = vmatpush3.bf16.msra.mxu0 %v23119_v0  ;;  %15814 = vmatprep.mubr.msk.f32.mxu0 %vm22637_vm0, %v27284_v3 }
 0x87d   :  { %v1901_v28 = vrot.slane %v1886_v59, 7  ;;  %15780 = vmatmul.mubr.f32.vlgmr.msra.gmra.mrb[14].mxu1 %v1886_v59  ;;  %19614 = vmatprep.subr.bf16.mxu0 %v27285_v51 }
 0x87e   :  { %19637 = vmatpush3.bf16.msra.mxu1 %v23124_v7  ;;  %15849 = vmatprep.mubr.msk.f32.mxu1 %vm22637_vm0, %v27284_v3 }
 0x87f   :  { %v1903_v27 = vsel %vm1902_vm4, %v1901_v28, %v1885_v62  ;;  %19638 = vmatprep.subr.bf16.mxu1 %v27285_v51 }
 0x880   :  { %19616 = vmatpush3.bf16.msra.mxu0 %v23157_v22 }
 0x881   :  { %19617 = vmatprep.subr.bf16.mxu0 %v27285_v51 }
 0x882   :  { %19640 = vmatpush3.bf16.msra.mxu1 %v23159_v25 }
 0x883   :  { %19641 = vmatprep.subr.bf16.mxu1 %v27285_v51 }
 0x884   :  { %19619 = vmatpush3.bf16.msra.mxu0 %v23181_v36 }
 0x885   :  { %19620 = vmatprep.subr.bf16.mxu0 %v27285_v51 }
 0x886   :  { %19643 = vmatpush3.bf16.msra.mxu1 %v23183_v39 }
 0x887   :  { %19644 = vmatprep.subr.bf16.mxu1 %v27285_v51 }
 0x888   :  { %19622 = vmatpush3.bf16.msra.mxu0 %v23205_v49 }
 0x889   :  { %19623 = vmatprep.subr.bf16.mxu0 %v27285_v51 }
 0x88a   :  { %19646 = vmatpush3.bf16.msra.mxu1 %v23207_v52 }
 0x88b   :  { %19647 = vmatprep.subr.bf16.mxu1 %v27285_v51 }
 0x88c   :  { %19625 = vmatpush3.bf16.msra.mxu0 %v23229_v1 }
 0x88d   :  { %19626 = vmatprep.subr.bf16.mxu0 %v27285_v51 }
 0x88e   :  { %19649 = vmatpush3.bf16.msra.mxu1 %v23231_v14 }
 0x88f   :  { %v1825_v46 = vpop.xlane.xlu1 %1824  ;;  %19650 = vmatprep.subr.bf16.mxu1 %v27285_v51 }
 0x890   :  { %v1835_v9 = vsub.f32 %v23814_v50, %v1825_v46  ;;  %19628 = vmatpush3.bf16.msra.mxu0 %v23253_v30 }
 0x891   :  { %v1828_v32 = vpop.xlane.xlu0 %1827  ;;  %19629 = vmatprep.subr.bf16.mxu0 %v27285_v51 }
 0x892   :  { %v1849_v56 = vmul.f32 1.442695, %v1835_v9  ;;  %v1836_v48 = vsub.f32 %v23817_v2, %v1828_v32  ;;  %19652 = vmatpush3.bf16.msra.mxu1 %v23255_v31 }
 0x893   :  { %19653 = vmatprep.subr.bf16.mxu1 %v27285_v51 }
 0x894   :  { %22310 = vpow2.f32 %v1849_v56  ;;  %v1851_v13 = vmul.f32 1.442695, %v1836_v48  ;;  %19631 = vmatpush3.bf16.msra.mxu0 %v23277_v45 }
 0x895   :  { %19632 = vmatprep.subr.bf16.mxu0 %v27285_v51 }
 0x896   :  { %22312 = vpow2.f32 %v1851_v13  ;;  %19655 = vmatpush3.bf16.msra.mxu1 %v23279_v57 }
 0x897   :  { %19656 = vmatprep.subr.bf16.mxu1 %v27285_v51 }
 0x898   :  { %19634 = vmatpush3.bf16.msra.mxu0 %v23301_v18 }
 0x899   :  { %19659 = vmatprep.subr.bf16.mxu0 %v27285_v51 }
 0x89a   :  { %19658 = vmatpush3.bf16.msra.mxu1 %v23303_v21 }
 0x89b   :  { %19683 = vmatprep.subr.bf16.mxu1 %v27285_v51 }
 0x89e   :  { %v23878_v50 = vpop.eup %22310 }
 0x89f   :  { %v1871_v2 = vsel %vm1804_vm3, %v23878_v50, 0.0 }
 0x8a0   :  { %v23882_v47 = vpop.eup %22312  ;;  %1872 = vadd.xlane.f32.xlu1 %v1871_v2 }
 0x8a1   :  { %v1874_v38 = vsel %vm1804_vm3, %v23882_v47, 0.0 }
 0x8a2   :  { %1875 = vadd.xlane.f32.xlu0 %v1874_v38 }
 0x8ad   :  { %v1861_v62 = vpop.xlane.xlu1 %1860 }
 0x8ae   :  { %22314 = vrcp.f32 %v1861_v62 }
 0x8b1   :  { %v1864_v12 = vpop.xlane.xlu0 %1863 }
 0x8b2   :  { %22316 = vrcp.f32 %v1864_v12 }
 0x8b8   :  { %v22315_v59 = vpop.eup %22314 }
 0x8b9   :  { %v1887_v28 = vmul.f32 %v22315_v59, %v23823_v15 }
 0x8bb   :  { %v1904_v46 = vrot.slane %v1887_v28, 6  ;;  %15815 = vmatmul.mubr.f32.vlgmr.msra.gmra.mrb[16].mxu0 %v1887_v28  ;;  %v27310_v28 = vld [vmem:[#allocation45_spill] sm:$0xff] }
 0x8bc   :  { %v22317_v9 = vpop.eup %22316  ;;  %19661 = vmatpush3.bf16.msra.mxu0 %v23325_v44  ;;  %15884 = vmatprep.mubr.msk.f32.mxu0 %vm22637_vm0, %v27284_v3 }
 0x8bd   :  { %v1906_v32 = vsel %vm1905_vm5, %v1904_v46, %v1903_v27  ;;  %v1888_v56 = vmul.f32 %v22317_v9, %v23827_v16  ;;  %19662 = vmatprep.subr.bf16.mxu0 %v27285_v51  ;;  %v27311_v46 = vld [vmem:[#allocation46_spill] sm:$0xff]  ;;  %v27312_v9 = vld [vmem:[#allocation47_spill] sm:$0xff] }
 0x8bf   :  { %v1907_v48 = vrot.slane %v1888_v56, 5  ;;  %15850 = vmatmul.mubr.f32.vlgmr.msra.gmra.mrb[16].mxu1 %v1888_v56  ;;  %v27314_v56 = vld [vmem:[#allocation49_spill] sm:$0xff] }
 0x8c0   :  { %19685 = vmatpush3.bf16.msra.mxu1 %v23329_v60  ;;  %19664 = vmatpush3.bf16.msra.mxu0 %v23359_v35 }
 0x8c1   :  { %v1909_v15 = vsel %vm1908_vm6, %v1907_v48, %v1906_v32  ;;  %19686 = vmatprep.subr.bf16.mxu1 %v27285_v51  ;;  %19665 = vmatprep.subr.bf16.mxu0 %v27285_v51  ;;  %v27313_v32 = vld [vmem:[#allocation48_spill] sm:$0xff]  ;;  %v27315_v48 = vld [vmem:[#allocation50_spill] sm:$0xff] }
 0x8c2   :  { %15919 = vmatprep.mubr.msk.f32.mxu1 %vm22637_vm0, %v27284_v3 }
 0x8c4   :  { %19688 = vmatpush3.bf16.msra.mxu1 %v23361_v40  ;;  %19667 = vmatpush3.bf16.msra.mxu0 %v23383_v10 }
 0x8c5   :  { %19689 = vmatprep.subr.bf16.mxu1 %v27285_v51  ;;  %19668 = vmatprep.subr.bf16.mxu0 %v27285_v51 }
 0x8c8   :  { %19691 = vmatpush3.bf16.msra.mxu1 %v23385_v17  ;;  %19670 = vmatpush3.bf16.msra.mxu0 %v23407_v61 }
 0x8c9   :  { %19692 = vmatprep.subr.bf16.mxu1 %v27285_v51  ;;  %19671 = vmatprep.subr.bf16.mxu0 %v27285_v51 }
 0x8cc   :  { %19694 = vmatpush3.bf16.msra.mxu1 %v23409_v6  ;;  %19673 = vmatpush3.bf16.msra.mxu0 %v23431_v41 }
 0x8cd   :  { %19695 = vmatprep.subr.bf16.mxu1 %v27285_v51  ;;  %19674 = vmatprep.subr.bf16.mxu0 %v27285_v51 }
 0x8d0   :  { %19697 = vmatpush3.bf16.msra.mxu1 %v23433_v58  ;;  %19676 = vmatpush3.bf16.msra.mxu0 %v23455_v11 }
 0x8d1   :  { %19698 = vmatprep.subr.bf16.mxu1 %v27285_v51  ;;  %19677 = vmatprep.subr.bf16.mxu0 %v27285_v51 }
 0x8d4   :  { %19700 = vmatpush3.bf16.msra.mxu1 %v23457_v26  ;;  %19679 = vmatpush3.bf16.msra.mxu0 %v23479_v43 }
 0x8d5   :  { %19701 = vmatprep.subr.bf16.mxu1 %v27285_v51  ;;  %19680 = vmatprep.subr.bf16.mxu0 %v27285_v51 }
 0x8d8   :  { %19703 = vmatpush3.bf16.msra.mxu1 %v23481_v23  ;;  %19682 = vmatpush3.bf16.msra.mxu0 %v23505_v29 }
 0x8d9   :  { %19704 = vmatprep.subr.bf16.mxu1 %v27285_v51  ;;  %19707 = vmatprep.subr.bf16.mxu0 %v27285_v51 }
 0x8dc   :  { %19706 = vmatpush3.bf16.msra.mxu1 %v23507_v55 }
 0x8dd   :  { %19731 = vmatprep.subr.bf16.mxu1 %v27285_v51 }
 0x8ed   :  { %v1867_v16 = vpop.xlane.xlu1 %1866 }
 0x8ee   :  { %22318 = vrcp.f32 %v1867_v16  ;;  %v27317_v16 = vld [vmem:[#allocation52_spill] sm:$0xff] }
 0x8ef   :  { %v1870_v27 = vpop.xlane.xlu0 %1869 }
 0x8f0   :  { %22320 = vrcp.f32 %v1870_v27  ;;  %v27318_v27 = vld [vmem:[#allocation54_spill] sm:$0xff] }
 0x8f8   :  { %v22319_v13 = vpop.eup %22318 }
 0x8f9   :  { %v1889_v2 = vmul.f32 %v22319_v13, %v23831_v24  ;;  %v27308_v24 = vld [vmem:[#allocation43_spill] sm:$0xff] }
 0x8fa   :  { %v22321_v38 = vpop.eup %22320 }
 0x8fb   :  { %v1910_v62 = vrot.slane %v1889_v2, 4  ;;  %15885 = vmatmul.mubr.f32.vlgmr.msra.gmra.mrb[18].mxu0 %v1889_v2  ;;  %v1890_v12 = vmul.f32 %v22321_v38, %v23835_v19  ;;  %v27309_v19 = vld [vmem:[#allocation44_spill] sm:$0xff] }
 0x8fc   :  { %19709 = vmatpush3.bf16.msra.mxu0 %v23530_v54  ;;  %15954 = vmatprep.mubr.msk.f32.mxu0 %vm22637_vm0, %v27284_v3 }
 0x8fd   :  { %v1912_v59 = vsel %vm1911_vm7, %v1910_v62, %v1909_v15  ;;  %15920 = vmatmul.mubr.f32.vlgmr.msra.gmra.mrb[18].mxu1 %v1890_v12  ;;  %19710 = vmatprep.subr.bf16.mxu0 %v27285_v51  ;;  %v27316_v15 = vld [vmem:[#allocation51_spill] sm:$0xff]  ;;  %v1913_v62 = vrot.slane %v1890_v12, 3  ;;  %v27319_v12 = vld [vmem:[#allocation9_spill] sm:$0xff] }
 0x8fe   :  { %19733 = vmatpush3.bf16.msra.mxu1 %v23535_v20  ;;  %15989 = vmatprep.mubr.msk.f32.mxu1 %vm22637_vm0, %v27284_v3 }
 0x8ff   :  { %19734 = vmatprep.subr.bf16.mxu1 %v27285_v51 }
 0x900   :  { %19712 = vmatpush3.bf16.msra.mxu0 %v27308_v24 }
 0x901   :  { %19713 = vmatprep.subr.bf16.mxu0 %v27285_v51 }
 0x902   :  { %19736 = vmatpush3.bf16.msra.mxu1 %v27309_v19 }
 0x903   :  { %19737 = vmatprep.subr.bf16.mxu1 %v27285_v51 }
 0x904   :  { %19715 = vmatpush3.bf16.msra.mxu0 %v27310_v28 }
 0x905   :  { %19716 = vmatprep.subr.bf16.mxu0 %v27285_v51 }
 0x906   :  { %19739 = vmatpush3.bf16.msra.mxu1 %v27311_v46 }
 0x907   :  { %19740 = vmatprep.subr.bf16.mxu1 %v27285_v51 }
 0x908   :  { %19718 = vmatpush3.bf16.msra.mxu0 %v27312_v9 }
 0x909   :  { %19719 = vmatprep.subr.bf16.mxu0 %v27285_v51 }
 0x90a   :  { %19742 = vmatpush3.bf16.msra.mxu1 %v27313_v32 }
 0x90b   :  { %19743 = vmatprep.subr.bf16.mxu1 %v27285_v51 }
 0x90c   :  { %19721 = vmatpush3.bf16.msra.mxu0 %v27314_v56 }
 0x90d   :  { %19722 = vmatprep.subr.bf16.mxu0 %v27285_v51 }
 0x90e   :  { %19745 = vmatpush3.bf16.msra.mxu1 %v27315_v48 }
 0x90f   :  { %19746 = vmatprep.subr.bf16.mxu1 %v27285_v51 }
 0x910   :  { %19724 = vmatpush3.bf16.msra.mxu0 %v27316_v15 }
 0x911   :  { %19725 = vmatprep.subr.bf16.mxu0 %v27285_v51 }
 0x912   :  { %19748 = vmatpush3.bf16.msra.mxu1 %v27317_v16 }
 0x913   :  { %19749 = vmatprep.subr.bf16.mxu1 %v27285_v51 }
 0x914   :  { %19727 = vmatpush3.bf16.msra.mxu0 %v23688_v8  ;;  %v1915_v8 = vsel %vm1914_vm8, %v1913_v62, %v1912_v59  ;;  %v241_v62 = vld [vmem:[%s27048_s9 + $0x28] sm:$0xff] }
 0x915   :  { %19728 = vmatprep.subr.bf16.mxu0 %v27285_v51 }
 0x916   :  { %19751 = vmatpush3.bf16.msra.mxu1 %v27318_v27 }
 0x917   :  { %19752 = vmatprep.subr.bf16.mxu1 %v27285_v51 }
 0x918   :  { %19730 = vmatpush3.bf16.msra.mxu0 %v23712_v63 }
 0x919   :  { %19755 = vmatprep.subr.bf16.mxu0 %v27285_v51 }
 0x91a   :  { %19754 = vmatpush3.bf16.msra.mxu1 %v23714_v53 }
 0x91b   :  { %19767 = vmatprep.subr.bf16.mxu1 %v27285_v51 }
 0x92d   :  { %v1873_v13 = vpop.xlane.xlu1 %1872 }
 0x92e   :  { %22322 = vrcp.f32 %v1873_v13 }
 0x92f   :  { %v1876_v2 = vpop.xlane.xlu0 %1875 }
 0x930   :  { %22324 = vrcp.f32 %v1876_v2 }
 0x938   :  { %v22323_v38 = vpop.eup %22322 }
 0x939   :  { %v1891_v5 = vmul.f32 %v22323_v38, %v23878_v50  ;;  %v240_v38 = vld [vmem:[%s27048_s9 + $0x20] sm:$0xff] }
 0x93a   :  { %v22325_v4 = vpop.eup %22324 }
 0x93b   :  { %v1916_v27 = vrot.slane %v1891_v5, 2  ;;  %15955 = vmatmul.mubr.f32.vlgmr.msra.gmra.mrb[20].mxu0 %v1891_v5  ;;  %v1892_v63 = vmul.f32 %v22325_v4, %v23882_v47  ;;  %v27320_v4 = vld [vmem:[#allocation11_spill] sm:$0xff] }
 0x93c   :  { %16000 = vmatprep.mubr.msk.f32.mxu0 %vm22637_vm0, %v27284_v3 }
 0x93d   :  { %v1918_v13 = vsel %vm1917_vm9, %v1916_v27, %v1915_v8  ;;  %v1919_v2 = vrot.slane %v1892_v63, 1  ;;  %15990 = vmatmul.mubr.f32.vlgmr.msra.gmra.mrb[20].mxu1 %v1892_v63 }
 0x93e   :  { %19769 = vmatpush3.bf16.msra.mxu1 %v27319_v12  ;;  %16022 = vmatprep.mubr.msk.f32.mxu1 %vm22637_vm0, %v27284_v3 }
 0x93f   :  { %v1921_v50 = vsel %vm1920_vm10, %v1919_v2, %v1918_v13  ;;  %19770 = vmatprep.subr.bf16.mxu1 %v27285_v51  ;;  %v23985_v13 = vpack.c.bf16 %v241_v62, %v240_v38  ;;  %v242_v2 = vld [vmem:[%s27048_s9 + $0x30] sm:$0xff] }
 0x940   :  { %1923 = vst [vmem:[#allocation5] sm:$0xff] %v1921_v50  ;;  %v243_v50 = vld [vmem:[%s27048_s9 + $0x38] sm:$0xff] }
 0x941   :  { %27321 = vst [vmem:[#allocation43_spill] sm:$0xff] %v23985_v13  ;;  %19757 = vmatpush3.bf16.msra.mxu0 %v23985_v13 }
 0x942   :  { %19772 = vmatpush3.bf16.msra.mxu1 %v27320_v4  ;;  %19758 = vmatprep.subr.bf16.mxu0 %v27285_v51 }
 0x943   :  { %19773 = vmatprep.subr.bf16.mxu1 %v27285_v51 }
 0x94e   :  { %v1990_v5 = vpop.f32.mrb[14].mxu0 }
 0x94f   :  { %v15746_v47 = vpop.f32.mrb[15].mxu0 }
 0x950   :  { %v2060_v59 = vpop.f32.mrb[14].mxu1  ;;  %v23995_v47 = vpack.c.bf16 %v243_v50, %v242_v2 }
 0x951   :  { %v2492_v8 = vrot.slane %v2060_v59, 7  ;;  %v15781_v27 = vpop.f32.mrb[15].mxu1 }
 0x952   :  { %27322 = vst [vmem:[#allocation44_spill] sm:$0xff] %v23995_v47  ;;  %19760 = vmatpush3.bf16.msra.mxu0 %v23995_v47 }
 0x953   :  { %v2493_v63 = vsel %vm1902_vm4, %v2492_v8, %v1990_v5  ;;  %19761 = vmatprep.subr.bf16.mxu0 %v27285_v51 }
 0x98e   :  { %v2130_v5 = vpop.f32.mrb[16].mxu0 }
 0x98f   :  { %v2494_v59 = vrot.slane %v2130_v5, 6  ;;  %v15816_v8 = vpop.f32.mrb[17].mxu0 }
 0x991   :  { %v2495_v27 = vsel %vm1905_vm5, %v2494_v59, %v2493_v63  ;;  %v236_v63 = vld [vmem:[%s27048_s9] sm:$0xff] }
 0x992   :  { %v2200_v38 = vpop.f32.mrb[16].mxu1 }
 0x993   :  { %v2496_v62 = vrot.slane %v2200_v38, 5  ;;  %v15851_v4 = vpop.f32.mrb[17].mxu1 }
 0x994   :  { %v237_v4 = vld [vmem:[%s27048_s9 + $0x8] sm:$0xff] }
 0x995   :  { %v2497_v12 = vsel %vm1908_vm6, %v2496_v62, %v2495_v27  ;;  %v239_v62 = vld [vmem:[%s27048_s9 + $0x18] sm:$0xff] }
 0x9ce   :  { %v2270_v13 = vpop.f32.mrb[18].mxu0 }
 0x9cf   :  { %v2498_v53 = vrot.slane %v2270_v13, 4  ;;  %v15886_v16 = vpop.f32.mrb[19].mxu0 }
 0x9d0   :  { %v2340_v15 = vpop.f32.mrb[18].mxu1 }
 0x9d1   :  { %v2499_v2 = vsel %vm1911_vm7, %v2498_v53, %v2497_v12  ;;  %v2500_v50 = vrot.slane %v2340_v15, 3  ;;  %v15921_v5 = vpop.f32.mrb[19].mxu1  ;;  %v24010_v15 = vpack.c.bf16 %v237_v4, %v236_v63  ;;  %v238_v12 = vld [vmem:[%s27048_s9 + $0x10] sm:$0xff]  ;;  %v27328_v63 = vld [vmem:[#allocation20_spill] sm:$0xff] }
 0x9d2   :  { %v27326_v5 = vld [vmem:[#allocation13_spill] sm:$0xff] }
 0x9d3   :  { %v2501_v8 = vsel %vm1914_vm8, %v2500_v50, %v2499_v2  ;;  %27323 = vst [vmem:[#allocation45_spill] sm:$0xff] %v24010_v15  ;;  %v27325_v50 = vld [vmem:[#allocation34_spill] sm:$0xff]  ;;  %v27329_v4 = vld [vmem:[#allocation17_spill] sm:$0xff] }
 0xa0e   :  { %v2410_v47 = vpop.f32.mrb[20].mxu0 }
 0xa0f   :  { %v2502_v59 = vrot.slane %v2410_v47, 2  ;;  %v15956_v27 = vpop.f32.mrb[21].mxu0  ;;  %v24021_v47 = vpack.c.bf16 %v239_v62, %v238_v12  ;;  %v27331_v12 = vld [vmem:[#allocation10_spill] sm:$0xff]  ;;  %v27332_v62 = vld [vmem:[#allocation12_spill] sm:$0xff] }
 0xa10   :  { %v2480_v13 = vpop.f32.mrb[20].mxu1 }
 0xa11   :  { %v2503_v16 = vsel %vm1917_vm9, %v2502_v59, %v2501_v8  ;;  %v2504_v38 = vrot.slane %v2480_v13, 1  ;;  %v15991_v53 = vpop.f32.mrb[21].mxu1  ;;  %27324 = vst [vmem:[#allocation46_spill] sm:$0xff] %v24021_v47  ;;  %v27327_v8 = vld [vmem:[#allocation14_spill] sm:$0xff]  ;;  %v27330_v59 = vld [vmem:[#allocation19_spill] sm:$0xff] }
 0xa13   :  { %v2505_v2 = vsel %vm1920_vm10, %v2504_v38, %v2503_v16 }
 0xa14   :  { %16001 = vmatmul.mubr.msk.f32.vlgmr.msra.gmra.mrb[22].mxu0 %vm292_vm1, %v2505_v2  ;;  %v12742_v2 = vld [vmem:[%s27039_s0 + $0x8] sm:$0xff] }
 0xa15   :  { %19763 = vmatpush3.bf16.msra.mxu0 %v24010_v15  ;;  %16011 = vmatprep.mubr.msk.f32.mxu0 %vm22637_vm0, %v27284_v3 }
 0xa16   :  { %19764 = vmatprep.subr.bf16.mxu0 %v27285_v51 }
 0xa19   :  { %19766 = vmatpush3.bf16.msra.mxu0 %v24021_v47 }
 0xa1a   :  { %19779 = vmatprep.subr.bf16.mxu0 %v27285_v51 }
 0xa1c   :  { %16012 = vmatmul.mubr.msk.f32.vlgmr.msra.gmra.mrb[22].mxu0 %vm292_vm1, %v27325_v50 }
 0xa1d   :  { %19781 = vmatpush3.bf16.msra.mxu0 %v27326_v5  ;;  %16044 = vmatprep.mubr.msk.f32.mxu0 %vm22637_vm0, %v27284_v3 }
 0xa1e   :  { %19782 = vmatprep.subr.bf16.mxu0 %v27285_v51 }
 0xa21   :  { %19784 = vmatpush3.bf16.msra.mxu0 %v27327_v8 }
 0xa22   :  { %19791 = vmatprep.subr.bf16.mxu0 %v27285_v51 }
 0xa24   :  { %16045 = vmatmul.mubr.msk.f32.vlgmr.msra.gmra.mrb[24].mxu0 %vm292_vm1, %v27328_v63  ;;  %v27333_v63 = vld [vmem:[#allocation16_spill] sm:$0xff] }
 0xa25   :  { %19793 = vmatpush3.bf16.msra.mxu0 %v27329_v4  ;;  %16066 = vmatprep.mubr.msk.f32.mxu0 %vm22637_vm0, %v27284_v3 }
 0xa26   :  { %19794 = vmatprep.subr.bf16.mxu0 %v27285_v51 }
 0xa29   :  { %19796 = vmatpush3.bf16.msra.mxu0 %v27330_v59 }
 0xa2a   :  { %19803 = vmatprep.subr.bf16.mxu0 %v27285_v51 }
 0xaef   :  { %v2644_v27 = vpop.f32.mrb[22].mxu0 }
 0xaf0   :  { %22326 = vtanh.f32 %v2644_v27  ;;  %v16013_v13 = vpop.f32.mrb[23].mxu0  ;;  %v27334_v27 = vld [vmem:[#allocation18_spill] sm:$0xff] }
 0xaf1   :  { %v27335_v13 = vld [vmem:[#allocation22_spill] sm:$0xff] }
 0xaf7   :  { %v2864_v16 = vpop.f32.mrb[24].mxu0 }
 0xaf8   :  { %v16046_v38 = vpop.f32.mrb[25].mxu0 }
 0xaf9   :  { %v27336_v38 = vld [vmem:[#allocation23_spill] sm:$0xff] }
 0xafa   :  { %v22327_v53 = vpop.eup %22326 }
 0xafb   :  { %2649 = vst.msk [vmem:[#allocation2] sm:$0xff] %vm292_vm1, %v22327_v53  ;;  %16023 = vmatmul.mubr.msk.f32.vlgmr.msra.gmra.mrb[22].mxu1 %vm292_vm1, %v22327_v53 }
 0xafc   :  { %19775 = vmatpush3.bf16.msra.mxu1 %v27331_v12  ;;  %16033 = vmatprep.mubr.msk.f32.mxu1 %vm22637_vm0, %v27284_v3 }
 0xafd   :  { %19776 = vmatprep.subr.bf16.mxu1 %v27285_v51 }
 0xb00   :  { %19778 = vmatpush3.bf16.msra.mxu1 %v27332_v62 }
 0xb01   :  { %19785 = vmatprep.subr.bf16.mxu1 %v27285_v51 }
 0xb03   :  { %16034 = vmatmul.mubr.msk.f32.vlgmr.msra.gmra.mrb[24].mxu1 %vm292_vm1, %v12742_v2 }
 0xb04   :  { %19787 = vmatpush3.bf16.msra.mxu1 %v27333_v63  ;;  %16055 = vmatprep.mubr.msk.f32.mxu1 %vm22637_vm0, %v27284_v3 }
 0xb05   :  { %19788 = vmatprep.subr.bf16.mxu1 %v27285_v51 }
 0xb08   :  { %19790 = vmatpush3.bf16.msra.mxu1 %v27334_v27 }
 0xb09   :  { %19797 = vmatprep.subr.bf16.mxu1 %v27285_v51 }
 0xb0b   :  { %16056 = vmatmul.mubr.msk.f32.vlgmr.msra.gmra.mrb[26].mxu1 %vm292_vm1, %v27325_v50  ;;  %v22578_v50 = vld [vmem:[%s27046_s7] ss:$0 sm:$0xff] }
 0xb0c   :  { %19799 = vmatpush3.bf16.msra.mxu1 %v27335_v13  ;;  %16077 = vmatprep.mubr.msk.f32.mxu1 %vm22637_vm0, %v27284_v3 }
 0xb0d   :  { %19800 = vmatprep.subr.bf16.mxu1 %v27285_v51 }
 0xb10   :  { %19802 = vmatpush3.bf16.msra.mxu1 %v27336_v38 }
 0xb11   :  { %19835 = vmatprep.subr.bf16.mxu1 %v27285_v51 }
 0xbce   :  { %v2721_v53 = vpop.f32.mrb[22].mxu1 }
 0xbcf   :  { %v16024_v2 = vpop.f32.mrb[23].mxu1 }
 0xbd6   :  { %v2794_v63 = vpop.f32.mrb[24].mxu1 }
 0xbd7   :  { %v2795_v27 = vadd.f32 %v2794_v63, %v2721_v53  ;;  %v16035_v62 = vpop.f32.mrb[25].mxu1 }
 0xbd9   :  { %v2868_v12 = vadd.f32 %v2864_v16, %v2795_v27  ;;  %v27337_v16 = vld [vmem:[#allocation15_spill] sm:$0xff] }
 0xbdb   :  { %v2869_v13 = vadd.f32 %v22578_v50, %v2868_v12  ;;  %v27342_v50 = vld [vmem:[#allocation30_spill] sm:$0xff] }
 0xbdd   :  { %22328 = vtanh.f32 %v2869_v13  ;;  %v12746_v38 = vmul.f32 -1.442695, %v2869_v13 }
 0xbde   :  { %v2960_v59 = vpop.f32.mrb[26].mxu1 }
 0xbdf   :  { %v16057_v4 = vpop.f32.mrb[27].mxu1  ;;  %22330 = vpow2.f32 %v12746_v38  ;;  %v27341_v38 = vld [vmem:[#allocation29_spill] sm:$0xff] }
 0xbe7   :  { %v22329_v8 = vpop.eup %22328 }
 0xbe8   :  { %2879 = vrot.lane.b32.xlu1 %v22329_v8, %s22639_s21 }
 0xbe9   :  { %v22331_v5 = vpop.eup %22330 }
 0xbea   :  { %v2873_v47 = vadd.f32 1.0, %v22331_v5  ;;  %v27340_v5 = vld [vmem:[#allocation28_spill] sm:$0xff] }
 0xbec   :  { %22332 = vrcp.f32 %v2873_v47 }
 0xbf6   :  { %v22333_v2 = vpop.eup %22332 }
 0xbf7   :  { %v2877_v27 = vmul.f32 %v22333_v2, %v27337_v16 }
 0xc5a   :  { %v2880_v63 = vpop.permute.xlu1 %2879 }
 0xc5b   :  { %v2882_v62 = vmul.f32 %v22333_v2, %v2880_v63  ;;  %v27344_v63 = vld [vmem:[#allocation32_spill] sm:$0xff] }
 0xc5d   :  { %2884 = vrot.lane.b32.xlu0 %v2882_v62, %s22640_s24 }
 0xccf   :  { %v2885_v53 = vpop.permute.xlu0 %2884 }
 0xcd0   :  { %v24076_v12 = vadd.f32 %v2885_v53, %v2877_v27  ;;  %v22579_v53 = vld [vmem:[%s27046_s7 + $0x1] ss:$0 sm:$0xff] }
 0xcd2   :  { %27338 = vst [vmem:[#allocation47_spill] sm:$0xff] %v24076_v12  ;;  %22334 = vtanh.f32 %v24076_v12 }
 0xcdc   :  { %v22335_v4 = vpop.eup %22334 }
 0xcdd   :  { %2890 = vrot.lane.b32.xlu1 %v22335_v4, %s22639_s21 }
 0xd4f   :  { %v2891_v8 = vpop.permute.xlu1 %2890 }
 0xd50   :  { %v2893_v13 = vmul.f32 %v22333_v2, %v2891_v8  ;;  %v27343_v2 = vld [vmem:[#allocation31_spill] sm:$0xff] }
 0xd52   :  { %2965 = vrot.lane.b32.xlu1 %v2893_v13, %s22640_s24 }
 0xdc4   :  { %v24081_v47 = vpop.permute.xlu1 %2965 }
 0xdc5   :  { %27339 = vst [vmem:[#allocation48_spill] sm:$0xff] %v24081_v47  ;;  %16067 = vmatmul.mubr.msk.f32.vlgmr.msra.gmra.mrb[26].mxu0 %vm292_vm1, %v24081_v47 }
 0xdc6   :  { %19806 = vmatpush3.bf16.xpose.msk.msra.mxu0 %vm22904_vm2, %v22908_v34  ;;  %16112 = vmatprep.mubr.msk.f32.mxu0 %vm22637_vm0, %v27284_v3 }
 0xdc7   :  { %19807 = vmatprep.subr.bf16.mxu0 %v27285_v51 }
 0xdce   :  { %19810 = vmatpush3.bf16.xpose.msk.msra.mxu0 %vm22904_vm2, %v22920_v37 }
 0xdcf   :  { %19811 = vmatprep.subr.bf16.mxu0 %v27285_v51 }
 0xdd6   :  { %19814 = vmatpush3.bf16.xpose.msk.msra.mxu0 %vm22904_vm2, %v22933_v42 }
 0xdd7   :  { %19815 = vmatprep.subr.bf16.mxu0 %v27285_v51 }
 0xdde   :  { %19818 = vmatpush3.bf16.xpose.msk.msra.mxu0 %vm22904_vm2, %v27340_v5 }
 0xddf   :  { %19819 = vmatprep.subr.bf16.mxu0 %v27285_v51 }
 0xde6   :  { %19822 = vmatpush3.bf16.xpose.msk.msra.mxu0 %vm22904_vm2, %v27341_v38 }
 0xde7   :  { %19823 = vmatprep.subr.bf16.mxu0 %v27285_v51 }
 0xdee   :  { %19826 = vmatpush3.bf16.xpose.msk.msra.mxu0 %vm22904_vm2, %v27342_v50 }
 0xdef   :  { %19827 = vmatprep.subr.bf16.mxu0 %v27285_v51 }
 0xdf6   :  { %19830 = vmatpush3.bf16.xpose.msk.msra.mxu0 %vm22904_vm2, %v27343_v2 }
 0xdf7   :  { %19831 = vmatprep.subr.bf16.mxu0 %v27285_v51 }
 0xdfe   :  { %19834 = vmatpush3.bf16.xpose.msk.msra.mxu0 %vm22904_vm2, %v27344_v63 }
 0xdff   :  { %19867 = vmatprep.subr.bf16.mxu0 %v27285_v51 }
 0xe98   :  { %v3035_v62 = vpop.f32.mrb[26].mxu0 }
 0xe99   :  { %v3036_v16 = vadd.f32 %v3035_v62, %v2960_v59  ;;  %v16068_v27 = vpop.f32.mrb[27].mxu0  ;;  %v27345_v59 = vld [vmem:[#allocation21_spill] sm:$0xff] }
 0xe9b   :  { %v3039_v4 = vadd.f32 %v22579_v53, %v3036_v16 }
 0xe9d   :  { %22336 = vtanh.f32 %v3039_v4  ;;  %v12749_v13 = vmul.f32 -1.442695, %v3039_v4 }
 0xe9f   :  { %22338 = vpow2.f32 %v12749_v13  ;;  %v27353_v13 = vld [vmem:[#allocation39_spill] sm:$0xff] }
 0xea7   :  { %v22337_v8 = vpop.eup %22336 }
 0xea8   :  { %3049 = vrot.lane.b32.xlu0 %v22337_v8, %s22639_s21  ;;  %v27352_v8 = vld [vmem:[#allocation38_spill] sm:$0xff] }
 0xea9   :  { %v22339_v12 = vpop.eup %22338 }
 0xeaa   :  { %v3043_v47 = vadd.f32 1.0, %v22339_v12 }
 0xeac   :  { %22340 = vrcp.f32 %v3043_v47  ;;  %v27348_v47 = vld [vmem:[#allocation33_spill] sm:$0xff] }
 0xeb6   :  { %v22341_v15 = vpop.eup %22340 }
 0xeb7   :  { %v3047_v62 = vmul.f32 %v22341_v15, %v27345_v59  ;;  %v27354_v59 = vld [vmem:[#allocation40_spill] sm:$0xff] }
 0xf1a   :  { %v3050_v63 = vpop.permute.xlu0 %3049 }
 0xf1b   :  { %v3052_v2 = vmul.f32 %v22341_v15, %v3050_v63  ;;  %v27351_v63 = vld [vmem:[#allocation37_spill] sm:$0xff] }
 0xf1d   :  { %3054 = vrot.lane.b32.xlu1 %v3052_v2, %s22640_s24  ;;  %v27349_v2 = vld [vmem:[#allocation35_spill] sm:$0xff] }
 0xf8f   :  { %v3055_v27 = vpop.permute.xlu1 %3054 }
 0xf90   :  { %v24125_v50 = vadd.f32 %v3055_v27, %v3047_v62  ;;  %v27355_v62 = vld [vmem:[#allocation41_spill] sm:$0xff] }
 0xf92   :  { %27346 = vst [vmem:[#allocation49_spill] sm:$0xff] %v24125_v50  ;;  %22342 = vtanh.f32 %v24125_v50 }
 0xf9c   :  { %v22343_v16 = vpop.eup %22342 }
 0xf9d   :  { %3060 = vrot.lane.b32.xlu0 %v22343_v16, %s22639_s21  ;;  %v27356_v16 = vld [vmem:[#allocation42_spill] sm:$0xff] }
0x100f   :  { %v3061_v53 = vpop.permute.xlu0 %3060 }
0x1010   :  { %v3063_v4 = vmul.f32 %v22341_v15, %v3061_v53  ;;  %v27350_v15 = vld [vmem:[#allocation36_spill] sm:$0xff] }
0x1012   :  { %3065 = vrot.lane.b32.xlu1 %v3063_v4, %s22640_s24 }
0x1084   :  { %v24130_v12 = vpop.permute.xlu1 %3065 }
0x1085   :  { %27347 = vst [vmem:[#allocation50_spill] sm:$0xff] %v24130_v12  ;;  %16078 = vmatmul.mubr.msk.f32.vlgmr.msra.gmra.mrb[28].mxu1 %vm292_vm1, %v24130_v12 }
0x1086   :  { %19838 = vmatpush3.bf16.xpose.msk.msra.mxu1 %vm22904_vm2, %v27348_v47  ;;  %16147 = vmatprep.mubr.msk.f32.mxu1 %vm22637_vm0, %v27284_v3 }
0x1087   :  { %19839 = vmatprep.subr.bf16.mxu1 %v27285_v51 }
0x108e   :  { %19842 = vmatpush3.bf16.xpose.msk.msra.mxu1 %vm22904_vm2, %v27349_v2 }
0x108f   :  { %19843 = vmatprep.subr.bf16.mxu1 %v27285_v51 }
0x1096   :  { %19846 = vmatpush3.bf16.xpose.msk.msra.mxu1 %vm22904_vm2, %v27350_v15 }
0x1097   :  { %19847 = vmatprep.subr.bf16.mxu1 %v27285_v51 }
0x109e   :  { %19850 = vmatpush3.bf16.xpose.msk.msra.mxu1 %vm22904_vm2, %v27351_v63 }
0x109f   :  { %19851 = vmatprep.subr.bf16.mxu1 %v27285_v51 }
0x10a6   :  { %19854 = vmatpush3.bf16.xpose.msk.msra.mxu1 %vm22904_vm2, %v27352_v8 }
0x10a7   :  { %19855 = vmatprep.subr.bf16.mxu1 %v27285_v51 }
0x10ae   :  { %19858 = vmatpush3.bf16.xpose.msk.msra.mxu1 %vm22904_vm2, %v27353_v13 }
0x10af   :  { %19859 = vmatprep.subr.bf16.mxu1 %v27285_v51 }
0x10b6   :  { %19862 = vmatpush3.bf16.xpose.msk.msra.mxu1 %vm22904_vm2, %v27354_v59 }
0x10b7   :  { %19863 = vmatprep.subr.bf16.mxu1 %v27285_v51 }
0x10be   :  { %19866 = vmatpush3.bf16.xpose.msk.msra.mxu1 %vm22904_vm2, %v27355_v62 }
0x10bf   :  { %19899 = vmatprep.subr.bf16.mxu1 %v27285_v51 }
0x1158   :  { %v24168_v27 = vpop.f32.mrb[28].mxu1 }
0x1159   :  { %v3147_v53 = vrot.slane %v24168_v27, %v27356_v16  ;;  %v16079_v4 = vpop.f32.mrb[29].mxu1 }
0x115b   :  { %v3155_v50 = vcombine.high %v3147_v53, %v3147_v53  ;;  %v3163_v12 = vrot.slane %v3147_v53, %v27356_v16 }
0x115d   :  { %v3177_v13 = vrot.slane %v3155_v50, %v27356_v16  ;;  %16113 = vmatmul.mubr.msk.f32.vlgmr.msra.gmra.mrb[28].mxu0 %vm292_vm1, %v3163_v12  ;;  %v3185_v50 = vcombine.high %v3163_v12, %v3163_v12  ;;  %v3140_v12 = vcombine.high %v24168_v27, %v24168_v27 }
0x115e   :  { %19870 = vmatpush3.bf16.xpose.msk.msra.mxu0 %vm22904_vm2, %v23119_v0  ;;  %16182 = vmatprep.mubr.msk.f32.mxu0 %vm22637_vm0, %v27284_v3 }
0x115f   :  { %16148 = vmatmul.mubr.msk.f32.vlgmr.msra.gmra.mrb[30].mxu1 %vm292_vm1, %v3177_v13  ;;  %19871 = vmatprep.subr.bf16.mxu0 %v27285_v51  ;;  %v3187_v53 = vcombine.high %v3177_v13, %v3177_v13  ;;  %v3154_v13 = vrot.slane %v3140_v12, %v27356_v16  ;;  %v27358_v12 = vld [vmem:[#allocation52_spill] sm:$0xff] }
0x1160   :  { %19902 = vmatpush3.bf16.xpose.msk.msra.mxu1 %vm22904_vm2, %v23124_v7  ;;  %16217 = vmatprep.mubr.msk.f32.mxu1 %vm22637_vm0, %v27284_v3 }
0x1161   :  { %19903 = vmatprep.subr.bf16.mxu1 %v27285_v51  ;;  %v3156_v4 = vcombine.high %v3154_v13, %v3154_v13 }
0x1163   :  { %v3184_v27 = vrot.slane %v3156_v4, %v27356_v16  ;;  %v27360_v4 = vld [vmem:[#allocation54_spill] sm:$0xff] }
0x1166   :  { %19874 = vmatpush3.bf16.xpose.msk.msra.mxu0 %vm22904_vm2, %v23157_v22 }
0x1167   :  { %19875 = vmatprep.subr.bf16.mxu0 %v27285_v51 }
0x1168   :  { %19906 = vmatpush3.bf16.xpose.msk.msra.mxu1 %vm22904_vm2, %v23159_v25 }
0x1169   :  { %19907 = vmatprep.subr.bf16.mxu1 %v27285_v51 }
0x116e   :  { %19878 = vmatpush3.bf16.xpose.msk.msra.mxu0 %vm22904_vm2, %v23181_v36 }
0x116f   :  { %19879 = vmatprep.subr.bf16.mxu0 %v27285_v51 }
0x1170   :  { %19910 = vmatpush3.bf16.xpose.msk.msra.mxu1 %vm22904_vm2, %v23183_v39 }
0x1171   :  { %19911 = vmatprep.subr.bf16.mxu1 %v27285_v51 }
0x1176   :  { %19882 = vmatpush3.bf16.xpose.msk.msra.mxu0 %vm22904_vm2, %v23205_v49 }
0x1177   :  { %19883 = vmatprep.subr.bf16.mxu0 %v27285_v51 }
0x1178   :  { %19914 = vmatpush3.bf16.xpose.msk.msra.mxu1 %vm22904_vm2, %v23207_v52 }
0x1179   :  { %19915 = vmatprep.subr.bf16.mxu1 %v27285_v51 }
0x117e   :  { %19886 = vmatpush3.bf16.xpose.msk.msra.mxu0 %vm22904_vm2, %v23229_v1 }
0x117f   :  { %19887 = vmatprep.subr.bf16.mxu0 %v27285_v51 }
0x1180   :  { %19918 = vmatpush3.bf16.xpose.msk.msra.mxu1 %vm22904_vm2, %v23231_v14 }
0x1181   :  { %19919 = vmatprep.subr.bf16.mxu1 %v27285_v51 }
0x1186   :  { %19890 = vmatpush3.bf16.xpose.msk.msra.mxu0 %vm22904_vm2, %v23253_v30 }
0x1187   :  { %19891 = vmatprep.subr.bf16.mxu0 %v27285_v51 }
0x1188   :  { %19922 = vmatpush3.bf16.xpose.msk.msra.mxu1 %vm22904_vm2, %v23255_v31 }
0x1189   :  { %19923 = vmatprep.subr.bf16.mxu1 %v27285_v51 }
0x118e   :  { %19894 = vmatpush3.bf16.xpose.msk.msra.mxu0 %vm22904_vm2, %v23277_v45 }
0x118f   :  { %19895 = vmatprep.subr.bf16.mxu0 %v27285_v51 }
0x1190   :  { %19926 = vmatpush3.bf16.xpose.msk.msra.mxu1 %vm22904_vm2, %v23279_v57 }
0x1191   :  { %19927 = vmatprep.subr.bf16.mxu1 %v27285_v51 }
0x1196   :  { %19898 = vmatpush3.bf16.xpose.msk.msra.mxu0 %vm22904_vm2, %v23301_v18 }
0x1197   :  { %19931 = vmatprep.subr.bf16.mxu0 %v27285_v51 }
0x1198   :  { %19930 = vmatpush3.bf16.xpose.msk.msra.mxu1 %vm22904_vm2, %v23303_v21 }
0x1199   :  { %19963 = vmatprep.subr.bf16.mxu1 %v27285_v51 }
0x119d   :  { %16183 = vmatmul.mubr.msk.f32.vlgmr.msra.gmra.mrb[30].mxu0 %vm292_vm1, %v3185_v50  ;;  %v3170_v50 = vrot.slane %v3154_v13, %v27356_v16  ;;  %v27359_v13 = vld [vmem:[#allocation53_spill] sm:$0xff]  ;;  %v27361_v16 = vld [vmem:[#allocation55_spill] sm:$0xff] }
0x119e   :  { %19934 = vmatpush3.bf16.xpose.msk.msra.mxu0 %vm22904_vm2, %v23325_v44  ;;  %16252 = vmatprep.mubr.msk.f32.mxu0 %vm22637_vm0, %v27284_v3 }
0x119f   :  { %16218 = vmatmul.mubr.msk.f32.vlgmr.msra.gmra.mrb[32].mxu1 %vm292_vm1, %v3187_v53  ;;  %19935 = vmatprep.subr.bf16.mxu0 %v27285_v51  ;;  %v27357_v53 = vld [vmem:[#allocation51_spill] sm:$0xff] }
0x11a0   :  { %19966 = vmatpush3.bf16.xpose.msk.msra.mxu1 %vm22904_vm2, %v23329_v60  ;;  %16287 = vmatprep.mubr.msk.f32.mxu1 %vm22637_vm0, %v27284_v3 }
0x11a1   :  { %19967 = vmatprep.subr.bf16.mxu1 %v27285_v51 }
0x11a6   :  { %19938 = vmatpush3.bf16.xpose.msk.msra.mxu0 %vm22904_vm2, %v23359_v35 }
0x11a7   :  { %19939 = vmatprep.subr.bf16.mxu0 %v27285_v51 }
0x11a8   :  { %19970 = vmatpush3.bf16.xpose.msk.msra.mxu1 %vm22904_vm2, %v23361_v40 }
0x11a9   :  { %19971 = vmatprep.subr.bf16.mxu1 %v27285_v51 }
0x11ae   :  { %19942 = vmatpush3.bf16.xpose.msk.msra.mxu0 %vm22904_vm2, %v23383_v10 }
0x11af   :  { %19943 = vmatprep.subr.bf16.mxu0 %v27285_v51 }
0x11b0   :  { %19974 = vmatpush3.bf16.xpose.msk.msra.mxu1 %vm22904_vm2, %v23385_v17 }
0x11b1   :  { %19975 = vmatprep.subr.bf16.mxu1 %v27285_v51 }
0x11b6   :  { %19946 = vmatpush3.bf16.xpose.msk.msra.mxu0 %vm22904_vm2, %v23407_v61 }
0x11b7   :  { %19947 = vmatprep.subr.bf16.mxu0 %v27285_v51 }
0x11b8   :  { %19978 = vmatpush3.bf16.xpose.msk.msra.mxu1 %vm22904_vm2, %v23409_v6 }
0x11b9   :  { %19979 = vmatprep.subr.bf16.mxu1 %v27285_v51 }
0x11be   :  { %19950 = vmatpush3.bf16.xpose.msk.msra.mxu0 %vm22904_vm2, %v23431_v41 }
0x11bf   :  { %19951 = vmatprep.subr.bf16.mxu0 %v27285_v51 }
0x11c0   :  { %19982 = vmatpush3.bf16.xpose.msk.msra.mxu1 %vm22904_vm2, %v23433_v58 }
0x11c1   :  { %19983 = vmatprep.subr.bf16.mxu1 %v27285_v51 }
0x11c6   :  { %19954 = vmatpush3.bf16.xpose.msk.msra.mxu0 %vm22904_vm2, %v23455_v11 }
0x11c7   :  { %19955 = vmatprep.subr.bf16.mxu0 %v27285_v51 }
0x11c8   :  { %19986 = vmatpush3.bf16.xpose.msk.msra.mxu1 %vm22904_vm2, %v23457_v26 }
0x11c9   :  { %19987 = vmatprep.subr.bf16.mxu1 %v27285_v51 }
0x11ce   :  { %19958 = vmatpush3.bf16.xpose.msk.msra.mxu0 %vm22904_vm2, %v23479_v43 }
0x11cf   :  { %19959 = vmatprep.subr.bf16.mxu0 %v27285_v51 }
0x11d0   :  { %19990 = vmatpush3.bf16.xpose.msk.msra.mxu1 %vm22904_vm2, %v23481_v23 }
0x11d1   :  { %19991 = vmatprep.subr.bf16.mxu1 %v27285_v51 }
0x11d6   :  { %19962 = vmatpush3.bf16.xpose.msk.msra.mxu0 %vm22904_vm2, %v23505_v29 }
0x11d7   :  { %19995 = vmatprep.subr.bf16.mxu0 %v27285_v51 }
0x11d8   :  { %19994 = vmatpush3.bf16.xpose.msk.msra.mxu1 %vm22904_vm2, %v23507_v55 }
0x11d9   :  { %20027 = vmatprep.subr.bf16.mxu1 %v27285_v51 }
0x11dd   :  { %16253 = vmatmul.mubr.msk.f32.vlgmr.msra.gmra.mrb[32].mxu0 %vm292_vm1, %v3170_v50 }
0x11de   :  { %19998 = vmatpush3.bf16.xpose.msk.msra.mxu0 %vm22904_vm2, %v23530_v54  ;;  %16322 = vmatprep.mubr.msk.f32.mxu0 %vm22637_vm0, %v27284_v3 }
0x11df   :  { %16288 = vmatmul.mubr.msk.f32.vlgmr.msra.gmra.mrb[34].mxu1 %vm292_vm1, %v3184_v27  ;;  %19999 = vmatprep.subr.bf16.mxu0 %v27285_v51 }
0x11e0   :  { %20030 = vmatpush3.bf16.xpose.msk.msra.mxu1 %vm22904_vm2, %v23535_v20  ;;  %16357 = vmatprep.mubr.msk.f32.mxu1 %vm22637_vm0, %v27284_v3 }
0x11e1   :  { %20031 = vmatprep.subr.bf16.mxu1 %v27285_v51 }
0x11e6   :  { %20002 = vmatpush3.bf16.xpose.msk.msra.mxu0 %vm22904_vm2, %v27308_v24 }
0x11e7   :  { %20003 = vmatprep.subr.bf16.mxu0 %v27285_v51 }
0x11e8   :  { %20034 = vmatpush3.bf16.xpose.msk.msra.mxu1 %vm22904_vm2, %v27309_v19 }
0x11e9   :  { %20035 = vmatprep.subr.bf16.mxu1 %v27285_v51 }
0x11ee   :  { %20006 = vmatpush3.bf16.xpose.msk.msra.mxu0 %vm22904_vm2, %v27310_v28 }
0x11ef   :  { %20007 = vmatprep.subr.bf16.mxu0 %v27285_v51 }
0x11f0   :  { %20038 = vmatpush3.bf16.xpose.msk.msra.mxu1 %vm22904_vm2, %v27311_v46 }
0x11f1   :  { %20039 = vmatprep.subr.bf16.mxu1 %v27285_v51 }
0x11f6   :  { %20010 = vmatpush3.bf16.xpose.msk.msra.mxu0 %vm22904_vm2, %v27312_v9 }
0x11f7   :  { %20011 = vmatprep.subr.bf16.mxu0 %v27285_v51 }
0x11f8   :  { %20042 = vmatpush3.bf16.xpose.msk.msra.mxu1 %vm22904_vm2, %v27313_v32 }
0x11f9   :  { %20043 = vmatprep.subr.bf16.mxu1 %v27285_v51 }
0x11fe   :  { %20014 = vmatpush3.bf16.xpose.msk.msra.mxu0 %vm22904_vm2, %v27314_v56 }
0x11ff   :  { %20015 = vmatprep.subr.bf16.mxu0 %v27285_v51 }
0x1200   :  { %20046 = vmatpush3.bf16.xpose.msk.msra.mxu1 %vm22904_vm2, %v27315_v48 }
0x1201   :  { %20047 = vmatprep.subr.bf16.mxu1 %v27285_v51 }
0x1206   :  { %20018 = vmatpush3.bf16.xpose.msk.msra.mxu0 %vm22904_vm2, %v27357_v53  ;;  %v3188_v53 = vcombine.high %v3184_v27, %v3184_v27  ;;  %v27363_v27 = vld [vmem:[#allocation57_spill] sm:$0xff] }
0x1207   :  { %20019 = vmatprep.subr.bf16.mxu0 %v27285_v51 }
0x1208   :  { %20050 = vmatpush3.bf16.xpose.msk.msra.mxu1 %vm22904_vm2, %v27358_v12  ;;  %v27362_v12 = vld [vmem:[#allocation56_spill] sm:$0xff] }
0x1209   :  { %20051 = vmatprep.subr.bf16.mxu1 %v27285_v51 }
0x120e   :  { %20022 = vmatpush3.bf16.xpose.msk.msra.mxu0 %vm22904_vm2, %v27359_v13  ;;  %v3186_v13 = vcombine.high %v3170_v50, %v3170_v50 }
0x120f   :  { %20023 = vmatprep.subr.bf16.mxu0 %v27285_v51 }
0x1210   :  { %20054 = vmatpush3.bf16.xpose.msk.msra.mxu1 %vm22904_vm2, %v27360_v4 }
0x1211   :  { %20055 = vmatprep.subr.bf16.mxu1 %v27285_v51 }
0x1216   :  { %20026 = vmatpush3.bf16.xpose.msk.msra.mxu0 %vm22904_vm2, %v27361_v16 }
0x1217   :  { %20059 = vmatprep.subr.bf16.mxu0 %v27285_v51 }
0x1218   :  { %20058 = vmatpush3.bf16.xpose.msk.msra.mxu1 %vm22904_vm2, %v27362_v12  ;;  %v27372_v12 = vld [vmem:[#allocation62_spill] sm:$0xff] }
0x1219   :  { %20083 = vmatprep.subr.bf16.mxu1 %v27285_v51 }
0x121d   :  { %16323 = vmatmul.mubr.msk.f32.vlgmr.msra.gmra.mrb[34].mxu0 %vm292_vm1, %v3186_v13 }
0x121e   :  { %20061 = vmatpush3.bf16.msra.mxu0 %v22908_v34  ;;  %16392 = vmatprep.mubr.msk.f32.mxu0 %vm22637_vm0, %v27284_v3 }
0x121f   :  { %16358 = vmatmul.mubr.msk.f32.vlgmr.msra.gmra.mrb[36].mxu1 %vm292_vm1, %v3188_v53  ;;  %20062 = vmatprep.subr.bf16.mxu0 %v27285_v51 }
0x1220   :  { %20085 = vmatpush3.bf16.msra.mxu1 %v27348_v47  ;;  %16427 = vmatprep.mubr.msk.f32.mxu1 %vm22637_vm0, %v27284_v3  ;;  %v27365_v47 = vld [vmem:[#allocation58_spill] sm:$0xff] }
0x1221   :  { %20086 = vmatprep.subr.bf16.mxu1 %v27285_v51 }
0x1222   :  { %20064 = vmatpush3.bf16.msra.mxu0 %v22920_v37  ;;  %v27371_v37 = vld [vmem:[#allocation61_spill] sm:$0xff] }
0x1223   :  { %20065 = vmatprep.subr.bf16.mxu0 %v27285_v51 }
0x1224   :  { %20088 = vmatpush3.bf16.msra.mxu1 %v27349_v2  ;;  %v27364_v2 = vld [vmem:[#allocation30_spill] sm:$0xff] }
0x1225   :  { %20089 = vmatprep.subr.bf16.mxu1 %v27285_v51 }
0x1226   :  { %20067 = vmatpush3.bf16.msra.mxu0 %v22933_v42 }
0x1227   :  { %20068 = vmatprep.subr.bf16.mxu0 %v27285_v51 }
0x1228   :  { %20091 = vmatpush3.bf16.msra.mxu1 %v27350_v15 }
0x1229   :  { %20092 = vmatprep.subr.bf16.mxu1 %v27285_v51 }
0x122a   :  { %20070 = vmatpush3.bf16.msra.mxu0 %v27340_v5 }
0x122b   :  { %20071 = vmatprep.subr.bf16.mxu0 %v27285_v51 }
0x122c   :  { %20094 = vmatpush3.bf16.msra.mxu1 %v27351_v63 }
0x122d   :  { %20095 = vmatprep.subr.bf16.mxu1 %v27285_v51 }
0x122e   :  { %20073 = vmatpush3.bf16.msra.mxu0 %v27341_v38  ;;  %v27366_v38 = vld [vmem:[#allocation39_spill] sm:$0xff] }
0x122f   :  { %20074 = vmatprep.subr.bf16.mxu0 %v27285_v51 }
0x1230   :  { %v3257_v50 = vpop.f32.mrb[28].mxu0  ;;  %20097 = vmatpush3.bf16.msra.mxu1 %v27352_v8 }
0x1231   :  { %v3258_v53 = vadd.f32 %v3257_v50, %v27363_v27  ;;  %v16114_v13 = vpop.f32.mrb[29].mxu0  ;;  %20098 = vmatprep.subr.bf16.mxu1 %v27285_v51  ;;  %v27367_v50 = vld [vmem:[#allocation31_spill] sm:$0xff]  ;;  %v27370_v27 = vld [vmem:[#allocation60_spill] sm:$0xff] }
0x1232   :  { %v3329_v15 = vpop.f32.mrb[30].mxu1  ;;  %20076 = vmatpush3.bf16.msra.mxu0 %v27364_v2 }
0x1233   :  { %v3330_v5 = vadd.f32 %v3329_v15, %v27365_v47  ;;  %v16149_v63 = vpop.f32.mrb[31].mxu1  ;;  %v3765_v42 = vsel %vm1804_vm3, %v3258_v53, -inf  ;;  %20077 = vmatprep.subr.bf16.mxu0 %v27285_v51  ;;  %v27368_v15 = vld [vmem:[#allocation32_spill] sm:$0xff] }
0x1234   :  { %3766 = vmax.xlane.f32.xlu0 %v3765_v42  ;;  %20100 = vmatpush3.bf16.msra.mxu1 %v27366_v38  ;;  %v27369_v63 = vld [vmem:[#allocation59_spill] sm:$0xff] }
0x1235   :  { %v3768_v8 = vsel %vm1804_vm3, %v3330_v5, -inf  ;;  %20101 = vmatprep.subr.bf16.mxu1 %v27285_v51 }
0x1236   :  { %3769 = vmax.xlane.f32.xlu1 %v3768_v8  ;;  %20079 = vmatpush3.bf16.msra.mxu0 %v27367_v50 }
0x1237   :  { %20080 = vmatprep.subr.bf16.mxu0 %v27285_v51 }
0x1238   :  { %20103 = vmatpush3.bf16.msra.mxu1 %v27354_v59 }
0x1239   :  { %20104 = vmatprep.subr.bf16.mxu1 %v27285_v51 }
0x123a   :  { %20082 = vmatpush3.bf16.msra.mxu0 %v27368_v15 }
0x123b   :  { %20107 = vmatprep.subr.bf16.mxu0 %v27285_v51 }
0x123c   :  { %20106 = vmatpush3.bf16.msra.mxu1 %v27355_v62 }
0x123d   :  { %20131 = vmatprep.subr.bf16.mxu1 %v27285_v51 }
0x1270   :  { %v3401_v42 = vpop.f32.mrb[30].mxu0 }
0x1271   :  { %v3402_v13 = vadd.f32 %v3401_v42, %v27369_v63  ;;  %v16184_v8 = vpop.f32.mrb[31].mxu0 }
0x1272   :  { %v3473_v47 = vpop.f32.mrb[32].mxu1 }
0x1273   :  { %v3474_v38 = vadd.f32 %v3473_v47, %v27370_v27  ;;  %v16219_v50 = vpop.f32.mrb[33].mxu1  ;;  %v3771_v59 = vsel %vm1804_vm3, %v3402_v13, -inf }
0x1274   :  { %3772 = vmax.xlane.f32.xlu0 %v3771_v59 }
0x1275   :  { %v3774_v2 = vsel %vm1804_vm3, %v3474_v38, -inf }
0x1278   :  { %3775 = vmax.xlane.f32.xlu0 %v3774_v2 }
0x12b0   :  { %v3545_v15 = vpop.f32.mrb[32].mxu0 }
0x12b1   :  { %v3546_v33 = vadd.f32 %v3545_v15, %v27371_v37  ;;  %v16254_v62 = vpop.f32.mrb[33].mxu0 }
0x12b2   :  { %v3617_v34 = vpop.f32.mrb[34].mxu1 }
0x12b3   :  { %v3618_v16 = vadd.f32 %v3617_v34, %v27372_v12  ;;  %v16289_v4 = vpop.f32.mrb[35].mxu1  ;;  %v3777_v42 = vsel %vm1804_vm3, %v3546_v33, -inf }
0x12b4   :  { %3778 = vmax.xlane.f32.xlu1 %v3777_v42  ;;  %v27373_v42 = vld [vmem:[#allocation63_spill] sm:$0xff] }
0x12b5   :  { %v3780_v47 = vsel %vm1804_vm3, %v3618_v16, -inf }
0x12b6   :  { %3781 = vmax.xlane.f32.xlu0 %v3780_v47 }
0x12c1   :  { %v3767_v50 = vpop.xlane.xlu0 %3766 }
0x12c2   :  { %v3789_v8 = vsub.f32 %v3258_v53, %v3767_v50  ;;  %v27374_v50 = vld [vmem:[#allocation64_spill] sm:$0xff] }
0x12c3   :  { %v3770_v59 = vpop.xlane.xlu1 %3769 }
0x12c4   :  { %v3797_v27 = vmul.f32 1.442695, %v3789_v8  ;;  %v3790_v63 = vsub.f32 %v3330_v5, %v3770_v59 }
0x12c6   :  { %22344 = vpow2.f32 %v3797_v27  ;;  %v3799_v2 = vmul.f32 1.442695, %v3790_v63 }
0x12c8   :  { %22346 = vpow2.f32 %v3799_v2 }
0x12d0   :  { %v22345_v15 = vpop.eup %22344 }
0x12d1   :  { %v3813_v62 = vsel %vm1804_vm3, %v22345_v15, 0.0 }
0x12d2   :  { %v22347_v37 = vpop.eup %22346  ;;  %3814 = vadd.xlane.f32.xlu1 %v3813_v62 }
0x12d3   :  { %v3816_v34 = vsel %vm1804_vm3, %v22347_v37, 0.0 }
0x12d4   :  { %3817 = vadd.xlane.f32.xlu0 %v3816_v34 }
0x12f0   :  { %v3689_v4 = vpop.f32.mrb[34].mxu0 }
0x12f1   :  { %v24442_v12 = vadd.f32 %v3689_v4, %v27373_v42  ;;  %v16324_v47 = vpop.f32.mrb[35].mxu0 }
0x12f2   :  { %v3761_v53 = vpop.f32.mrb[36].mxu1 }
0x12f3   :  { %v24445_v8 = vadd.f32 %v3761_v53, %v27374_v50  ;;  %v16359_v5 = vpop.f32.mrb[37].mxu1  ;;  %v3783_v27 = vsel %vm1804_vm3, %v24442_v12, -inf  ;;  %v27381_v50 = vld [vmem:[#allocation43_spill] sm:$0xff] }
0x12f4   :  { %3784 = vmax.xlane.f32.xlu1 %v3783_v27 }
0x12f5   :  { %v3786_v63 = vsel %vm1804_vm3, %v24445_v8, -inf }
0x12f6   :  { %3787 = vmax.xlane.f32.xlu0 %v3786_v63 }
0x1301   :  { %v3773_v59 = vpop.xlane.xlu0 %3772 }
0x1302   :  { %v3791_v2 = vsub.f32 %v3402_v13, %v3773_v59 }
0x1304   :  { %v3801_v62 = vmul.f32 1.442695, %v3791_v2 }
0x1305   :  { %v3776_v34 = vpop.xlane.xlu0 %3775 }
0x1306   :  { %22348 = vpow2.f32 %v3801_v62  ;;  %v3792_v4 = vsub.f32 %v3474_v38, %v3776_v34 }
0x1308   :  { %v3803_v47 = vmul.f32 1.442695, %v3792_v4 }
0x130a   :  { %22350 = vpow2.f32 %v3803_v47 }
0x1310   :  { %v24451_v42 = vpop.eup %22348 }
0x1311   :  { %v3819_v53 = vsel %vm1804_vm3, %v24451_v42, 0.0 }
0x1312   :  { %3820 = vadd.xlane.f32.xlu1 %v3819_v53 }
0x1314   :  { %v24455_v5 = vpop.eup %22350 }
0x1315   :  { %v3822_v27 = vsel %vm1804_vm3, %v24455_v5, 0.0 }
0x1316   :  { %3823 = vadd.xlane.f32.xlu0 %v3822_v27 }
0x1341   :  { %v3779_v63 = vpop.xlane.xlu1 %3778 }
0x1342   :  { %v3793_v13 = vsub.f32 %v3546_v33, %v3779_v63 }
0x1343   :  { %v3782_v59 = vpop.xlane.xlu0 %3781 }
0x1344   :  { %v3805_v2 = vmul.f32 1.442695, %v3793_v13  ;;  %v3794_v62 = vsub.f32 %v3618_v16, %v3782_v59 }
0x1346   :  { %22352 = vpow2.f32 %v3805_v2  ;;  %v3807_v38 = vmul.f32 1.442695, %v3794_v62 }
0x1348   :  { %22354 = vpow2.f32 %v3807_v38 }
0x1350   :  { %v24459_v34 = vpop.eup %22352 }
0x1351   :  { %v3825_v4 = vsel %vm1804_vm3, %v24459_v34, 0.0 }
0x1352   :  { %v24463_v47 = vpop.eup %22354  ;;  %3826 = vadd.xlane.f32.xlu1 %v3825_v4 }
0x1353   :  { %v3828_v53 = vsel %vm1804_vm3, %v24463_v47, 0.0 }
0x1354   :  { %3829 = vadd.xlane.f32.xlu0 %v3828_v53 }
0x135f   :  { %v3815_v27 = vpop.xlane.xlu1 %3814 }
0x1360   :  { %22356 = vrcp.f32 %v3815_v27 }
0x1361   :  { %v3818_v33 = vpop.xlane.xlu0 %3817 }
0x1362   :  { %22358 = vrcp.f32 %v3818_v33 }
0x136a   :  { %v22357_v16 = vpop.eup %22356 }
0x136b   :  { %v3845_v63 = vmul.f32 %v22357_v16, %v22345_v15 }
0x136c   :  { %v22359_v13 = vpop.eup %22358 }
0x136d   :  { %16393 = vmatmul.mubr.f32.vlgmr.msra.gmra.mrb[36].mxu0 %v3845_v63  ;;  %v3846_v59 = vmul.f32 %v22359_v13, %v22347_v37 }
0x136e   :  { %20109 = vmatpush3.bf16.msra.mxu0 %v23119_v0  ;;  %16462 = vmatprep.mubr.msk.f32.mxu0 %vm22637_vm0, %v27284_v3 }
0x136f   :  { %v3861_v2 = vrot.slane %v3846_v59, 7  ;;  %16428 = vmatmul.mubr.f32.vlgmr.msra.gmra.mrb[38].mxu1 %v3846_v59  ;;  %20110 = vmatprep.subr.bf16.mxu0 %v27285_v51 }
0x1370   :  { %20133 = vmatpush3.bf16.msra.mxu1 %v23124_v7  ;;  %16497 = vmatprep.mubr.msk.f32.mxu1 %vm22637_vm0, %v27284_v3 }
0x1371   :  { %v3862_v62 = vsel %vm1902_vm4, %v3861_v2, %v3845_v63  ;;  %20134 = vmatprep.subr.bf16.mxu1 %v27285_v51 }
0x1372   :  { %20112 = vmatpush3.bf16.msra.mxu0 %v23157_v22 }
0x1373   :  { %20113 = vmatprep.subr.bf16.mxu0 %v27285_v51 }
0x1374   :  { %20136 = vmatpush3.bf16.msra.mxu1 %v23159_v25 }
0x1375   :  { %20137 = vmatprep.subr.bf16.mxu1 %v27285_v51 }
0x1376   :  { %20115 = vmatpush3.bf16.msra.mxu0 %v23181_v36 }
0x1377   :  { %20116 = vmatprep.subr.bf16.mxu0 %v27285_v51 }
0x1378   :  { %20139 = vmatpush3.bf16.msra.mxu1 %v23183_v39 }
0x1379   :  { %20140 = vmatprep.subr.bf16.mxu1 %v27285_v51 }
0x137a   :  { %20118 = vmatpush3.bf16.msra.mxu0 %v23205_v49 }
0x137b   :  { %20119 = vmatprep.subr.bf16.mxu0 %v27285_v51 }
0x137c   :  { %20142 = vmatpush3.bf16.msra.mxu1 %v23207_v52 }
0x137d   :  { %20143 = vmatprep.subr.bf16.mxu1 %v27285_v51 }
0x137e   :  { %20121 = vmatpush3.bf16.msra.mxu0 %v23229_v1 }
0x137f   :  { %20122 = vmatprep.subr.bf16.mxu0 %v27285_v51 }
0x1380   :  { %20145 = vmatpush3.bf16.msra.mxu1 %v23231_v14 }
0x1381   :  { %v3785_v37 = vpop.xlane.xlu1 %3784  ;;  %20146 = vmatprep.subr.bf16.mxu1 %v27285_v51 }
0x1382   :  { %v3795_v15 = vsub.f32 %v24442_v12, %v3785_v37  ;;  %20124 = vmatpush3.bf16.msra.mxu0 %v23253_v30 }
0x1383   :  { %v3788_v38 = vpop.xlane.xlu0 %3787  ;;  %20125 = vmatprep.subr.bf16.mxu0 %v27285_v51 }
0x1384   :  { %v3809_v4 = vmul.f32 1.442695, %v3795_v15  ;;  %v3796_v53 = vsub.f32 %v24445_v8, %v3788_v38  ;;  %20148 = vmatpush3.bf16.msra.mxu1 %v23255_v31 }
0x1385   :  { %20149 = vmatprep.subr.bf16.mxu1 %v27285_v51 }
0x1386   :  { %22360 = vpow2.f32 %v3809_v4  ;;  %v3811_v27 = vmul.f32 1.442695, %v3796_v53  ;;  %20127 = vmatpush3.bf16.msra.mxu0 %v23277_v45 }
0x1387   :  { %20128 = vmatprep.subr.bf16.mxu0 %v27285_v51 }
0x1388   :  { %22362 = vpow2.f32 %v3811_v27  ;;  %20151 = vmatpush3.bf16.msra.mxu1 %v23279_v57 }
0x1389   :  { %20152 = vmatprep.subr.bf16.mxu1 %v27285_v51 }
0x138a   :  { %20130 = vmatpush3.bf16.msra.mxu0 %v23301_v18 }
0x138b   :  { %20155 = vmatprep.subr.bf16.mxu0 %v27285_v51 }
0x138c   :  { %20154 = vmatpush3.bf16.msra.mxu1 %v23303_v21 }
0x138d   :  { %20179 = vmatprep.subr.bf16.mxu1 %v27285_v51 }
0x1390   :  { %v24506_v12 = vpop.eup %22360 }
0x1391   :  { %v3831_v8 = vsel %vm1804_vm3, %v24506_v12, 0.0 }
0x1392   :  { %v24510_v33 = vpop.eup %22362  ;;  %3832 = vadd.xlane.f32.xlu1 %v3831_v8 }
0x1393   :  { %v3834_v16 = vsel %vm1804_vm3, %v24510_v33, 0.0 }
0x1394   :  { %3835 = vadd.xlane.f32.xlu0 %v3834_v16 }
0x139f   :  { %v3821_v63 = vpop.xlane.xlu1 %3820 }
0x13a0   :  { %22364 = vrcp.f32 %v3821_v63 }
0x13a3   :  { %v3824_v13 = vpop.xlane.xlu0 %3823 }
0x13a4   :  { %22366 = vrcp.f32 %v3824_v13 }
0x13aa   :  { %v22365_v59 = vpop.eup %22364 }
0x13ab   :  { %v3847_v2 = vmul.f32 %v22365_v59, %v24451_v42 }
0x13ad   :  { %v3863_v37 = vrot.slane %v3847_v2, 6  ;;  %16463 = vmatmul.mubr.f32.vlgmr.msra.gmra.mrb[38].mxu0 %v3847_v2  ;;  %v27377_v2 = vld [vmem:[#allocation53_spill] sm:$0xff] }
0x13ae   :  { %v22367_v15 = vpop.eup %22366  ;;  %20157 = vmatpush3.bf16.msra.mxu0 %v23325_v44  ;;  %16532 = vmatprep.mubr.msk.f32.mxu0 %vm22637_vm0, %v27284_v3 }
0x13af   :  { %v3864_v38 = vsel %vm1905_vm5, %v3863_v37, %v3862_v62  ;;  %v3848_v4 = vmul.f32 %v22367_v15, %v24455_v5  ;;  %20158 = vmatprep.subr.bf16.mxu0 %v27285_v51  ;;  %v27378_v37 = vld [vmem:[#allocation54_spill] sm:$0xff]  ;;  %v27379_v15 = vld [vmem:[#allocation55_spill] sm:$0xff] }
0x13b1   :  { %v3865_v53 = vrot.slane %v3848_v4, 5  ;;  %16498 = vmatmul.mubr.f32.vlgmr.msra.gmra.mrb[40].mxu1 %v3848_v4 }
0x13b2   :  { %20181 = vmatpush3.bf16.msra.mxu1 %v23329_v60  ;;  %20160 = vmatpush3.bf16.msra.mxu0 %v23359_v35 }
0x13b3   :  { %v3866_v42 = vsel %vm1908_vm6, %v3865_v53, %v3864_v38  ;;  %20182 = vmatprep.subr.bf16.mxu1 %v27285_v51  ;;  %20161 = vmatprep.subr.bf16.mxu0 %v27285_v51  ;;  %v27380_v38 = vld [vmem:[#allocation56_spill] sm:$0xff] }
0x13b4   :  { %16567 = vmatprep.mubr.msk.f32.mxu1 %vm22637_vm0, %v27284_v3 }
0x13b6   :  { %20184 = vmatpush3.bf16.msra.mxu1 %v23361_v40  ;;  %20163 = vmatpush3.bf16.msra.mxu0 %v23383_v10 }
0x13b7   :  { %20185 = vmatprep.subr.bf16.mxu1 %v27285_v51  ;;  %20164 = vmatprep.subr.bf16.mxu0 %v27285_v51 }
0x13ba   :  { %20187 = vmatpush3.bf16.msra.mxu1 %v23385_v17  ;;  %20166 = vmatpush3.bf16.msra.mxu0 %v23407_v61 }
0x13bb   :  { %20188 = vmatprep.subr.bf16.mxu1 %v27285_v51  ;;  %20167 = vmatprep.subr.bf16.mxu0 %v27285_v51 }
0x13be   :  { %20190 = vmatpush3.bf16.msra.mxu1 %v23409_v6  ;;  %20169 = vmatpush3.bf16.msra.mxu0 %v23431_v41 }
0x13bf   :  { %20191 = vmatprep.subr.bf16.mxu1 %v27285_v51  ;;  %20170 = vmatprep.subr.bf16.mxu0 %v27285_v51 }
0x13c2   :  { %20193 = vmatpush3.bf16.msra.mxu1 %v23433_v58  ;;  %20172 = vmatpush3.bf16.msra.mxu0 %v23455_v11 }
0x13c3   :  { %20194 = vmatprep.subr.bf16.mxu1 %v27285_v51  ;;  %20173 = vmatprep.subr.bf16.mxu0 %v27285_v51 }
0x13c6   :  { %20196 = vmatpush3.bf16.msra.mxu1 %v23457_v26  ;;  %20175 = vmatpush3.bf16.msra.mxu0 %v23479_v43 }
0x13c7   :  { %20197 = vmatprep.subr.bf16.mxu1 %v27285_v51  ;;  %20176 = vmatprep.subr.bf16.mxu0 %v27285_v51 }
0x13ca   :  { %20199 = vmatpush3.bf16.msra.mxu1 %v23481_v23  ;;  %20178 = vmatpush3.bf16.msra.mxu0 %v23505_v29 }
0x13cb   :  { %20200 = vmatprep.subr.bf16.mxu1 %v27285_v51  ;;  %20203 = vmatprep.subr.bf16.mxu0 %v27285_v51 }
0x13ce   :  { %20202 = vmatpush3.bf16.msra.mxu1 %v23507_v55 }
0x13cf   :  { %20227 = vmatprep.subr.bf16.mxu1 %v27285_v51 }
0x13df   :  { %v3827_v5 = vpop.xlane.xlu1 %3826 }
0x13e0   :  { %22368 = vrcp.f32 %v3827_v5 }
0x13e1   :  { %v3830_v62 = vpop.xlane.xlu0 %3829 }
0x13e2   :  { %22370 = vrcp.f32 %v3830_v62 }
0x13ea   :  { %v22369_v27 = vpop.eup %22368 }
0x13eb   :  { %v3849_v8 = vmul.f32 %v22369_v27, %v24459_v34  ;;  %v27375_v34 = vld [vmem:[#allocation51_spill] sm:$0xff] }
0x13ec   :  { %v22371_v16 = vpop.eup %22370 }
0x13ed   :  { %v3867_v63 = vrot.slane %v3849_v8, 4  ;;  %16533 = vmatmul.mubr.f32.vlgmr.msra.gmra.mrb[40].mxu0 %v3849_v8  ;;  %v3850_v13 = vmul.f32 %v22371_v16, %v24463_v47  ;;  %v27376_v47 = vld [vmem:[#allocation52_spill] sm:$0xff] }
0x13ee   :  { %20205 = vmatpush3.bf16.msra.mxu0 %v23530_v54  ;;  %16602 = vmatprep.mubr.msk.f32.mxu0 %vm22637_vm0, %v27284_v3 }
0x13ef   :  { %v3868_v59 = vsel %vm1911_vm7, %v3867_v63, %v3866_v42  ;;  %16568 = vmatmul.mubr.f32.vlgmr.msra.gmra.mrb[42].mxu1 %v3850_v13  ;;  %20206 = vmatprep.subr.bf16.mxu0 %v27285_v51  ;;  %v3869_v5 = vrot.slane %v3850_v13, 3  ;;  %v27382_v13 = vld [vmem:[#allocation9_spill] sm:$0xff] }
0x13f0   :  { %20229 = vmatpush3.bf16.msra.mxu1 %v23535_v20  ;;  %16637 = vmatprep.mubr.msk.f32.mxu1 %vm22637_vm0, %v27284_v3 }
0x13f1   :  { %20230 = vmatprep.subr.bf16.mxu1 %v27285_v51  ;;  %v3870_v63 = vsel %vm1914_vm8, %v3869_v5, %v3868_v59  ;;  %v27384_v59 = vld [vmem:[#allocation11_spill] sm:$0xff] }
0x13f2   :  { %20208 = vmatpush3.bf16.msra.mxu0 %v27308_v24 }
0x13f3   :  { %20209 = vmatprep.subr.bf16.mxu0 %v27285_v51 }
0x13f4   :  { %20232 = vmatpush3.bf16.msra.mxu1 %v27309_v19 }
0x13f5   :  { %20233 = vmatprep.subr.bf16.mxu1 %v27285_v51 }
0x13f6   :  { %20211 = vmatpush3.bf16.msra.mxu0 %v27310_v28 }
0x13f7   :  { %20212 = vmatprep.subr.bf16.mxu0 %v27285_v51 }
0x13f8   :  { %20235 = vmatpush3.bf16.msra.mxu1 %v27311_v46 }
0x13f9   :  { %20236 = vmatprep.subr.bf16.mxu1 %v27285_v51 }
0x13fa   :  { %20214 = vmatpush3.bf16.msra.mxu0 %v27312_v9 }
0x13fb   :  { %20215 = vmatprep.subr.bf16.mxu0 %v27285_v51 }
0x13fc   :  { %20238 = vmatpush3.bf16.msra.mxu1 %v27313_v32 }
0x13fd   :  { %20239 = vmatprep.subr.bf16.mxu1 %v27285_v51 }
0x13fe   :  { %20217 = vmatpush3.bf16.msra.mxu0 %v27314_v56 }
0x13ff   :  { %20218 = vmatprep.subr.bf16.mxu0 %v27285_v51 }
0x1400   :  { %20241 = vmatpush3.bf16.msra.mxu1 %v27315_v48 }
0x1401   :  { %20242 = vmatprep.subr.bf16.mxu1 %v27285_v51 }
0x1402   :  { %20220 = vmatpush3.bf16.msra.mxu0 %v27375_v34 }
0x1403   :  { %20221 = vmatprep.subr.bf16.mxu0 %v27285_v51 }
0x1404   :  { %20244 = vmatpush3.bf16.msra.mxu1 %v27376_v47 }
0x1405   :  { %20245 = vmatprep.subr.bf16.mxu1 %v27285_v51 }
0x1406   :  { %20223 = vmatpush3.bf16.msra.mxu0 %v27377_v2 }
0x1407   :  { %20224 = vmatprep.subr.bf16.mxu0 %v27285_v51 }
0x1408   :  { %20247 = vmatpush3.bf16.msra.mxu1 %v27378_v37 }
0x1409   :  { %20248 = vmatprep.subr.bf16.mxu1 %v27285_v51 }
0x140a   :  { %20226 = vmatpush3.bf16.msra.mxu0 %v27379_v15 }
0x140b   :  { %20251 = vmatprep.subr.bf16.mxu0 %v27285_v51 }
0x140c   :  { %20250 = vmatpush3.bf16.msra.mxu1 %v27380_v38 }
0x140d   :  { %20263 = vmatprep.subr.bf16.mxu1 %v27285_v51 }
0x141f   :  { %v3833_v4 = vpop.xlane.xlu1 %3832 }
0x1420   :  { %22372 = vrcp.f32 %v3833_v4 }
0x1421   :  { %v3836_v53 = vpop.xlane.xlu0 %3835 }
0x1422   :  { %22374 = vrcp.f32 %v3836_v53 }
0x142a   :  { %v22373_v42 = vpop.eup %22372 }
0x142b   :  { %v3851_v62 = vmul.f32 %v22373_v42, %v24506_v12 }
0x142c   :  { %v22375_v27 = vpop.eup %22374 }
0x142d   :  { %v3871_v8 = vrot.slane %v3851_v62, 2  ;;  %16603 = vmatmul.mubr.f32.vlgmr.msra.gmra.mrb[42].mxu0 %v3851_v62  ;;  %v3852_v16 = vmul.f32 %v22375_v27, %v24510_v33  ;;  %v27383_v33 = vld [vmem:[#allocation44_spill] sm:$0xff] }
0x142e   :  { %20253 = vmatpush3.bf16.msra.mxu0 %v27381_v50  ;;  %16648 = vmatprep.mubr.msk.f32.mxu0 %vm22637_vm0, %v27284_v3 }
0x142f   :  { %v3872_v4 = vsel %vm1917_vm9, %v3871_v8, %v3870_v63  ;;  %v3873_v38 = vrot.slane %v3852_v16, 1  ;;  %16638 = vmatmul.mubr.f32.vlgmr.msra.gmra.mrb[44].mxu1 %v3852_v16  ;;  %20254 = vmatprep.subr.bf16.mxu0 %v27285_v51 }
0x1430   :  { %20265 = vmatpush3.bf16.msra.mxu1 %v27382_v13  ;;  %16670 = vmatprep.mubr.msk.f32.mxu1 %vm22637_vm0, %v27284_v3 }
0x1431   :  { %v3874_v12 = vsel %vm1920_vm10, %v3873_v38, %v3872_v4  ;;  %20266 = vmatprep.subr.bf16.mxu1 %v27285_v51 }
0x1432   :  { %3877 = vst [vmem:[#allocation5 + $0x8] sm:$0xff] %v3874_v12  ;;  %20256 = vmatpush3.bf16.msra.mxu0 %v27383_v33 }
0x1433   :  { %20257 = vmatprep.subr.bf16.mxu0 %v27285_v51 }
0x1434   :  { %20268 = vmatpush3.bf16.msra.mxu1 %v27384_v59 }
0x1435   :  { %20269 = vmatprep.subr.bf16.mxu1 %v27285_v51 }
0x1440   :  { %v3944_v53 = vpop.f32.mrb[36].mxu0 }
0x1441   :  { %v16394_v42 = vpop.f32.mrb[37].mxu0 }
0x1442   :  { %v4014_v5 = vpop.f32.mrb[38].mxu1 }
0x1443   :  { %v4446_v62 = vrot.slane %v4014_v5, 7  ;;  %v16429_v27 = vpop.f32.mrb[39].mxu1 }
0x1445   :  { %v4447_v8 = vsel %vm1902_vm4, %v4446_v62, %v3944_v53 }
0x1480   :  { %v4084_v16 = vpop.f32.mrb[38].mxu0 }
0x1481   :  { %v4448_v38 = vrot.slane %v4084_v16, 6  ;;  %v16464_v63 = vpop.f32.mrb[39].mxu0 }
0x1483   :  { %v4449_v4 = vsel %vm1905_vm5, %v4448_v38, %v4447_v8 }
0x1484   :  { %v4154_v12 = vpop.f32.mrb[40].mxu1 }
0x1485   :  { %v4450_v33 = vrot.slane %v4154_v12, 5  ;;  %v16499_v13 = vpop.f32.mrb[41].mxu1  ;;  %v27392_v12 = vld [vmem:[#allocation19_spill] sm:$0xff] }
0x1487   :  { %v4451_v50 = vsel %vm1908_vm6, %v4450_v33, %v4449_v4  ;;  %v27391_v4 = vld [vmem:[#allocation17_spill] sm:$0xff] }
0x14c0   :  { %v4224_v59 = vpop.f32.mrb[40].mxu0 }
0x14c1   :  { %v4452_v15 = vrot.slane %v4224_v59, 4  ;;  %v16534_v37 = vpop.f32.mrb[41].mxu0  ;;  %v27390_v59 = vld [vmem:[#allocation48_spill] sm:$0xff] }
0x14c2   :  { %v4294_v2 = vpop.f32.mrb[42].mxu1  ;;  %v27385_v37 = vld [vmem:[#allocation45_spill] sm:$0xff] }
0x14c3   :  { %v4453_v42 = vsel %vm1911_vm7, %v4452_v15, %v4451_v50  ;;  %v4454_v5 = vrot.slane %v4294_v2, 3  ;;  %v16569_v27 = vpop.f32.mrb[43].mxu1  ;;  %v27386_v50 = vld [vmem:[#allocation46_spill] sm:$0xff] }
0x14c4   :  { %v27387_v2 = vld [vmem:[#allocation50_spill] sm:$0xff] }
0x14c5   :  { %v4455_v53 = vsel %vm1914_vm8, %v4454_v5, %v4453_v42  ;;  %v27389_v15 = vld [vmem:[#allocation14_spill] sm:$0xff] }
0x1500   :  { %v4364_v62 = vpop.f32.mrb[42].mxu0 }
0x1501   :  { %v4456_v16 = vrot.slane %v4364_v62, 2  ;;  %v16604_v63 = vpop.f32.mrb[43].mxu0 }
0x1502   :  { %v4434_v47 = vpop.f32.mrb[44].mxu1  ;;  %v27394_v63 = vld [vmem:[#allocation12_spill] sm:$0xff] }
0x1503   :  { %v4457_v8 = vsel %vm1917_vm9, %v4456_v16, %v4455_v53  ;;  %v4458_v38 = vrot.slane %v4434_v47, 1  ;;  %v16639_v13 = vpop.f32.mrb[45].mxu1  ;;  %v27388_v47 = vld [vmem:[#allocation13_spill] sm:$0xff]  ;;  %v27393_v16 = vld [vmem:[#allocation10_spill] sm:$0xff] }
0x1504   :  { %v27396_v13 = vld [vmem:[#allocation18_spill] sm:$0xff] }
0x1505   :  { %v4459_v33 = vsel %vm1920_vm10, %v4458_v38, %v4457_v8  ;;  %v12889_v8 = vld [vmem:[%s27039_s0 + $0x10] sm:$0xff]  ;;  %v27395_v38 = vld [vmem:[#allocation16_spill] sm:$0xff] }
0x1506   :  { %16649 = vmatmul.mubr.msk.f32.vlgmr.msra.gmra.mrb[44].mxu0 %vm292_vm1, %v4459_v33  ;;  %v27397_v33 = vld [vmem:[#allocation22_spill] sm:$0xff] }
0x1507   :  { %20259 = vmatpush3.bf16.msra.mxu0 %v27385_v37  ;;  %16659 = vmatprep.mubr.msk.f32.mxu0 %vm22637_vm0, %v27284_v3 }
0x1508   :  { %20260 = vmatprep.subr.bf16.mxu0 %v27285_v51 }
0x150b   :  { %20262 = vmatpush3.bf16.msra.mxu0 %v27386_v50 }
0x150c   :  { %20275 = vmatprep.subr.bf16.mxu0 %v27285_v51 }
0x150e   :  { %16660 = vmatmul.mubr.msk.f32.vlgmr.msra.gmra.mrb[44].mxu0 %vm292_vm1, %v27387_v2 }
0x150f   :  { %20277 = vmatpush3.bf16.msra.mxu0 %v27388_v47  ;;  %16692 = vmatprep.mubr.msk.f32.mxu0 %vm22637_vm0, %v27284_v3 }
0x1510   :  { %20278 = vmatprep.subr.bf16.mxu0 %v27285_v51 }
0x1513   :  { %20280 = vmatpush3.bf16.msra.mxu0 %v27389_v15 }
0x1514   :  { %20287 = vmatprep.subr.bf16.mxu0 %v27285_v51 }
0x1516   :  { %16693 = vmatmul.mubr.msk.f32.vlgmr.msra.gmra.mrb[46].mxu0 %vm292_vm1, %v27390_v59  ;;  %v27398_v59 = vld [vmem:[#allocation23_spill] sm:$0xff] }
0x1517   :  { %20289 = vmatpush3.bf16.msra.mxu0 %v27391_v4  ;;  %16714 = vmatprep.mubr.msk.f32.mxu0 %vm22637_vm0, %v27284_v3 }
0x1518   :  { %20290 = vmatprep.subr.bf16.mxu0 %v27285_v51 }
0x151b   :  { %20292 = vmatpush3.bf16.msra.mxu0 %v27392_v12 }
0x151c   :  { %20299 = vmatprep.subr.bf16.mxu0 %v27285_v51 }
0x15e1   :  { %v4598_v42 = vpop.f32.mrb[44].mxu0 }
0x15e2   :  { %22376 = vtanh.f32 %v4598_v42  ;;  %v16661_v5 = vpop.f32.mrb[45].mxu0 }
0x15e9   :  { %v4818_v27 = vpop.f32.mrb[46].mxu0 }
0x15ea   :  { %v16694_v53 = vpop.f32.mrb[47].mxu0 }
0x15ec   :  { %v22377_v62 = vpop.eup %22376 }
0x15ed   :  { %4603 = vst.msk [vmem:[#allocation2 + $0x8] sm:$0xff] %vm292_vm1, %v22377_v62  ;;  %16671 = vmatmul.mubr.msk.f32.vlgmr.msra.gmra.mrb[46].mxu1 %vm292_vm1, %v22377_v62 }
0x15ee   :  { %20271 = vmatpush3.bf16.msra.mxu1 %v27393_v16  ;;  %16681 = vmatprep.mubr.msk.f32.mxu1 %vm22637_vm0, %v27284_v3 }
0x15ef   :  { %20272 = vmatprep.subr.bf16.mxu1 %v27285_v51 }
0x15f2   :  { %20274 = vmatpush3.bf16.msra.mxu1 %v27394_v63 }
0x15f3   :  { %20281 = vmatprep.subr.bf16.mxu1 %v27285_v51 }
0x15f5   :  { %16682 = vmatmul.mubr.msk.f32.vlgmr.msra.gmra.mrb[48].mxu1 %vm292_vm1, %v12889_v8 }
0x15f6   :  { %20283 = vmatpush3.bf16.msra.mxu1 %v27395_v38  ;;  %16703 = vmatprep.mubr.msk.f32.mxu1 %vm22637_vm0, %v27284_v3 }
0x15f7   :  { %20284 = vmatprep.subr.bf16.mxu1 %v27285_v51 }
0x15fa   :  { %20286 = vmatpush3.bf16.msra.mxu1 %v27396_v13 }
0x15fb   :  { %20293 = vmatprep.subr.bf16.mxu1 %v27285_v51 }
0x15fd   :  { %16704 = vmatmul.mubr.msk.f32.vlgmr.msra.gmra.mrb[50].mxu1 %vm292_vm1, %v27387_v2  ;;  %v22580_v2 = vld [vmem:[%s27046_s7] ss:$0 sm:$0xff] }
0x15fe   :  { %20295 = vmatpush3.bf16.msra.mxu1 %v27397_v33  ;;  %16725 = vmatprep.mubr.msk.f32.mxu1 %vm22637_vm0, %v27284_v3 }
0x15ff   :  { %20296 = vmatprep.subr.bf16.mxu1 %v27285_v51 }
0x1602   :  { %20298 = vmatpush3.bf16.msra.mxu1 %v27398_v59 }
0x1603   :  { %20331 = vmatprep.subr.bf16.mxu1 %v27285_v51 }
0x16c0   :  { %v4675_v42 = vpop.f32.mrb[46].mxu1 }
0x16c1   :  { %v16672_v5 = vpop.f32.mrb[47].mxu1 }
0x16c8   :  { %v4748_v53 = vpop.f32.mrb[48].mxu1 }
0x16c9   :  { %v4749_v62 = vadd.f32 %v4748_v53, %v4675_v42  ;;  %v16683_v8 = vpop.f32.mrb[49].mxu1 }
0x16cb   :  { %v4822_v13 = vadd.f32 %v4818_v27, %v4749_v62  ;;  %v27399_v27 = vld [vmem:[#allocation47_spill] sm:$0xff] }
0x16cd   :  { %v4823_v33 = vadd.f32 %v22580_v2, %v4822_v13  ;;  %v27404_v2 = vld [vmem:[#allocation26_spill] sm:$0xff] }
0x16cf   :  { %22378 = vtanh.f32 %v4823_v33  ;;  %v12893_v59 = vmul.f32 -1.442695, %v4823_v33 }
0x16d0   :  { %v4914_v38 = vpop.f32.mrb[50].mxu1 }
0x16d1   :  { %v16705_v63 = vpop.f32.mrb[51].mxu1  ;;  %22380 = vpow2.f32 %v12893_v59  ;;  %v27437_v59 = vld [vmem:[#allocation61_spill] sm:$0xff] }
0x16d9   :  { %v22379_v16 = vpop.eup %22378 }
0x16da   :  { %4833 = vrot.lane.b32.xlu1 %v22379_v16, %s22639_s21 }
0x16db   :  { %v22381_v12 = vpop.eup %22380 }
0x16dc   :  { %v4827_v4 = vadd.f32 1.0, %v22381_v12  ;;  %v27402_v12 = vld [vmem:[#allocation25_spill] sm:$0xff] }
0x16de   :  { %22382 = vrcp.f32 %v4827_v4 }
0x16e8   :  { %v22383_v5 = vpop.eup %22382 }
0x16e9   :  { %v4831_v62 = vmul.f32 %v22383_v5, %v27399_v27  ;;  %v27408_v27 = vld [vmem:[#allocation30_spill] sm:$0xff] }
0x174c   :  { %v4834_v42 = vpop.permute.xlu1 %4833 }
0x174d   :  { %v4836_v53 = vmul.f32 %v22383_v5, %v4834_v42  ;;  %v27406_v42 = vld [vmem:[#allocation28_spill] sm:$0xff] }
0x174f   :  { %4838 = vrot.lane.b32.xlu0 %v4836_v53, %s22640_s24  ;;  %v27407_v53 = vld [vmem:[#allocation29_spill] sm:$0xff] }
0x17c1   :  { %v4839_v8 = vpop.permute.xlu0 %4838 }
0x17c2   :  { %v24672_v13 = vadd.f32 %v4839_v8, %v4831_v62  ;;  %v27409_v62 = vld [vmem:[#allocation31_spill] sm:$0xff]  ;;  %v27410_v8 = vld [vmem:[#allocation32_spill] sm:$0xff] }
0x17c4   :  { %27400 = vst [vmem:[#allocation34_spill] sm:$0xff] %v24672_v13  ;;  %22384 = vtanh.f32 %v24672_v13  ;;  %v22581_v13 = vld [vmem:[%s27046_s7 + $0x1] ss:$0 sm:$0xff] }
0x17ce   :  { %v22385_v63 = vpop.eup %22384 }
0x17cf   :  { %4844 = vrot.lane.b32.xlu1 %v22385_v63, %s22639_s21 }
0x1841   :  { %v4845_v16 = vpop.permute.xlu1 %4844 }
0x1842   :  { %v4847_v33 = vmul.f32 %v22383_v5, %v4845_v16  ;;  %v27405_v5 = vld [vmem:[#allocation27_spill] sm:$0xff] }
0x1844   :  { %4919 = vrot.lane.b32.xlu1 %v4847_v33, %s22640_s24 }
0x18b6   :  { %v24677_v4 = vpop.permute.xlu1 %4919 }
0x18b7   :  { %27401 = vst [vmem:[#allocation20_spill] sm:$0xff] %v24677_v4  ;;  %16715 = vmatmul.mubr.msk.f32.vlgmr.msra.gmra.mrb[48].mxu0 %vm292_vm1, %v24677_v4 }
0x18b8   :  { %20302 = vmatpush3.bf16.xpose.msk.msra.mxu0 %vm22904_vm2, %v27402_v12  ;;  %16760 = vmatprep.mubr.msk.f32.mxu0 %vm22637_vm0, %v27284_v3 }
0x18b9   :  { %20303 = vmatprep.subr.bf16.mxu0 %v27285_v51 }
0x18c0   :  { %20306 = vmatpush3.bf16.xpose.msk.msra.mxu0 %vm22904_vm2, %v27404_v2 }
0x18c1   :  { %20307 = vmatprep.subr.bf16.mxu0 %v27285_v51 }
0x18c8   :  { %20310 = vmatpush3.bf16.xpose.msk.msra.mxu0 %vm22904_vm2, %v27405_v5 }
0x18c9   :  { %20311 = vmatprep.subr.bf16.mxu0 %v27285_v51 }
0x18d0   :  { %20314 = vmatpush3.bf16.xpose.msk.msra.mxu0 %vm22904_vm2, %v27406_v42 }
0x18d1   :  { %20315 = vmatprep.subr.bf16.mxu0 %v27285_v51 }
0x18d8   :  { %20318 = vmatpush3.bf16.xpose.msk.msra.mxu0 %vm22904_vm2, %v27407_v53 }
0x18d9   :  { %20319 = vmatprep.subr.bf16.mxu0 %v27285_v51 }
0x18e0   :  { %20322 = vmatpush3.bf16.xpose.msk.msra.mxu0 %vm22904_vm2, %v27408_v27 }
0x18e1   :  { %20323 = vmatprep.subr.bf16.mxu0 %v27285_v51 }
0x18e8   :  { %20326 = vmatpush3.bf16.xpose.msk.msra.mxu0 %vm22904_vm2, %v27409_v62 }
0x18e9   :  { %20327 = vmatprep.subr.bf16.mxu0 %v27285_v51 }
0x18f0   :  { %20330 = vmatpush3.bf16.xpose.msk.msra.mxu0 %vm22904_vm2, %v27410_v8 }
0x18f1   :  { %20363 = vmatprep.subr.bf16.mxu0 %v27285_v51 }
0x198a   :  { %v4989_v63 = vpop.f32.mrb[48].mxu0 }
0x198b   :  { %v4990_v16 = vadd.f32 %v4989_v63, %v4914_v38  ;;  %v16716_v33 = vpop.f32.mrb[49].mxu0  ;;  %v27411_v38 = vld [vmem:[#allocation49_spill] sm:$0xff] }
0x198d   :  { %v4993_v4 = vadd.f32 %v22581_v13, %v4990_v16  ;;  %v27419_v16 = vld [vmem:[#allocation39_spill] sm:$0xff] }
0x198f   :  { %22386 = vtanh.f32 %v4993_v4  ;;  %v12896_v47 = vmul.f32 -1.442695, %v4993_v4  ;;  %v27415_v4 = vld [vmem:[#allocation35_spill] sm:$0xff] }
0x1991   :  { %22388 = vpow2.f32 %v12896_v47 }
0x1999   :  { %v22387_v15 = vpop.eup %22386 }
0x199a   :  { %5003 = vrot.lane.b32.xlu0 %v22387_v15, %s22639_s21 }
0x199b   :  { %v22389_v50 = vpop.eup %22388 }
0x199c   :  { %v4997_v37 = vadd.f32 1.0, %v22389_v50  ;;  %v27414_v50 = vld [vmem:[#allocation33_spill] sm:$0xff] }
0x199e   :  { %22390 = vrcp.f32 %v4997_v37 }
0x19a8   :  { %v22391_v8 = vpop.eup %22390 }
0x19a9   :  { %v5001_v63 = vmul.f32 %v22391_v8, %v27411_v38  ;;  %v27420_v38 = vld [vmem:[#allocation40_spill] sm:$0xff] }
0x1a0c   :  { %v5004_v62 = vpop.permute.xlu0 %5003 }
0x1a0d   :  { %v5006_v27 = vmul.f32 %v22391_v8, %v5004_v62  ;;  %v27417_v62 = vld [vmem:[#allocation37_spill] sm:$0xff] }
0x1a0f   :  { %5008 = vrot.lane.b32.xlu1 %v5006_v27, %s22640_s24  ;;  %v27416_v27 = vld [vmem:[#allocation36_spill] sm:$0xff] }
0x1a81   :  { %v5009_v33 = vpop.permute.xlu1 %5008 }
0x1a82   :  { %v24721_v53 = vadd.f32 %v5009_v33, %v5001_v63  ;;  %v27421_v63 = vld [vmem:[#allocation41_spill] sm:$0xff] }
0x1a84   :  { %27412 = vst [vmem:[#allocation15_spill] sm:$0xff] %v24721_v53  ;;  %22392 = vtanh.f32 %v24721_v53 }
0x1a8e   :  { %v22393_v13 = vpop.eup %22392 }
0x1a8f   :  { %5014 = vrot.lane.b32.xlu0 %v22393_v13, %s22639_s21  ;;  %v27422_v13 = vld [vmem:[#allocation42_spill] sm:$0xff] }
0x1b01   :  { %v5015_v15 = vpop.permute.xlu0 %5014 }
0x1b02   :  { %v5017_v47 = vmul.f32 %v22391_v8, %v5015_v15  ;;  %v27418_v8 = vld [vmem:[#allocation38_spill] sm:$0xff] }
0x1b04   :  { %5019 = vrot.lane.b32.xlu1 %v5017_v47, %s22640_s24 }
0x1b76   :  { %v24726_v37 = vpop.permute.xlu1 %5019 }
0x1b77   :  { %27413 = vst [vmem:[#allocation21_spill] sm:$0xff] %v24726_v37  ;;  %16726 = vmatmul.mubr.msk.f32.vlgmr.msra.gmra.mrb[52].mxu1 %vm292_vm1, %v24726_v37 }
0x1b78   :  { %20334 = vmatpush3.bf16.xpose.msk.msra.mxu1 %vm22904_vm2, %v27414_v50  ;;  %16795 = vmatprep.mubr.msk.f32.mxu1 %vm22637_vm0, %v27284_v3 }
0x1b79   :  { %20335 = vmatprep.subr.bf16.mxu1 %v27285_v51 }
0x1b80   :  { %20338 = vmatpush3.bf16.xpose.msk.msra.mxu1 %vm22904_vm2, %v27415_v4 }
0x1b81   :  { %20339 = vmatprep.subr.bf16.mxu1 %v27285_v51 }
0x1b88   :  { %20342 = vmatpush3.bf16.xpose.msk.msra.mxu1 %vm22904_vm2, %v27416_v27 }
0x1b89   :  { %20343 = vmatprep.subr.bf16.mxu1 %v27285_v51 }
0x1b90   :  { %20346 = vmatpush3.bf16.xpose.msk.msra.mxu1 %vm22904_vm2, %v27417_v62 }
0x1b91   :  { %20347 = vmatprep.subr.bf16.mxu1 %v27285_v51 }
0x1b98   :  { %20350 = vmatpush3.bf16.xpose.msk.msra.mxu1 %vm22904_vm2, %v27418_v8 }
0x1b99   :  { %20351 = vmatprep.subr.bf16.mxu1 %v27285_v51 }
0x1ba0   :  { %20354 = vmatpush3.bf16.xpose.msk.msra.mxu1 %vm22904_vm2, %v27419_v16 }
0x1ba1   :  { %20355 = vmatprep.subr.bf16.mxu1 %v27285_v51 }
0x1ba8   :  { %20358 = vmatpush3.bf16.xpose.msk.msra.mxu1 %vm22904_vm2, %v27420_v38 }
0x1ba9   :  { %20359 = vmatprep.subr.bf16.mxu1 %v27285_v51 }
0x1bb0   :  { %20362 = vmatpush3.bf16.xpose.msk.msra.mxu1 %vm22904_vm2, %v27421_v63 }
0x1bb1   :  { %20395 = vmatprep.subr.bf16.mxu1 %v27285_v51 }
0x1c4a   :  { %v24764_v33 = vpop.f32.mrb[52].mxu1 }
0x1c4b   :  { %v5101_v15 = vrot.slane %v24764_v33, %v27422_v13  ;;  %v16727_v47 = vpop.f32.mrb[53].mxu1 }
0x1c4d   :  { %v5109_v53 = vcombine.high %v5101_v15, %v5101_v15  ;;  %v5117_v37 = vrot.slane %v5101_v15, %v27422_v13 }
0x1c4f   :  { %v5131_v16 = vrot.slane %v5109_v53, %v27422_v13  ;;  %16761 = vmatmul.mubr.msk.f32.vlgmr.msra.gmra.mrb[50].mxu0 %vm292_vm1, %v5117_v37  ;;  %v5139_v53 = vcombine.high %v5117_v37, %v5117_v37  ;;  %v5094_v37 = vcombine.high %v24764_v33, %v24764_v33 }
0x1c50   :  { %20366 = vmatpush3.bf16.xpose.msk.msra.mxu0 %vm22904_vm2, %v23119_v0  ;;  %16830 = vmatprep.mubr.msk.f32.mxu0 %vm22637_vm0, %v27284_v3 }
0x1c51   :  { %16796 = vmatmul.mubr.msk.f32.vlgmr.msra.gmra.mrb[54].mxu1 %vm292_vm1, %v5131_v16  ;;  %20367 = vmatprep.subr.bf16.mxu0 %v27285_v51  ;;  %v5141_v15 = vcombine.high %v5131_v16, %v5131_v16  ;;  %v5108_v16 = vrot.slane %v5094_v37, %v27422_v13  ;;  %v27424_v37 = vld [vmem:[#allocation53_spill] sm:$0xff] }
0x1c52   :  { %20398 = vmatpush3.bf16.xpose.msk.msra.mxu1 %vm22904_vm2, %v23124_v7  ;;  %16865 = vmatprep.mubr.msk.f32.mxu1 %vm22637_vm0, %v27284_v3 }
0x1c53   :  { %20399 = vmatprep.subr.bf16.mxu1 %v27285_v51  ;;  %v5110_v47 = vcombine.high %v5108_v16, %v5108_v16 }
0x1c55   :  { %v5138_v33 = vrot.slane %v5110_v47, %v27422_v13  ;;  %v27426_v47 = vld [vmem:[#allocation55_spill] sm:$0xff] }
0x1c58   :  { %20370 = vmatpush3.bf16.xpose.msk.msra.mxu0 %vm22904_vm2, %v23157_v22 }
0x1c59   :  { %20371 = vmatprep.subr.bf16.mxu0 %v27285_v51 }
0x1c5a   :  { %20402 = vmatpush3.bf16.xpose.msk.msra.mxu1 %vm22904_vm2, %v23159_v25 }
0x1c5b   :  { %20403 = vmatprep.subr.bf16.mxu1 %v27285_v51 }
0x1c60   :  { %20374 = vmatpush3.bf16.xpose.msk.msra.mxu0 %vm22904_vm2, %v23181_v36 }
0x1c61   :  { %20375 = vmatprep.subr.bf16.mxu0 %v27285_v51 }
0x1c62   :  { %20406 = vmatpush3.bf16.xpose.msk.msra.mxu1 %vm22904_vm2, %v23183_v39 }
0x1c63   :  { %20407 = vmatprep.subr.bf16.mxu1 %v27285_v51 }
0x1c68   :  { %20378 = vmatpush3.bf16.xpose.msk.msra.mxu0 %vm22904_vm2, %v23205_v49 }
0x1c69   :  { %20379 = vmatprep.subr.bf16.mxu0 %v27285_v51 }
0x1c6a   :  { %20410 = vmatpush3.bf16.xpose.msk.msra.mxu1 %vm22904_vm2, %v23207_v52 }
0x1c6b   :  { %20411 = vmatprep.subr.bf16.mxu1 %v27285_v51 }
0x1c70   :  { %20382 = vmatpush3.bf16.xpose.msk.msra.mxu0 %vm22904_vm2, %v23229_v1 }
0x1c71   :  { %20383 = vmatprep.subr.bf16.mxu0 %v27285_v51 }
0x1c72   :  { %20414 = vmatpush3.bf16.xpose.msk.msra.mxu1 %vm22904_vm2, %v23231_v14 }
0x1c73   :  { %20415 = vmatprep.subr.bf16.mxu1 %v27285_v51 }
0x1c78   :  { %20386 = vmatpush3.bf16.xpose.msk.msra.mxu0 %vm22904_vm2, %v23253_v30 }
0x1c79   :  { %20387 = vmatprep.subr.bf16.mxu0 %v27285_v51 }
0x1c7a   :  { %20418 = vmatpush3.bf16.xpose.msk.msra.mxu1 %vm22904_vm2, %v23255_v31 }
0x1c7b   :  { %20419 = vmatprep.subr.bf16.mxu1 %v27285_v51 }
0x1c80   :  { %20390 = vmatpush3.bf16.xpose.msk.msra.mxu0 %vm22904_vm2, %v23277_v45 }
0x1c81   :  { %20391 = vmatprep.subr.bf16.mxu0 %v27285_v51 }
0x1c82   :  { %20422 = vmatpush3.bf16.xpose.msk.msra.mxu1 %vm22904_vm2, %v23279_v57 }
0x1c83   :  { %20423 = vmatprep.subr.bf16.mxu1 %v27285_v51 }
0x1c88   :  { %20394 = vmatpush3.bf16.xpose.msk.msra.mxu0 %vm22904_vm2, %v23301_v18 }
0x1c89   :  { %20427 = vmatprep.subr.bf16.mxu0 %v27285_v51 }
0x1c8a   :  { %20426 = vmatpush3.bf16.xpose.msk.msra.mxu1 %vm22904_vm2, %v23303_v21 }
0x1c8b   :  { %20459 = vmatprep.subr.bf16.mxu1 %v27285_v51 }
0x1c8f   :  { %16831 = vmatmul.mubr.msk.f32.vlgmr.msra.gmra.mrb[52].mxu0 %vm292_vm1, %v5139_v53  ;;  %v5124_v53 = vrot.slane %v5108_v16, %v27422_v13  ;;  %v27425_v16 = vld [vmem:[#allocation54_spill] sm:$0xff]  ;;  %v27427_v13 = vld [vmem:[#allocation56_spill] sm:$0xff] }
0x1c90   :  { %20430 = vmatpush3.bf16.xpose.msk.msra.mxu0 %vm22904_vm2, %v23325_v44  ;;  %16900 = vmatprep.mubr.msk.f32.mxu0 %vm22637_vm0, %v27284_v3 }
0x1c91   :  { %16866 = vmatmul.mubr.msk.f32.vlgmr.msra.gmra.mrb[56].mxu1 %vm292_vm1, %v5141_v15  ;;  %20431 = vmatprep.subr.bf16.mxu0 %v27285_v51  ;;  %v27423_v15 = vld [vmem:[#allocation52_spill] sm:$0xff] }
0x1c92   :  { %20462 = vmatpush3.bf16.xpose.msk.msra.mxu1 %vm22904_vm2, %v23329_v60  ;;  %16935 = vmatprep.mubr.msk.f32.mxu1 %vm22637_vm0, %v27284_v3 }
0x1c93   :  { %20463 = vmatprep.subr.bf16.mxu1 %v27285_v51 }
0x1c98   :  { %20434 = vmatpush3.bf16.xpose.msk.msra.mxu0 %vm22904_vm2, %v23359_v35 }
0x1c99   :  { %20435 = vmatprep.subr.bf16.mxu0 %v27285_v51 }
0x1c9a   :  { %20466 = vmatpush3.bf16.xpose.msk.msra.mxu1 %vm22904_vm2, %v23361_v40 }
0x1c9b   :  { %20467 = vmatprep.subr.bf16.mxu1 %v27285_v51 }
0x1ca0   :  { %20438 = vmatpush3.bf16.xpose.msk.msra.mxu0 %vm22904_vm2, %v23383_v10 }
0x1ca1   :  { %20439 = vmatprep.subr.bf16.mxu0 %v27285_v51 }
0x1ca2   :  { %20470 = vmatpush3.bf16.xpose.msk.msra.mxu1 %vm22904_vm2, %v23385_v17 }
0x1ca3   :  { %20471 = vmatprep.subr.bf16.mxu1 %v27285_v51 }
0x1ca8   :  { %20442 = vmatpush3.bf16.xpose.msk.msra.mxu0 %vm22904_vm2, %v23407_v61 }
0x1ca9   :  { %20443 = vmatprep.subr.bf16.mxu0 %v27285_v51 }
0x1caa   :  { %20474 = vmatpush3.bf16.xpose.msk.msra.mxu1 %vm22904_vm2, %v23409_v6 }
0x1cab   :  { %20475 = vmatprep.subr.bf16.mxu1 %v27285_v51 }
0x1cb0   :  { %20446 = vmatpush3.bf16.xpose.msk.msra.mxu0 %vm22904_vm2, %v23431_v41 }
0x1cb1   :  { %20447 = vmatprep.subr.bf16.mxu0 %v27285_v51 }
0x1cb2   :  { %20478 = vmatpush3.bf16.xpose.msk.msra.mxu1 %vm22904_vm2, %v23433_v58 }
0x1cb3   :  { %20479 = vmatprep.subr.bf16.mxu1 %v27285_v51 }
0x1cb8   :  { %20450 = vmatpush3.bf16.xpose.msk.msra.mxu0 %vm22904_vm2, %v23455_v11 }
0x1cb9   :  { %20451 = vmatprep.subr.bf16.mxu0 %v27285_v51 }
0x1cba   :  { %20482 = vmatpush3.bf16.xpose.msk.msra.mxu1 %vm22904_vm2, %v23457_v26 }
0x1cbb   :  { %20483 = vmatprep.subr.bf16.mxu1 %v27285_v51 }
0x1cc0   :  { %20454 = vmatpush3.bf16.xpose.msk.msra.mxu0 %vm22904_vm2, %v23479_v43 }
0x1cc1   :  { %20455 = vmatprep.subr.bf16.mxu0 %v27285_v51 }
0x1cc2   :  { %20486 = vmatpush3.bf16.xpose.msk.msra.mxu1 %vm22904_vm2, %v23481_v23 }
0x1cc3   :  { %20487 = vmatprep.subr.bf16.mxu1 %v27285_v51 }
0x1cc8   :  { %20458 = vmatpush3.bf16.xpose.msk.msra.mxu0 %vm22904_vm2, %v23505_v29 }
0x1cc9   :  { %20491 = vmatprep.subr.bf16.mxu0 %v27285_v51 }
0x1cca   :  { %20490 = vmatpush3.bf16.xpose.msk.msra.mxu1 %vm22904_vm2, %v23507_v55 }
0x1ccb   :  { %20523 = vmatprep.subr.bf16.mxu1 %v27285_v51 }
0x1ccf   :  { %16901 = vmatmul.mubr.msk.f32.vlgmr.msra.gmra.mrb[54].mxu0 %vm292_vm1, %v5124_v53 }
0x1cd0   :  { %20494 = vmatpush3.bf16.xpose.msk.msra.mxu0 %vm22904_vm2, %v23530_v54  ;;  %16970 = vmatprep.mubr.msk.f32.mxu0 %vm22637_vm0, %v27284_v3 }
0x1cd1   :  { %16936 = vmatmul.mubr.msk.f32.vlgmr.msra.gmra.mrb[58].mxu1 %vm292_vm1, %v5138_v33  ;;  %20495 = vmatprep.subr.bf16.mxu0 %v27285_v51 }
0x1cd2   :  { %20526 = vmatpush3.bf16.xpose.msk.msra.mxu1 %vm22904_vm2, %v23535_v20  ;;  %17005 = vmatprep.mubr.msk.f32.mxu1 %vm22637_vm0, %v27284_v3 }
0x1cd3   :  { %20527 = vmatprep.subr.bf16.mxu1 %v27285_v51 }
0x1cd8   :  { %20498 = vmatpush3.bf16.xpose.msk.msra.mxu0 %vm22904_vm2, %v27308_v24 }
0x1cd9   :  { %20499 = vmatprep.subr.bf16.mxu0 %v27285_v51 }
0x1cda   :  { %20530 = vmatpush3.bf16.xpose.msk.msra.mxu1 %vm22904_vm2, %v27309_v19 }
0x1cdb   :  { %20531 = vmatprep.subr.bf16.mxu1 %v27285_v51 }
0x1ce0   :  { %20502 = vmatpush3.bf16.xpose.msk.msra.mxu0 %vm22904_vm2, %v27310_v28 }
0x1ce1   :  { %20503 = vmatprep.subr.bf16.mxu0 %v27285_v51 }
0x1ce2   :  { %20534 = vmatpush3.bf16.xpose.msk.msra.mxu1 %vm22904_vm2, %v27311_v46 }
0x1ce3   :  { %20535 = vmatprep.subr.bf16.mxu1 %v27285_v51 }
0x1ce8   :  { %20506 = vmatpush3.bf16.xpose.msk.msra.mxu0 %vm22904_vm2, %v27312_v9 }
0x1ce9   :  { %20507 = vmatprep.subr.bf16.mxu0 %v27285_v51 }
0x1cea   :  { %20538 = vmatpush3.bf16.xpose.msk.msra.mxu1 %vm22904_vm2, %v27313_v32 }
0x1ceb   :  { %20539 = vmatprep.subr.bf16.mxu1 %v27285_v51 }
0x1cf0   :  { %20510 = vmatpush3.bf16.xpose.msk.msra.mxu0 %vm22904_vm2, %v27314_v56 }
0x1cf1   :  { %20511 = vmatprep.subr.bf16.mxu0 %v27285_v51 }
0x1cf2   :  { %20542 = vmatpush3.bf16.xpose.msk.msra.mxu1 %vm22904_vm2, %v27315_v48 }
0x1cf3   :  { %20543 = vmatprep.subr.bf16.mxu1 %v27285_v51 }
0x1cf8   :  { %20514 = vmatpush3.bf16.xpose.msk.msra.mxu0 %vm22904_vm2, %v27375_v34 }
0x1cf9   :  { %20515 = vmatprep.subr.bf16.mxu0 %v27285_v51 }
0x1cfa   :  { %20546 = vmatpush3.bf16.xpose.msk.msra.mxu1 %vm22904_vm2, %v27423_v15  ;;  %v5142_v15 = vcombine.high %v5138_v33, %v5138_v33 }
0x1cfb   :  { %20547 = vmatprep.subr.bf16.mxu1 %v27285_v51 }
0x1d00   :  { %20518 = vmatpush3.bf16.xpose.msk.msra.mxu0 %vm22904_vm2, %v27424_v37  ;;  %v5140_v37 = vcombine.high %v5124_v53, %v5124_v53  ;;  %v27428_v53 = vld [vmem:[#allocation29_spill] sm:$0xff] }
0x1d01   :  { %20519 = vmatprep.subr.bf16.mxu0 %v27285_v51 }
0x1d02   :  { %20550 = vmatpush3.bf16.xpose.msk.msra.mxu1 %vm22904_vm2, %v27425_v16 }
0x1d03   :  { %20551 = vmatprep.subr.bf16.mxu1 %v27285_v51 }
0x1d08   :  { %20522 = vmatpush3.bf16.xpose.msk.msra.mxu0 %vm22904_vm2, %v27426_v47  ;;  %v27438_v47 = vld [vmem:[#allocation62_spill] sm:$0xff] }
0x1d09   :  { %20555 = vmatprep.subr.bf16.mxu0 %v27285_v51 }
0x1d0a   :  { %20554 = vmatpush3.bf16.xpose.msk.msra.mxu1 %vm22904_vm2, %v27427_v13 }
0x1d0b   :  { %20579 = vmatprep.subr.bf16.mxu1 %v27285_v51 }
0x1d0f   :  { %16971 = vmatmul.mubr.msk.f32.vlgmr.msra.gmra.mrb[56].mxu0 %vm292_vm1, %v5140_v37 }
0x1d10   :  { %20557 = vmatpush3.bf16.msra.mxu0 %v27402_v12  ;;  %17040 = vmatprep.mubr.msk.f32.mxu0 %vm22637_vm0, %v27284_v3 }
0x1d11   :  { %17006 = vmatmul.mubr.msk.f32.vlgmr.msra.gmra.mrb[60].mxu1 %vm292_vm1, %v5142_v15  ;;  %20558 = vmatprep.subr.bf16.mxu0 %v27285_v51  ;;  %v27429_v15 = vld [vmem:[#allocation57_spill] sm:$0xff] }
0x1d12   :  { %20581 = vmatpush3.bf16.msra.mxu1 %v27414_v50  ;;  %17075 = vmatprep.mubr.msk.f32.mxu1 %vm22637_vm0, %v27284_v3  ;;  %v27430_v50 = vld [vmem:[#allocation30_spill] sm:$0xff] }
0x1d13   :  { %20582 = vmatprep.subr.bf16.mxu1 %v27285_v51 }
0x1d14   :  { %20560 = vmatpush3.bf16.msra.mxu0 %v27404_v2 }
0x1d15   :  { %20561 = vmatprep.subr.bf16.mxu0 %v27285_v51 }
0x1d16   :  { %20584 = vmatpush3.bf16.msra.mxu1 %v27415_v4 }
0x1d17   :  { %20585 = vmatprep.subr.bf16.mxu1 %v27285_v51 }
0x1d18   :  { %20563 = vmatpush3.bf16.msra.mxu0 %v27405_v5 }
0x1d19   :  { %20564 = vmatprep.subr.bf16.mxu0 %v27285_v51 }
0x1d1a   :  { %20587 = vmatpush3.bf16.msra.mxu1 %v27416_v27 }
0x1d1b   :  { %20588 = vmatprep.subr.bf16.mxu1 %v27285_v51 }
0x1d1c   :  { %20566 = vmatpush3.bf16.msra.mxu0 %v27406_v42  ;;  %v27431_v42 = vld [vmem:[#allocation58_spill] sm:$0xff] }
0x1d1d   :  { %20567 = vmatprep.subr.bf16.mxu0 %v27285_v51 }
0x1d1e   :  { %20590 = vmatpush3.bf16.msra.mxu1 %v27417_v62 }
0x1d1f   :  { %20591 = vmatprep.subr.bf16.mxu1 %v27285_v51 }
0x1d20   :  { %20569 = vmatpush3.bf16.msra.mxu0 %v27428_v53  ;;  %v27432_v53 = vld [vmem:[#allocation39_spill] sm:$0xff] }
0x1d21   :  { %20570 = vmatprep.subr.bf16.mxu0 %v27285_v51 }
0x1d22   :  { %v5211_v33 = vpop.f32.mrb[50].mxu0  ;;  %20593 = vmatpush3.bf16.msra.mxu1 %v27418_v8 }
0x1d23   :  { %v5212_v37 = vadd.f32 %v5211_v33, %v27429_v15  ;;  %v16762_v27 = vpop.f32.mrb[51].mxu0  ;;  %20594 = vmatprep.subr.bf16.mxu1 %v27285_v51  ;;  %v27436_v15 = vld [vmem:[#allocation60_spill] sm:$0xff] }
0x1d24   :  { %v5283_v4 = vpop.f32.mrb[54].mxu1  ;;  %20572 = vmatpush3.bf16.msra.mxu0 %v27430_v50  ;;  %v27433_v27 = vld [vmem:[#allocation31_spill] sm:$0xff] }
0x1d25   :  { %v5284_v5 = vadd.f32 %v5283_v4, %v27431_v42  ;;  %v16797_v62 = vpop.f32.mrb[55].mxu1  ;;  %v5719_v2 = vsel %vm1804_vm3, %v5212_v37, -inf  ;;  %20573 = vmatprep.subr.bf16.mxu0 %v27285_v51  ;;  %v27434_v4 = vld [vmem:[#allocation32_spill] sm:$0xff] }
0x1d26   :  { %5720 = vmax.xlane.f32.xlu0 %v5719_v2  ;;  %20596 = vmatpush3.bf16.msra.mxu1 %v27432_v53  ;;  %v27435_v62 = vld [vmem:[#allocation59_spill] sm:$0xff] }
0x1d27   :  { %v5722_v8 = vsel %vm1804_vm3, %v5284_v5, -inf  ;;  %20597 = vmatprep.subr.bf16.mxu1 %v27285_v51 }
0x1d28   :  { %5723 = vmax.xlane.f32.xlu1 %v5722_v8  ;;  %20575 = vmatpush3.bf16.msra.mxu0 %v27433_v27 }
0x1d29   :  { %20576 = vmatprep.subr.bf16.mxu0 %v27285_v51 }
0x1d2a   :  { %20599 = vmatpush3.bf16.msra.mxu1 %v27420_v38 }
0x1d2b   :  { %20600 = vmatprep.subr.bf16.mxu1 %v27285_v51 }
0x1d2c   :  { %20578 = vmatpush3.bf16.msra.mxu0 %v27434_v4 }
0x1d2d   :  { %20603 = vmatprep.subr.bf16.mxu0 %v27285_v51 }
0x1d2e   :  { %20602 = vmatpush3.bf16.msra.mxu1 %v27421_v63 }
0x1d2f   :  { %20627 = vmatprep.subr.bf16.mxu1 %v27285_v51 }
0x1d62   :  { %v5355_v2 = vpop.f32.mrb[52].mxu0 }
0x1d63   :  { %v5356_v33 = vadd.f32 %v5355_v2, %v27435_v62  ;;  %v16832_v8 = vpop.f32.mrb[53].mxu0 }
0x1d64   :  { %v5427_v42 = vpop.f32.mrb[56].mxu1 }
0x1d65   :  { %v5428_v53 = vadd.f32 %v5427_v42, %v27436_v15  ;;  %v16867_v27 = vpop.f32.mrb[57].mxu1  ;;  %v5725_v38 = vsel %vm1804_vm3, %v5356_v33, -inf }
0x1d66   :  { %5726 = vmax.xlane.f32.xlu0 %v5725_v38 }
0x1d67   :  { %v5728_v50 = vsel %vm1804_vm3, %v5428_v53, -inf }
0x1d6a   :  { %5729 = vmax.xlane.f32.xlu0 %v5728_v50 }
0x1da2   :  { %v5499_v4 = vpop.f32.mrb[54].mxu0 }
0x1da3   :  { %v5500_v12 = vadd.f32 %v5499_v4, %v27437_v59  ;;  %v16902_v63 = vpop.f32.mrb[55].mxu0 }
0x1da4   :  { %v5571_v13 = vpop.f32.mrb[58].mxu1 }
0x1da5   :  { %v5572_v16 = vadd.f32 %v5571_v13, %v27438_v47  ;;  %v16937_v34 = vpop.f32.mrb[59].mxu1  ;;  %v5731_v2 = vsel %vm1804_vm3, %v5500_v12, -inf }
0x1da6   :  { %5732 = vmax.xlane.f32.xlu1 %v5731_v2  ;;  %v27439_v2 = vld [vmem:[#allocation63_spill] sm:$0xff] }
0x1da7   :  { %v5734_v42 = vsel %vm1804_vm3, %v5572_v16, -inf }
0x1da8   :  { %5735 = vmax.xlane.f32.xlu0 %v5734_v42 }
0x1db3   :  { %v5721_v27 = vpop.xlane.xlu0 %5720 }
0x1db4   :  { %v5743_v8 = vsub.f32 %v5212_v37, %v5721_v27  ;;  %v27440_v27 = vld [vmem:[#allocation64_spill] sm:$0xff] }
0x1db5   :  { %v5724_v38 = vpop.xlane.xlu1 %5723 }
0x1db6   :  { %v5751_v15 = vmul.f32 1.442695, %v5743_v8  ;;  %v5744_v62 = vsub.f32 %v5284_v5, %v5724_v38 }
0x1db8   :  { %22394 = vpow2.f32 %v5751_v15  ;;  %v5753_v50 = vmul.f32 1.442695, %v5744_v62 }
0x1dba   :  { %22396 = vpow2.f32 %v5753_v50 }
0x1dc2   :  { %v22395_v4 = vpop.eup %22394 }
0x1dc3   :  { %v5767_v63 = vsel %vm1804_vm3, %v22395_v4, 0.0 }
0x1dc4   :  { %v22397_v59 = vpop.eup %22396  ;;  %5768 = vadd.xlane.f32.xlu1 %v5767_v63 }
0x1dc5   :  { %v5770_v34 = vsel %vm1804_vm3, %v22397_v59, 0.0 }
0x1dc6   :  { %5771 = vadd.xlane.f32.xlu0 %v5770_v34 }
0x1de2   :  { %v5643_v13 = vpop.f32.mrb[56].mxu0 }
0x1de3   :  { %v25038_v47 = vadd.f32 %v5643_v13, %v27439_v2  ;;  %v16972_v42 = vpop.f32.mrb[57].mxu0 }
0x1de4   :  { %v5715_v37 = vpop.f32.mrb[60].mxu1 }
0x1de5   :  { %v25041_v8 = vadd.f32 %v5715_v37, %v27440_v27  ;;  %v17007_v5 = vpop.f32.mrb[61].mxu1  ;;  %v5737_v15 = vsel %vm1804_vm3, %v25038_v47, -inf  ;;  %v27447_v27 = vld [vmem:[#allocation43_spill] sm:$0xff] }
0x1de6   :  { %5738 = vmax.xlane.f32.xlu1 %v5737_v15 }
0x1de7   :  { %v5740_v62 = vsel %vm1804_vm3, %v25041_v8, -inf }
0x1de8   :  { %5741 = vmax.xlane.f32.xlu0 %v5740_v62 }
0x1df3   :  { %v5727_v38 = vpop.xlane.xlu0 %5726 }
0x1df4   :  { %v5745_v50 = vsub.f32 %v5356_v33, %v5727_v38 }
0x1df6   :  { %v5755_v63 = vmul.f32 1.442695, %v5745_v50 }
0x1df7   :  { %v5730_v34 = vpop.xlane.xlu0 %5729 }
0x1df8   :  { %22398 = vpow2.f32 %v5755_v63  ;;  %v5746_v13 = vsub.f32 %v5428_v53, %v5730_v34 }
0x1dfa   :  { %v5757_v42 = vmul.f32 1.442695, %v5746_v13 }
0x1dfc   :  { %22400 = vpow2.f32 %v5757_v42 }
0x1e02   :  { %v25047_v2 = vpop.eup %22398 }
0x1e03   :  { %v5773_v37 = vsel %vm1804_vm3, %v25047_v2, 0.0 }
0x1e04   :  { %5774 = vadd.xlane.f32.xlu1 %v5773_v37 }
0x1e06   :  { %v25051_v5 = vpop.eup %22400 }
0x1e07   :  { %v5776_v15 = vsel %vm1804_vm3, %v25051_v5, 0.0 }
0x1e08   :  { %5777 = vadd.xlane.f32.xlu0 %v5776_v15 }
0x1e33   :  { %v5733_v62 = vpop.xlane.xlu1 %5732 }
0x1e34   :  { %v5747_v33 = vsub.f32 %v5500_v12, %v5733_v62 }
0x1e35   :  { %v5736_v38 = vpop.xlane.xlu0 %5735 }
0x1e36   :  { %v5759_v50 = vmul.f32 1.442695, %v5747_v33  ;;  %v5748_v63 = vsub.f32 %v5572_v16, %v5736_v38 }
0x1e38   :  { %22402 = vpow2.f32 %v5759_v50  ;;  %v5761_v53 = vmul.f32 1.442695, %v5748_v63 }
0x1e3a   :  { %22404 = vpow2.f32 %v5761_v53 }
0x1e42   :  { %v25055_v34 = vpop.eup %22402 }
0x1e43   :  { %v5779_v13 = vsel %vm1804_vm3, %v25055_v34, 0.0 }
0x1e44   :  { %v25059_v42 = vpop.eup %22404  ;;  %5780 = vadd.xlane.f32.xlu1 %v5779_v13 }
0x1e45   :  { %v5782_v37 = vsel %vm1804_vm3, %v25059_v42, 0.0 }
0x1e46   :  { %5783 = vadd.xlane.f32.xlu0 %v5782_v37 }
0x1e51   :  { %v5769_v15 = vpop.xlane.xlu1 %5768 }
0x1e52   :  { %22406 = vrcp.f32 %v5769_v15 }
0x1e53   :  { %v5772_v12 = vpop.xlane.xlu0 %5771 }
0x1e54   :  { %22408 = vrcp.f32 %v5772_v12 }
0x1e5c   :  { %v22407_v16 = vpop.eup %22406 }
0x1e5d   :  { %v5799_v62 = vmul.f32 %v22407_v16, %v22395_v4 }
0x1e5e   :  { %v22409_v33 = vpop.eup %22408 }
0x1e5f   :  { %17041 = vmatmul.mubr.f32.vlgmr.msra.gmra.mrb[58].mxu0 %v5799_v62  ;;  %v5800_v38 = vmul.f32 %v22409_v33, %v22397_v59 }
0x1e60   :  { %20605 = vmatpush3.bf16.msra.mxu0 %v23119_v0  ;;  %17110 = vmatprep.mubr.msk.f32.mxu0 %vm22637_vm0, %v27284_v3 }
0x1e61   :  { %v5815_v50 = vrot.slane %v5800_v38, 7  ;;  %17076 = vmatmul.mubr.f32.vlgmr.msra.gmra.mrb[62].mxu1 %v5800_v38  ;;  %20606 = vmatprep.subr.bf16.mxu0 %v27285_v51 }
0x1e62   :  { %20629 = vmatpush3.bf16.msra.mxu1 %v23124_v7  ;;  %17145 = vmatprep.mubr.msk.f32.mxu1 %vm22637_vm0, %v27284_v3 }
0x1e63   :  { %v5816_v63 = vsel %vm1902_vm4, %v5815_v50, %v5799_v62  ;;  %20630 = vmatprep.subr.bf16.mxu1 %v27285_v51 }
0x1e64   :  { %20608 = vmatpush3.bf16.msra.mxu0 %v23157_v22 }
0x1e65   :  { %20609 = vmatprep.subr.bf16.mxu0 %v27285_v51 }
0x1e66   :  { %20632 = vmatpush3.bf16.msra.mxu1 %v23159_v25 }
0x1e67   :  { %20633 = vmatprep.subr.bf16.mxu1 %v27285_v51 }
0x1e68   :  { %20611 = vmatpush3.bf16.msra.mxu0 %v23181_v36 }
0x1e69   :  { %20612 = vmatprep.subr.bf16.mxu0 %v27285_v51 }
0x1e6a   :  { %20635 = vmatpush3.bf16.msra.mxu1 %v23183_v39 }
0x1e6b   :  { %20636 = vmatprep.subr.bf16.mxu1 %v27285_v51 }
0x1e6c   :  { %20614 = vmatpush3.bf16.msra.mxu0 %v23205_v49 }
0x1e6d   :  { %20615 = vmatprep.subr.bf16.mxu0 %v27285_v51 }
0x1e6e   :  { %20638 = vmatpush3.bf16.msra.mxu1 %v23207_v52 }
0x1e6f   :  { %20639 = vmatprep.subr.bf16.mxu1 %v27285_v51 }
0x1e70   :  { %20617 = vmatpush3.bf16.msra.mxu0 %v23229_v1 }
0x1e71   :  { %20618 = vmatprep.subr.bf16.mxu0 %v27285_v51 }
0x1e72   :  { %20641 = vmatpush3.bf16.msra.mxu1 %v23231_v14 }
0x1e73   :  { %v5739_v59 = vpop.xlane.xlu1 %5738  ;;  %20642 = vmatprep.subr.bf16.mxu1 %v27285_v51 }
0x1e74   :  { %v5749_v4 = vsub.f32 %v25038_v47, %v5739_v59  ;;  %20620 = vmatpush3.bf16.msra.mxu0 %v23253_v30 }
0x1e75   :  { %v5742_v53 = vpop.xlane.xlu0 %5741  ;;  %20621 = vmatprep.subr.bf16.mxu0 %v27285_v51 }
0x1e76   :  { %v5763_v13 = vmul.f32 1.442695, %v5749_v4  ;;  %v5750_v37 = vsub.f32 %v25041_v8, %v5742_v53  ;;  %20644 = vmatpush3.bf16.msra.mxu1 %v23255_v31 }
0x1e77   :  { %20645 = vmatprep.subr.bf16.mxu1 %v27285_v51 }
0x1e78   :  { %22410 = vpow2.f32 %v5763_v13  ;;  %v5765_v15 = vmul.f32 1.442695, %v5750_v37  ;;  %20623 = vmatpush3.bf16.msra.mxu0 %v23277_v45 }
0x1e79   :  { %20624 = vmatprep.subr.bf16.mxu0 %v27285_v51 }
0x1e7a   :  { %22412 = vpow2.f32 %v5765_v15  ;;  %20647 = vmatpush3.bf16.msra.mxu1 %v23279_v57 }
0x1e7b   :  { %20648 = vmatprep.subr.bf16.mxu1 %v27285_v51 }
0x1e7c   :  { %20626 = vmatpush3.bf16.msra.mxu0 %v23301_v18 }
0x1e7d   :  { %20651 = vmatprep.subr.bf16.mxu0 %v27285_v51 }
0x1e7e   :  { %20650 = vmatpush3.bf16.msra.mxu1 %v23303_v21 }
0x1e7f   :  { %20675 = vmatprep.subr.bf16.mxu1 %v27285_v51 }
0x1e82   :  { %v25102_v47 = vpop.eup %22410 }
0x1e83   :  { %v5785_v8 = vsel %vm1804_vm3, %v25102_v47, 0.0 }
0x1e84   :  { %v25106_v12 = vpop.eup %22412  ;;  %5786 = vadd.xlane.f32.xlu1 %v5785_v8 }
0x1e85   :  { %v5788_v16 = vsel %vm1804_vm3, %v25106_v12, 0.0 }
0x1e86   :  { %5789 = vadd.xlane.f32.xlu0 %v5788_v16 }
0x1e91   :  { %v5775_v62 = vpop.xlane.xlu1 %5774 }
0x1e92   :  { %22414 = vrcp.f32 %v5775_v62 }
0x1e95   :  { %v5778_v33 = vpop.xlane.xlu0 %5777 }
0x1e96   :  { %22416 = vrcp.f32 %v5778_v33 }
0x1e9c   :  { %v22415_v38 = vpop.eup %22414 }
0x1e9d   :  { %v5801_v50 = vmul.f32 %v22415_v38, %v25047_v2 }
0x1e9f   :  { %v5817_v59 = vrot.slane %v5801_v50, 6  ;;  %17111 = vmatmul.mubr.f32.vlgmr.msra.gmra.mrb[60].mxu0 %v5801_v50  ;;  %v27443_v50 = vld [vmem:[#allocation53_spill] sm:$0xff] }
0x1ea0   :  { %v22417_v4 = vpop.eup %22416  ;;  %20653 = vmatpush3.bf16.msra.mxu0 %v23325_v44  ;;  %17180 = vmatprep.mubr.msk.f32.mxu0 %vm22637_vm0, %v27284_v3 }
0x1ea1   :  { %v5818_v53 = vsel %vm1905_vm5, %v5817_v59, %v5816_v63  ;;  %v5802_v13 = vmul.f32 %v22417_v4, %v25051_v5  ;;  %20654 = vmatprep.subr.bf16.mxu0 %v27285_v51  ;;  %v27444_v59 = vld [vmem:[#allocation54_spill] sm:$0xff]  ;;  %v27445_v4 = vld [vmem:[#allocation55_spill] sm:$0xff] }
0x1ea3   :  { %v5819_v37 = vrot.slane %v5802_v13, 5  ;;  %17146 = vmatmul.mubr.f32.vlgmr.msra.gmra.mrb[64].mxu1 %v5802_v13 }
0x1ea4   :  { %20677 = vmatpush3.bf16.msra.mxu1 %v23329_v60  ;;  %20656 = vmatpush3.bf16.msra.mxu0 %v23359_v35 }
0x1ea5   :  { %v5820_v2 = vsel %vm1908_vm6, %v5819_v37, %v5818_v53  ;;  %20678 = vmatprep.subr.bf16.mxu1 %v27285_v51  ;;  %20657 = vmatprep.subr.bf16.mxu0 %v27285_v51  ;;  %v27446_v53 = vld [vmem:[#allocation56_spill] sm:$0xff] }
0x1ea6   :  { %17215 = vmatprep.mubr.msk.f32.mxu1 %vm22637_vm0, %v27284_v3 }
0x1ea8   :  { %20680 = vmatpush3.bf16.msra.mxu1 %v23361_v40  ;;  %20659 = vmatpush3.bf16.msra.mxu0 %v23383_v10 }
0x1ea9   :  { %20681 = vmatprep.subr.bf16.mxu1 %v27285_v51  ;;  %20660 = vmatprep.subr.bf16.mxu0 %v27285_v51 }
0x1eac   :  { %20683 = vmatpush3.bf16.msra.mxu1 %v23385_v17  ;;  %20662 = vmatpush3.bf16.msra.mxu0 %v23407_v61 }
0x1ead   :  { %20684 = vmatprep.subr.bf16.mxu1 %v27285_v51  ;;  %20663 = vmatprep.subr.bf16.mxu0 %v27285_v51 }
0x1eb0   :  { %20686 = vmatpush3.bf16.msra.mxu1 %v23409_v6  ;;  %20665 = vmatpush3.bf16.msra.mxu0 %v23431_v41 }
0x1eb1   :  { %20687 = vmatprep.subr.bf16.mxu1 %v27285_v51  ;;  %20666 = vmatprep.subr.bf16.mxu0 %v27285_v51 }
0x1eb4   :  { %20689 = vmatpush3.bf16.msra.mxu1 %v23433_v58  ;;  %20668 = vmatpush3.bf16.msra.mxu0 %v23455_v11 }
0x1eb5   :  { %20690 = vmatprep.subr.bf16.mxu1 %v27285_v51  ;;  %20669 = vmatprep.subr.bf16.mxu0 %v27285_v51 }
0x1eb8   :  { %20692 = vmatpush3.bf16.msra.mxu1 %v23457_v26  ;;  %20671 = vmatpush3.bf16.msra.mxu0 %v23479_v43 }
0x1eb9   :  { %20693 = vmatprep.subr.bf16.mxu1 %v27285_v51  ;;  %20672 = vmatprep.subr.bf16.mxu0 %v27285_v51 }
0x1ebc   :  { %20695 = vmatpush3.bf16.msra.mxu1 %v23481_v23  ;;  %20674 = vmatpush3.bf16.msra.mxu0 %v23505_v29 }
0x1ebd   :  { %20696 = vmatprep.subr.bf16.mxu1 %v27285_v51  ;;  %20699 = vmatprep.subr.bf16.mxu0 %v27285_v51 }
0x1ec0   :  { %20698 = vmatpush3.bf16.msra.mxu1 %v23507_v55 }
0x1ec1   :  { %20723 = vmatprep.subr.bf16.mxu1 %v27285_v51 }
0x1ed1   :  { %v5781_v5 = vpop.xlane.xlu1 %5780 }
0x1ed2   :  { %22418 = vrcp.f32 %v5781_v5 }
0x1ed3   :  { %v5784_v63 = vpop.xlane.xlu0 %5783 }
0x1ed4   :  { %22420 = vrcp.f32 %v5784_v63 }
0x1edc   :  { %v22419_v15 = vpop.eup %22418 }
0x1edd   :  { %v5803_v8 = vmul.f32 %v22419_v15, %v25055_v34  ;;  %v27441_v34 = vld [vmem:[#allocation51_spill] sm:$0xff] }
0x1ede   :  { %v22421_v16 = vpop.eup %22420 }
0x1edf   :  { %v5821_v62 = vrot.slane %v5803_v8, 4  ;;  %17181 = vmatmul.mubr.f32.vlgmr.msra.gmra.mrb[62].mxu0 %v5803_v8  ;;  %v5804_v33 = vmul.f32 %v22421_v16, %v25059_v42  ;;  %v27442_v42 = vld [vmem:[#allocation52_spill] sm:$0xff] }
0x1ee0   :  { %20701 = vmatpush3.bf16.msra.mxu0 %v23530_v54  ;;  %17250 = vmatprep.mubr.msk.f32.mxu0 %vm22637_vm0, %v27284_v3 }
0x1ee1   :  { %v5822_v38 = vsel %vm1911_vm7, %v5821_v62, %v5820_v2  ;;  %17216 = vmatmul.mubr.f32.vlgmr.msra.gmra.mrb[66].mxu1 %v5804_v33  ;;  %20702 = vmatprep.subr.bf16.mxu0 %v27285_v51  ;;  %v5823_v5 = vrot.slane %v5804_v33, 3  ;;  %v27448_v33 = vld [vmem:[#allocation9_spill] sm:$0xff] }
0x1ee2   :  { %20725 = vmatpush3.bf16.msra.mxu1 %v23535_v20  ;;  %17285 = vmatprep.mubr.msk.f32.mxu1 %vm22637_vm0, %v27284_v3 }
0x1ee3   :  { %20726 = vmatprep.subr.bf16.mxu1 %v27285_v51  ;;  %v5824_v62 = vsel %vm1914_vm8, %v5823_v5, %v5822_v38  ;;  %v27450_v38 = vld [vmem:[#allocation11_spill] sm:$0xff] }
0x1ee4   :  { %20704 = vmatpush3.bf16.msra.mxu0 %v27308_v24 }
0x1ee5   :  { %20705 = vmatprep.subr.bf16.mxu0 %v27285_v51 }
0x1ee6   :  { %20728 = vmatpush3.bf16.msra.mxu1 %v27309_v19 }
0x1ee7   :  { %20729 = vmatprep.subr.bf16.mxu1 %v27285_v51 }
0x1ee8   :  { %20707 = vmatpush3.bf16.msra.mxu0 %v27310_v28 }
0x1ee9   :  { %20708 = vmatprep.subr.bf16.mxu0 %v27285_v51 }
0x1eea   :  { %20731 = vmatpush3.bf16.msra.mxu1 %v27311_v46 }
0x1eeb   :  { %20732 = vmatprep.subr.bf16.mxu1 %v27285_v51 }
0x1eec   :  { %20710 = vmatpush3.bf16.msra.mxu0 %v27312_v9 }
0x1eed   :  { %20711 = vmatprep.subr.bf16.mxu0 %v27285_v51 }
0x1eee   :  { %20734 = vmatpush3.bf16.msra.mxu1 %v27313_v32 }
0x1eef   :  { %20735 = vmatprep.subr.bf16.mxu1 %v27285_v51 }
0x1ef0   :  { %20713 = vmatpush3.bf16.msra.mxu0 %v27314_v56 }
0x1ef1   :  { %20714 = vmatprep.subr.bf16.mxu0 %v27285_v51 }
0x1ef2   :  { %20737 = vmatpush3.bf16.msra.mxu1 %v27315_v48 }
0x1ef3   :  { %20738 = vmatprep.subr.bf16.mxu1 %v27285_v51 }
0x1ef4   :  { %20716 = vmatpush3.bf16.msra.mxu0 %v27441_v34 }
0x1ef5   :  { %20717 = vmatprep.subr.bf16.mxu0 %v27285_v51 }
0x1ef6   :  { %20740 = vmatpush3.bf16.msra.mxu1 %v27442_v42 }
0x1ef7   :  { %20741 = vmatprep.subr.bf16.mxu1 %v27285_v51 }
0x1ef8   :  { %20719 = vmatpush3.bf16.msra.mxu0 %v27443_v50 }
0x1ef9   :  { %20720 = vmatprep.subr.bf16.mxu0 %v27285_v51 }
0x1efa   :  { %20743 = vmatpush3.bf16.msra.mxu1 %v27444_v59 }
0x1efb   :  { %20744 = vmatprep.subr.bf16.mxu1 %v27285_v51 }
0x1efc   :  { %20722 = vmatpush3.bf16.msra.mxu0 %v27445_v4 }
0x1efd   :  { %20747 = vmatprep.subr.bf16.mxu0 %v27285_v51 }
0x1efe   :  { %20746 = vmatpush3.bf16.msra.mxu1 %v27446_v53 }
0x1eff   :  { %20759 = vmatprep.subr.bf16.mxu1 %v27285_v51 }
0x1f11   :  { %v5787_v13 = vpop.xlane.xlu1 %5786 }
0x1f12   :  { %22422 = vrcp.f32 %v5787_v13 }
0x1f13   :  { %v5790_v37 = vpop.xlane.xlu0 %5789 }
0x1f14   :  { %22424 = vrcp.f32 %v5790_v37 }
0x1f1c   :  { %v22423_v2 = vpop.eup %22422 }
0x1f1d   :  { %v5805_v63 = vmul.f32 %v22423_v2, %v25102_v47 }
0x1f1e   :  { %v22425_v15 = vpop.eup %22424 }
0x1f1f   :  { %v5825_v8 = vrot.slane %v5805_v63, 2  ;;  %17251 = vmatmul.mubr.f32.vlgmr.msra.gmra.mrb[64].mxu0 %v5805_v63  ;;  %v5806_v16 = vmul.f32 %v22425_v15, %v25106_v12  ;;  %v27449_v12 = vld [vmem:[#allocation44_spill] sm:$0xff] }
0x1f20   :  { %20749 = vmatpush3.bf16.msra.mxu0 %v27447_v27  ;;  %17296 = vmatprep.mubr.msk.f32.mxu0 %vm22637_vm0, %v27284_v3 }
0x1f21   :  { %v5826_v13 = vsel %vm1917_vm9, %v5825_v8, %v5824_v62  ;;  %v5827_v53 = vrot.slane %v5806_v16, 1  ;;  %17286 = vmatmul.mubr.f32.vlgmr.msra.gmra.mrb[68].mxu1 %v5806_v16  ;;  %20750 = vmatprep.subr.bf16.mxu0 %v27285_v51 }
0x1f22   :  { %20761 = vmatpush3.bf16.msra.mxu1 %v27448_v33  ;;  %17318 = vmatprep.mubr.msk.f32.mxu1 %vm22637_vm0, %v27284_v3 }
0x1f23   :  { %v5828_v47 = vsel %vm1920_vm10, %v5827_v53, %v5826_v13  ;;  %20762 = vmatprep.subr.bf16.mxu1 %v27285_v51 }
0x1f24   :  { %5831 = vst [vmem:[#allocation5 + $0x10] sm:$0xff] %v5828_v47  ;;  %20752 = vmatpush3.bf16.msra.mxu0 %v27449_v12 }
0x1f25   :  { %20753 = vmatprep.subr.bf16.mxu0 %v27285_v51 }
0x1f26   :  { %20764 = vmatpush3.bf16.msra.mxu1 %v27450_v38 }
0x1f27   :  { %20765 = vmatprep.subr.bf16.mxu1 %v27285_v51 }
0x1f32   :  { %v5898_v37 = vpop.f32.mrb[58].mxu0 }
0x1f33   :  { %v17042_v2 = vpop.f32.mrb[59].mxu0 }
0x1f34   :  { %v5968_v5 = vpop.f32.mrb[62].mxu1 }
0x1f35   :  { %v6400_v63 = vrot.slane %v5968_v5, 7  ;;  %v17077_v15 = vpop.f32.mrb[63].mxu1 }
0x1f37   :  { %v6401_v8 = vsel %vm1902_vm4, %v6400_v63, %v5898_v37 }
0x1f72   :  { %v6038_v16 = vpop.f32.mrb[60].mxu0 }
0x1f73   :  { %v6402_v53 = vrot.slane %v6038_v16, 6  ;;  %v17112_v62 = vpop.f32.mrb[61].mxu0 }
0x1f75   :  { %v6403_v13 = vsel %vm1905_vm5, %v6402_v53, %v6401_v8 }
0x1f76   :  { %v6108_v47 = vpop.f32.mrb[64].mxu1 }
0x1f77   :  { %v6404_v12 = vrot.slane %v6108_v47, 5  ;;  %v17147_v33 = vpop.f32.mrb[65].mxu1  ;;  %v27458_v47 = vld [vmem:[#allocation19_spill] sm:$0xff] }
0x1f79   :  { %v6405_v27 = vsel %vm1908_vm6, %v6404_v12, %v6403_v13  ;;  %v27457_v13 = vld [vmem:[#allocation17_spill] sm:$0xff] }
0x1fb2   :  { %v6178_v38 = vpop.f32.mrb[62].mxu0 }
0x1fb3   :  { %v6406_v4 = vrot.slane %v6178_v38, 4  ;;  %v17182_v59 = vpop.f32.mrb[63].mxu0  ;;  %v27456_v38 = vld [vmem:[#allocation20_spill] sm:$0xff] }
0x1fb4   :  { %v6248_v50 = vpop.f32.mrb[66].mxu1  ;;  %v27451_v59 = vld [vmem:[#allocation45_spill] sm:$0xff] }
0x1fb5   :  { %v6407_v2 = vsel %vm1911_vm7, %v6406_v4, %v6405_v27  ;;  %v6408_v5 = vrot.slane %v6248_v50, 3  ;;  %v17217_v15 = vpop.f32.mrb[67].mxu1  ;;  %v27452_v27 = vld [vmem:[#allocation46_spill] sm:$0xff]  ;;  %v27453_v50 = vld [vmem:[#allocation21_spill] sm:$0xff] }
0x1fb6   :  { %v27455_v4 = vld [vmem:[#allocation14_spill] sm:$0xff] }
0x1fb7   :  { %v6409_v37 = vsel %vm1914_vm8, %v6408_v5, %v6407_v2 }
0x1ff2   :  { %v6318_v63 = vpop.f32.mrb[64].mxu0 }
0x1ff3   :  { %v6410_v16 = vrot.slane %v6318_v63, 2  ;;  %v17252_v62 = vpop.f32.mrb[65].mxu0 }
0x1ff4   :  { %v6388_v42 = vpop.f32.mrb[68].mxu1  ;;  %v27460_v62 = vld [vmem:[#allocation12_spill] sm:$0xff] }
0x1ff5   :  { %v6411_v8 = vsel %vm1917_vm9, %v6410_v16, %v6409_v37  ;;  %v6412_v53 = vrot.slane %v6388_v42, 1  ;;  %v17287_v33 = vpop.f32.mrb[69].mxu1  ;;  %v27454_v42 = vld [vmem:[#allocation13_spill] sm:$0xff]  ;;  %v27459_v16 = vld [vmem:[#allocation10_spill] sm:$0xff] }
0x1ff6   :  { %v27462_v33 = vld [vmem:[#allocation18_spill] sm:$0xff] }
0x1ff7   :  { %v6413_v12 = vsel %vm1920_vm10, %v6412_v53, %v6411_v8  ;;  %v13036_v8 = vld [vmem:[%s27039_s0 + $0x18] sm:$0xff]  ;;  %v27461_v53 = vld [vmem:[#allocation16_spill] sm:$0xff] }
0x1ff8   :  { %17297 = vmatmul.mubr.msk.f32.vlgmr.msra.gmra.mrb[66].mxu0 %vm292_vm1, %v6413_v12  ;;  %v27463_v12 = vld [vmem:[#allocation22_spill] sm:$0xff] }
0x1ff9   :  { %20755 = vmatpush3.bf16.msra.mxu0 %v27451_v59  ;;  %17307 = vmatprep.mubr.msk.f32.mxu0 %vm22637_vm0, %v27284_v3 }
0x1ffa   :  { %20756 = vmatprep.subr.bf16.mxu0 %v27285_v51 }
0x1ffd   :  { %20758 = vmatpush3.bf16.msra.mxu0 %v27452_v27 }
0x1ffe   :  { %20771 = vmatprep.subr.bf16.mxu0 %v27285_v51 }
0x2000   :  { %17308 = vmatmul.mubr.msk.f32.vlgmr.msra.gmra.mrb[66].mxu0 %vm292_vm1, %v27453_v50 }
0x2001   :  { %20773 = vmatpush3.bf16.msra.mxu0 %v27454_v42  ;;  %17340 = vmatprep.mubr.msk.f32.mxu0 %vm22637_vm0, %v27284_v3 }
0x2002   :  { %20774 = vmatprep.subr.bf16.mxu0 %v27285_v51 }
0x2005   :  { %20776 = vmatpush3.bf16.msra.mxu0 %v27455_v4 }
0x2006   :  { %20783 = vmatprep.subr.bf16.mxu0 %v27285_v51 }
0x2008   :  { %17341 = vmatmul.mubr.msk.f32.vlgmr.msra.gmra.mrb[68].mxu0 %vm292_vm1, %v27456_v38  ;;  %v27464_v38 = vld [vmem:[#allocation23_spill] sm:$0xff] }
0x2009   :  { %20785 = vmatpush3.bf16.msra.mxu0 %v27457_v13  ;;  %17362 = vmatprep.mubr.msk.f32.mxu0 %vm22637_vm0, %v27284_v3 }
0x200a   :  { %20786 = vmatprep.subr.bf16.mxu0 %v27285_v51 }
0x200d   :  { %20788 = vmatpush3.bf16.msra.mxu0 %v27458_v47 }
0x200e   :  { %20795 = vmatprep.subr.bf16.mxu0 %v27285_v51 }
0x20d3   :  { %v6552_v2 = vpop.f32.mrb[66].mxu0 }
0x20d4   :  { %22426 = vtanh.f32 %v6552_v2  ;;  %v17309_v5 = vpop.f32.mrb[67].mxu0 }
0x20db   :  { %v6772_v15 = vpop.f32.mrb[68].mxu0 }
0x20dc   :  { %v17342_v37 = vpop.f32.mrb[69].mxu0 }
0x20de   :  { %v22427_v63 = vpop.eup %22426 }
0x20df   :  { %6557 = vst.msk [vmem:[#allocation2 + $0x10] sm:$0xff] %vm292_vm1, %v22427_v63  ;;  %17319 = vmatmul.mubr.msk.f32.vlgmr.msra.gmra.mrb[70].mxu1 %vm292_vm1, %v22427_v63 }
0x20e0   :  { %20767 = vmatpush3.bf16.msra.mxu1 %v27459_v16  ;;  %17329 = vmatprep.mubr.msk.f32.mxu1 %vm22637_vm0, %v27284_v3 }
0x20e1   :  { %20768 = vmatprep.subr.bf16.mxu1 %v27285_v51 }
0x20e4   :  { %20770 = vmatpush3.bf16.msra.mxu1 %v27460_v62 }
0x20e5   :  { %20777 = vmatprep.subr.bf16.mxu1 %v27285_v51 }
0x20e7   :  { %17330 = vmatmul.mubr.msk.f32.vlgmr.msra.gmra.mrb[72].mxu1 %vm292_vm1, %v13036_v8 }
0x20e8   :  { %20779 = vmatpush3.bf16.msra.mxu1 %v27461_v53  ;;  %17351 = vmatprep.mubr.msk.f32.mxu1 %vm22637_vm0, %v27284_v3 }
0x20e9   :  { %20780 = vmatprep.subr.bf16.mxu1 %v27285_v51 }
0x20ec   :  { %20782 = vmatpush3.bf16.msra.mxu1 %v27462_v33 }
0x20ed   :  { %20789 = vmatprep.subr.bf16.mxu1 %v27285_v51 }
0x20ef   :  { %17352 = vmatmul.mubr.msk.f32.vlgmr.msra.gmra.mrb[74].mxu1 %vm292_vm1, %v27453_v50  ;;  %v22582_v50 = vld [vmem:[%s27046_s7] ss:$0 sm:$0xff] }
0x20f0   :  { %20791 = vmatpush3.bf16.msra.mxu1 %v27463_v12  ;;  %17373 = vmatprep.mubr.msk.f32.mxu1 %vm22637_vm0, %v27284_v3 }
0x20f1   :  { %20792 = vmatprep.subr.bf16.mxu1 %v27285_v51 }
0x20f4   :  { %20794 = vmatpush3.bf16.msra.mxu1 %v27464_v38 }
0x20f5   :  { %20827 = vmatprep.subr.bf16.mxu1 %v27285_v51 }
0x21b2   :  { %v6629_v2 = vpop.f32.mrb[70].mxu1 }
0x21b3   :  { %v17320_v5 = vpop.f32.mrb[71].mxu1 }
0x21ba   :  { %v6702_v37 = vpop.f32.mrb[72].mxu1 }
0x21bb   :  { %v6703_v63 = vadd.f32 %v6702_v37, %v6629_v2  ;;  %v17331_v8 = vpop.f32.mrb[73].mxu1 }
0x21bd   :  { %v6776_v33 = vadd.f32 %v6772_v15, %v6703_v63  ;;  %v27465_v15 = vld [vmem:[#allocation34_spill] sm:$0xff] }
0x21bf   :  { %v6777_v12 = vadd.f32 %v22582_v50, %v6776_v33  ;;  %v27470_v50 = vld [vmem:[#allocation26_spill] sm:$0xff] }
0x21c1   :  { %22428 = vtanh.f32 %v6777_v12  ;;  %v13040_v38 = vmul.f32 -1.442695, %v6777_v12 }
0x21c2   :  { %v6868_v53 = vpop.f32.mrb[74].mxu1 }
0x21c3   :  { %v17353_v62 = vpop.f32.mrb[75].mxu1  ;;  %22430 = vpow2.f32 %v13040_v38  ;;  %v27503_v38 = vld [vmem:[#allocation61_spill] sm:$0xff] }
0x21cb   :  { %v22429_v16 = vpop.eup %22428 }
0x21cc   :  { %6787 = vrot.lane.b32.xlu1 %v22429_v16, %s22639_s21 }
0x21cd   :  { %v22431_v47 = vpop.eup %22430 }
0x21ce   :  { %v6781_v13 = vadd.f32 1.0, %v22431_v47  ;;  %v27468_v47 = vld [vmem:[#allocation25_spill] sm:$0xff] }
0x21d0   :  { %22432 = vrcp.f32 %v6781_v13 }
0x21da   :  { %v22433_v5 = vpop.eup %22432 }
0x21db   :  { %v6785_v63 = vmul.f32 %v22433_v5, %v27465_v15  ;;  %v27474_v15 = vld [vmem:[#allocation30_spill] sm:$0xff] }
0x223e   :  { %v6788_v2 = vpop.permute.xlu1 %6787 }
0x223f   :  { %v6790_v37 = vmul.f32 %v22433_v5, %v6788_v2  ;;  %v27472_v2 = vld [vmem:[#allocation28_spill] sm:$0xff] }
0x2241   :  { %6792 = vrot.lane.b32.xlu0 %v6790_v37, %s22640_s24  ;;  %v27473_v37 = vld [vmem:[#allocation29_spill] sm:$0xff] }
0x22b3   :  { %v6793_v8 = vpop.permute.xlu0 %6792 }
0x22b4   :  { %v25268_v33 = vadd.f32 %v6793_v8, %v6785_v63  ;;  %v27475_v63 = vld [vmem:[#allocation31_spill] sm:$0xff]  ;;  %v27476_v8 = vld [vmem:[#allocation32_spill] sm:$0xff] }
0x22b6   :  { %27466 = vst [vmem:[#allocation50_spill] sm:$0xff] %v25268_v33  ;;  %22434 = vtanh.f32 %v25268_v33  ;;  %v22583_v33 = vld [vmem:[%s27046_s7 + $0x1] ss:$0 sm:$0xff] }
0x22c0   :  { %v22435_v62 = vpop.eup %22434 }
0x22c1   :  { %6798 = vrot.lane.b32.xlu1 %v22435_v62, %s22639_s21 }
0x2333   :  { %v6799_v16 = vpop.permute.xlu1 %6798 }
0x2334   :  { %v6801_v12 = vmul.f32 %v22433_v5, %v6799_v16  ;;  %v27471_v5 = vld [vmem:[#allocation27_spill] sm:$0xff] }
0x2336   :  { %6873 = vrot.lane.b32.xlu1 %v6801_v12, %s22640_s24 }
0x23a8   :  { %v25273_v13 = vpop.permute.xlu1 %6873 }
0x23a9   :  { %27467 = vst [vmem:[#allocation48_spill] sm:$0xff] %v25273_v13  ;;  %17363 = vmatmul.mubr.msk.f32.vlgmr.msra.gmra.mrb[70].mxu0 %vm292_vm1, %v25273_v13 }
0x23aa   :  { %20798 = vmatpush3.bf16.xpose.msk.msra.mxu0 %vm22904_vm2, %v27468_v47  ;;  %17408 = vmatprep.mubr.msk.f32.mxu0 %vm22637_vm0, %v27284_v3 }
0x23ab   :  { %20799 = vmatprep.subr.bf16.mxu0 %v27285_v51 }
0x23b2   :  { %20802 = vmatpush3.bf16.xpose.msk.msra.mxu0 %vm22904_vm2, %v27470_v50 }
0x23b3   :  { %20803 = vmatprep.subr.bf16.mxu0 %v27285_v51 }
0x23ba   :  { %20806 = vmatpush3.bf16.xpose.msk.msra.mxu0 %vm22904_vm2, %v27471_v5 }
0x23bb   :  { %20807 = vmatprep.subr.bf16.mxu0 %v27285_v51 }
0x23c2   :  { %20810 = vmatpush3.bf16.xpose.msk.msra.mxu0 %vm22904_vm2, %v27472_v2 }
0x23c3   :  { %20811 = vmatprep.subr.bf16.mxu0 %v27285_v51 }
0x23ca   :  { %20814 = vmatpush3.bf16.xpose.msk.msra.mxu0 %vm22904_vm2, %v27473_v37 }
0x23cb   :  { %20815 = vmatprep.subr.bf16.mxu0 %v27285_v51 }
0x23d2   :  { %20818 = vmatpush3.bf16.xpose.msk.msra.mxu0 %vm22904_vm2, %v27474_v15 }
0x23d3   :  { %20819 = vmatprep.subr.bf16.mxu0 %v27285_v51 }
0x23da   :  { %20822 = vmatpush3.bf16.xpose.msk.msra.mxu0 %vm22904_vm2, %v27475_v63 }
0x23db   :  { %20823 = vmatprep.subr.bf16.mxu0 %v27285_v51 }
0x23e2   :  { %20826 = vmatpush3.bf16.xpose.msk.msra.mxu0 %vm22904_vm2, %v27476_v8 }
0x23e3   :  { %20859 = vmatprep.subr.bf16.mxu0 %v27285_v51 }
0x247c   :  { %v6943_v62 = vpop.f32.mrb[70].mxu0 }
0x247d   :  { %v6944_v16 = vadd.f32 %v6943_v62, %v6868_v53  ;;  %v17364_v12 = vpop.f32.mrb[71].mxu0  ;;  %v27477_v53 = vld [vmem:[#allocation15_spill] sm:$0xff] }
0x247f   :  { %v6947_v13 = vadd.f32 %v22583_v33, %v6944_v16  ;;  %v27485_v16 = vld [vmem:[#allocation39_spill] sm:$0xff] }
0x2481   :  { %22436 = vtanh.f32 %v6947_v13  ;;  %v13043_v42 = vmul.f32 -1.442695, %v6947_v13  ;;  %v27481_v13 = vld [vmem:[#allocation35_spill] sm:$0xff] }
0x2483   :  { %22438 = vpow2.f32 %v13043_v42 }
0x248b   :  { %v22437_v4 = vpop.eup %22436 }
0x248c   :  { %6957 = vrot.lane.b32.xlu0 %v22437_v4, %s22639_s21 }
0x248d   :  { %v22439_v27 = vpop.eup %22438 }
0x248e   :  { %v6951_v59 = vadd.f32 1.0, %v22439_v27  ;;  %v27480_v27 = vld [vmem:[#allocation33_spill] sm:$0xff] }
0x2490   :  { %22440 = vrcp.f32 %v6951_v59 }
0x249a   :  { %v22441_v8 = vpop.eup %22440 }
0x249b   :  { %v6955_v62 = vmul.f32 %v22441_v8, %v27477_v53  ;;  %v27486_v53 = vld [vmem:[#allocation40_spill] sm:$0xff] }
0x24fe   :  { %v6958_v63 = vpop.permute.xlu0 %6957 }
0x24ff   :  { %v6960_v15 = vmul.f32 %v22441_v8, %v6958_v63  ;;  %v27483_v63 = vld [vmem:[#allocation37_spill] sm:$0xff] }
0x2501   :  { %6962 = vrot.lane.b32.xlu1 %v6960_v15, %s22640_s24  ;;  %v27482_v15 = vld [vmem:[#allocation36_spill] sm:$0xff] }
0x2573   :  { %v6963_v12 = vpop.permute.xlu1 %6962 }
0x2574   :  { %v25317_v37 = vadd.f32 %v6963_v12, %v6955_v62  ;;  %v27487_v62 = vld [vmem:[#allocation41_spill] sm:$0xff] }
0x2576   :  { %27478 = vst [vmem:[#allocation47_spill] sm:$0xff] %v25317_v37  ;;  %22442 = vtanh.f32 %v25317_v37 }
0x2580   :  { %v22443_v33 = vpop.eup %22442 }
0x2581   :  { %6968 = vrot.lane.b32.xlu0 %v22443_v33, %s22639_s21  ;;  %v27488_v33 = vld [vmem:[#allocation42_spill] sm:$0xff] }
0x25f3   :  { %v6969_v4 = vpop.permute.xlu0 %6968 }
0x25f4   :  { %v6971_v42 = vmul.f32 %v22441_v8, %v6969_v4  ;;  %v27484_v8 = vld [vmem:[#allocation38_spill] sm:$0xff] }
0x25f6   :  { %6973 = vrot.lane.b32.xlu1 %v6971_v42, %s22640_s24 }
0x2668   :  { %v25322_v59 = vpop.permute.xlu1 %6973 }
0x2669   :  { %27479 = vst [vmem:[#allocation49_spill] sm:$0xff] %v25322_v59  ;;  %17374 = vmatmul.mubr.msk.f32.vlgmr.msra.gmra.mrb[76].mxu1 %vm292_vm1, %v25322_v59 }
0x266a   :  { %20830 = vmatpush3.bf16.xpose.msk.msra.mxu1 %vm22904_vm2, %v27480_v27  ;;  %17443 = vmatprep.mubr.msk.f32.mxu1 %vm22637_vm0, %v27284_v3 }
0x266b   :  { %20831 = vmatprep.subr.bf16.mxu1 %v27285_v51 }
0x2672   :  { %20834 = vmatpush3.bf16.xpose.msk.msra.mxu1 %vm22904_vm2, %v27481_v13 }
0x2673   :  { %20835 = vmatprep.subr.bf16.mxu1 %v27285_v51 }
0x267a   :  { %20838 = vmatpush3.bf16.xpose.msk.msra.mxu1 %vm22904_vm2, %v27482_v15 }
0x267b   :  { %20839 = vmatprep.subr.bf16.mxu1 %v27285_v51 }
0x2682   :  { %20842 = vmatpush3.bf16.xpose.msk.msra.mxu1 %vm22904_vm2, %v27483_v63 }
0x2683   :  { %20843 = vmatprep.subr.bf16.mxu1 %v27285_v51 }
0x268a   :  { %20846 = vmatpush3.bf16.xpose.msk.msra.mxu1 %vm22904_vm2, %v27484_v8 }
0x268b   :  { %20847 = vmatprep.subr.bf16.mxu1 %v27285_v51 }
0x2692   :  { %20850 = vmatpush3.bf16.xpose.msk.msra.mxu1 %vm22904_vm2, %v27485_v16 }
0x2693   :  { %20851 = vmatprep.subr.bf16.mxu1 %v27285_v51 }
0x269a   :  { %20854 = vmatpush3.bf16.xpose.msk.msra.mxu1 %vm22904_vm2, %v27486_v53 }
0x269b   :  { %20855 = vmatprep.subr.bf16.mxu1 %v27285_v51 }
0x26a2   :  { %20858 = vmatpush3.bf16.xpose.msk.msra.mxu1 %vm22904_vm2, %v27487_v62 }
0x26a3   :  { %20891 = vmatprep.subr.bf16.mxu1 %v27285_v51 }
0x273c   :  { %v25360_v12 = vpop.f32.mrb[76].mxu1 }
0x273d   :  { %v7055_v4 = vrot.slane %v25360_v12, %v27488_v33  ;;  %v17375_v42 = vpop.f32.mrb[77].mxu1 }
0x273f   :  { %v7063_v37 = vcombine.high %v7055_v4, %v7055_v4  ;;  %v7071_v59 = vrot.slane %v7055_v4, %v27488_v33 }
0x2741   :  { %v7085_v16 = vrot.slane %v7063_v37, %v27488_v33  ;;  %17409 = vmatmul.mubr.msk.f32.vlgmr.msra.gmra.mrb[72].mxu0 %vm292_vm1, %v7071_v59  ;;  %v7093_v37 = vcombine.high %v7071_v59, %v7071_v59  ;;  %v7048_v59 = vcombine.high %v25360_v12, %v25360_v12 }
0x2742   :  { %20862 = vmatpush3.bf16.xpose.msk.msra.mxu0 %vm22904_vm2, %v23119_v0  ;;  %17478 = vmatprep.mubr.msk.f32.mxu0 %vm22637_vm0, %v27284_v3 }
0x2743   :  { %17444 = vmatmul.mubr.msk.f32.vlgmr.msra.gmra.mrb[78].mxu1 %vm292_vm1, %v7085_v16  ;;  %20863 = vmatprep.subr.bf16.mxu0 %v27285_v51  ;;  %v7095_v4 = vcombine.high %v7085_v16, %v7085_v16  ;;  %v7062_v16 = vrot.slane %v7048_v59, %v27488_v33  ;;  %v27490_v59 = vld [vmem:[#allocation53_spill] sm:$0xff] }
0x2744   :  { %20894 = vmatpush3.bf16.xpose.msk.msra.mxu1 %vm22904_vm2, %v23124_v7  ;;  %17513 = vmatprep.mubr.msk.f32.mxu1 %vm22637_vm0, %v27284_v3 }
0x2745   :  { %20895 = vmatprep.subr.bf16.mxu1 %v27285_v51  ;;  %v7064_v42 = vcombine.high %v7062_v16, %v7062_v16 }
0x2747   :  { %v7092_v12 = vrot.slane %v7064_v42, %v27488_v33  ;;  %v27492_v42 = vld [vmem:[#allocation55_spill] sm:$0xff] }
0x274a   :  { %20866 = vmatpush3.bf16.xpose.msk.msra.mxu0 %vm22904_vm2, %v23157_v22 }
0x274b   :  { %20867 = vmatprep.subr.bf16.mxu0 %v27285_v51 }
0x274c   :  { %20898 = vmatpush3.bf16.xpose.msk.msra.mxu1 %vm22904_vm2, %v23159_v25 }
0x274d   :  { %20899 = vmatprep.subr.bf16.mxu1 %v27285_v51 }
0x2752   :  { %20870 = vmatpush3.bf16.xpose.msk.msra.mxu0 %vm22904_vm2, %v23181_v36 }
0x2753   :  { %20871 = vmatprep.subr.bf16.mxu0 %v27285_v51 }
0x2754   :  { %20902 = vmatpush3.bf16.xpose.msk.msra.mxu1 %vm22904_vm2, %v23183_v39 }
0x2755   :  { %20903 = vmatprep.subr.bf16.mxu1 %v27285_v51 }
0x275a   :  { %20874 = vmatpush3.bf16.xpose.msk.msra.mxu0 %vm22904_vm2, %v23205_v49 }
0x275b   :  { %20875 = vmatprep.subr.bf16.mxu0 %v27285_v51 }
0x275c   :  { %20906 = vmatpush3.bf16.xpose.msk.msra.mxu1 %vm22904_vm2, %v23207_v52 }
0x275d   :  { %20907 = vmatprep.subr.bf16.mxu1 %v27285_v51 }
0x2762   :  { %20878 = vmatpush3.bf16.xpose.msk.msra.mxu0 %vm22904_vm2, %v23229_v1 }
0x2763   :  { %20879 = vmatprep.subr.bf16.mxu0 %v27285_v51 }
0x2764   :  { %20910 = vmatpush3.bf16.xpose.msk.msra.mxu1 %vm22904_vm2, %v23231_v14 }
0x2765   :  { %20911 = vmatprep.subr.bf16.mxu1 %v27285_v51 }
0x276a   :  { %20882 = vmatpush3.bf16.xpose.msk.msra.mxu0 %vm22904_vm2, %v23253_v30 }
0x276b   :  { %20883 = vmatprep.subr.bf16.mxu0 %v27285_v51 }
0x276c   :  { %20914 = vmatpush3.bf16.xpose.msk.msra.mxu1 %vm22904_vm2, %v23255_v31 }
0x276d   :  { %20915 = vmatprep.subr.bf16.mxu1 %v27285_v51 }
0x2772   :  { %20886 = vmatpush3.bf16.xpose.msk.msra.mxu0 %vm22904_vm2, %v23277_v45 }
0x2773   :  { %20887 = vmatprep.subr.bf16.mxu0 %v27285_v51 }
0x2774   :  { %20918 = vmatpush3.bf16.xpose.msk.msra.mxu1 %vm22904_vm2, %v23279_v57 }
0x2775   :  { %20919 = vmatprep.subr.bf16.mxu1 %v27285_v51 }
0x277a   :  { %20890 = vmatpush3.bf16.xpose.msk.msra.mxu0 %vm22904_vm2, %v23301_v18 }
0x277b   :  { %20923 = vmatprep.subr.bf16.mxu0 %v27285_v51 }
0x277c   :  { %20922 = vmatpush3.bf16.xpose.msk.msra.mxu1 %vm22904_vm2, %v23303_v21 }
0x277d   :  { %20955 = vmatprep.subr.bf16.mxu1 %v27285_v51 }
0x2781   :  { %17479 = vmatmul.mubr.msk.f32.vlgmr.msra.gmra.mrb[74].mxu0 %vm292_vm1, %v7093_v37  ;;  %v7078_v37 = vrot.slane %v7062_v16, %v27488_v33  ;;  %v27491_v16 = vld [vmem:[#allocation54_spill] sm:$0xff]  ;;  %v27493_v33 = vld [vmem:[#allocation56_spill] sm:$0xff] }
0x2782   :  { %20926 = vmatpush3.bf16.xpose.msk.msra.mxu0 %vm22904_vm2, %v23325_v44  ;;  %17548 = vmatprep.mubr.msk.f32.mxu0 %vm22637_vm0, %v27284_v3 }
0x2783   :  { %17514 = vmatmul.mubr.msk.f32.vlgmr.msra.gmra.mrb[80].mxu1 %vm292_vm1, %v7095_v4  ;;  %20927 = vmatprep.subr.bf16.mxu0 %v27285_v51  ;;  %v27489_v4 = vld [vmem:[#allocation52_spill] sm:$0xff] }
0x2784   :  { %20958 = vmatpush3.bf16.xpose.msk.msra.mxu1 %vm22904_vm2, %v23329_v60  ;;  %17583 = vmatprep.mubr.msk.f32.mxu1 %vm22637_vm0, %v27284_v3 }
0x2785   :  { %20959 = vmatprep.subr.bf16.mxu1 %v27285_v51 }
0x278a   :  { %20930 = vmatpush3.bf16.xpose.msk.msra.mxu0 %vm22904_vm2, %v23359_v35 }
0x278b   :  { %20931 = vmatprep.subr.bf16.mxu0 %v27285_v51 }
0x278c   :  { %20962 = vmatpush3.bf16.xpose.msk.msra.mxu1 %vm22904_vm2, %v23361_v40 }
0x278d   :  { %20963 = vmatprep.subr.bf16.mxu1 %v27285_v51 }
0x2792   :  { %20934 = vmatpush3.bf16.xpose.msk.msra.mxu0 %vm22904_vm2, %v23383_v10 }
0x2793   :  { %20935 = vmatprep.subr.bf16.mxu0 %v27285_v51 }
0x2794   :  { %20966 = vmatpush3.bf16.xpose.msk.msra.mxu1 %vm22904_vm2, %v23385_v17 }
0x2795   :  { %20967 = vmatprep.subr.bf16.mxu1 %v27285_v51 }
0x279a   :  { %20938 = vmatpush3.bf16.xpose.msk.msra.mxu0 %vm22904_vm2, %v23407_v61 }
0x279b   :  { %20939 = vmatprep.subr.bf16.mxu0 %v27285_v51 }
0x279c   :  { %20970 = vmatpush3.bf16.xpose.msk.msra.mxu1 %vm22904_vm2, %v23409_v6 }
0x279d   :  { %20971 = vmatprep.subr.bf16.mxu1 %v27285_v51 }
0x27a2   :  { %20942 = vmatpush3.bf16.xpose.msk.msra.mxu0 %vm22904_vm2, %v23431_v41 }
0x27a3   :  { %20943 = vmatprep.subr.bf16.mxu0 %v27285_v51 }
0x27a4   :  { %20974 = vmatpush3.bf16.xpose.msk.msra.mxu1 %vm22904_vm2, %v23433_v58 }
0x27a5   :  { %20975 = vmatprep.subr.bf16.mxu1 %v27285_v51 }
0x27aa   :  { %20946 = vmatpush3.bf16.xpose.msk.msra.mxu0 %vm22904_vm2, %v23455_v11 }
0x27ab   :  { %20947 = vmatprep.subr.bf16.mxu0 %v27285_v51 }
0x27ac   :  { %20978 = vmatpush3.bf16.xpose.msk.msra.mxu1 %vm22904_vm2, %v23457_v26 }
0x27ad   :  { %20979 = vmatprep.subr.bf16.mxu1 %v27285_v51 }
0x27b2   :  { %20950 = vmatpush3.bf16.xpose.msk.msra.mxu0 %vm22904_vm2, %v23479_v43 }
0x27b3   :  { %20951 = vmatprep.subr.bf16.mxu0 %v27285_v51 }
0x27b4   :  { %20982 = vmatpush3.bf16.xpose.msk.msra.mxu1 %vm22904_vm2, %v23481_v23 }
0x27b5   :  { %20983 = vmatprep.subr.bf16.mxu1 %v27285_v51 }
0x27ba   :  { %20954 = vmatpush3.bf16.xpose.msk.msra.mxu0 %vm22904_vm2, %v23505_v29 }
0x27bb   :  { %20987 = vmatprep.subr.bf16.mxu0 %v27285_v51 }
0x27bc   :  { %20986 = vmatpush3.bf16.xpose.msk.msra.mxu1 %vm22904_vm2, %v23507_v55 }
0x27bd   :  { %21019 = vmatprep.subr.bf16.mxu1 %v27285_v51 }
0x27c1   :  { %17549 = vmatmul.mubr.msk.f32.vlgmr.msra.gmra.mrb[76].mxu0 %vm292_vm1, %v7078_v37 }
0x27c2   :  { %20990 = vmatpush3.bf16.xpose.msk.msra.mxu0 %vm22904_vm2, %v23530_v54  ;;  %17618 = vmatprep.mubr.msk.f32.mxu0 %vm22637_vm0, %v27284_v3 }
0x27c3   :  { %17584 = vmatmul.mubr.msk.f32.vlgmr.msra.gmra.mrb[82].mxu1 %vm292_vm1, %v7092_v12  ;;  %20991 = vmatprep.subr.bf16.mxu0 %v27285_v51 }
0x27c4   :  { %21022 = vmatpush3.bf16.xpose.msk.msra.mxu1 %vm22904_vm2, %v23535_v20  ;;  %17653 = vmatprep.mubr.msk.f32.mxu1 %vm22637_vm0, %v27284_v3 }
0x27c5   :  { %21023 = vmatprep.subr.bf16.mxu1 %v27285_v51 }
0x27ca   :  { %20994 = vmatpush3.bf16.xpose.msk.msra.mxu0 %vm22904_vm2, %v27308_v24 }
0x27cb   :  { %20995 = vmatprep.subr.bf16.mxu0 %v27285_v51 }
0x27cc   :  { %21026 = vmatpush3.bf16.xpose.msk.msra.mxu1 %vm22904_vm2, %v27309_v19 }
0x27cd   :  { %21027 = vmatprep.subr.bf16.mxu1 %v27285_v51 }
0x27d2   :  { %20998 = vmatpush3.bf16.xpose.msk.msra.mxu0 %vm22904_vm2, %v27310_v28 }
0x27d3   :  { %20999 = vmatprep.subr.bf16.mxu0 %v27285_v51 }
0x27d4   :  { %21030 = vmatpush3.bf16.xpose.msk.msra.mxu1 %vm22904_vm2, %v27311_v46 }
0x27d5   :  { %21031 = vmatprep.subr.bf16.mxu1 %v27285_v51 }
0x27da   :  { %21002 = vmatpush3.bf16.xpose.msk.msra.mxu0 %vm22904_vm2, %v27312_v9 }
0x27db   :  { %21003 = vmatprep.subr.bf16.mxu0 %v27285_v51 }
0x27dc   :  { %21034 = vmatpush3.bf16.xpose.msk.msra.mxu1 %vm22904_vm2, %v27313_v32 }
0x27dd   :  { %21035 = vmatprep.subr.bf16.mxu1 %v27285_v51 }
0x27e2   :  { %21006 = vmatpush3.bf16.xpose.msk.msra.mxu0 %vm22904_vm2, %v27314_v56 }
0x27e3   :  { %21007 = vmatprep.subr.bf16.mxu0 %v27285_v51 }
0x27e4   :  { %21038 = vmatpush3.bf16.xpose.msk.msra.mxu1 %vm22904_vm2, %v27315_v48 }
0x27e5   :  { %21039 = vmatprep.subr.bf16.mxu1 %v27285_v51 }
0x27ea   :  { %21010 = vmatpush3.bf16.xpose.msk.msra.mxu0 %vm22904_vm2, %v27441_v34 }
0x27eb   :  { %21011 = vmatprep.subr.bf16.mxu0 %v27285_v51 }
0x27ec   :  { %21042 = vmatpush3.bf16.xpose.msk.msra.mxu1 %vm22904_vm2, %v27489_v4  ;;  %v7096_v4 = vcombine.high %v7092_v12, %v7092_v12 }
0x27ed   :  { %21043 = vmatprep.subr.bf16.mxu1 %v27285_v51 }
0x27f2   :  { %21014 = vmatpush3.bf16.xpose.msk.msra.mxu0 %vm22904_vm2, %v27490_v59  ;;  %v7094_v59 = vcombine.high %v7078_v37, %v7078_v37  ;;  %v27494_v37 = vld [vmem:[#allocation29_spill] sm:$0xff] }
0x27f3   :  { %21015 = vmatprep.subr.bf16.mxu0 %v27285_v51 }
0x27f4   :  { %21046 = vmatpush3.bf16.xpose.msk.msra.mxu1 %vm22904_vm2, %v27491_v16 }
0x27f5   :  { %21047 = vmatprep.subr.bf16.mxu1 %v27285_v51 }
0x27fa   :  { %21018 = vmatpush3.bf16.xpose.msk.msra.mxu0 %vm22904_vm2, %v27492_v42  ;;  %v27504_v42 = vld [vmem:[#allocation62_spill] sm:$0xff] }
0x27fb   :  { %21051 = vmatprep.subr.bf16.mxu0 %v27285_v51 }
0x27fc   :  { %21050 = vmatpush3.bf16.xpose.msk.msra.mxu1 %vm22904_vm2, %v27493_v33 }
0x27fd   :  { %21075 = vmatprep.subr.bf16.mxu1 %v27285_v51 }
0x2801   :  { %17619 = vmatmul.mubr.msk.f32.vlgmr.msra.gmra.mrb[78].mxu0 %vm292_vm1, %v7094_v59 }
0x2802   :  { %21053 = vmatpush3.bf16.msra.mxu0 %v27468_v47  ;;  %17688 = vmatprep.mubr.msk.f32.mxu0 %vm22637_vm0, %v27284_v3 }
0x2803   :  { %17654 = vmatmul.mubr.msk.f32.vlgmr.msra.gmra.mrb[84].mxu1 %vm292_vm1, %v7096_v4  ;;  %21054 = vmatprep.subr.bf16.mxu0 %v27285_v51  ;;  %v27495_v4 = vld [vmem:[#allocation57_spill] sm:$0xff] }
0x2804   :  { %21077 = vmatpush3.bf16.msra.mxu1 %v27480_v27  ;;  %17723 = vmatprep.mubr.msk.f32.mxu1 %vm22637_vm0, %v27284_v3  ;;  %v27496_v27 = vld [vmem:[#allocation30_spill] sm:$0xff] }
0x2805   :  { %21078 = vmatprep.subr.bf16.mxu1 %v27285_v51 }
0x2806   :  { %21056 = vmatpush3.bf16.msra.mxu0 %v27470_v50 }
0x2807   :  { %21057 = vmatprep.subr.bf16.mxu0 %v27285_v51 }
0x2808   :  { %21080 = vmatpush3.bf16.msra.mxu1 %v27481_v13 }
0x2809   :  { %21081 = vmatprep.subr.bf16.mxu1 %v27285_v51 }
0x280a   :  { %21059 = vmatpush3.bf16.msra.mxu0 %v27471_v5 }
0x280b   :  { %21060 = vmatprep.subr.bf16.mxu0 %v27285_v51 }
0x280c   :  { %21083 = vmatpush3.bf16.msra.mxu1 %v27482_v15 }
0x280d   :  { %21084 = vmatprep.subr.bf16.mxu1 %v27285_v51 }
0x280e   :  { %21062 = vmatpush3.bf16.msra.mxu0 %v27472_v2  ;;  %v27497_v2 = vld [vmem:[#allocation58_spill] sm:$0xff] }
0x280f   :  { %21063 = vmatprep.subr.bf16.mxu0 %v27285_v51 }
0x2810   :  { %21086 = vmatpush3.bf16.msra.mxu1 %v27483_v63 }
0x2811   :  { %21087 = vmatprep.subr.bf16.mxu1 %v27285_v51 }
0x2812   :  { %21065 = vmatpush3.bf16.msra.mxu0 %v27494_v37  ;;  %v27498_v37 = vld [vmem:[#allocation39_spill] sm:$0xff] }
0x2813   :  { %21066 = vmatprep.subr.bf16.mxu0 %v27285_v51 }
0x2814   :  { %v7165_v12 = vpop.f32.mrb[72].mxu0  ;;  %21089 = vmatpush3.bf16.msra.mxu1 %v27484_v8 }
0x2815   :  { %v7166_v59 = vadd.f32 %v7165_v12, %v27495_v4  ;;  %v17410_v15 = vpop.f32.mrb[73].mxu0  ;;  %21090 = vmatprep.subr.bf16.mxu1 %v27285_v51  ;;  %v27502_v4 = vld [vmem:[#allocation60_spill] sm:$0xff] }
0x2816   :  { %v7237_v13 = vpop.f32.mrb[78].mxu1  ;;  %21068 = vmatpush3.bf16.msra.mxu0 %v27496_v27  ;;  %v27499_v15 = vld [vmem:[#allocation31_spill] sm:$0xff] }
0x2817   :  { %v7238_v5 = vadd.f32 %v7237_v13, %v27497_v2  ;;  %v17445_v63 = vpop.f32.mrb[79].mxu1  ;;  %v7673_v50 = vsel %vm1804_vm3, %v7166_v59, -inf  ;;  %21069 = vmatprep.subr.bf16.mxu0 %v27285_v51  ;;  %v27500_v13 = vld [vmem:[#allocation32_spill] sm:$0xff] }
0x2818   :  { %7674 = vmax.xlane.f32.xlu0 %v7673_v50  ;;  %21092 = vmatpush3.bf16.msra.mxu1 %v27498_v37  ;;  %v27501_v63 = vld [vmem:[#allocation59_spill] sm:$0xff] }
0x2819   :  { %v7676_v8 = vsel %vm1804_vm3, %v7238_v5, -inf  ;;  %21093 = vmatprep.subr.bf16.mxu1 %v27285_v51 }
0x281a   :  { %7677 = vmax.xlane.f32.xlu1 %v7676_v8  ;;  %21071 = vmatpush3.bf16.msra.mxu0 %v27499_v15 }
0x281b   :  { %21072 = vmatprep.subr.bf16.mxu0 %v27285_v51 }
0x281c   :  { %21095 = vmatpush3.bf16.msra.mxu1 %v27486_v53 }
0x281d   :  { %21096 = vmatprep.subr.bf16.mxu1 %v27285_v51 }
0x281e   :  { %21074 = vmatpush3.bf16.msra.mxu0 %v27500_v13 }
0x281f   :  { %21099 = vmatprep.subr.bf16.mxu0 %v27285_v51 }
0x2820   :  { %21098 = vmatpush3.bf16.msra.mxu1 %v27487_v62 }
0x2821   :  { %21123 = vmatprep.subr.bf16.mxu1 %v27285_v51 }
0x2854   :  { %v7309_v50 = vpop.f32.mrb[74].mxu0 }
0x2855   :  { %v7310_v12 = vadd.f32 %v7309_v50, %v27501_v63  ;;  %v17480_v8 = vpop.f32.mrb[75].mxu0 }
0x2856   :  { %v7381_v2 = vpop.f32.mrb[80].mxu1 }
0x2857   :  { %v7382_v37 = vadd.f32 %v7381_v2, %v27502_v4  ;;  %v17515_v15 = vpop.f32.mrb[81].mxu1  ;;  %v7679_v53 = vsel %vm1804_vm3, %v7310_v12, -inf }
0x2858   :  { %7680 = vmax.xlane.f32.xlu0 %v7679_v53 }
0x2859   :  { %v7682_v27 = vsel %vm1804_vm3, %v7382_v37, -inf }
0x285c   :  { %7683 = vmax.xlane.f32.xlu0 %v7682_v27 }
0x2894   :  { %v7453_v13 = vpop.f32.mrb[76].mxu0 }
0x2895   :  { %v7454_v47 = vadd.f32 %v7453_v13, %v27503_v38  ;;  %v17550_v62 = vpop.f32.mrb[77].mxu0 }
0x2896   :  { %v7525_v33 = vpop.f32.mrb[82].mxu1 }
0x2897   :  { %v7526_v16 = vadd.f32 %v7525_v33, %v27504_v42  ;;  %v17585_v34 = vpop.f32.mrb[83].mxu1  ;;  %v7685_v50 = vsel %vm1804_vm3, %v7454_v47, -inf }
0x2898   :  { %7686 = vmax.xlane.f32.xlu1 %v7685_v50  ;;  %v27505_v50 = vld [vmem:[#allocation63_spill] sm:$0xff] }
0x2899   :  { %v7688_v2 = vsel %vm1804_vm3, %v7526_v16, -inf }
0x289a   :  { %7689 = vmax.xlane.f32.xlu0 %v7688_v2 }
0x28a5   :  { %v7675_v15 = vpop.xlane.xlu0 %7674 }
0x28a6   :  { %v7697_v8 = vsub.f32 %v7166_v59, %v7675_v15  ;;  %v27506_v15 = vld [vmem:[#allocation64_spill] sm:$0xff] }
0x28a7   :  { %v7678_v53 = vpop.xlane.xlu1 %7677 }
0x28a8   :  { %v7705_v4 = vmul.f32 1.442695, %v7697_v8  ;;  %v7698_v63 = vsub.f32 %v7238_v5, %v7678_v53 }
0x28aa   :  { %22444 = vpow2.f32 %v7705_v4  ;;  %v7707_v27 = vmul.f32 1.442695, %v7698_v63 }
0x28ac   :  { %22446 = vpow2.f32 %v7707_v27 }
0x28b4   :  { %v22445_v13 = vpop.eup %22444 }
0x28b5   :  { %v7721_v62 = vsel %vm1804_vm3, %v22445_v13, 0.0 }
0x28b6   :  { %v22447_v38 = vpop.eup %22446  ;;  %7722 = vadd.xlane.f32.xlu1 %v7721_v62 }
0x28b7   :  { %v7724_v34 = vsel %vm1804_vm3, %v22447_v38, 0.0 }
0x28b8   :  { %7725 = vadd.xlane.f32.xlu0 %v7724_v34 }
0x28d4   :  { %v7597_v33 = vpop.f32.mrb[78].mxu0 }
0x28d5   :  { %v25634_v42 = vadd.f32 %v7597_v33, %v27505_v50  ;;  %v17620_v2 = vpop.f32.mrb[79].mxu0 }
0x28d6   :  { %v7669_v59 = vpop.f32.mrb[84].mxu1 }
0x28d7   :  { %v25637_v8 = vadd.f32 %v7669_v59, %v27506_v15  ;;  %v17655_v5 = vpop.f32.mrb[85].mxu1  ;;  %v7691_v4 = vsel %vm1804_vm3, %v25634_v42, -inf  ;;  %v27513_v15 = vld [vmem:[#allocation43_spill] sm:$0xff] }
0x28d8   :  { %7692 = vmax.xlane.f32.xlu1 %v7691_v4 }
0x28d9   :  { %v7694_v63 = vsel %vm1804_vm3, %v25637_v8, -inf }
0x28da   :  { %7695 = vmax.xlane.f32.xlu0 %v7694_v63 }
0x28e5   :  { %v7681_v53 = vpop.xlane.xlu0 %7680 }
0x28e6   :  { %v7699_v27 = vsub.f32 %v7310_v12, %v7681_v53 }
0x28e8   :  { %v7709_v62 = vmul.f32 1.442695, %v7699_v27 }
0x28e9   :  { %v7684_v34 = vpop.xlane.xlu0 %7683 }
0x28ea   :  { %22448 = vpow2.f32 %v7709_v62  ;;  %v7700_v33 = vsub.f32 %v7382_v37, %v7684_v34 }
0x28ec   :  { %v7711_v2 = vmul.f32 1.442695, %v7700_v33 }
0x28ee   :  { %22450 = vpow2.f32 %v7711_v2 }
0x28f4   :  { %v25643_v50 = vpop.eup %22448 }
0x28f5   :  { %v7727_v59 = vsel %vm1804_vm3, %v25643_v50, 0.0 }
0x28f6   :  { %7728 = vadd.xlane.f32.xlu1 %v7727_v59 }
0x28f8   :  { %v25647_v5 = vpop.eup %22450 }
0x28f9   :  { %v7730_v4 = vsel %vm1804_vm3, %v25647_v5, 0.0 }
0x28fa   :  { %7731 = vadd.xlane.f32.xlu0 %v7730_v4 }
0x2925   :  { %v7687_v63 = vpop.xlane.xlu1 %7686 }
0x2926   :  { %v7701_v12 = vsub.f32 %v7454_v47, %v7687_v63 }
0x2927   :  { %v7690_v53 = vpop.xlane.xlu0 %7689 }
0x2928   :  { %v7713_v27 = vmul.f32 1.442695, %v7701_v12  ;;  %v7702_v62 = vsub.f32 %v7526_v16, %v7690_v53 }
0x292a   :  { %22452 = vpow2.f32 %v7713_v27  ;;  %v7715_v37 = vmul.f32 1.442695, %v7702_v62 }
0x292c   :  { %22454 = vpow2.f32 %v7715_v37 }
0x2934   :  { %v25651_v34 = vpop.eup %22452 }
0x2935   :  { %v7733_v33 = vsel %vm1804_vm3, %v25651_v34, 0.0 }
0x2936   :  { %v25655_v2 = vpop.eup %22454  ;;  %7734 = vadd.xlane.f32.xlu1 %v7733_v33 }
0x2937   :  { %v7736_v59 = vsel %vm1804_vm3, %v25655_v2, 0.0 }
0x2938   :  { %7737 = vadd.xlane.f32.xlu0 %v7736_v59 }
0x2943   :  { %v7723_v4 = vpop.xlane.xlu1 %7722 }
0x2944   :  { %22456 = vrcp.f32 %v7723_v4 }
0x2945   :  { %v7726_v47 = vpop.xlane.xlu0 %7725 }
0x2946   :  { %22458 = vrcp.f32 %v7726_v47 }
0x294e   :  { %v22457_v16 = vpop.eup %22456 }
0x294f   :  { %v7753_v63 = vmul.f32 %v22457_v16, %v22445_v13 }
0x2950   :  { %v22459_v12 = vpop.eup %22458 }
0x2951   :  { %17689 = vmatmul.mubr.f32.vlgmr.msra.gmra.mrb[80].mxu0 %v7753_v63  ;;  %v7754_v53 = vmul.f32 %v22459_v12, %v22447_v38 }
0x2952   :  { %21101 = vmatpush3.bf16.msra.mxu0 %v23119_v0  ;;  %17758 = vmatprep.mubr.msk.f32.mxu0 %vm22637_vm0, %v27284_v3 }
0x2953   :  { %v7769_v27 = vrot.slane %v7754_v53, 7  ;;  %17724 = vmatmul.mubr.f32.vlgmr.msra.gmra.mrb[86].mxu1 %v7754_v53  ;;  %21102 = vmatprep.subr.bf16.mxu0 %v27285_v51 }
0x2954   :  { %21125 = vmatpush3.bf16.msra.mxu1 %v23124_v7  ;;  %17793 = vmatprep.mubr.msk.f32.mxu1 %vm22637_vm0, %v27284_v3 }
0x2955   :  { %v7770_v62 = vsel %vm1902_vm4, %v7769_v27, %v7753_v63  ;;  %21126 = vmatprep.subr.bf16.mxu1 %v27285_v51 }
0x2956   :  { %21104 = vmatpush3.bf16.msra.mxu0 %v23157_v22 }
0x2957   :  { %21105 = vmatprep.subr.bf16.mxu0 %v27285_v51 }
0x2958   :  { %21128 = vmatpush3.bf16.msra.mxu1 %v23159_v25 }
0x2959   :  { %21129 = vmatprep.subr.bf16.mxu1 %v27285_v51 }
0x295a   :  { %21107 = vmatpush3.bf16.msra.mxu0 %v23181_v36 }
0x295b   :  { %21108 = vmatprep.subr.bf16.mxu0 %v27285_v51 }
0x295c   :  { %21131 = vmatpush3.bf16.msra.mxu1 %v23183_v39 }
0x295d   :  { %21132 = vmatprep.subr.bf16.mxu1 %v27285_v51 }
0x295e   :  { %21110 = vmatpush3.bf16.msra.mxu0 %v23205_v49 }
0x295f   :  { %21111 = vmatprep.subr.bf16.mxu0 %v27285_v51 }
0x2960   :  { %21134 = vmatpush3.bf16.msra.mxu1 %v23207_v52 }
0x2961   :  { %21135 = vmatprep.subr.bf16.mxu1 %v27285_v51 }
0x2962   :  { %21113 = vmatpush3.bf16.msra.mxu0 %v23229_v1 }
0x2963   :  { %21114 = vmatprep.subr.bf16.mxu0 %v27285_v51 }
0x2964   :  { %21137 = vmatpush3.bf16.msra.mxu1 %v23231_v14 }
0x2965   :  { %v7693_v38 = vpop.xlane.xlu1 %7692  ;;  %21138 = vmatprep.subr.bf16.mxu1 %v27285_v51 }
0x2966   :  { %v7703_v13 = vsub.f32 %v25634_v42, %v7693_v38  ;;  %21116 = vmatpush3.bf16.msra.mxu0 %v23253_v30 }
0x2967   :  { %v7696_v37 = vpop.xlane.xlu0 %7695  ;;  %21117 = vmatprep.subr.bf16.mxu0 %v27285_v51 }
0x2968   :  { %v7717_v33 = vmul.f32 1.442695, %v7703_v13  ;;  %v7704_v59 = vsub.f32 %v25637_v8, %v7696_v37  ;;  %21140 = vmatpush3.bf16.msra.mxu1 %v23255_v31 }
0x2969   :  { %21141 = vmatprep.subr.bf16.mxu1 %v27285_v51 }
0x296a   :  { %22460 = vpow2.f32 %v7717_v33  ;;  %v7719_v4 = vmul.f32 1.442695, %v7704_v59  ;;  %21119 = vmatpush3.bf16.msra.mxu0 %v23277_v45 }
0x296b   :  { %21120 = vmatprep.subr.bf16.mxu0 %v27285_v51 }
0x296c   :  { %22462 = vpow2.f32 %v7719_v4  ;;  %21143 = vmatpush3.bf16.msra.mxu1 %v23279_v57 }
0x296d   :  { %21144 = vmatprep.subr.bf16.mxu1 %v27285_v51 }
0x296e   :  { %21122 = vmatpush3.bf16.msra.mxu0 %v23301_v18 }
0x296f   :  { %21147 = vmatprep.subr.bf16.mxu0 %v27285_v51 }
0x2970   :  { %21146 = vmatpush3.bf16.msra.mxu1 %v23303_v21 }
0x2971   :  { %21171 = vmatprep.subr.bf16.mxu1 %v27285_v51 }
0x2974   :  { %v25698_v42 = vpop.eup %22460 }
0x2975   :  { %v7739_v8 = vsel %vm1804_vm3, %v25698_v42, 0.0 }
0x2976   :  { %v25702_v47 = vpop.eup %22462  ;;  %7740 = vadd.xlane.f32.xlu1 %v7739_v8 }
0x2977   :  { %v7742_v16 = vsel %vm1804_vm3, %v25702_v47, 0.0 }
0x2978   :  { %7743 = vadd.xlane.f32.xlu0 %v7742_v16 }
0x2983   :  { %v7729_v63 = vpop.xlane.xlu1 %7728 }
0x2984   :  { %22464 = vrcp.f32 %v7729_v63 }
0x2987   :  { %v7732_v12 = vpop.xlane.xlu0 %7731 }
0x2988   :  { %22466 = vrcp.f32 %v7732_v12 }
0x298e   :  { %v22465_v53 = vpop.eup %22464 }
0x298f   :  { %v7755_v27 = vmul.f32 %v22465_v53, %v25643_v50 }
0x2991   :  { %v7771_v38 = vrot.slane %v7755_v27, 6  ;;  %17759 = vmatmul.mubr.f32.vlgmr.msra.gmra.mrb[82].mxu0 %v7755_v27  ;;  %v27509_v27 = vld [vmem:[#allocation53_spill] sm:$0xff] }
0x2992   :  { %v22467_v13 = vpop.eup %22466  ;;  %21149 = vmatpush3.bf16.msra.mxu0 %v23325_v44  ;;  %17828 = vmatprep.mubr.msk.f32.mxu0 %vm22637_vm0, %v27284_v3 }
0x2993   :  { %v7772_v37 = vsel %vm1905_vm5, %v7771_v38, %v7770_v62  ;;  %v7756_v33 = vmul.f32 %v22467_v13, %v25647_v5  ;;  %21150 = vmatprep.subr.bf16.mxu0 %v27285_v51  ;;  %v27510_v38 = vld [vmem:[#allocation54_spill] sm:$0xff]  ;;  %v27511_v13 = vld [vmem:[#allocation55_spill] sm:$0xff] }
0x2995   :  { %v7773_v59 = vrot.slane %v7756_v33, 5  ;;  %17794 = vmatmul.mubr.f32.vlgmr.msra.gmra.mrb[88].mxu1 %v7756_v33 }
0x2996   :  { %21173 = vmatpush3.bf16.msra.mxu1 %v23329_v60  ;;  %21152 = vmatpush3.bf16.msra.mxu0 %v23359_v35 }
0x2997   :  { %v7774_v50 = vsel %vm1908_vm6, %v7773_v59, %v7772_v37  ;;  %21174 = vmatprep.subr.bf16.mxu1 %v27285_v51  ;;  %21153 = vmatprep.subr.bf16.mxu0 %v27285_v51  ;;  %v27512_v37 = vld [vmem:[#allocation56_spill] sm:$0xff] }
0x2998   :  { %17863 = vmatprep.mubr.msk.f32.mxu1 %vm22637_vm0, %v27284_v3 }
0x299a   :  { %21176 = vmatpush3.bf16.msra.mxu1 %v23361_v40  ;;  %21155 = vmatpush3.bf16.msra.mxu0 %v23383_v10 }
0x299b   :  { %21177 = vmatprep.subr.bf16.mxu1 %v27285_v51  ;;  %21156 = vmatprep.subr.bf16.mxu0 %v27285_v51 }
0x299e   :  { %21179 = vmatpush3.bf16.msra.mxu1 %v23385_v17  ;;  %21158 = vmatpush3.bf16.msra.mxu0 %v23407_v61 }
0x299f   :  { %21180 = vmatprep.subr.bf16.mxu1 %v27285_v51  ;;  %21159 = vmatprep.subr.bf16.mxu0 %v27285_v51 }
0x29a2   :  { %21182 = vmatpush3.bf16.msra.mxu1 %v23409_v6  ;;  %21161 = vmatpush3.bf16.msra.mxu0 %v23431_v41 }
0x29a3   :  { %21183 = vmatprep.subr.bf16.mxu1 %v27285_v51  ;;  %21162 = vmatprep.subr.bf16.mxu0 %v27285_v51 }
0x29a6   :  { %21185 = vmatpush3.bf16.msra.mxu1 %v23433_v58  ;;  %21164 = vmatpush3.bf16.msra.mxu0 %v23455_v11 }
0x29a7   :  { %21186 = vmatprep.subr.bf16.mxu1 %v27285_v51  ;;  %21165 = vmatprep.subr.bf16.mxu0 %v27285_v51 }
0x29aa   :  { %21188 = vmatpush3.bf16.msra.mxu1 %v23457_v26  ;;  %21167 = vmatpush3.bf16.msra.mxu0 %v23479_v43 }
0x29ab   :  { %21189 = vmatprep.subr.bf16.mxu1 %v27285_v51  ;;  %21168 = vmatprep.subr.bf16.mxu0 %v27285_v51 }
0x29ae   :  { %21191 = vmatpush3.bf16.msra.mxu1 %v23481_v23  ;;  %21170 = vmatpush3.bf16.msra.mxu0 %v23505_v29 }
0x29af   :  { %21192 = vmatprep.subr.bf16.mxu1 %v27285_v51  ;;  %21195 = vmatprep.subr.bf16.mxu0 %v27285_v51 }
0x29b2   :  { %21194 = vmatpush3.bf16.msra.mxu1 %v23507_v55 }
0x29b3   :  { %21219 = vmatprep.subr.bf16.mxu1 %v27285_v51 }
0x29c3   :  { %v7735_v5 = vpop.xlane.xlu1 %7734 }
0x29c4   :  { %22468 = vrcp.f32 %v7735_v5 }
0x29c5   :  { %v7738_v62 = vpop.xlane.xlu0 %7737 }
0x29c6   :  { %22470 = vrcp.f32 %v7738_v62 }
0x29ce   :  { %v22469_v4 = vpop.eup %22468 }
0x29cf   :  { %v7757_v8 = vmul.f32 %v22469_v4, %v25651_v34  ;;  %v27507_v34 = vld [vmem:[#allocation51_spill] sm:$0xff] }
0x29d0   :  { %v22471_v16 = vpop.eup %22470 }
0x29d1   :  { %v7775_v63 = vrot.slane %v7757_v8, 4  ;;  %17829 = vmatmul.mubr.f32.vlgmr.msra.gmra.mrb[84].mxu0 %v7757_v8  ;;  %v7758_v12 = vmul.f32 %v22471_v16, %v25655_v2  ;;  %v27508_v2 = vld [vmem:[#allocation52_spill] sm:$0xff] }
0x29d2   :  { %21197 = vmatpush3.bf16.msra.mxu0 %v23530_v54  ;;  %17898 = vmatprep.mubr.msk.f32.mxu0 %vm22637_vm0, %v27284_v3 }
0x29d3   :  { %v7776_v53 = vsel %vm1911_vm7, %v7775_v63, %v7774_v50  ;;  %17864 = vmatmul.mubr.f32.vlgmr.msra.gmra.mrb[90].mxu1 %v7758_v12  ;;  %21198 = vmatprep.subr.bf16.mxu0 %v27285_v51  ;;  %v7777_v5 = vrot.slane %v7758_v12, 3  ;;  %v27514_v12 = vld [vmem:[#allocation9_spill] sm:$0xff] }
0x29d4   :  { %21221 = vmatpush3.bf16.msra.mxu1 %v23535_v20  ;;  %17933 = vmatprep.mubr.msk.f32.mxu1 %vm22637_vm0, %v27284_v3 }
0x29d5   :  { %21222 = vmatprep.subr.bf16.mxu1 %v27285_v51  ;;  %v7778_v63 = vsel %vm1914_vm8, %v7777_v5, %v7776_v53  ;;  %v27516_v53 = vld [vmem:[#allocation11_spill] sm:$0xff] }
0x29d6   :  { %21200 = vmatpush3.bf16.msra.mxu0 %v27308_v24 }
0x29d7   :  { %21201 = vmatprep.subr.bf16.mxu0 %v27285_v51 }
0x29d8   :  { %21224 = vmatpush3.bf16.msra.mxu1 %v27309_v19 }
0x29d9   :  { %21225 = vmatprep.subr.bf16.mxu1 %v27285_v51 }
0x29da   :  { %21203 = vmatpush3.bf16.msra.mxu0 %v27310_v28 }
0x29db   :  { %21204 = vmatprep.subr.bf16.mxu0 %v27285_v51 }
0x29dc   :  { %21227 = vmatpush3.bf16.msra.mxu1 %v27311_v46 }
0x29dd   :  { %21228 = vmatprep.subr.bf16.mxu1 %v27285_v51 }
0x29de   :  { %21206 = vmatpush3.bf16.msra.mxu0 %v27312_v9 }
0x29df   :  { %21207 = vmatprep.subr.bf16.mxu0 %v27285_v51 }
0x29e0   :  { %21230 = vmatpush3.bf16.msra.mxu1 %v27313_v32 }
0x29e1   :  { %21231 = vmatprep.subr.bf16.mxu1 %v27285_v51 }
0x29e2   :  { %21209 = vmatpush3.bf16.msra.mxu0 %v27314_v56 }
0x29e3   :  { %21210 = vmatprep.subr.bf16.mxu0 %v27285_v51 }
0x29e4   :  { %21233 = vmatpush3.bf16.msra.mxu1 %v27315_v48 }
0x29e5   :  { %21234 = vmatprep.subr.bf16.mxu1 %v27285_v51 }
0x29e6   :  { %21212 = vmatpush3.bf16.msra.mxu0 %v27507_v34 }
0x29e7   :  { %21213 = vmatprep.subr.bf16.mxu0 %v27285_v51 }
0x29e8   :  { %21236 = vmatpush3.bf16.msra.mxu1 %v27508_v2 }
0x29e9   :  { %21237 = vmatprep.subr.bf16.mxu1 %v27285_v51 }
0x29ea   :  { %21215 = vmatpush3.bf16.msra.mxu0 %v27509_v27 }
0x29eb   :  { %21216 = vmatprep.subr.bf16.mxu0 %v27285_v51 }
0x29ec   :  { %21239 = vmatpush3.bf16.msra.mxu1 %v27510_v38 }
0x29ed   :  { %21240 = vmatprep.subr.bf16.mxu1 %v27285_v51 }
0x29ee   :  { %21218 = vmatpush3.bf16.msra.mxu0 %v27511_v13 }
0x29ef   :  { %21243 = vmatprep.subr.bf16.mxu0 %v27285_v51 }
0x29f0   :  { %21242 = vmatpush3.bf16.msra.mxu1 %v27512_v37 }
0x29f1   :  { %21255 = vmatprep.subr.bf16.mxu1 %v27285_v51 }
0x2a03   :  { %v7741_v33 = vpop.xlane.xlu1 %7740 }
0x2a04   :  { %22472 = vrcp.f32 %v7741_v33 }
0x2a05   :  { %v7744_v59 = vpop.xlane.xlu0 %7743 }
0x2a06   :  { %22474 = vrcp.f32 %v7744_v59 }
0x2a0e   :  { %v22473_v50 = vpop.eup %22472 }
0x2a0f   :  { %v7759_v62 = vmul.f32 %v22473_v50, %v25698_v42 }
0x2a10   :  { %v22475_v4 = vpop.eup %22474 }
0x2a11   :  { %v7779_v8 = vrot.slane %v7759_v62, 2  ;;  %17899 = vmatmul.mubr.f32.vlgmr.msra.gmra.mrb[86].mxu0 %v7759_v62  ;;  %v7760_v16 = vmul.f32 %v22475_v4, %v25702_v47  ;;  %v27515_v47 = vld [vmem:[#allocation44_spill] sm:$0xff] }
0x2a12   :  { %21245 = vmatpush3.bf16.msra.mxu0 %v27513_v15  ;;  %17944 = vmatprep.mubr.msk.f32.mxu0 %vm22637_vm0, %v27284_v3 }
0x2a13   :  { %v7780_v33 = vsel %vm1917_vm9, %v7779_v8, %v7778_v63  ;;  %v7781_v37 = vrot.slane %v7760_v16, 1  ;;  %17934 = vmatmul.mubr.f32.vlgmr.msra.gmra.mrb[92].mxu1 %v7760_v16  ;;  %21246 = vmatprep.subr.bf16.mxu0 %v27285_v51 }
0x2a14   :  { %21257 = vmatpush3.bf16.msra.mxu1 %v27514_v12  ;;  %17966 = vmatprep.mubr.msk.f32.mxu1 %vm22637_vm0, %v27284_v3 }
0x2a15   :  { %v7782_v42 = vsel %vm1920_vm10, %v7781_v37, %v7780_v33  ;;  %21258 = vmatprep.subr.bf16.mxu1 %v27285_v51 }
0x2a16   :  { %7785 = vst [vmem:[#allocation5 + $0x18] sm:$0xff] %v7782_v42  ;;  %21248 = vmatpush3.bf16.msra.mxu0 %v27515_v47 }
0x2a17   :  { %21249 = vmatprep.subr.bf16.mxu0 %v27285_v51 }
0x2a18   :  { %21260 = vmatpush3.bf16.msra.mxu1 %v27516_v53 }
0x2a19   :  { %21261 = vmatprep.subr.bf16.mxu1 %v27285_v51 }
0x2a24   :  { %v7852_v59 = vpop.f32.mrb[80].mxu0 }
0x2a25   :  { %v17690_v50 = vpop.f32.mrb[81].mxu0 }
0x2a26   :  { %v7922_v5 = vpop.f32.mrb[86].mxu1 }
0x2a27   :  { %v8354_v62 = vrot.slane %v7922_v5, 7  ;;  %v17725_v4 = vpop.f32.mrb[87].mxu1 }
0x2a29   :  { %v8355_v8 = vsel %vm1902_vm4, %v8354_v62, %v7852_v59 }
0x2a64   :  { %v7992_v16 = vpop.f32.mrb[82].mxu0 }
0x2a65   :  { %v8356_v37 = vrot.slane %v7992_v16, 6  ;;  %v17760_v63 = vpop.f32.mrb[83].mxu0 }
0x2a67   :  { %v8357_v33 = vsel %vm1905_vm5, %v8356_v37, %v8355_v8 }
0x2a68   :  { %v8062_v42 = vpop.f32.mrb[88].mxu1 }
0x2a69   :  { %v8358_v47 = vrot.slane %v8062_v42, 5  ;;  %v17795_v12 = vpop.f32.mrb[89].mxu1  ;;  %v27524_v42 = vld [vmem:[#allocation19_spill] sm:$0xff] }
0x2a6b   :  { %v8359_v15 = vsel %vm1908_vm6, %v8358_v47, %v8357_v33  ;;  %v27523_v33 = vld [vmem:[#allocation17_spill] sm:$0xff] }
0x2aa4   :  { %v8132_v53 = vpop.f32.mrb[84].mxu0 }
0x2aa5   :  { %v8360_v13 = vrot.slane %v8132_v53, 4  ;;  %v17830_v38 = vpop.f32.mrb[85].mxu0  ;;  %v27522_v53 = vld [vmem:[#allocation48_spill] sm:$0xff] }
0x2aa6   :  { %v8202_v27 = vpop.f32.mrb[90].mxu1  ;;  %v27517_v38 = vld [vmem:[#allocation45_spill] sm:$0xff] }
0x2aa7   :  { %v8361_v50 = vsel %vm1911_vm7, %v8360_v13, %v8359_v15  ;;  %v8362_v5 = vrot.slane %v8202_v27, 3  ;;  %v17865_v4 = vpop.f32.mrb[91].mxu1  ;;  %v27518_v15 = vld [vmem:[#allocation46_spill] sm:$0xff]  ;;  %v27519_v27 = vld [vmem:[#allocation49_spill] sm:$0xff] }
0x2aa8   :  { %v27521_v13 = vld [vmem:[#allocation14_spill] sm:$0xff] }
0x2aa9   :  { %v8363_v59 = vsel %vm1914_vm8, %v8362_v5, %v8361_v50 }
0x2ae4   :  { %v8272_v62 = vpop.f32.mrb[86].mxu0 }
0x2ae5   :  { %v8364_v16 = vrot.slane %v8272_v62, 2  ;;  %v17900_v63 = vpop.f32.mrb[87].mxu0 }
0x2ae6   :  { %v8342_v2 = vpop.f32.mrb[92].mxu1  ;;  %v27526_v63 = vld [vmem:[#allocation12_spill] sm:$0xff] }
0x2ae7   :  { %v8365_v8 = vsel %vm1917_vm9, %v8364_v16, %v8363_v59  ;;  %v8366_v37 = vrot.slane %v8342_v2, 1  ;;  %v17935_v12 = vpop.f32.mrb[93].mxu1  ;;  %v27520_v2 = vld [vmem:[#allocation13_spill] sm:$0xff]  ;;  %v27525_v16 = vld [vmem:[#allocation10_spill] sm:$0xff] }
0x2ae8   :  { %v27528_v12 = vld [vmem:[#allocation18_spill] sm:$0xff] }
0x2ae9   :  { %v8367_v47 = vsel %vm1920_vm10, %v8366_v37, %v8365_v8  ;;  %v13183_v8 = vld [vmem:[%s27039_s0 + $0x20] sm:$0xff]  ;;  %v27527_v37 = vld [vmem:[#allocation16_spill] sm:$0xff] }
0x2aea   :  { %17945 = vmatmul.mubr.msk.f32.vlgmr.msra.gmra.mrb[88].mxu0 %vm292_vm1, %v8367_v47  ;;  %v27529_v47 = vld [vmem:[#allocation22_spill] sm:$0xff] }
0x2aeb   :  { %21251 = vmatpush3.bf16.msra.mxu0 %v27517_v38  ;;  %17955 = vmatprep.mubr.msk.f32.mxu0 %vm22637_vm0, %v27284_v3 }
0x2aec   :  { %21252 = vmatprep.subr.bf16.mxu0 %v27285_v51 }
0x2aef   :  { %21254 = vmatpush3.bf16.msra.mxu0 %v27518_v15 }
0x2af0   :  { %21267 = vmatprep.subr.bf16.mxu0 %v27285_v51 }
0x2af2   :  { %17956 = vmatmul.mubr.msk.f32.vlgmr.msra.gmra.mrb[88].mxu0 %vm292_vm1, %v27519_v27 }
0x2af3   :  { %21269 = vmatpush3.bf16.msra.mxu0 %v27520_v2  ;;  %17988 = vmatprep.mubr.msk.f32.mxu0 %vm22637_vm0, %v27284_v3 }
0x2af4   :  { %21270 = vmatprep.subr.bf16.mxu0 %v27285_v51 }
0x2af7   :  { %21272 = vmatpush3.bf16.msra.mxu0 %v27521_v13 }
0x2af8   :  { %21279 = vmatprep.subr.bf16.mxu0 %v27285_v51 }
0x2afa   :  { %17989 = vmatmul.mubr.msk.f32.vlgmr.msra.gmra.mrb[90].mxu0 %vm292_vm1, %v27522_v53  ;;  %v27530_v53 = vld [vmem:[#allocation23_spill] sm:$0xff] }
0x2afb   :  { %21281 = vmatpush3.bf16.msra.mxu0 %v27523_v33  ;;  %18010 = vmatprep.mubr.msk.f32.mxu0 %vm22637_vm0, %v27284_v3 }
0x2afc   :  { %21282 = vmatprep.subr.bf16.mxu0 %v27285_v51 }
0x2aff   :  { %21284 = vmatpush3.bf16.msra.mxu0 %v27524_v42 }
0x2b00   :  { %21291 = vmatprep.subr.bf16.mxu0 %v27285_v51 }
0x2bc5   :  { %v8506_v50 = vpop.f32.mrb[88].mxu0 }
0x2bc6   :  { %22476 = vtanh.f32 %v8506_v50  ;;  %v17957_v5 = vpop.f32.mrb[89].mxu0 }
0x2bcd   :  { %v8726_v4 = vpop.f32.mrb[90].mxu0 }
0x2bce   :  { %v17990_v59 = vpop.f32.mrb[91].mxu0 }
0x2bd0   :  { %v22477_v62 = vpop.eup %22476 }
0x2bd1   :  { %8511 = vst.msk [vmem:[#allocation2 + $0x18] sm:$0xff] %vm292_vm1, %v22477_v62  ;;  %17967 = vmatmul.mubr.msk.f32.vlgmr.msra.gmra.mrb[94].mxu1 %vm292_vm1, %v22477_v62 }
0x2bd2   :  { %21263 = vmatpush3.bf16.msra.mxu1 %v27525_v16  ;;  %17977 = vmatprep.mubr.msk.f32.mxu1 %vm22637_vm0, %v27284_v3 }
0x2bd3   :  { %21264 = vmatprep.subr.bf16.mxu1 %v27285_v51 }
0x2bd6   :  { %21266 = vmatpush3.bf16.msra.mxu1 %v27526_v63 }
0x2bd7   :  { %21273 = vmatprep.subr.bf16.mxu1 %v27285_v51 }
0x2bd9   :  { %17978 = vmatmul.mubr.msk.f32.vlgmr.msra.gmra.mrb[96].mxu1 %vm292_vm1, %v13183_v8 }
0x2bda   :  { %21275 = vmatpush3.bf16.msra.mxu1 %v27527_v37  ;;  %17999 = vmatprep.mubr.msk.f32.mxu1 %vm22637_vm0, %v27284_v3 }
0x2bdb   :  { %21276 = vmatprep.subr.bf16.mxu1 %v27285_v51 }
0x2bde   :  { %21278 = vmatpush3.bf16.msra.mxu1 %v27528_v12 }
0x2bdf   :  { %21285 = vmatprep.subr.bf16.mxu1 %v27285_v51 }
0x2be1   :  { %18000 = vmatmul.mubr.msk.f32.vlgmr.msra.gmra.mrb[98].mxu1 %vm292_vm1, %v27519_v27  ;;  %v22584_v27 = vld [vmem:[%s27046_s7] ss:$0 sm:$0xff] }
0x2be2   :  { %21287 = vmatpush3.bf16.msra.mxu1 %v27529_v47  ;;  %18021 = vmatprep.mubr.msk.f32.mxu1 %vm22637_vm0, %v27284_v3 }
0x2be3   :  { %21288 = vmatprep.subr.bf16.mxu1 %v27285_v51 }
0x2be6   :  { %21290 = vmatpush3.bf16.msra.mxu1 %v27530_v53 }
0x2be7   :  { %21323 = vmatprep.subr.bf16.mxu1 %v27285_v51 }
0x2ca4   :  { %v8583_v50 = vpop.f32.mrb[94].mxu1 }
0x2ca5   :  { %v17968_v5 = vpop.f32.mrb[95].mxu1 }
0x2cac   :  { %v8656_v59 = vpop.f32.mrb[96].mxu1 }
0x2cad   :  { %v8657_v62 = vadd.f32 %v8656_v59, %v8583_v50  ;;  %v17979_v8 = vpop.f32.mrb[97].mxu1 }
0x2caf   :  { %v8730_v12 = vadd.f32 %v8726_v4, %v8657_v62  ;;  %v27531_v4 = vld [vmem:[#allocation50_spill] sm:$0xff] }
0x2cb1   :  { %v8731_v47 = vadd.f32 %v22584_v27, %v8730_v12  ;;  %v27536_v27 = vld [vmem:[#allocation26_spill] sm:$0xff] }
0x2cb3   :  { %22478 = vtanh.f32 %v8731_v47  ;;  %v13187_v53 = vmul.f32 -1.442695, %v8731_v47 }
0x2cb4   :  { %v8822_v37 = vpop.f32.mrb[98].mxu1 }
0x2cb5   :  { %v18001_v63 = vpop.f32.mrb[99].mxu1  ;;  %22480 = vpow2.f32 %v13187_v53  ;;  %v27569_v53 = vld [vmem:[#allocation61_spill] sm:$0xff] }
0x2cbd   :  { %v22479_v16 = vpop.eup %22478 }
0x2cbe   :  { %8741 = vrot.lane.b32.xlu1 %v22479_v16, %s22639_s21 }
0x2cbf   :  { %v22481_v42 = vpop.eup %22480 }
0x2cc0   :  { %v8735_v33 = vadd.f32 1.0, %v22481_v42  ;;  %v27534_v42 = vld [vmem:[#allocation25_spill] sm:$0xff] }
0x2cc2   :  { %22482 = vrcp.f32 %v8735_v33 }
0x2ccc   :  { %v22483_v5 = vpop.eup %22482 }
0x2ccd   :  { %v8739_v62 = vmul.f32 %v22483_v5, %v27531_v4  ;;  %v27540_v4 = vld [vmem:[#allocation30_spill] sm:$0xff] }
0x2d30   :  { %v8742_v50 = vpop.permute.xlu1 %8741 }
0x2d31   :  { %v8744_v59 = vmul.f32 %v22483_v5, %v8742_v50  ;;  %v27538_v50 = vld [vmem:[#allocation28_spill] sm:$0xff] }
0x2d33   :  { %8746 = vrot.lane.b32.xlu0 %v8744_v59, %s22640_s24  ;;  %v27539_v59 = vld [vmem:[#allocation29_spill] sm:$0xff] }
0x2da5   :  { %v8747_v8 = vpop.permute.xlu0 %8746 }
0x2da6   :  { %v25864_v12 = vadd.f32 %v8747_v8, %v8739_v62  ;;  %v27541_v62 = vld [vmem:[#allocation31_spill] sm:$0xff]  ;;  %v27542_v8 = vld [vmem:[#allocation32_spill] sm:$0xff] }
0x2da8   :  { %27532 = vst [vmem:[#allocation21_spill] sm:$0xff] %v25864_v12  ;;  %22484 = vtanh.f32 %v25864_v12  ;;  %v22585_v12 = vld [vmem:[%s27046_s7 + $0x1] ss:$0 sm:$0xff] }
0x2db2   :  { %v22485_v63 = vpop.eup %22484 }
0x2db3   :  { %8752 = vrot.lane.b32.xlu1 %v22485_v63, %s22639_s21 }
0x2e25   :  { %v8753_v16 = vpop.permute.xlu1 %8752 }
0x2e26   :  { %v8755_v47 = vmul.f32 %v22483_v5, %v8753_v16  ;;  %v27537_v5 = vld [vmem:[#allocation27_spill] sm:$0xff] }
0x2e28   :  { %8827 = vrot.lane.b32.xlu1 %v8755_v47, %s22640_s24 }
0x2e9a   :  { %v25869_v33 = vpop.permute.xlu1 %8827 }
0x2e9b   :  { %27533 = vst [vmem:[#allocation20_spill] sm:$0xff] %v25869_v33  ;;  %18011 = vmatmul.mubr.msk.f32.vlgmr.msra.gmra.mrb[92].mxu0 %vm292_vm1, %v25869_v33 }
0x2e9c   :  { %21294 = vmatpush3.bf16.xpose.msk.msra.mxu0 %vm22904_vm2, %v27534_v42  ;;  %18056 = vmatprep.mubr.msk.f32.mxu0 %vm22637_vm0, %v27284_v3 }
0x2e9d   :  { %21295 = vmatprep.subr.bf16.mxu0 %v27285_v51 }
0x2ea4   :  { %21298 = vmatpush3.bf16.xpose.msk.msra.mxu0 %vm22904_vm2, %v27536_v27 }
0x2ea5   :  { %21299 = vmatprep.subr.bf16.mxu0 %v27285_v51 }
0x2eac   :  { %21302 = vmatpush3.bf16.xpose.msk.msra.mxu0 %vm22904_vm2, %v27537_v5 }
0x2ead   :  { %21303 = vmatprep.subr.bf16.mxu0 %v27285_v51 }
0x2eb4   :  { %21306 = vmatpush3.bf16.xpose.msk.msra.mxu0 %vm22904_vm2, %v27538_v50 }
0x2eb5   :  { %21307 = vmatprep.subr.bf16.mxu0 %v27285_v51 }
0x2ebc   :  { %21310 = vmatpush3.bf16.xpose.msk.msra.mxu0 %vm22904_vm2, %v27539_v59 }
0x2ebd   :  { %21311 = vmatprep.subr.bf16.mxu0 %v27285_v51 }
0x2ec4   :  { %21314 = vmatpush3.bf16.xpose.msk.msra.mxu0 %vm22904_vm2, %v27540_v4 }
0x2ec5   :  { %21315 = vmatprep.subr.bf16.mxu0 %v27285_v51 }
0x2ecc   :  { %21318 = vmatpush3.bf16.xpose.msk.msra.mxu0 %vm22904_vm2, %v27541_v62 }
0x2ecd   :  { %21319 = vmatprep.subr.bf16.mxu0 %v27285_v51 }
0x2ed4   :  { %21322 = vmatpush3.bf16.xpose.msk.msra.mxu0 %vm22904_vm2, %v27542_v8 }
0x2ed5   :  { %21355 = vmatprep.subr.bf16.mxu0 %v27285_v51 }
0x2f6e   :  { %v8897_v63 = vpop.f32.mrb[92].mxu0 }
0x2f6f   :  { %v8898_v16 = vadd.f32 %v8897_v63, %v8822_v37  ;;  %v18012_v47 = vpop.f32.mrb[93].mxu0  ;;  %v27543_v37 = vld [vmem:[#allocation47_spill] sm:$0xff] }
0x2f71   :  { %v8901_v33 = vadd.f32 %v22585_v12, %v8898_v16  ;;  %v27551_v16 = vld [vmem:[#allocation39_spill] sm:$0xff] }
0x2f73   :  { %22486 = vtanh.f32 %v8901_v33  ;;  %v13190_v2 = vmul.f32 -1.442695, %v8901_v33  ;;  %v27547_v33 = vld [vmem:[#allocation35_spill] sm:$0xff] }
0x2f75   :  { %22488 = vpow2.f32 %v13190_v2 }
0x2f7d   :  { %v22487_v13 = vpop.eup %22486 }
0x2f7e   :  { %8911 = vrot.lane.b32.xlu0 %v22487_v13, %s22639_s21 }
0x2f7f   :  { %v22489_v15 = vpop.eup %22488 }
0x2f80   :  { %v8905_v38 = vadd.f32 1.0, %v22489_v15  ;;  %v27546_v15 = vld [vmem:[#allocation33_spill] sm:$0xff] }
0x2f82   :  { %22490 = vrcp.f32 %v8905_v38 }
0x2f8c   :  { %v22491_v8 = vpop.eup %22490 }
0x2f8d   :  { %v8909_v63 = vmul.f32 %v22491_v8, %v27543_v37  ;;  %v27552_v37 = vld [vmem:[#allocation40_spill] sm:$0xff] }
0x2ff0   :  { %v8912_v62 = vpop.permute.xlu0 %8911 }
0x2ff1   :  { %v8914_v4 = vmul.f32 %v22491_v8, %v8912_v62  ;;  %v27549_v62 = vld [vmem:[#allocation37_spill] sm:$0xff] }
0x2ff3   :  { %8916 = vrot.lane.b32.xlu1 %v8914_v4, %s22640_s24  ;;  %v27548_v4 = vld [vmem:[#allocation36_spill] sm:$0xff] }
0x3065   :  { %v8917_v47 = vpop.permute.xlu1 %8916 }
0x3066   :  { %v25913_v59 = vadd.f32 %v8917_v47, %v8909_v63  ;;  %v27553_v63 = vld [vmem:[#allocation41_spill] sm:$0xff] }
0x3068   :  { %27544 = vst [vmem:[#allocation34_spill] sm:$0xff] %v25913_v59  ;;  %22492 = vtanh.f32 %v25913_v59 }
0x3072   :  { %v22493_v12 = vpop.eup %22492 }
0x3073   :  { %8922 = vrot.lane.b32.xlu0 %v22493_v12, %s22639_s21  ;;  %v27554_v12 = vld [vmem:[#allocation42_spill] sm:$0xff] }
0x30e5   :  { %v8923_v13 = vpop.permute.xlu0 %8922 }
0x30e6   :  { %v8925_v2 = vmul.f32 %v22491_v8, %v8923_v13  ;;  %v27550_v8 = vld [vmem:[#allocation38_spill] sm:$0xff] }
0x30e8   :  { %8927 = vrot.lane.b32.xlu1 %v8925_v2, %s22640_s24 }
0x315a   :  { %v25918_v38 = vpop.permute.xlu1 %8927 }
0x315b   :  { %27545 = vst [vmem:[#allocation15_spill] sm:$0xff] %v25918_v38  ;;  %18022 = vmatmul.mubr.msk.f32.vlgmr.msra.gmra.mrb[100].mxu1 %vm292_vm1, %v25918_v38 }
0x315c   :  { %21326 = vmatpush3.bf16.xpose.msk.msra.mxu1 %vm22904_vm2, %v27546_v15  ;;  %18091 = vmatprep.mubr.msk.f32.mxu1 %vm22637_vm0, %v27284_v3 }
0x315d   :  { %21327 = vmatprep.subr.bf16.mxu1 %v27285_v51 }
0x3164   :  { %21330 = vmatpush3.bf16.xpose.msk.msra.mxu1 %vm22904_vm2, %v27547_v33 }
0x3165   :  { %21331 = vmatprep.subr.bf16.mxu1 %v27285_v51 }
0x316c   :  { %21334 = vmatpush3.bf16.xpose.msk.msra.mxu1 %vm22904_vm2, %v27548_v4 }
0x316d   :  { %21335 = vmatprep.subr.bf16.mxu1 %v27285_v51 }
0x3174   :  { %21338 = vmatpush3.bf16.xpose.msk.msra.mxu1 %vm22904_vm2, %v27549_v62 }
0x3175   :  { %21339 = vmatprep.subr.bf16.mxu1 %v27285_v51 }
0x317c   :  { %21342 = vmatpush3.bf16.xpose.msk.msra.mxu1 %vm22904_vm2, %v27550_v8 }
0x317d   :  { %21343 = vmatprep.subr.bf16.mxu1 %v27285_v51 }
0x3184   :  { %21346 = vmatpush3.bf16.xpose.msk.msra.mxu1 %vm22904_vm2, %v27551_v16 }
0x3185   :  { %21347 = vmatprep.subr.bf16.mxu1 %v27285_v51 }
0x318c   :  { %21350 = vmatpush3.bf16.xpose.msk.msra.mxu1 %vm22904_vm2, %v27552_v37 }
0x318d   :  { %21351 = vmatprep.subr.bf16.mxu1 %v27285_v51 }
0x3194   :  { %21354 = vmatpush3.bf16.xpose.msk.msra.mxu1 %vm22904_vm2, %v27553_v63 }
0x3195   :  { %21387 = vmatprep.subr.bf16.mxu1 %v27285_v51 }
0x322e   :  { %v25956_v47 = vpop.f32.mrb[100].mxu1 }
0x322f   :  { %v9009_v13 = vrot.slane %v25956_v47, %v27554_v12  ;;  %v18023_v2 = vpop.f32.mrb[101].mxu1 }
0x3231   :  { %v9017_v59 = vcombine.high %v9009_v13, %v9009_v13  ;;  %v9025_v38 = vrot.slane %v9009_v13, %v27554_v12 }
0x3233   :  { %v9039_v16 = vrot.slane %v9017_v59, %v27554_v12  ;;  %18057 = vmatmul.mubr.msk.f32.vlgmr.msra.gmra.mrb[94].mxu0 %vm292_vm1, %v9025_v38  ;;  %v9047_v59 = vcombine.high %v9025_v38, %v9025_v38  ;;  %v9002_v38 = vcombine.high %v25956_v47, %v25956_v47 }
0x3234   :  { %21358 = vmatpush3.bf16.xpose.msk.msra.mxu0 %vm22904_vm2, %v23119_v0  ;;  %18126 = vmatprep.mubr.msk.f32.mxu0 %vm22637_vm0, %v27284_v3 }
0x3235   :  { %18092 = vmatmul.mubr.msk.f32.vlgmr.msra.gmra.mrb[102].mxu1 %vm292_vm1, %v9039_v16  ;;  %21359 = vmatprep.subr.bf16.mxu0 %v27285_v51  ;;  %v9049_v13 = vcombine.high %v9039_v16, %v9039_v16  ;;  %v9016_v16 = vrot.slane %v9002_v38, %v27554_v12  ;;  %v27556_v38 = vld [vmem:[#allocation53_spill] sm:$0xff] }
0x3236   :  { %21390 = vmatpush3.bf16.xpose.msk.msra.mxu1 %vm22904_vm2, %v23124_v7  ;;  %18161 = vmatprep.mubr.msk.f32.mxu1 %vm22637_vm0, %v27284_v3 }
0x3237   :  { %21391 = vmatprep.subr.bf16.mxu1 %v27285_v51  ;;  %v9018_v2 = vcombine.high %v9016_v16, %v9016_v16 }
0x3239   :  { %v9046_v47 = vrot.slane %v9018_v2, %v27554_v12  ;;  %v27558_v2 = vld [vmem:[#allocation55_spill] sm:$0xff] }
0x323c   :  { %21362 = vmatpush3.bf16.xpose.msk.msra.mxu0 %vm22904_vm2, %v23157_v22 }
0x323d   :  { %21363 = vmatprep.subr.bf16.mxu0 %v27285_v51 }
0x323e   :  { %21394 = vmatpush3.bf16.xpose.msk.msra.mxu1 %vm22904_vm2, %v23159_v25 }
0x323f   :  { %21395 = vmatprep.subr.bf16.mxu1 %v27285_v51 }
0x3244   :  { %21366 = vmatpush3.bf16.xpose.msk.msra.mxu0 %vm22904_vm2, %v23181_v36 }
0x3245   :  { %21367 = vmatprep.subr.bf16.mxu0 %v27285_v51 }
0x3246   :  { %21398 = vmatpush3.bf16.xpose.msk.msra.mxu1 %vm22904_vm2, %v23183_v39 }
0x3247   :  { %21399 = vmatprep.subr.bf16.mxu1 %v27285_v51 }
0x324c   :  { %21370 = vmatpush3.bf16.xpose.msk.msra.mxu0 %vm22904_vm2, %v23205_v49 }
0x324d   :  { %21371 = vmatprep.subr.bf16.mxu0 %v27285_v51 }
0x324e   :  { %21402 = vmatpush3.bf16.xpose.msk.msra.mxu1 %vm22904_vm2, %v23207_v52 }
0x324f   :  { %21403 = vmatprep.subr.bf16.mxu1 %v27285_v51 }
0x3254   :  { %21374 = vmatpush3.bf16.xpose.msk.msra.mxu0 %vm22904_vm2, %v23229_v1 }
0x3255   :  { %21375 = vmatprep.subr.bf16.mxu0 %v27285_v51 }
0x3256   :  { %21406 = vmatpush3.bf16.xpose.msk.msra.mxu1 %vm22904_vm2, %v23231_v14 }
0x3257   :  { %21407 = vmatprep.subr.bf16.mxu1 %v27285_v51 }
0x325c   :  { %21378 = vmatpush3.bf16.xpose.msk.msra.mxu0 %vm22904_vm2, %v23253_v30 }
0x325d   :  { %21379 = vmatprep.subr.bf16.mxu0 %v27285_v51 }
0x325e   :  { %21410 = vmatpush3.bf16.xpose.msk.msra.mxu1 %vm22904_vm2, %v23255_v31 }
0x325f   :  { %21411 = vmatprep.subr.bf16.mxu1 %v27285_v51 }
0x3264   :  { %21382 = vmatpush3.bf16.xpose.msk.msra.mxu0 %vm22904_vm2, %v23277_v45 }
0x3265   :  { %21383 = vmatprep.subr.bf16.mxu0 %v27285_v51 }
0x3266   :  { %21414 = vmatpush3.bf16.xpose.msk.msra.mxu1 %vm22904_vm2, %v23279_v57 }
0x3267   :  { %21415 = vmatprep.subr.bf16.mxu1 %v27285_v51 }
0x326c   :  { %21386 = vmatpush3.bf16.xpose.msk.msra.mxu0 %vm22904_vm2, %v23301_v18 }
0x326d   :  { %21419 = vmatprep.subr.bf16.mxu0 %v27285_v51 }
0x326e   :  { %21418 = vmatpush3.bf16.xpose.msk.msra.mxu1 %vm22904_vm2, %v23303_v21 }
0x326f   :  { %21451 = vmatprep.subr.bf16.mxu1 %v27285_v51 }
0x3273   :  { %18127 = vmatmul.mubr.msk.f32.vlgmr.msra.gmra.mrb[96].mxu0 %vm292_vm1, %v9047_v59  ;;  %v9032_v59 = vrot.slane %v9016_v16, %v27554_v12  ;;  %v27557_v16 = vld [vmem:[#allocation54_spill] sm:$0xff]  ;;  %v27559_v12 = vld [vmem:[#allocation56_spill] sm:$0xff] }
0x3274   :  { %21422 = vmatpush3.bf16.xpose.msk.msra.mxu0 %vm22904_vm2, %v23325_v44  ;;  %18196 = vmatprep.mubr.msk.f32.mxu0 %vm22637_vm0, %v27284_v3 }
0x3275   :  { %18162 = vmatmul.mubr.msk.f32.vlgmr.msra.gmra.mrb[104].mxu1 %vm292_vm1, %v9049_v13  ;;  %21423 = vmatprep.subr.bf16.mxu0 %v27285_v51  ;;  %v27555_v13 = vld [vmem:[#allocation52_spill] sm:$0xff] }
0x3276   :  { %21454 = vmatpush3.bf16.xpose.msk.msra.mxu1 %vm22904_vm2, %v23329_v60  ;;  %18231 = vmatprep.mubr.msk.f32.mxu1 %vm22637_vm0, %v27284_v3 }
0x3277   :  { %21455 = vmatprep.subr.bf16.mxu1 %v27285_v51 }
0x327c   :  { %21426 = vmatpush3.bf16.xpose.msk.msra.mxu0 %vm22904_vm2, %v23359_v35 }
0x327d   :  { %21427 = vmatprep.subr.bf16.mxu0 %v27285_v51 }
0x327e   :  { %21458 = vmatpush3.bf16.xpose.msk.msra.mxu1 %vm22904_vm2, %v23361_v40 }
0x327f   :  { %21459 = vmatprep.subr.bf16.mxu1 %v27285_v51 }
0x3284   :  { %21430 = vmatpush3.bf16.xpose.msk.msra.mxu0 %vm22904_vm2, %v23383_v10 }
0x3285   :  { %21431 = vmatprep.subr.bf16.mxu0 %v27285_v51 }
0x3286   :  { %21462 = vmatpush3.bf16.xpose.msk.msra.mxu1 %vm22904_vm2, %v23385_v17 }
0x3287   :  { %21463 = vmatprep.subr.bf16.mxu1 %v27285_v51 }
0x328c   :  { %21434 = vmatpush3.bf16.xpose.msk.msra.mxu0 %vm22904_vm2, %v23407_v61 }
0x328d   :  { %21435 = vmatprep.subr.bf16.mxu0 %v27285_v51 }
0x328e   :  { %21466 = vmatpush3.bf16.xpose.msk.msra.mxu1 %vm22904_vm2, %v23409_v6 }
0x328f   :  { %21467 = vmatprep.subr.bf16.mxu1 %v27285_v51 }
0x3294   :  { %21438 = vmatpush3.bf16.xpose.msk.msra.mxu0 %vm22904_vm2, %v23431_v41 }
0x3295   :  { %21439 = vmatprep.subr.bf16.mxu0 %v27285_v51 }
0x3296   :  { %21470 = vmatpush3.bf16.xpose.msk.msra.mxu1 %vm22904_vm2, %v23433_v58 }
0x3297   :  { %21471 = vmatprep.subr.bf16.mxu1 %v27285_v51 }
0x329c   :  { %21442 = vmatpush3.bf16.xpose.msk.msra.mxu0 %vm22904_vm2, %v23455_v11 }
0x329d   :  { %21443 = vmatprep.subr.bf16.mxu0 %v27285_v51 }
0x329e   :  { %21474 = vmatpush3.bf16.xpose.msk.msra.mxu1 %vm22904_vm2, %v23457_v26 }
0x329f   :  { %21475 = vmatprep.subr.bf16.mxu1 %v27285_v51 }
0x32a4   :  { %21446 = vmatpush3.bf16.xpose.msk.msra.mxu0 %vm22904_vm2, %v23479_v43 }
0x32a5   :  { %21447 = vmatprep.subr.bf16.mxu0 %v27285_v51 }
0x32a6   :  { %21478 = vmatpush3.bf16.xpose.msk.msra.mxu1 %vm22904_vm2, %v23481_v23 }
0x32a7   :  { %21479 = vmatprep.subr.bf16.mxu1 %v27285_v51 }
0x32ac   :  { %21450 = vmatpush3.bf16.xpose.msk.msra.mxu0 %vm22904_vm2, %v23505_v29 }
0x32ad   :  { %21483 = vmatprep.subr.bf16.mxu0 %v27285_v51 }
0x32ae   :  { %21482 = vmatpush3.bf16.xpose.msk.msra.mxu1 %vm22904_vm2, %v23507_v55 }
0x32af   :  { %21515 = vmatprep.subr.bf16.mxu1 %v27285_v51 }
0x32b3   :  { %18197 = vmatmul.mubr.msk.f32.vlgmr.msra.gmra.mrb[98].mxu0 %vm292_vm1, %v9032_v59 }
0x32b4   :  { %21486 = vmatpush3.bf16.xpose.msk.msra.mxu0 %vm22904_vm2, %v23530_v54  ;;  %18266 = vmatprep.mubr.msk.f32.mxu0 %vm22637_vm0, %v27284_v3 }
0x32b5   :  { %18232 = vmatmul.mubr.msk.f32.vlgmr.msra.gmra.mrb[106].mxu1 %vm292_vm1, %v9046_v47  ;;  %21487 = vmatprep.subr.bf16.mxu0 %v27285_v51 }
0x32b6   :  { %21518 = vmatpush3.bf16.xpose.msk.msra.mxu1 %vm22904_vm2, %v23535_v20  ;;  %18301 = vmatprep.mubr.msk.f32.mxu1 %vm22637_vm0, %v27284_v3 }
0x32b7   :  { %21519 = vmatprep.subr.bf16.mxu1 %v27285_v51 }
0x32bc   :  { %21490 = vmatpush3.bf16.xpose.msk.msra.mxu0 %vm22904_vm2, %v27308_v24 }
0x32bd   :  { %21491 = vmatprep.subr.bf16.mxu0 %v27285_v51 }
0x32be   :  { %21522 = vmatpush3.bf16.xpose.msk.msra.mxu1 %vm22904_vm2, %v27309_v19 }
0x32bf   :  { %21523 = vmatprep.subr.bf16.mxu1 %v27285_v51 }
0x32c4   :  { %21494 = vmatpush3.bf16.xpose.msk.msra.mxu0 %vm22904_vm2, %v27310_v28 }
0x32c5   :  { %21495 = vmatprep.subr.bf16.mxu0 %v27285_v51 }
0x32c6   :  { %21526 = vmatpush3.bf16.xpose.msk.msra.mxu1 %vm22904_vm2, %v27311_v46 }
0x32c7   :  { %21527 = vmatprep.subr.bf16.mxu1 %v27285_v51 }
0x32cc   :  { %21498 = vmatpush3.bf16.xpose.msk.msra.mxu0 %vm22904_vm2, %v27312_v9 }
0x32cd   :  { %21499 = vmatprep.subr.bf16.mxu0 %v27285_v51 }
0x32ce   :  { %21530 = vmatpush3.bf16.xpose.msk.msra.mxu1 %vm22904_vm2, %v27313_v32 }
0x32cf   :  { %21531 = vmatprep.subr.bf16.mxu1 %v27285_v51 }
0x32d4   :  { %21502 = vmatpush3.bf16.xpose.msk.msra.mxu0 %vm22904_vm2, %v27314_v56 }
0x32d5   :  { %21503 = vmatprep.subr.bf16.mxu0 %v27285_v51 }
0x32d6   :  { %21534 = vmatpush3.bf16.xpose.msk.msra.mxu1 %vm22904_vm2, %v27315_v48 }
0x32d7   :  { %21535 = vmatprep.subr.bf16.mxu1 %v27285_v51 }
0x32dc   :  { %21506 = vmatpush3.bf16.xpose.msk.msra.mxu0 %vm22904_vm2, %v27507_v34 }
0x32dd   :  { %21507 = vmatprep.subr.bf16.mxu0 %v27285_v51 }
0x32de   :  { %21538 = vmatpush3.bf16.xpose.msk.msra.mxu1 %vm22904_vm2, %v27555_v13  ;;  %v9050_v13 = vcombine.high %v9046_v47, %v9046_v47 }
0x32df   :  { %21539 = vmatprep.subr.bf16.mxu1 %v27285_v51 }
0x32e4   :  { %21510 = vmatpush3.bf16.xpose.msk.msra.mxu0 %vm22904_vm2, %v27556_v38  ;;  %v9048_v38 = vcombine.high %v9032_v59, %v9032_v59  ;;  %v27560_v59 = vld [vmem:[#allocation29_spill] sm:$0xff] }
0x32e5   :  { %21511 = vmatprep.subr.bf16.mxu0 %v27285_v51 }
0x32e6   :  { %21542 = vmatpush3.bf16.xpose.msk.msra.mxu1 %vm22904_vm2, %v27557_v16 }
0x32e7   :  { %21543 = vmatprep.subr.bf16.mxu1 %v27285_v51 }
0x32ec   :  { %21514 = vmatpush3.bf16.xpose.msk.msra.mxu0 %vm22904_vm2, %v27558_v2  ;;  %v27570_v2 = vld [vmem:[#allocation62_spill] sm:$0xff] }
0x32ed   :  { %21547 = vmatprep.subr.bf16.mxu0 %v27285_v51 }
0x32ee   :  { %21546 = vmatpush3.bf16.xpose.msk.msra.mxu1 %vm22904_vm2, %v27559_v12 }
0x32ef   :  { %21571 = vmatprep.subr.bf16.mxu1 %v27285_v51 }
0x32f3   :  { %18267 = vmatmul.mubr.msk.f32.vlgmr.msra.gmra.mrb[100].mxu0 %vm292_vm1, %v9048_v38 }
0x32f4   :  { %21549 = vmatpush3.bf16.msra.mxu0 %v27534_v42  ;;  %18336 = vmatprep.mubr.msk.f32.mxu0 %vm22637_vm0, %v27284_v3 }
0x32f5   :  { %18302 = vmatmul.mubr.msk.f32.vlgmr.msra.gmra.mrb[108].mxu1 %vm292_vm1, %v9050_v13  ;;  %21550 = vmatprep.subr.bf16.mxu0 %v27285_v51  ;;  %v27561_v13 = vld [vmem:[#allocation57_spill] sm:$0xff] }
0x32f6   :  { %21573 = vmatpush3.bf16.msra.mxu1 %v27546_v15  ;;  %18371 = vmatprep.mubr.msk.f32.mxu1 %vm22637_vm0, %v27284_v3  ;;  %v27562_v15 = vld [vmem:[#allocation30_spill] sm:$0xff] }
0x32f7   :  { %21574 = vmatprep.subr.bf16.mxu1 %v27285_v51 }
0x32f8   :  { %21552 = vmatpush3.bf16.msra.mxu0 %v27536_v27 }
0x32f9   :  { %21553 = vmatprep.subr.bf16.mxu0 %v27285_v51 }
0x32fa   :  { %21576 = vmatpush3.bf16.msra.mxu1 %v27547_v33 }
0x32fb   :  { %21577 = vmatprep.subr.bf16.mxu1 %v27285_v51 }
0x32fc   :  { %21555 = vmatpush3.bf16.msra.mxu0 %v27537_v5 }
0x32fd   :  { %21556 = vmatprep.subr.bf16.mxu0 %v27285_v51 }
0x32fe   :  { %21579 = vmatpush3.bf16.msra.mxu1 %v27548_v4 }
0x32ff   :  { %21580 = vmatprep.subr.bf16.mxu1 %v27285_v51 }
0x3300   :  { %21558 = vmatpush3.bf16.msra.mxu0 %v27538_v50  ;;  %v27563_v50 = vld [vmem:[#allocation58_spill] sm:$0xff] }
0x3301   :  { %21559 = vmatprep.subr.bf16.mxu0 %v27285_v51 }
0x3302   :  { %21582 = vmatpush3.bf16.msra.mxu1 %v27549_v62 }
0x3303   :  { %21583 = vmatprep.subr.bf16.mxu1 %v27285_v51 }
0x3304   :  { %21561 = vmatpush3.bf16.msra.mxu0 %v27560_v59  ;;  %v27564_v59 = vld [vmem:[#allocation39_spill] sm:$0xff] }
0x3305   :  { %21562 = vmatprep.subr.bf16.mxu0 %v27285_v51 }
0x3306   :  { %v9119_v47 = vpop.f32.mrb[94].mxu0  ;;  %21585 = vmatpush3.bf16.msra.mxu1 %v27550_v8 }
0x3307   :  { %v9120_v38 = vadd.f32 %v9119_v47, %v27561_v13  ;;  %v18058_v4 = vpop.f32.mrb[95].mxu0  ;;  %21586 = vmatprep.subr.bf16.mxu1 %v27285_v51  ;;  %v27568_v13 = vld [vmem:[#allocation60_spill] sm:$0xff] }
0x3308   :  { %v9191_v33 = vpop.f32.mrb[102].mxu1  ;;  %21564 = vmatpush3.bf16.msra.mxu0 %v27562_v15  ;;  %v27565_v4 = vld [vmem:[#allocation31_spill] sm:$0xff] }
0x3309   :  { %v9192_v5 = vadd.f32 %v9191_v33, %v27563_v50  ;;  %v18093_v62 = vpop.f32.mrb[103].mxu1  ;;  %v9627_v27 = vsel %vm1804_vm3, %v9120_v38, -inf  ;;  %21565 = vmatprep.subr.bf16.mxu0 %v27285_v51  ;;  %v27566_v33 = vld [vmem:[#allocation32_spill] sm:$0xff] }
0x330a   :  { %9628 = vmax.xlane.f32.xlu0 %v9627_v27  ;;  %21588 = vmatpush3.bf16.msra.mxu1 %v27564_v59  ;;  %v27567_v62 = vld [vmem:[#allocation59_spill] sm:$0xff] }
0x330b   :  { %v9630_v8 = vsel %vm1804_vm3, %v9192_v5, -inf  ;;  %21589 = vmatprep.subr.bf16.mxu1 %v27285_v51 }
0x330c   :  { %9631 = vmax.xlane.f32.xlu1 %v9630_v8  ;;  %21567 = vmatpush3.bf16.msra.mxu0 %v27565_v4 }
0x330d   :  { %21568 = vmatprep.subr.bf16.mxu0 %v27285_v51 }
0x330e   :  { %21591 = vmatpush3.bf16.msra.mxu1 %v27552_v37 }
0x330f   :  { %21592 = vmatprep.subr.bf16.mxu1 %v27285_v51 }
0x3310   :  { %21570 = vmatpush3.bf16.msra.mxu0 %v27566_v33 }
0x3311   :  { %21595 = vmatprep.subr.bf16.mxu0 %v27285_v51 }
0x3312   :  { %21594 = vmatpush3.bf16.msra.mxu1 %v27553_v63 }
0x3313   :  { %21619 = vmatprep.subr.bf16.mxu1 %v27285_v51 }
0x3346   :  { %v9263_v27 = vpop.f32.mrb[96].mxu0 }
0x3347   :  { %v9264_v47 = vadd.f32 %v9263_v27, %v27567_v62  ;;  %v18128_v8 = vpop.f32.mrb[97].mxu0 }
0x3348   :  { %v9335_v50 = vpop.f32.mrb[104].mxu1 }
0x3349   :  { %v9336_v59 = vadd.f32 %v9335_v50, %v27568_v13  ;;  %v18163_v4 = vpop.f32.mrb[105].mxu1  ;;  %v9633_v37 = vsel %vm1804_vm3, %v9264_v47, -inf }
0x334a   :  { %9634 = vmax.xlane.f32.xlu0 %v9633_v37 }
0x334b   :  { %v9636_v15 = vsel %vm1804_vm3, %v9336_v59, -inf }
0x334e   :  { %9637 = vmax.xlane.f32.xlu0 %v9636_v15 }
0x3386   :  { %v9407_v33 = vpop.f32.mrb[98].mxu0 }
0x3387   :  { %v9408_v42 = vadd.f32 %v9407_v33, %v27569_v53  ;;  %v18198_v63 = vpop.f32.mrb[99].mxu0 }
0x3388   :  { %v9479_v12 = vpop.f32.mrb[106].mxu1 }
0x3389   :  { %v9480_v16 = vadd.f32 %v9479_v12, %v27570_v2  ;;  %v18233_v34 = vpop.f32.mrb[107].mxu1  ;;  %v9639_v27 = vsel %vm1804_vm3, %v9408_v42, -inf }
0x338a   :  { %9640 = vmax.xlane.f32.xlu1 %v9639_v27  ;;  %v27571_v27 = vld [vmem:[#allocation63_spill] sm:$0xff] }
0x338b   :  { %v9642_v50 = vsel %vm1804_vm3, %v9480_v16, -inf }
0x338c   :  { %9643 = vmax.xlane.f32.xlu0 %v9642_v50 }
0x3397   :  { %v9629_v4 = vpop.xlane.xlu0 %9628 }
0x3398   :  { %v9651_v8 = vsub.f32 %v9120_v38, %v9629_v4  ;;  %v27572_v4 = vld [vmem:[#allocation64_spill] sm:$0xff] }
0x3399   :  { %v9632_v37 = vpop.xlane.xlu1 %9631 }
0x339a   :  { %v9659_v13 = vmul.f32 1.442695, %v9651_v8  ;;  %v9652_v62 = vsub.f32 %v9192_v5, %v9632_v37 }
0x339c   :  { %22494 = vpow2.f32 %v9659_v13  ;;  %v9661_v15 = vmul.f32 1.442695, %v9652_v62 }
0x339e   :  { %22496 = vpow2.f32 %v9661_v15 }
0x33a6   :  { %v22495_v33 = vpop.eup %22494 }
0x33a7   :  { %v9675_v63 = vsel %vm1804_vm3, %v22495_v33, 0.0 }
0x33a8   :  { %v22497_v53 = vpop.eup %22496  ;;  %9676 = vadd.xlane.f32.xlu1 %v9675_v63 }
0x33a9   :  { %v9678_v34 = vsel %vm1804_vm3, %v22497_v53, 0.0 }
0x33aa   :  { %9679 = vadd.xlane.f32.xlu0 %v9678_v34 }
0x33c6   :  { %v9551_v12 = vpop.f32.mrb[100].mxu0 }
0x33c7   :  { %v26230_v2 = vadd.f32 %v9551_v12, %v27571_v27  ;;  %v18268_v50 = vpop.f32.mrb[101].mxu0 }
0x33c8   :  { %v9623_v38 = vpop.f32.mrb[108].mxu1 }
0x33c9   :  { %v26233_v8 = vadd.f32 %v9623_v38, %v27572_v4  ;;  %v18303_v5 = vpop.f32.mrb[109].mxu1  ;;  %v9645_v13 = vsel %vm1804_vm3, %v26230_v2, -inf  ;;  %v27579_v4 = vld [vmem:[#allocation43_spill] sm:$0xff] }
0x33ca   :  { %9646 = vmax.xlane.f32.xlu1 %v9645_v13 }
0x33cb   :  { %v9648_v62 = vsel %vm1804_vm3, %v26233_v8, -inf }
0x33cc   :  { %9649 = vmax.xlane.f32.xlu0 %v9648_v62 }
0x33d7   :  { %v9635_v37 = vpop.xlane.xlu0 %9634 }
0x33d8   :  { %v9653_v15 = vsub.f32 %v9264_v47, %v9635_v37 }
0x33da   :  { %v9663_v63 = vmul.f32 1.442695, %v9653_v15 }
0x33db   :  { %v9638_v34 = vpop.xlane.xlu0 %9637 }
0x33dc   :  { %22498 = vpow2.f32 %v9663_v63  ;;  %v9654_v12 = vsub.f32 %v9336_v59, %v9638_v34 }
0x33de   :  { %v9665_v50 = vmul.f32 1.442695, %v9654_v12 }
0x33e0   :  { %22500 = vpow2.f32 %v9665_v50 }
0x33e6   :  { %v26239_v27 = vpop.eup %22498 }
0x33e7   :  { %v9681_v38 = vsel %vm1804_vm3, %v26239_v27, 0.0 }
0x33e8   :  { %9682 = vadd.xlane.f32.xlu1 %v9681_v38 }
0x33ea   :  { %v26243_v5 = vpop.eup %22500 }
0x33eb   :  { %v9684_v13 = vsel %vm1804_vm3, %v26243_v5, 0.0 }
0x33ec   :  { %9685 = vadd.xlane.f32.xlu0 %v9684_v13 }
0x3417   :  { %v9641_v62 = vpop.xlane.xlu1 %9640 }
0x3418   :  { %v9655_v47 = vsub.f32 %v9408_v42, %v9641_v62 }
0x3419   :  { %v9644_v37 = vpop.xlane.xlu0 %9643 }
0x341a   :  { %v9667_v15 = vmul.f32 1.442695, %v9655_v47  ;;  %v9656_v63 = vsub.f32 %v9480_v16, %v9644_v37 }
0x341c   :  { %22502 = vpow2.f32 %v9667_v15  ;;  %v9669_v59 = vmul.f32 1.442695, %v9656_v63 }
0x341e   :  { %22504 = vpow2.f32 %v9669_v59 }
0x3426   :  { %v26247_v34 = vpop.eup %22502 }
0x3427   :  { %v9687_v12 = vsel %vm1804_vm3, %v26247_v34, 0.0 }
0x3428   :  { %v26251_v50 = vpop.eup %22504  ;;  %9688 = vadd.xlane.f32.xlu1 %v9687_v12 }
0x3429   :  { %v9690_v38 = vsel %vm1804_vm3, %v26251_v50, 0.0 }
0x342a   :  { %9691 = vadd.xlane.f32.xlu0 %v9690_v38 }
0x3435   :  { %v9677_v13 = vpop.xlane.xlu1 %9676 }
0x3436   :  { %22506 = vrcp.f32 %v9677_v13 }
0x3437   :  { %v9680_v42 = vpop.xlane.xlu0 %9679 }
0x3438   :  { %22508 = vrcp.f32 %v9680_v42 }
0x3440   :  { %v22507_v16 = vpop.eup %22506 }
0x3441   :  { %v9707_v62 = vmul.f32 %v22507_v16, %v22495_v33 }
0x3442   :  { %v22509_v47 = vpop.eup %22508 }
0x3443   :  { %18337 = vmatmul.mubr.f32.vlgmr.msra.gmra.mrb[102].mxu0 %v9707_v62  ;;  %v9708_v37 = vmul.f32 %v22509_v47, %v22497_v53 }
0x3444   :  { %21597 = vmatpush3.bf16.msra.mxu0 %v23119_v0  ;;  %18406 = vmatprep.mubr.msk.f32.mxu0 %vm22637_vm0, %v27284_v3 }
0x3445   :  { %v9723_v15 = vrot.slane %v9708_v37, 7  ;;  %18372 = vmatmul.mubr.f32.vlgmr.msra.gmra.mrb[110].mxu1 %v9708_v37  ;;  %21598 = vmatprep.subr.bf16.mxu0 %v27285_v51 }
0x3446   :  { %21621 = vmatpush3.bf16.msra.mxu1 %v23124_v7  ;;  %18441 = vmatprep.mubr.msk.f32.mxu1 %vm22637_vm0, %v27284_v3 }
0x3447   :  { %v9724_v63 = vsel %vm1902_vm4, %v9723_v15, %v9707_v62  ;;  %21622 = vmatprep.subr.bf16.mxu1 %v27285_v51 }
0x3448   :  { %21600 = vmatpush3.bf16.msra.mxu0 %v23157_v22 }
0x3449   :  { %21601 = vmatprep.subr.bf16.mxu0 %v27285_v51 }
0x344a   :  { %21624 = vmatpush3.bf16.msra.mxu1 %v23159_v25 }
0x344b   :  { %21625 = vmatprep.subr.bf16.mxu1 %v27285_v51 }
0x344c   :  { %21603 = vmatpush3.bf16.msra.mxu0 %v23181_v36 }
0x344d   :  { %21604 = vmatprep.subr.bf16.mxu0 %v27285_v51 }
0x344e   :  { %21627 = vmatpush3.bf16.msra.mxu1 %v23183_v39 }
0x344f   :  { %21628 = vmatprep.subr.bf16.mxu1 %v27285_v51 }
0x3450   :  { %21606 = vmatpush3.bf16.msra.mxu0 %v23205_v49 }
0x3451   :  { %21607 = vmatprep.subr.bf16.mxu0 %v27285_v51 }
0x3452   :  { %21630 = vmatpush3.bf16.msra.mxu1 %v23207_v52 }
0x3453   :  { %21631 = vmatprep.subr.bf16.mxu1 %v27285_v51 }
0x3454   :  { %21609 = vmatpush3.bf16.msra.mxu0 %v23229_v1 }
0x3455   :  { %21610 = vmatprep.subr.bf16.mxu0 %v27285_v51 }
0x3456   :  { %21633 = vmatpush3.bf16.msra.mxu1 %v23231_v14 }
0x3457   :  { %v9647_v53 = vpop.xlane.xlu1 %9646  ;;  %21634 = vmatprep.subr.bf16.mxu1 %v27285_v51 }
0x3458   :  { %v9657_v33 = vsub.f32 %v26230_v2, %v9647_v53  ;;  %21612 = vmatpush3.bf16.msra.mxu0 %v23253_v30 }
0x3459   :  { %v9650_v59 = vpop.xlane.xlu0 %9649  ;;  %21613 = vmatprep.subr.bf16.mxu0 %v27285_v51 }
0x345a   :  { %v9671_v12 = vmul.f32 1.442695, %v9657_v33  ;;  %v9658_v38 = vsub.f32 %v26233_v8, %v9650_v59  ;;  %21636 = vmatpush3.bf16.msra.mxu1 %v23255_v31 }
0x345b   :  { %21637 = vmatprep.subr.bf16.mxu1 %v27285_v51 }
0x345c   :  { %22510 = vpow2.f32 %v9671_v12  ;;  %v9673_v13 = vmul.f32 1.442695, %v9658_v38  ;;  %21615 = vmatpush3.bf16.msra.mxu0 %v23277_v45 }
0x345d   :  { %21616 = vmatprep.subr.bf16.mxu0 %v27285_v51 }
0x345e   :  { %22512 = vpow2.f32 %v9673_v13  ;;  %21639 = vmatpush3.bf16.msra.mxu1 %v23279_v57 }
0x345f   :  { %21640 = vmatprep.subr.bf16.mxu1 %v27285_v51 }
0x3460   :  { %21618 = vmatpush3.bf16.msra.mxu0 %v23301_v18 }
0x3461   :  { %21643 = vmatprep.subr.bf16.mxu0 %v27285_v51 }
0x3462   :  { %21642 = vmatpush3.bf16.msra.mxu1 %v23303_v21 }
0x3463   :  { %21667 = vmatprep.subr.bf16.mxu1 %v27285_v51 }
0x3466   :  { %v26294_v2 = vpop.eup %22510 }
0x3467   :  { %v9693_v8 = vsel %vm1804_vm3, %v26294_v2, 0.0 }
0x3468   :  { %v26298_v42 = vpop.eup %22512  ;;  %9694 = vadd.xlane.f32.xlu1 %v9693_v8 }
0x3469   :  { %v9696_v16 = vsel %vm1804_vm3, %v26298_v42, 0.0 }
0x346a   :  { %9697 = vadd.xlane.f32.xlu0 %v9696_v16 }
0x3475   :  { %v9683_v62 = vpop.xlane.xlu1 %9682 }
0x3476   :  { %22514 = vrcp.f32 %v9683_v62 }
0x3479   :  { %v9686_v47 = vpop.xlane.xlu0 %9685 }
0x347a   :  { %22516 = vrcp.f32 %v9686_v47 }
0x3480   :  { %v22515_v37 = vpop.eup %22514 }
0x3481   :  { %v9709_v15 = vmul.f32 %v22515_v37, %v26239_v27 }
0x3483   :  { %v9725_v53 = vrot.slane %v9709_v15, 6  ;;  %18407 = vmatmul.mubr.f32.vlgmr.msra.gmra.mrb[104].mxu0 %v9709_v15  ;;  %v27575_v15 = vld [vmem:[#allocation53_spill] sm:$0xff] }
0x3484   :  { %v22517_v33 = vpop.eup %22516  ;;  %21645 = vmatpush3.bf16.msra.mxu0 %v23325_v44  ;;  %18476 = vmatprep.mubr.msk.f32.mxu0 %vm22637_vm0, %v27284_v3 }
0x3485   :  { %v9726_v59 = vsel %vm1905_vm5, %v9725_v53, %v9724_v63  ;;  %v9710_v12 = vmul.f32 %v22517_v33, %v26243_v5  ;;  %21646 = vmatprep.subr.bf16.mxu0 %v27285_v51  ;;  %v27576_v53 = vld [vmem:[#allocation54_spill] sm:$0xff]  ;;  %v27577_v33 = vld [vmem:[#allocation55_spill] sm:$0xff] }
0x3487   :  { %v9727_v38 = vrot.slane %v9710_v12, 5  ;;  %18442 = vmatmul.mubr.f32.vlgmr.msra.gmra.mrb[112].mxu1 %v9710_v12 }
0x3488   :  { %21669 = vmatpush3.bf16.msra.mxu1 %v23329_v60  ;;  %21648 = vmatpush3.bf16.msra.mxu0 %v23359_v35 }
0x3489   :  { %v9728_v27 = vsel %vm1908_vm6, %v9727_v38, %v9726_v59  ;;  %21670 = vmatprep.subr.bf16.mxu1 %v27285_v51  ;;  %21649 = vmatprep.subr.bf16.mxu0 %v27285_v51  ;;  %v27578_v59 = vld [vmem:[#allocation56_spill] sm:$0xff] }
0x348a   :  { %18511 = vmatprep.mubr.msk.f32.mxu1 %vm22637_vm0, %v27284_v3 }
0x348c   :  { %21672 = vmatpush3.bf16.msra.mxu1 %v23361_v40  ;;  %21651 = vmatpush3.bf16.msra.mxu0 %v23383_v10 }
0x348d   :  { %21673 = vmatprep.subr.bf16.mxu1 %v27285_v51  ;;  %21652 = vmatprep.subr.bf16.mxu0 %v27285_v51 }
0x3490   :  { %21675 = vmatpush3.bf16.msra.mxu1 %v23385_v17  ;;  %21654 = vmatpush3.bf16.msra.mxu0 %v23407_v61 }
0x3491   :  { %21676 = vmatprep.subr.bf16.mxu1 %v27285_v51  ;;  %21655 = vmatprep.subr.bf16.mxu0 %v27285_v51 }
0x3494   :  { %21678 = vmatpush3.bf16.msra.mxu1 %v23409_v6  ;;  %21657 = vmatpush3.bf16.msra.mxu0 %v23431_v41 }
0x3495   :  { %21679 = vmatprep.subr.bf16.mxu1 %v27285_v51  ;;  %21658 = vmatprep.subr.bf16.mxu0 %v27285_v51 }
0x3498   :  { %21681 = vmatpush3.bf16.msra.mxu1 %v23433_v58  ;;  %21660 = vmatpush3.bf16.msra.mxu0 %v23455_v11 }
0x3499   :  { %21682 = vmatprep.subr.bf16.mxu1 %v27285_v51  ;;  %21661 = vmatprep.subr.bf16.mxu0 %v27285_v51 }
0x349c   :  { %21684 = vmatpush3.bf16.msra.mxu1 %v23457_v26  ;;  %21663 = vmatpush3.bf16.msra.mxu0 %v23479_v43 }
0x349d   :  { %21685 = vmatprep.subr.bf16.mxu1 %v27285_v51  ;;  %21664 = vmatprep.subr.bf16.mxu0 %v27285_v51 }
0x34a0   :  { %21687 = vmatpush3.bf16.msra.mxu1 %v23481_v23  ;;  %21666 = vmatpush3.bf16.msra.mxu0 %v23505_v29 }
0x34a1   :  { %21688 = vmatprep.subr.bf16.mxu1 %v27285_v51  ;;  %21691 = vmatprep.subr.bf16.mxu0 %v27285_v51 }
0x34a4   :  { %21690 = vmatpush3.bf16.msra.mxu1 %v23507_v55 }
0x34a5   :  { %21715 = vmatprep.subr.bf16.mxu1 %v27285_v51 }
0x34b5   :  { %v9689_v5 = vpop.xlane.xlu1 %9688 }
0x34b6   :  { %22518 = vrcp.f32 %v9689_v5 }
0x34b7   :  { %v9692_v63 = vpop.xlane.xlu0 %9691 }
0x34b8   :  { %22520 = vrcp.f32 %v9692_v63 }
0x34c0   :  { %v22519_v13 = vpop.eup %22518 }
0x34c1   :  { %v9711_v8 = vmul.f32 %v22519_v13, %v26247_v34  ;;  %v27573_v34 = vld [vmem:[#allocation51_spill] sm:$0xff] }
0x34c2   :  { %v22521_v16 = vpop.eup %22520 }
0x34c3   :  { %v9729_v62 = vrot.slane %v9711_v8, 4  ;;  %18477 = vmatmul.mubr.f32.vlgmr.msra.gmra.mrb[106].mxu0 %v9711_v8  ;;  %v9712_v47 = vmul.f32 %v22521_v16, %v26251_v50  ;;  %v27574_v50 = vld [vmem:[#allocation52_spill] sm:$0xff] }
0x34c4   :  { %21693 = vmatpush3.bf16.msra.mxu0 %v23530_v54  ;;  %18546 = vmatprep.mubr.msk.f32.mxu0 %vm22637_vm0, %v27284_v3 }
0x34c5   :  { %v9730_v37 = vsel %vm1911_vm7, %v9729_v62, %v9728_v27  ;;  %18512 = vmatmul.mubr.f32.vlgmr.msra.gmra.mrb[114].mxu1 %v9712_v47  ;;  %21694 = vmatprep.subr.bf16.mxu0 %v27285_v51  ;;  %v9731_v5 = vrot.slane %v9712_v47, 3  ;;  %v27580_v47 = vld [vmem:[#allocation9_spill] sm:$0xff] }
0x34c6   :  { %21717 = vmatpush3.bf16.msra.mxu1 %v23535_v20  ;;  %18581 = vmatprep.mubr.msk.f32.mxu1 %vm22637_vm0, %v27284_v3 }
0x34c7   :  { %21718 = vmatprep.subr.bf16.mxu1 %v27285_v51  ;;  %v9732_v62 = vsel %vm1914_vm8, %v9731_v5, %v9730_v37  ;;  %v27582_v37 = vld [vmem:[#allocation11_spill] sm:$0xff] }
0x34c8   :  { %21696 = vmatpush3.bf16.msra.mxu0 %v27308_v24 }
0x34c9   :  { %21697 = vmatprep.subr.bf16.mxu0 %v27285_v51 }
0x34ca   :  { %21720 = vmatpush3.bf16.msra.mxu1 %v27309_v19 }
0x34cb   :  { %21721 = vmatprep.subr.bf16.mxu1 %v27285_v51 }
0x34cc   :  { %21699 = vmatpush3.bf16.msra.mxu0 %v27310_v28 }
0x34cd   :  { %21700 = vmatprep.subr.bf16.mxu0 %v27285_v51 }
0x34ce   :  { %21723 = vmatpush3.bf16.msra.mxu1 %v27311_v46 }
0x34cf   :  { %21724 = vmatprep.subr.bf16.mxu1 %v27285_v51 }
0x34d0   :  { %21702 = vmatpush3.bf16.msra.mxu0 %v27312_v9 }
0x34d1   :  { %21703 = vmatprep.subr.bf16.mxu0 %v27285_v51 }
0x34d2   :  { %21726 = vmatpush3.bf16.msra.mxu1 %v27313_v32 }
0x34d3   :  { %21727 = vmatprep.subr.bf16.mxu1 %v27285_v51 }
0x34d4   :  { %21705 = vmatpush3.bf16.msra.mxu0 %v27314_v56 }
0x34d5   :  { %21706 = vmatprep.subr.bf16.mxu0 %v27285_v51 }
0x34d6   :  { %21729 = vmatpush3.bf16.msra.mxu1 %v27315_v48 }
0x34d7   :  { %21730 = vmatprep.subr.bf16.mxu1 %v27285_v51 }
0x34d8   :  { %21708 = vmatpush3.bf16.msra.mxu0 %v27573_v34 }
0x34d9   :  { %21709 = vmatprep.subr.bf16.mxu0 %v27285_v51 }
0x34da   :  { %21732 = vmatpush3.bf16.msra.mxu1 %v27574_v50 }
0x34db   :  { %21733 = vmatprep.subr.bf16.mxu1 %v27285_v51 }
0x34dc   :  { %21711 = vmatpush3.bf16.msra.mxu0 %v27575_v15 }
0x34dd   :  { %21712 = vmatprep.subr.bf16.mxu0 %v27285_v51 }
0x34de   :  { %21735 = vmatpush3.bf16.msra.mxu1 %v27576_v53 }
0x34df   :  { %21736 = vmatprep.subr.bf16.mxu1 %v27285_v51 }
0x34e0   :  { %21714 = vmatpush3.bf16.msra.mxu0 %v27577_v33 }
0x34e1   :  { %21739 = vmatprep.subr.bf16.mxu0 %v27285_v51 }
0x34e2   :  { %21738 = vmatpush3.bf16.msra.mxu1 %v27578_v59 }
0x34e3   :  { %21751 = vmatprep.subr.bf16.mxu1 %v27285_v51 }
0x34f5   :  { %v9695_v12 = vpop.xlane.xlu1 %9694 }
0x34f6   :  { %22522 = vrcp.f32 %v9695_v12 }
0x34f7   :  { %v9698_v38 = vpop.xlane.xlu0 %9697 }
0x34f8   :  { %22524 = vrcp.f32 %v9698_v38 }
0x3500   :  { %v22523_v27 = vpop.eup %22522 }
0x3501   :  { %v9713_v63 = vmul.f32 %v22523_v27, %v26294_v2 }
0x3502   :  { %v22525_v13 = vpop.eup %22524 }
0x3503   :  { %v9733_v8 = vrot.slane %v9713_v63, 2  ;;  %18547 = vmatmul.mubr.f32.vlgmr.msra.gmra.mrb[108].mxu0 %v9713_v63  ;;  %v9714_v16 = vmul.f32 %v22525_v13, %v26298_v42  ;;  %v27581_v42 = vld [vmem:[#allocation44_spill] sm:$0xff] }
0x3504   :  { %21741 = vmatpush3.bf16.msra.mxu0 %v27579_v4  ;;  %18592 = vmatprep.mubr.msk.f32.mxu0 %vm22637_vm0, %v27284_v3 }
0x3505   :  { %v9734_v12 = vsel %vm1917_vm9, %v9733_v8, %v9732_v62  ;;  %v9735_v59 = vrot.slane %v9714_v16, 1  ;;  %18582 = vmatmul.mubr.f32.vlgmr.msra.gmra.mrb[116].mxu1 %v9714_v16  ;;  %21742 = vmatprep.subr.bf16.mxu0 %v27285_v51 }
0x3506   :  { %21753 = vmatpush3.bf16.msra.mxu1 %v27580_v47  ;;  %18614 = vmatprep.mubr.msk.f32.mxu1 %vm22637_vm0, %v27284_v3 }
0x3507   :  { %v9736_v2 = vsel %vm1920_vm10, %v9735_v59, %v9734_v12  ;;  %21754 = vmatprep.subr.bf16.mxu1 %v27285_v51 }
0x3508   :  { %9739 = vst [vmem:[#allocation5 + $0x20] sm:$0xff] %v9736_v2  ;;  %21744 = vmatpush3.bf16.msra.mxu0 %v27581_v42 }
0x3509   :  { %21745 = vmatprep.subr.bf16.mxu0 %v27285_v51 }
0x350a   :  { %21756 = vmatpush3.bf16.msra.mxu1 %v27582_v37 }
0x350b   :  { %21757 = vmatprep.subr.bf16.mxu1 %v27285_v51 }
0x3516   :  { %v9806_v38 = vpop.f32.mrb[102].mxu0 }
0x3517   :  { %v18338_v27 = vpop.f32.mrb[103].mxu0 }
0x3518   :  { %v9876_v5 = vpop.f32.mrb[110].mxu1 }
0x3519   :  { %v10308_v63 = vrot.slane %v9876_v5, 7  ;;  %v18373_v13 = vpop.f32.mrb[111].mxu1 }
0x351b   :  { %v10309_v8 = vsel %vm1902_vm4, %v10308_v63, %v9806_v38 }
0x3556   :  { %v9946_v16 = vpop.f32.mrb[104].mxu0 }
0x3557   :  { %v10310_v59 = vrot.slane %v9946_v16, 6  ;;  %v18408_v62 = vpop.f32.mrb[105].mxu0 }
0x3559   :  { %v10311_v12 = vsel %vm1905_vm5, %v10310_v59, %v10309_v8 }
0x355a   :  { %v10016_v47 = vpop.f32.mrb[112].mxu1 }
0x355b   :  { %v10312_v2 = vrot.slane %v10016_v47, 5  ;;  %v18443_v42 = vpop.f32.mrb[113].mxu1  ;;  %v27588_v47 = vld [vmem:[#allocation20_spill] sm:$0xff] }
0x355d   :  { %v10313_v4 = vsel %vm1908_vm6, %v10312_v2, %v10311_v12  ;;  %v27589_v2 = vld [vmem:[#allocation17_spill] sm:$0xff] }
0x3596   :  { %v10086_v37 = vpop.f32.mrb[106].mxu0 }
0x3597   :  { %v10314_v33 = vrot.slane %v10086_v37, 4  ;;  %v18478_v53 = vpop.f32.mrb[107].mxu0  ;;  %v27590_v37 = vld [vmem:[#allocation19_spill] sm:$0xff] }
0x3598   :  { %v10156_v15 = vpop.f32.mrb[114].mxu1  ;;  %v27583_v53 = vld [vmem:[#allocation45_spill] sm:$0xff] }
0x3599   :  { %v10315_v27 = vsel %vm1911_vm7, %v10314_v33, %v10313_v4  ;;  %v10316_v5 = vrot.slane %v10156_v15, 3  ;;  %v18513_v13 = vpop.f32.mrb[115].mxu1  ;;  %v27584_v4 = vld [vmem:[#allocation46_spill] sm:$0xff]  ;;  %v27585_v15 = vld [vmem:[#allocation15_spill] sm:$0xff] }
0x359a   :  { %v27587_v33 = vld [vmem:[#allocation14_spill] sm:$0xff] }
0x359b   :  { %v10317_v38 = vsel %vm1914_vm8, %v10316_v5, %v10315_v27 }
0x35d6   :  { %v10226_v63 = vpop.f32.mrb[108].mxu0 }
0x35d7   :  { %v10318_v16 = vrot.slane %v10226_v63, 2  ;;  %v18548_v62 = vpop.f32.mrb[109].mxu0 }
0x35d8   :  { %v10296_v50 = vpop.f32.mrb[116].mxu1  ;;  %v27592_v62 = vld [vmem:[#allocation12_spill] sm:$0xff] }
0x35d9   :  { %v10319_v8 = vsel %vm1917_vm9, %v10318_v16, %v10317_v38  ;;  %v10320_v59 = vrot.slane %v10296_v50, 1  ;;  %v18583_v42 = vpop.f32.mrb[117].mxu1  ;;  %v27586_v50 = vld [vmem:[#allocation13_spill] sm:$0xff]  ;;  %v27591_v16 = vld [vmem:[#allocation10_spill] sm:$0xff] }
0x35da   :  { %v27594_v42 = vld [vmem:[#allocation18_spill] sm:$0xff] }
0x35db   :  { %v10321_v12 = vsel %vm1920_vm10, %v10320_v59, %v10319_v8  ;;  %v13330_v8 = vld [vmem:[%s27039_s0 + $0x28] sm:$0xff] }
0x35dc   :  { %18593 = vmatmul.mubr.msk.f32.vlgmr.msra.gmra.mrb[110].mxu0 %vm292_vm1, %v10321_v12  ;;  %v27593_v59 = vld [vmem:[#allocation16_spill] sm:$0xff]  ;;  %v27595_v12 = vld [vmem:[#allocation22_spill] sm:$0xff] }
0x35dd   :  { %21747 = vmatpush3.bf16.msra.mxu0 %v27583_v53  ;;  %18603 = vmatprep.mubr.msk.f32.mxu0 %vm22637_vm0, %v27284_v3 }
0x35de   :  { %21748 = vmatprep.subr.bf16.mxu0 %v27285_v51 }
0x35e1   :  { %21750 = vmatpush3.bf16.msra.mxu0 %v27584_v4 }
0x35e2   :  { %21763 = vmatprep.subr.bf16.mxu0 %v27285_v51 }
0x35e4   :  { %18604 = vmatmul.mubr.msk.f32.vlgmr.msra.gmra.mrb[110].mxu0 %vm292_vm1, %v27585_v15 }
0x35e5   :  { %21765 = vmatpush3.bf16.msra.mxu0 %v27586_v50  ;;  %18636 = vmatprep.mubr.msk.f32.mxu0 %vm22637_vm0, %v27284_v3  ;;  %v27596_v50 = vld [vmem:[#allocation23_spill] sm:$0xff] }
0x35e6   :  { %21766 = vmatprep.subr.bf16.mxu0 %v27285_v51 }
0x35e9   :  { %21768 = vmatpush3.bf16.msra.mxu0 %v27587_v33 }
0x35ea   :  { %21775 = vmatprep.subr.bf16.mxu0 %v27285_v51 }
0x35ec   :  { %18637 = vmatmul.mubr.msk.f32.vlgmr.msra.gmra.mrb[112].mxu0 %vm292_vm1, %v27588_v47 }
0x35ed   :  { %21777 = vmatpush3.bf16.msra.mxu0 %v27589_v2  ;;  %18658 = vmatprep.mubr.msk.f32.mxu0 %vm22637_vm0, %v27284_v3 }
0x35ee   :  { %21778 = vmatprep.subr.bf16.mxu0 %v27285_v51 }
0x35f1   :  { %21780 = vmatpush3.bf16.msra.mxu0 %v27590_v37 }
0x35f2   :  { %21787 = vmatprep.subr.bf16.mxu0 %v27285_v51 }
0x36b7   :  { %v10460_v27 = vpop.f32.mrb[110].mxu0 }
0x36b8   :  { %22526 = vtanh.f32 %v10460_v27  ;;  %v18605_v5 = vpop.f32.mrb[111].mxu0 }
0x36bf   :  { %v10680_v13 = vpop.f32.mrb[112].mxu0 }
0x36c0   :  { %v18638_v38 = vpop.f32.mrb[113].mxu0 }
0x36c2   :  { %v22527_v63 = vpop.eup %22526 }
0x36c3   :  { %10465 = vst.msk [vmem:[#allocation2 + $0x20] sm:$0xff] %vm292_vm1, %v22527_v63  ;;  %18615 = vmatmul.mubr.msk.f32.vlgmr.msra.gmra.mrb[118].mxu1 %vm292_vm1, %v22527_v63 }
0x36c4   :  { %21759 = vmatpush3.bf16.msra.mxu1 %v27591_v16  ;;  %18625 = vmatprep.mubr.msk.f32.mxu1 %vm22637_vm0, %v27284_v3 }
0x36c5   :  { %21760 = vmatprep.subr.bf16.mxu1 %v27285_v51 }
0x36c8   :  { %21762 = vmatpush3.bf16.msra.mxu1 %v27592_v62 }
0x36c9   :  { %21769 = vmatprep.subr.bf16.mxu1 %v27285_v51 }
0x36cb   :  { %18626 = vmatmul.mubr.msk.f32.vlgmr.msra.gmra.mrb[120].mxu1 %vm292_vm1, %v13330_v8 }
0x36cc   :  { %21771 = vmatpush3.bf16.msra.mxu1 %v27593_v59  ;;  %18647 = vmatprep.mubr.msk.f32.mxu1 %vm22637_vm0, %v27284_v3 }
0x36cd   :  { %21772 = vmatprep.subr.bf16.mxu1 %v27285_v51 }
0x36d0   :  { %21774 = vmatpush3.bf16.msra.mxu1 %v27594_v42 }
0x36d1   :  { %21781 = vmatprep.subr.bf16.mxu1 %v27285_v51 }
0x36d3   :  { %18648 = vmatmul.mubr.msk.f32.vlgmr.msra.gmra.mrb[122].mxu1 %vm292_vm1, %v27585_v15  ;;  %v22586_v15 = vld [vmem:[%s27046_s7] ss:$0 sm:$0xff] }
0x36d4   :  { %21783 = vmatpush3.bf16.msra.mxu1 %v27595_v12  ;;  %18669 = vmatprep.mubr.msk.f32.mxu1 %vm22637_vm0, %v27284_v3 }
0x36d5   :  { %21784 = vmatprep.subr.bf16.mxu1 %v27285_v51 }
0x36d8   :  { %21786 = vmatpush3.bf16.msra.mxu1 %v27596_v50 }
0x36d9   :  { %21819 = vmatprep.subr.bf16.mxu1 %v27285_v51 }
0x3796   :  { %v10537_v33 = vpop.f32.mrb[118].mxu1 }
0x3797   :  { %v18616_v47 = vpop.f32.mrb[119].mxu1 }
0x379e   :  { %v10610_v2 = vpop.f32.mrb[120].mxu1 }
0x379f   :  { %v10611_v37 = vadd.f32 %v10610_v2, %v10537_v33  ;;  %v18627_v27 = vpop.f32.mrb[121].mxu1 }
0x37a1   :  { %v10684_v5 = vadd.f32 %v10680_v13, %v10611_v37  ;;  %v27597_v13 = vld [vmem:[#allocation21_spill] sm:$0xff] }
0x37a3   :  { %v10685_v38 = vadd.f32 %v22586_v15, %v10684_v5 }
0x37a5   :  { %22528 = vtanh.f32 %v10685_v38  ;;  %v13334_v8 = vmul.f32 -1.442695, %v10685_v38 }
0x37a6   :  { %v10776_v63 = vpop.f32.mrb[122].mxu1 }
0x37a7   :  { %v18649_v16 = vpop.f32.mrb[123].mxu1  ;;  %22530 = vpow2.f32 %v13334_v8  ;;  %v27600_v8 = vld [vmem:[#allocation26_spill] sm:$0xff] }
0x37a8   :  { %v27598_v16 = vld [vmem:[#allocation25_spill] sm:$0xff] }
0x37af   :  { %v22529_v62 = vpop.eup %22528 }
0x37b0   :  { %10695 = vrot.lane.b32.xlu1 %v22529_v62, %s22639_s21 }
0x37b1   :  { %v22531_v59 = vpop.eup %22530 }
0x37b2   :  { %v10689_v42 = vadd.f32 1.0, %v22531_v59  ;;  %v27601_v59 = vld [vmem:[#allocation27_spill] sm:$0xff] }
0x37b4   :  { %22532 = vrcp.f32 %v10689_v42  ;;  %v27602_v42 = vld [vmem:[#allocation28_spill] sm:$0xff] }
0x37be   :  { %v22533_v12 = vpop.eup %22532 }
0x37bf   :  { %v10693_v47 = vmul.f32 %v22533_v12, %v27597_v13  ;;  %v27606_v13 = vld [vmem:[#allocation32_spill] sm:$0xff] }
0x3822   :  { %v10696_v50 = vpop.permute.xlu1 %10695 }
0x3823   :  { %v10698_v33 = vmul.f32 %v22533_v12, %v10696_v50  ;;  %v27604_v50 = vld [vmem:[#allocation30_spill] sm:$0xff] }
0x3825   :  { %10700 = vrot.lane.b32.xlu0 %v10698_v33, %s22640_s24  ;;  %v27605_v33 = vld [vmem:[#allocation31_spill] sm:$0xff] }
0x3897   :  { %v10701_v2 = vpop.permute.xlu0 %10700 }
0x3898   :  { %v10703_v37 = vadd.f32 %v10701_v2, %v10693_v47 }
0x389a   :  { %22534 = vtanh.f32 %v10703_v37 }
0x38a4   :  { %v22535_v27 = vpop.eup %22534 }
0x38a5   :  { %10706 = vrot.lane.b32.xlu1 %v22535_v27, %s22639_s21  ;;  %v22587_v27 = vld [vmem:[%s27046_s7 + $0x1] ss:$0 sm:$0xff] }
0x3917   :  { %v10707_v5 = vpop.permute.xlu1 %10706 }
0x3918   :  { %v10709_v15 = vmul.f32 %v22533_v12, %v10707_v5  ;;  %v27603_v12 = vld [vmem:[#allocation29_spill] sm:$0xff] }
0x391a   :  { %10781 = vrot.lane.b32.xlu1 %v10709_v15, %s22640_s24 }
0x398c   :  { %v10782_v38 = vpop.permute.xlu1 %10781 }
0x398d   :  { %18659 = vmatmul.mubr.msk.f32.vlgmr.msra.gmra.mrb[114].mxu0 %vm292_vm1, %v10782_v38 }
0x398e   :  { %21790 = vmatpush3.bf16.xpose.msk.msra.mxu0 %vm22904_vm2, %v27598_v16  ;;  %18704 = vmatprep.mubr.msk.f32.mxu0 %vm22637_vm0, %v27284_v3 }
0x398f   :  { %21791 = vmatprep.subr.bf16.mxu0 %v27285_v51 }
0x3996   :  { %21794 = vmatpush3.bf16.xpose.msk.msra.mxu0 %vm22904_vm2, %v27600_v8 }
0x3997   :  { %21795 = vmatprep.subr.bf16.mxu0 %v27285_v51 }
0x399e   :  { %21798 = vmatpush3.bf16.xpose.msk.msra.mxu0 %vm22904_vm2, %v27601_v59 }
0x399f   :  { %21799 = vmatprep.subr.bf16.mxu0 %v27285_v51 }
0x39a6   :  { %21802 = vmatpush3.bf16.xpose.msk.msra.mxu0 %vm22904_vm2, %v27602_v42 }
0x39a7   :  { %21803 = vmatprep.subr.bf16.mxu0 %v27285_v51 }
0x39ae   :  { %21806 = vmatpush3.bf16.xpose.msk.msra.mxu0 %vm22904_vm2, %v27603_v12 }
0x39af   :  { %21807 = vmatprep.subr.bf16.mxu0 %v27285_v51 }
0x39b6   :  { %21810 = vmatpush3.bf16.xpose.msk.msra.mxu0 %vm22904_vm2, %v27604_v50 }
0x39b7   :  { %21811 = vmatprep.subr.bf16.mxu0 %v27285_v51 }
0x39be   :  { %21814 = vmatpush3.bf16.xpose.msk.msra.mxu0 %vm22904_vm2, %v27605_v33 }
0x39bf   :  { %21815 = vmatprep.subr.bf16.mxu0 %v27285_v51 }
0x39c6   :  { %21818 = vmatpush3.bf16.xpose.msk.msra.mxu0 %vm22904_vm2, %v27606_v13 }
0x39c7   :  { %21851 = vmatprep.subr.bf16.mxu0 %v27285_v51 }
0x3a60   :  { %v10851_v47 = vpop.f32.mrb[114].mxu0 }
0x3a61   :  { %v10852_v2 = vadd.f32 %v10851_v47, %v10776_v63  ;;  %v18660_v37 = vpop.f32.mrb[115].mxu0  ;;  %v27607_v63 = vld [vmem:[#allocation34_spill] sm:$0xff] }
0x3a63   :  { %v10855_v5 = vadd.f32 %v22587_v27, %v10852_v2 }
0x3a65   :  { %22536 = vtanh.f32 %v10855_v5  ;;  %v13337_v38 = vmul.f32 -1.442695, %v10855_v5 }
0x3a67   :  { %22538 = vpow2.f32 %v13337_v38  ;;  %v27615_v38 = vld [vmem:[#allocation40_spill] sm:$0xff] }
0x3a6f   :  { %v22537_v15 = vpop.eup %22536 }
0x3a70   :  { %10865 = vrot.lane.b32.xlu0 %v22537_v15, %s22639_s21 }
0x3a71   :  { %v22539_v4 = vpop.eup %22538 }
0x3a72   :  { %v10859_v53 = vadd.f32 1.0, %v22539_v4  ;;  %v27610_v4 = vld [vmem:[#allocation35_spill] sm:$0xff] }
0x3a74   :  { %22540 = vrcp.f32 %v10859_v53  ;;  %v27609_v53 = vld [vmem:[#allocation33_spill] sm:$0xff] }
0x3a7e   :  { %v22541_v13 = vpop.eup %22540 }
0x3a7f   :  { %v10863_v47 = vmul.f32 %v22541_v13, %v27607_v63  ;;  %v27616_v63 = vld [vmem:[#allocation41_spill] sm:$0xff] }
0x3ae2   :  { %v10866_v33 = vpop.permute.xlu0 %10865 }
0x3ae3   :  { %v10868_v50 = vmul.f32 %v22541_v13, %v10866_v33  ;;  %v27613_v33 = vld [vmem:[#allocation38_spill] sm:$0xff] }
0x3ae5   :  { %10870 = vrot.lane.b32.xlu1 %v10868_v50, %s22640_s24  ;;  %v27612_v50 = vld [vmem:[#allocation37_spill] sm:$0xff] }
0x3b57   :  { %v10871_v37 = vpop.permute.xlu1 %10870 }
0x3b58   :  { %v10873_v12 = vadd.f32 %v10871_v37, %v10863_v47  ;;  %v27617_v37 = vld [vmem:[#allocation42_spill] sm:$0xff] }
0x3b5a   :  { %22542 = vtanh.f32 %v10873_v12  ;;  %v27611_v12 = vld [vmem:[#allocation36_spill] sm:$0xff] }
0x3b64   :  { %v22543_v2 = vpop.eup %22542 }
0x3b65   :  { %10876 = vrot.lane.b32.xlu0 %v22543_v2, %s22639_s21 }
0x3bd7   :  { %v10877_v27 = vpop.permute.xlu0 %10876 }
0x3bd8   :  { %v10879_v15 = vmul.f32 %v22541_v13, %v10877_v27  ;;  %v27614_v13 = vld [vmem:[#allocation39_spill] sm:$0xff] }
0x3bda   :  { %10881 = vrot.lane.b32.xlu1 %v10879_v15, %s22640_s24 }
0x3c4c   :  { %v26505_v5 = vpop.permute.xlu1 %10881 }
0x3c4d   :  { %27608 = vst [vmem:[#allocation49_spill] sm:$0xff] %v26505_v5  ;;  %18670 = vmatmul.mubr.msk.f32.vlgmr.msra.gmra.mrb[124].mxu1 %vm292_vm1, %v26505_v5 }
0x3c4e   :  { %21822 = vmatpush3.bf16.xpose.msk.msra.mxu1 %vm22904_vm2, %v27609_v53  ;;  %18739 = vmatprep.mubr.msk.f32.mxu1 %vm22637_vm0, %v27284_v3 }
0x3c4f   :  { %21823 = vmatprep.subr.bf16.mxu1 %v27285_v51 }
0x3c56   :  { %21826 = vmatpush3.bf16.xpose.msk.msra.mxu1 %vm22904_vm2, %v27610_v4 }
0x3c57   :  { %21827 = vmatprep.subr.bf16.mxu1 %v27285_v51 }
0x3c5e   :  { %21830 = vmatpush3.bf16.xpose.msk.msra.mxu1 %vm22904_vm2, %v27611_v12 }
0x3c5f   :  { %21831 = vmatprep.subr.bf16.mxu1 %v27285_v51 }
0x3c66   :  { %21834 = vmatpush3.bf16.xpose.msk.msra.mxu1 %vm22904_vm2, %v27612_v50 }
0x3c67   :  { %21835 = vmatprep.subr.bf16.mxu1 %v27285_v51 }
0x3c6e   :  { %21838 = vmatpush3.bf16.xpose.msk.msra.mxu1 %vm22904_vm2, %v27613_v33 }
0x3c6f   :  { %21839 = vmatprep.subr.bf16.mxu1 %v27285_v51 }
0x3c76   :  { %21842 = vmatpush3.bf16.xpose.msk.msra.mxu1 %vm22904_vm2, %v27614_v13 }
0x3c77   :  { %21843 = vmatprep.subr.bf16.mxu1 %v27285_v51 }
0x3c7e   :  { %21846 = vmatpush3.bf16.xpose.msk.msra.mxu1 %vm22904_vm2, %v27615_v38 }
0x3c7f   :  { %21847 = vmatprep.subr.bf16.mxu1 %v27285_v51 }
0x3c86   :  { %21850 = vmatpush3.bf16.xpose.msk.msra.mxu1 %vm22904_vm2, %v27616_v63 }
0x3c87   :  { %21883 = vmatprep.subr.bf16.mxu1 %v27285_v51 }
0x3d20   :  { %v26543_v47 = vpop.f32.mrb[124].mxu1 }
0x3d21   :  { %v10963_v2 = vrot.slane %v26543_v47, %v27617_v37  ;;  %v18671_v27 = vpop.f32.mrb[125].mxu1 }
0x3d23   :  { %v10971_v15 = vcombine.high %v10963_v2, %v10963_v2  ;;  %v10979_v5 = vrot.slane %v10963_v2, %v27617_v37 }
0x3d25   :  { %v10993_v13 = vrot.slane %v10971_v15, %v27617_v37  ;;  %18705 = vmatmul.mubr.msk.f32.vlgmr.msra.gmra.mrb[116].mxu0 %vm292_vm1, %v10979_v5  ;;  %v11001_v2 = vcombine.high %v10979_v5, %v10979_v5  ;;  %v10956_v5 = vcombine.high %v26543_v47, %v26543_v47 }
0x3d26   :  { %21854 = vmatpush3.bf16.xpose.msk.msra.mxu0 %vm22904_vm2, %v23119_v0  ;;  %18774 = vmatprep.mubr.msk.f32.mxu0 %vm22637_vm0, %v27284_v3 }
0x3d27   :  { %18740 = vmatmul.mubr.msk.f32.vlgmr.msra.gmra.mrb[126].mxu1 %vm292_vm1, %v10993_v13  ;;  %21855 = vmatprep.subr.bf16.mxu0 %v27285_v51  ;;  %v11003_v27 = vcombine.high %v10993_v13, %v10993_v13  ;;  %v10970_v13 = vrot.slane %v10956_v5, %v27617_v37  ;;  %v27620_v5 = vld [vmem:[#allocation54_spill] sm:$0xff] }
0x3d28   :  { %21886 = vmatpush3.bf16.xpose.msk.msra.mxu1 %vm22904_vm2, %v23124_v7  ;;  %18809 = vmatprep.mubr.msk.f32.mxu1 %vm22637_vm0, %v27284_v3 }
0x3d29   :  { %21887 = vmatprep.subr.bf16.mxu1 %v27285_v51  ;;  %v10972_v15 = vcombine.high %v10970_v13, %v10970_v13 }
0x3d2b   :  { %v11000_v47 = vrot.slane %v10972_v15, %v27617_v37  ;;  %v27622_v15 = vld [vmem:[#allocation56_spill] sm:$0xff] }
0x3d2e   :  { %21858 = vmatpush3.bf16.xpose.msk.msra.mxu0 %vm22904_vm2, %v23157_v22 }
0x3d2f   :  { %21859 = vmatprep.subr.bf16.mxu0 %v27285_v51 }
0x3d30   :  { %21890 = vmatpush3.bf16.xpose.msk.msra.mxu1 %vm22904_vm2, %v23159_v25 }
0x3d31   :  { %21891 = vmatprep.subr.bf16.mxu1 %v27285_v51 }
0x3d36   :  { %21862 = vmatpush3.bf16.xpose.msk.msra.mxu0 %vm22904_vm2, %v23181_v36 }
0x3d37   :  { %21863 = vmatprep.subr.bf16.mxu0 %v27285_v51 }
0x3d38   :  { %21894 = vmatpush3.bf16.xpose.msk.msra.mxu1 %vm22904_vm2, %v23183_v39 }
0x3d39   :  { %21895 = vmatprep.subr.bf16.mxu1 %v27285_v51 }
0x3d3e   :  { %21866 = vmatpush3.bf16.xpose.msk.msra.mxu0 %vm22904_vm2, %v23205_v49 }
0x3d3f   :  { %21867 = vmatprep.subr.bf16.mxu0 %v27285_v51 }
0x3d40   :  { %21898 = vmatpush3.bf16.xpose.msk.msra.mxu1 %vm22904_vm2, %v23207_v52 }
0x3d41   :  { %21899 = vmatprep.subr.bf16.mxu1 %v27285_v51 }
0x3d46   :  { %21870 = vmatpush3.bf16.xpose.msk.msra.mxu0 %vm22904_vm2, %v23229_v1 }
0x3d47   :  { %21871 = vmatprep.subr.bf16.mxu0 %v27285_v51 }
0x3d48   :  { %21902 = vmatpush3.bf16.xpose.msk.msra.mxu1 %vm22904_vm2, %v23231_v14 }
0x3d49   :  { %21903 = vmatprep.subr.bf16.mxu1 %v27285_v51 }
0x3d4e   :  { %21874 = vmatpush3.bf16.xpose.msk.msra.mxu0 %vm22904_vm2, %v23253_v30 }
0x3d4f   :  { %21875 = vmatprep.subr.bf16.mxu0 %v27285_v51 }
0x3d50   :  { %21906 = vmatpush3.bf16.xpose.msk.msra.mxu1 %vm22904_vm2, %v23255_v31 }
0x3d51   :  { %21907 = vmatprep.subr.bf16.mxu1 %v27285_v51 }
0x3d56   :  { %21878 = vmatpush3.bf16.xpose.msk.msra.mxu0 %vm22904_vm2, %v23277_v45 }
0x3d57   :  { %21879 = vmatprep.subr.bf16.mxu0 %v27285_v51 }
0x3d58   :  { %21910 = vmatpush3.bf16.xpose.msk.msra.mxu1 %vm22904_vm2, %v23279_v57 }
0x3d59   :  { %21911 = vmatprep.subr.bf16.mxu1 %v27285_v51 }
0x3d5e   :  { %21882 = vmatpush3.bf16.xpose.msk.msra.mxu0 %vm22904_vm2, %v23301_v18 }
0x3d5f   :  { %21915 = vmatprep.subr.bf16.mxu0 %v27285_v51 }
0x3d60   :  { %21914 = vmatpush3.bf16.xpose.msk.msra.mxu1 %vm22904_vm2, %v23303_v21 }
0x3d61   :  { %21947 = vmatprep.subr.bf16.mxu1 %v27285_v51 }
0x3d65   :  { %18775 = vmatmul.mubr.msk.f32.vlgmr.msra.gmra.mrb[118].mxu0 %vm292_vm1, %v11001_v2  ;;  %v10986_v2 = vrot.slane %v10970_v13, %v27617_v37  ;;  %v27618_v37 = vld [vmem:[#allocation52_spill] sm:$0xff]  ;;  %v27621_v13 = vld [vmem:[#allocation55_spill] sm:$0xff] }
0x3d66   :  { %21918 = vmatpush3.bf16.xpose.msk.msra.mxu0 %vm22904_vm2, %v23325_v44  ;;  %18844 = vmatprep.mubr.msk.f32.mxu0 %vm22637_vm0, %v27284_v3 }
0x3d67   :  { %18810 = vmatmul.mubr.msk.f32.vlgmr.msra.gmra.mrb[128].mxu1 %vm292_vm1, %v11003_v27  ;;  %21919 = vmatprep.subr.bf16.mxu0 %v27285_v51  ;;  %v27619_v27 = vld [vmem:[#allocation53_spill] sm:$0xff] }
0x3d68   :  { %21950 = vmatpush3.bf16.xpose.msk.msra.mxu1 %vm22904_vm2, %v23329_v60  ;;  %18879 = vmatprep.mubr.msk.f32.mxu1 %vm22637_vm0, %v27284_v3 }
0x3d69   :  { %21951 = vmatprep.subr.bf16.mxu1 %v27285_v51 }
0x3d6e   :  { %21922 = vmatpush3.bf16.xpose.msk.msra.mxu0 %vm22904_vm2, %v23359_v35 }
0x3d6f   :  { %21923 = vmatprep.subr.bf16.mxu0 %v27285_v51 }
0x3d70   :  { %21954 = vmatpush3.bf16.xpose.msk.msra.mxu1 %vm22904_vm2, %v23361_v40 }
0x3d71   :  { %21955 = vmatprep.subr.bf16.mxu1 %v27285_v51 }
0x3d76   :  { %21926 = vmatpush3.bf16.xpose.msk.msra.mxu0 %vm22904_vm2, %v23383_v10 }
0x3d77   :  { %21927 = vmatprep.subr.bf16.mxu0 %v27285_v51 }
0x3d78   :  { %21958 = vmatpush3.bf16.xpose.msk.msra.mxu1 %vm22904_vm2, %v23385_v17 }
0x3d79   :  { %21959 = vmatprep.subr.bf16.mxu1 %v27285_v51 }
0x3d7e   :  { %21930 = vmatpush3.bf16.xpose.msk.msra.mxu0 %vm22904_vm2, %v23407_v61 }
0x3d7f   :  { %21931 = vmatprep.subr.bf16.mxu0 %v27285_v51 }
0x3d80   :  { %21962 = vmatpush3.bf16.xpose.msk.msra.mxu1 %vm22904_vm2, %v23409_v6 }
0x3d81   :  { %21963 = vmatprep.subr.bf16.mxu1 %v27285_v51 }
0x3d86   :  { %21934 = vmatpush3.bf16.xpose.msk.msra.mxu0 %vm22904_vm2, %v23431_v41 }
0x3d87   :  { %21935 = vmatprep.subr.bf16.mxu0 %v27285_v51 }
0x3d88   :  { %21966 = vmatpush3.bf16.xpose.msk.msra.mxu1 %vm22904_vm2, %v23433_v58 }
0x3d89   :  { %21967 = vmatprep.subr.bf16.mxu1 %v27285_v51 }
0x3d8e   :  { %21938 = vmatpush3.bf16.xpose.msk.msra.mxu0 %vm22904_vm2, %v23455_v11 }
0x3d8f   :  { %21939 = vmatprep.subr.bf16.mxu0 %v27285_v51 }
0x3d90   :  { %21970 = vmatpush3.bf16.xpose.msk.msra.mxu1 %vm22904_vm2, %v23457_v26 }
0x3d91   :  { %21971 = vmatprep.subr.bf16.mxu1 %v27285_v51 }
0x3d96   :  { %21942 = vmatpush3.bf16.xpose.msk.msra.mxu0 %vm22904_vm2, %v23479_v43 }
0x3d97   :  { %21943 = vmatprep.subr.bf16.mxu0 %v27285_v51 }
0x3d98   :  { %21974 = vmatpush3.bf16.xpose.msk.msra.mxu1 %vm22904_vm2, %v23481_v23 }
0x3d99   :  { %21975 = vmatprep.subr.bf16.mxu1 %v27285_v51 }
0x3d9e   :  { %21946 = vmatpush3.bf16.xpose.msk.msra.mxu0 %vm22904_vm2, %v23505_v29 }
0x3d9f   :  { %21979 = vmatprep.subr.bf16.mxu0 %v27285_v51 }
0x3da0   :  { %21978 = vmatpush3.bf16.xpose.msk.msra.mxu1 %vm22904_vm2, %v23507_v55 }
0x3da1   :  { %22011 = vmatprep.subr.bf16.mxu1 %v27285_v51 }
0x3da5   :  { %18845 = vmatmul.mubr.msk.f32.vlgmr.msra.gmra.mrb[120].mxu0 %vm292_vm1, %v10986_v2 }
0x3da6   :  { %21982 = vmatpush3.bf16.xpose.msk.msra.mxu0 %vm22904_vm2, %v23530_v54  ;;  %18914 = vmatprep.mubr.msk.f32.mxu0 %vm22637_vm0, %v27284_v3 }
0x3da7   :  { %18880 = vmatmul.mubr.msk.f32.vlgmr.msra.gmra.mrb[130].mxu1 %vm292_vm1, %v11000_v47  ;;  %21983 = vmatprep.subr.bf16.mxu0 %v27285_v51 }
0x3da8   :  { %22014 = vmatpush3.bf16.xpose.msk.msra.mxu1 %vm22904_vm2, %v23535_v20  ;;  %18949 = vmatprep.mubr.msk.f32.mxu1 %vm22637_vm0, %v27284_v3 }
0x3da9   :  { %22015 = vmatprep.subr.bf16.mxu1 %v27285_v51 }
0x3dae   :  { %21986 = vmatpush3.bf16.xpose.msk.msra.mxu0 %vm22904_vm2, %v27308_v24 }
0x3daf   :  { %21987 = vmatprep.subr.bf16.mxu0 %v27285_v51 }
0x3db0   :  { %22018 = vmatpush3.bf16.xpose.msk.msra.mxu1 %vm22904_vm2, %v27309_v19 }
0x3db1   :  { %22019 = vmatprep.subr.bf16.mxu1 %v27285_v51 }
0x3db6   :  { %21990 = vmatpush3.bf16.xpose.msk.msra.mxu0 %vm22904_vm2, %v27310_v28 }
0x3db7   :  { %21991 = vmatprep.subr.bf16.mxu0 %v27285_v51 }
0x3db8   :  { %22022 = vmatpush3.bf16.xpose.msk.msra.mxu1 %vm22904_vm2, %v27311_v46 }
0x3db9   :  { %22023 = vmatprep.subr.bf16.mxu1 %v27285_v51 }
0x3dbe   :  { %21994 = vmatpush3.bf16.xpose.msk.msra.mxu0 %vm22904_vm2, %v27312_v9 }
0x3dbf   :  { %21995 = vmatprep.subr.bf16.mxu0 %v27285_v51 }
0x3dc0   :  { %22026 = vmatpush3.bf16.xpose.msk.msra.mxu1 %vm22904_vm2, %v27313_v32 }
0x3dc1   :  { %22027 = vmatprep.subr.bf16.mxu1 %v27285_v51 }
0x3dc6   :  { %21998 = vmatpush3.bf16.xpose.msk.msra.mxu0 %vm22904_vm2, %v27314_v56 }
0x3dc7   :  { %21999 = vmatprep.subr.bf16.mxu0 %v27285_v51 }
0x3dc8   :  { %22030 = vmatpush3.bf16.xpose.msk.msra.mxu1 %vm22904_vm2, %v27315_v48 }
0x3dc9   :  { %22031 = vmatprep.subr.bf16.mxu1 %v27285_v51 }
0x3dce   :  { %22002 = vmatpush3.bf16.xpose.msk.msra.mxu0 %vm22904_vm2, %v27573_v34 }
0x3dcf   :  { %22003 = vmatprep.subr.bf16.mxu0 %v27285_v51 }
0x3dd0   :  { %22034 = vmatpush3.bf16.xpose.msk.msra.mxu1 %vm22904_vm2, %v27618_v37  ;;  %v11004_v37 = vcombine.high %v11000_v47, %v11000_v47 }
0x3dd1   :  { %22035 = vmatprep.subr.bf16.mxu1 %v27285_v51 }
0x3dd6   :  { %22006 = vmatpush3.bf16.xpose.msk.msra.mxu0 %vm22904_vm2, %v27619_v27  ;;  %v11002_v27 = vcombine.high %v10986_v2, %v10986_v2 }
0x3dd7   :  { %22007 = vmatprep.subr.bf16.mxu0 %v27285_v51 }
0x3dd8   :  { %22038 = vmatpush3.bf16.xpose.msk.msra.mxu1 %vm22904_vm2, %v27620_v5 }
0x3dd9   :  { %22039 = vmatprep.subr.bf16.mxu1 %v27285_v51 }
0x3dde   :  { %22010 = vmatpush3.bf16.xpose.msk.msra.mxu0 %vm22904_vm2, %v27621_v13  ;;  %v27633_v13 = vld [vmem:[#allocation62_spill] sm:$0xff] }
0x3ddf   :  { %22043 = vmatprep.subr.bf16.mxu0 %v27285_v51 }
0x3de0   :  { %22042 = vmatpush3.bf16.xpose.msk.msra.mxu1 %vm22904_vm2, %v27622_v15 }
0x3de1   :  { %22067 = vmatprep.subr.bf16.mxu1 %v27285_v51 }
0x3de5   :  { %18915 = vmatmul.mubr.msk.f32.vlgmr.msra.gmra.mrb[122].mxu0 %vm292_vm1, %v11002_v27  ;;  %v27628_v27 = vld [vmem:[#allocation31_spill] sm:$0xff] }
0x3de6   :  { %22045 = vmatpush3.bf16.msra.mxu0 %v27598_v16  ;;  %18984 = vmatprep.mubr.msk.f32.mxu0 %vm22637_vm0, %v27284_v3  ;;  %v27623_v16 = vld [vmem:[#allocation29_spill] sm:$0xff] }
0x3de7   :  { %18950 = vmatmul.mubr.msk.f32.vlgmr.msra.gmra.mrb[132].mxu1 %vm292_vm1, %v11004_v37  ;;  %22046 = vmatprep.subr.bf16.mxu0 %v27285_v51  ;;  %v27627_v37 = vld [vmem:[#allocation39_spill] sm:$0xff] }
0x3de8   :  { %22069 = vmatpush3.bf16.msra.mxu1 %v27609_v53  ;;  %19019 = vmatprep.mubr.msk.f32.mxu1 %vm22637_vm0, %v27284_v3 }
0x3de9   :  { %22070 = vmatprep.subr.bf16.mxu1 %v27285_v51 }
0x3dea   :  { %22048 = vmatpush3.bf16.msra.mxu0 %v27600_v8  ;;  %v27624_v8 = vld [vmem:[#allocation57_spill] sm:$0xff] }
0x3deb   :  { %22049 = vmatprep.subr.bf16.mxu0 %v27285_v51 }
0x3dec   :  { %22072 = vmatpush3.bf16.msra.mxu1 %v27610_v4 }
0x3ded   :  { %22073 = vmatprep.subr.bf16.mxu1 %v27285_v51 }
0x3dee   :  { %22051 = vmatpush3.bf16.msra.mxu0 %v27601_v59 }
0x3def   :  { %22052 = vmatprep.subr.bf16.mxu0 %v27285_v51 }
0x3df0   :  { %22075 = vmatpush3.bf16.msra.mxu1 %v27611_v12  ;;  %v27626_v12 = vld [vmem:[#allocation58_spill] sm:$0xff] }
0x3df1   :  { %22076 = vmatprep.subr.bf16.mxu1 %v27285_v51 }
0x3df2   :  { %22054 = vmatpush3.bf16.msra.mxu0 %v27602_v42  ;;  %v27625_v42 = vld [vmem:[#allocation30_spill] sm:$0xff] }
0x3df3   :  { %22055 = vmatprep.subr.bf16.mxu0 %v27285_v51 }
0x3df4   :  { %22078 = vmatpush3.bf16.msra.mxu1 %v27612_v50 }
0x3df5   :  { %22079 = vmatprep.subr.bf16.mxu1 %v27285_v51 }
0x3df6   :  { %22057 = vmatpush3.bf16.msra.mxu0 %v27623_v16  ;;  %v27629_v16 = vld [vmem:[#allocation32_spill] sm:$0xff] }
0x3df7   :  { %22058 = vmatprep.subr.bf16.mxu0 %v27285_v51 }
0x3df8   :  { %v11073_v62 = vpop.f32.mrb[116].mxu0  ;;  %22081 = vmatpush3.bf16.msra.mxu1 %v27613_v33 }
0x3df9   :  { %v11074_v59 = vadd.f32 %v11073_v62, %v27624_v8  ;;  %v18706_v53 = vpop.f32.mrb[117].mxu0  ;;  %22082 = vmatprep.subr.bf16.mxu1 %v27285_v51  ;;  %v27630_v8 = vld [vmem:[#allocation59_spill] sm:$0xff] }
0x3dfa   :  { %v11145_v4 = vpop.f32.mrb[126].mxu1  ;;  %22060 = vmatpush3.bf16.msra.mxu0 %v27625_v42 }
0x3dfb   :  { %v11146_v2 = vadd.f32 %v11145_v4, %v27626_v12  ;;  %v18741_v50 = vpop.f32.mrb[127].mxu1  ;;  %v11581_v47 = vsel %vm1804_vm3, %v11074_v59, -inf  ;;  %22061 = vmatprep.subr.bf16.mxu0 %v27285_v51  ;;  %v27631_v12 = vld [vmem:[#allocation60_spill] sm:$0xff] }
0x3dfc   :  { %11582 = vmax.xlane.f32.xlu0 %v11581_v47  ;;  %22084 = vmatpush3.bf16.msra.mxu1 %v27627_v37 }
0x3dfd   :  { %v11584_v33 = vsel %vm1804_vm3, %v11146_v2, -inf  ;;  %22085 = vmatprep.subr.bf16.mxu1 %v27285_v51 }
0x3dfe   :  { %11585 = vmax.xlane.f32.xlu1 %v11584_v33  ;;  %22063 = vmatpush3.bf16.msra.mxu0 %v27628_v27  ;;  %v27632_v27 = vld [vmem:[#allocation61_spill] sm:$0xff] }
0x3dff   :  { %22064 = vmatprep.subr.bf16.mxu0 %v27285_v51 }
0x3e00   :  { %22087 = vmatpush3.bf16.msra.mxu1 %v27615_v38 }
0x3e01   :  { %22088 = vmatprep.subr.bf16.mxu1 %v27285_v51 }
0x3e02   :  { %22066 = vmatpush3.bf16.msra.mxu0 %v27629_v16 }
0x3e03   :  { %22091 = vmatprep.subr.bf16.mxu0 %v27285_v51 }
0x3e04   :  { %22090 = vmatpush3.bf16.msra.mxu1 %v27616_v63 }
0x3e05   :  { %22115 = vmatprep.subr.bf16.mxu1 %v27285_v51 }
0x3e38   :  { %v11217_v62 = vpop.f32.mrb[118].mxu0 }
0x3e39   :  { %v11218_v53 = vadd.f32 %v11217_v62, %v27630_v8  ;;  %v18776_v4 = vpop.f32.mrb[119].mxu0 }
0x3e3a   :  { %v11289_v42 = vpop.f32.mrb[128].mxu1 }
0x3e3b   :  { %v11290_v50 = vadd.f32 %v11289_v42, %v27631_v12  ;;  %v18811_v47 = vpop.f32.mrb[129].mxu1  ;;  %v11587_v38 = vsel %vm1804_vm3, %v11218_v53, -inf }
0x3e3c   :  { %11588 = vmax.xlane.f32.xlu0 %v11587_v38 }
0x3e3d   :  { %v11590_v37 = vsel %vm1804_vm3, %v11290_v50, -inf }
0x3e40   :  { %11591 = vmax.xlane.f32.xlu0 %v11590_v37 }
0x3e78   :  { %v11361_v33 = vpop.f32.mrb[120].mxu0 }
0x3e79   :  { %v11362_v16 = vadd.f32 %v11361_v33, %v27632_v27  ;;  %v18846_v63 = vpop.f32.mrb[121].mxu0 }
0x3e7a   :  { %v11433_v15 = vpop.f32.mrb[130].mxu1 }
0x3e7b   :  { %v11434_v5 = vadd.f32 %v11433_v15, %v27633_v13  ;;  %v18881_v34 = vpop.f32.mrb[131].mxu1  ;;  %v11593_v62 = vsel %vm1804_vm3, %v11362_v16, -inf  ;;  %v27634_v15 = vld [vmem:[#allocation63_spill] sm:$0xff] }
0x3e7c   :  { %11594 = vmax.xlane.f32.xlu1 %v11593_v62 }
0x3e7d   :  { %v11596_v8 = vsel %vm1804_vm3, %v11434_v5, -inf }
0x3e7e   :  { %11597 = vmax.xlane.f32.xlu0 %v11596_v8 }
0x3e89   :  { %v11583_v4 = vpop.xlane.xlu0 %11582 }
0x3e8a   :  { %v11605_v42 = vsub.f32 %v11074_v59, %v11583_v4  ;;  %v27635_v4 = vld [vmem:[#allocation64_spill] sm:$0xff] }
0x3e8b   :  { %v11586_v12 = vpop.xlane.xlu1 %11585 }
0x3e8c   :  { %v11613_v47 = vmul.f32 1.442695, %v11605_v42  ;;  %v11606_v38 = vsub.f32 %v11146_v2, %v11586_v12 }
0x3e8e   :  { %22544 = vpow2.f32 %v11613_v47  ;;  %v11615_v37 = vmul.f32 1.442695, %v11606_v38 }
0x3e90   :  { %22546 = vpow2.f32 %v11615_v37 }
0x3e98   :  { %v22545_v33 = vpop.eup %22544 }
0x3e99   :  { %v11629_v27 = vsel %vm1804_vm3, %v22545_v33, 0.0 }
0x3e9a   :  { %v22547_v63 = vpop.eup %22546  ;;  %11630 = vadd.xlane.f32.xlu1 %v11629_v27 }
0x3e9b   :  { %v11632_v34 = vsel %vm1804_vm3, %v22547_v63, 0.0 }
0x3e9c   :  { %11633 = vadd.xlane.f32.xlu0 %v11632_v34 }
0x3eb8   :  { %v11505_v13 = vpop.f32.mrb[122].mxu0 }
0x3eb9   :  { %v26817_v62 = vadd.f32 %v11505_v13, %v27634_v15  ;;  %v18916_v8 = vpop.f32.mrb[123].mxu0 }
0x3eba   :  { %v11577_v59 = vpop.f32.mrb[132].mxu1 }
0x3ebb   :  { %v26820_v42 = vadd.f32 %v11577_v59, %v27635_v4  ;;  %v18951_v2 = vpop.f32.mrb[133].mxu1  ;;  %v11599_v12 = vsel %vm1804_vm3, %v26817_v62, -inf }
0x3ebc   :  { %11600 = vmax.xlane.f32.xlu1 %v11599_v12 }
0x3ebd   :  { %v11602_v47 = vsel %vm1804_vm3, %v26820_v42, -inf }
0x3ebe   :  { %11603 = vmax.xlane.f32.xlu0 %v11602_v47 }
0x3ec9   :  { %v11589_v38 = vpop.xlane.xlu0 %11588 }
0x3eca   :  { %v11607_v37 = vsub.f32 %v11218_v53, %v11589_v38 }
0x3ecc   :  { %v11617_v27 = vmul.f32 1.442695, %v11607_v37 }
0x3ecd   :  { %v11592_v34 = vpop.xlane.xlu0 %11591 }
0x3ece   :  { %22548 = vpow2.f32 %v11617_v27  ;;  %v11608_v13 = vsub.f32 %v11290_v50, %v11592_v34 }
0x3ed0   :  { %v11619_v15 = vmul.f32 1.442695, %v11608_v13 }
0x3ed2   :  { %22550 = vpow2.f32 %v11619_v15 }
0x3ed8   :  { %v26826_v8 = vpop.eup %22548 }
0x3ed9   :  { %v11635_v59 = vsel %vm1804_vm3, %v26826_v8, 0.0 }
0x3eda   :  { %11636 = vadd.xlane.f32.xlu1 %v11635_v59 }
0x3edc   :  { %v26830_v4 = vpop.eup %22550 }
0x3edd   :  { %v11638_v2 = vsel %vm1804_vm3, %v26830_v4, 0.0 }
0x3ede   :  { %11639 = vadd.xlane.f32.xlu0 %v11638_v2 }
0x3f09   :  { %v11595_v12 = vpop.xlane.xlu1 %11594 }
0x3f0a   :  { %v11609_v53 = vsub.f32 %v11362_v16, %v11595_v12 }
0x3f0b   :  { %v11598_v47 = vpop.xlane.xlu0 %11597 }
0x3f0c   :  { %v11621_v38 = vmul.f32 1.442695, %v11609_v53  ;;  %v11610_v37 = vsub.f32 %v11434_v5, %v11598_v47 }
0x3f0e   :  { %22552 = vpow2.f32 %v11621_v38  ;;  %v11623_v50 = vmul.f32 1.442695, %v11610_v37 }
0x3f10   :  { %22554 = vpow2.f32 %v11623_v50  ;;  %v27642_v50 = vld [vmem:[#allocation43_spill] sm:$0xff] }
0x3f18   :  { %v26834_v27 = vpop.eup %22552 }
0x3f19   :  { %v11641_v34 = vsel %vm1804_vm3, %v26834_v27, 0.0 }
0x3f1a   :  { %v26838_v13 = vpop.eup %22554  ;;  %11642 = vadd.xlane.f32.xlu1 %v11641_v34 }
0x3f1b   :  { %v11644_v15 = vsel %vm1804_vm3, %v26838_v13, 0.0 }
0x3f1c   :  { %11645 = vadd.xlane.f32.xlu0 %v11644_v15 }
0x3f27   :  { %v11631_v59 = vpop.xlane.xlu1 %11630 }
0x3f28   :  { %22556 = vrcp.f32 %v11631_v59  ;;  %v27643_v59 = vld [vmem:[#allocation44_spill] sm:$0xff] }
0x3f29   :  { %v11634_v16 = vpop.xlane.xlu0 %11633 }
0x3f2a   :  { %22558 = vrcp.f32 %v11634_v16  ;;  %v12421_v16 = vld [vmem:[#allocation2 + $0x8] sm:$0xff] }
0x3f32   :  { %v22557_v5 = vpop.eup %22556 }
0x3f33   :  { %v11661_v2 = vmul.f32 %v22557_v5, %v22545_v33  ;;  %v12422_v5 = vld [vmem:[#allocation2 + $0x10] sm:$0xff] }
0x3f34   :  { %v22559_v12 = vpop.eup %22558 }
0x3f35   :  { %18985 = vmatmul.mubr.f32.vlgmr.msra.gmra.mrb[124].mxu0 %v11661_v2  ;;  %v11662_v53 = vmul.f32 %v22559_v12, %v22547_v63  ;;  %v12424_v12 = vld [vmem:[#allocation2 + $0x20] sm:$0xff] }
0x3f36   :  { %22093 = vmatpush3.bf16.msra.mxu0 %v23119_v0  ;;  %19054 = vmatprep.mubr.msk.f32.mxu0 %vm22637_vm0, %v27284_v3 }
0x3f37   :  { %v11677_v47 = vrot.slane %v11662_v53, 7  ;;  %19020 = vmatmul.mubr.f32.vlgmr.msra.gmra.mrb[134].mxu1 %v11662_v53  ;;  %22094 = vmatprep.subr.bf16.mxu0 %v27285_v51 }
0x3f38   :  { %22117 = vmatpush3.bf16.msra.mxu1 %v23124_v7  ;;  %19089 = vmatprep.mubr.msk.f32.mxu1 %vm22637_vm0, %v27284_v3 }
0x3f39   :  { %v11678_v38 = vsel %vm1902_vm4, %v11677_v47, %v11661_v2  ;;  %22118 = vmatprep.subr.bf16.mxu1 %v27285_v51  ;;  %v12423_v2 = vld [vmem:[#allocation2 + $0x18] sm:$0xff] }
0x3f3a   :  { %22096 = vmatpush3.bf16.msra.mxu0 %v23157_v22 }
0x3f3b   :  { %22097 = vmatprep.subr.bf16.mxu0 %v27285_v51 }
0x3f3c   :  { %22120 = vmatpush3.bf16.msra.mxu1 %v23159_v25 }
0x3f3d   :  { %22121 = vmatprep.subr.bf16.mxu1 %v27285_v51 }
0x3f3e   :  { %22099 = vmatpush3.bf16.msra.mxu0 %v23181_v36 }
0x3f3f   :  { %22100 = vmatprep.subr.bf16.mxu0 %v27285_v51 }
0x3f40   :  { %22123 = vmatpush3.bf16.msra.mxu1 %v23183_v39 }
0x3f41   :  { %22124 = vmatprep.subr.bf16.mxu1 %v27285_v51 }
0x3f42   :  { %22102 = vmatpush3.bf16.msra.mxu0 %v23205_v49 }
0x3f43   :  { %22103 = vmatprep.subr.bf16.mxu0 %v27285_v51 }
0x3f44   :  { %22126 = vmatpush3.bf16.msra.mxu1 %v23207_v52 }
0x3f45   :  { %22127 = vmatprep.subr.bf16.mxu1 %v27285_v51 }
0x3f46   :  { %22105 = vmatpush3.bf16.msra.mxu0 %v23229_v1 }
0x3f47   :  { %22106 = vmatprep.subr.bf16.mxu0 %v27285_v51 }
0x3f48   :  { %22129 = vmatpush3.bf16.msra.mxu1 %v23231_v14 }
0x3f49   :  { %v11601_v0 = vpop.xlane.xlu1 %11600  ;;  %22130 = vmatprep.subr.bf16.mxu1 %v27285_v51 }
0x3f4a   :  { %v11611_v7 = vsub.f32 %v26817_v62, %v11601_v0  ;;  %22108 = vmatpush3.bf16.msra.mxu0 %v23253_v30 }
0x3f4b   :  { %v11604_v22 = vpop.xlane.xlu0 %11603  ;;  %22109 = vmatprep.subr.bf16.mxu0 %v27285_v51 }
0x3f4c   :  { %v11625_v25 = vmul.f32 1.442695, %v11611_v7  ;;  %v11612_v36 = vsub.f32 %v26820_v42, %v11604_v22  ;;  %22132 = vmatpush3.bf16.msra.mxu1 %v23255_v31 }
0x3f4d   :  { %22133 = vmatprep.subr.bf16.mxu1 %v27285_v51 }
0x3f4e   :  { %22560 = vpow2.f32 %v11625_v25  ;;  %v11627_v39 = vmul.f32 1.442695, %v11612_v36  ;;  %22111 = vmatpush3.bf16.msra.mxu0 %v23277_v45 }
0x3f4f   :  { %22112 = vmatprep.subr.bf16.mxu0 %v27285_v51 }
0x3f50   :  { %22562 = vpow2.f32 %v11627_v39  ;;  %22135 = vmatpush3.bf16.msra.mxu1 %v23279_v57 }
0x3f51   :  { %22136 = vmatprep.subr.bf16.mxu1 %v27285_v51 }
0x3f52   :  { %22114 = vmatpush3.bf16.msra.mxu0 %v23301_v18 }
0x3f53   :  { %22139 = vmatprep.subr.bf16.mxu0 %v27285_v51 }
0x3f54   :  { %22138 = vmatpush3.bf16.msra.mxu1 %v23303_v21 }
0x3f55   :  { %22163 = vmatprep.subr.bf16.mxu1 %v27285_v51 }
0x3f58   :  { %v26881_v49 = vpop.eup %22560 }
0x3f59   :  { %v11647_v52 = vsel %vm1804_vm3, %v26881_v49, 0.0 }
0x3f5a   :  { %v26885_v1 = vpop.eup %22562  ;;  %11648 = vadd.xlane.f32.xlu1 %v11647_v52 }
0x3f5b   :  { %v11650_v14 = vsel %vm1804_vm3, %v26885_v1, 0.0 }
0x3f5c   :  { %11651 = vadd.xlane.f32.xlu0 %v11650_v14 }
0x3f67   :  { %v11637_v30 = vpop.xlane.xlu1 %11636 }
0x3f68   :  { %22564 = vrcp.f32 %v11637_v30 }
0x3f6b   :  { %v11640_v31 = vpop.xlane.xlu0 %11639 }
0x3f6c   :  { %22566 = vrcp.f32 %v11640_v31 }
0x3f72   :  { %v22565_v45 = vpop.eup %22564 }
0x3f73   :  { %v11663_v57 = vmul.f32 %v22565_v45, %v26826_v8 }
0x3f75   :  { %v11679_v18 = vrot.slane %v11663_v57, 6  ;;  %19055 = vmatmul.mubr.f32.vlgmr.msra.gmra.mrb[126].mxu0 %v11663_v57 }
0x3f76   :  { %v22567_v21 = vpop.eup %22566  ;;  %22141 = vmatpush3.bf16.msra.mxu0 %v23325_v44  ;;  %19124 = vmatprep.mubr.msk.f32.mxu0 %vm22637_vm0, %v27284_v3 }
0x3f77   :  { %v11680_v33 = vsel %vm1905_vm5, %v11679_v18, %v11678_v38  ;;  %v11664_v63 = vmul.f32 %v22567_v21, %v26830_v4  ;;  %22142 = vmatprep.subr.bf16.mxu0 %v27285_v51 }
0x3f79   :  { %v11681_v62 = vrot.slane %v11664_v63, 5  ;;  %19090 = vmatmul.mubr.f32.vlgmr.msra.gmra.mrb[136].mxu1 %v11664_v63 }
0x3f7a   :  { %22165 = vmatpush3.bf16.msra.mxu1 %v23329_v60  ;;  %22144 = vmatpush3.bf16.msra.mxu0 %v23359_v35 }
0x3f7b   :  { %v11682_v42 = vsel %vm1908_vm6, %v11681_v62, %v11680_v33  ;;  %22166 = vmatprep.subr.bf16.mxu1 %v27285_v51  ;;  %22145 = vmatprep.subr.bf16.mxu0 %v27285_v51 }
0x3f7c   :  { %19159 = vmatprep.mubr.msk.f32.mxu1 %vm22637_vm0, %v27284_v3 }
0x3f7e   :  { %22168 = vmatpush3.bf16.msra.mxu1 %v23361_v40  ;;  %22147 = vmatpush3.bf16.msra.mxu0 %v23383_v10 }
0x3f7f   :  { %22169 = vmatprep.subr.bf16.mxu1 %v27285_v51  ;;  %22148 = vmatprep.subr.bf16.mxu0 %v27285_v51 }
0x3f82   :  { %22171 = vmatpush3.bf16.msra.mxu1 %v23385_v17  ;;  %22150 = vmatpush3.bf16.msra.mxu0 %v23407_v61 }
0x3f83   :  { %22172 = vmatprep.subr.bf16.mxu1 %v27285_v51  ;;  %22151 = vmatprep.subr.bf16.mxu0 %v27285_v51 }
0x3f86   :  { %22174 = vmatpush3.bf16.msra.mxu1 %v23409_v6  ;;  %22153 = vmatpush3.bf16.msra.mxu0 %v23431_v41  ;;  %v27637_v6 = vld [vmem:[#allocation52_spill] sm:$0xff]  ;;  %v27638_v41 = vld [vmem:[#allocation53_spill] sm:$0xff] }
0x3f87   :  { %22175 = vmatprep.subr.bf16.mxu1 %v27285_v51  ;;  %22154 = vmatprep.subr.bf16.mxu0 %v27285_v51 }
0x3f8a   :  { %22177 = vmatpush3.bf16.msra.mxu1 %v23433_v58  ;;  %22156 = vmatpush3.bf16.msra.mxu0 %v23455_v11  ;;  %v244_v58 = vld [vmem:[%s27049_s10] sm:$0xff]  ;;  %v245_v11 = vld [vmem:[%s27049_s10 + $0x8] sm:$0xff] }
0x3f8b   :  { %22178 = vmatprep.subr.bf16.mxu1 %v27285_v51  ;;  %22157 = vmatprep.subr.bf16.mxu0 %v27285_v51 }
0x3f8e   :  { %22180 = vmatpush3.bf16.msra.mxu1 %v23457_v26  ;;  %22159 = vmatpush3.bf16.msra.mxu0 %v23479_v43  ;;  %v27639_v26 = vld [vmem:[#allocation54_spill] sm:$0xff]  ;;  %v22247_v43 = vpack.c.bf16 %v245_v11, %v244_v58 }
0x3f8f   :  { %22181 = vmatprep.subr.bf16.mxu1 %v27285_v51  ;;  %22160 = vmatprep.subr.bf16.mxu0 %v27285_v51  ;;  %v27645_v58 = vld [vmem:[#allocation46_spill] sm:$0xff] }
0x3f92   :  { %22183 = vmatpush3.bf16.msra.mxu1 %v23481_v23  ;;  %22162 = vmatpush3.bf16.msra.mxu0 %v23505_v29  ;;  %v27640_v23 = vld [vmem:[#allocation55_spill] sm:$0xff]  ;;  %v27641_v29 = vld [vmem:[#allocation56_spill] sm:$0xff] }
0x3f93   :  { %22184 = vmatprep.subr.bf16.mxu1 %v27285_v51  ;;  %22187 = vmatprep.subr.bf16.mxu0 %v27285_v51 }
0x3f96   :  { %22186 = vmatpush3.bf16.msra.mxu1 %v23507_v55 }
0x3f97   :  { %22211 = vmatprep.subr.bf16.mxu1 %v27285_v51 }
0x3fa7   :  { %v11643_v44 = vpop.xlane.xlu1 %11642 }
0x3fa8   :  { %22568 = vrcp.f32 %v11643_v44 }
0x3fa9   :  { %v11646_v60 = vpop.xlane.xlu0 %11645 }
0x3faa   :  { %22570 = vrcp.f32 %v11646_v60 }
0x3fb2   :  { %v22569_v35 = vpop.eup %22568 }
0x3fb3   :  { %v11665_v40 = vmul.f32 %v22569_v35, %v26834_v27 }
0x3fb4   :  { %v22571_v10 = vpop.eup %22570 }
0x3fb5   :  { %v11683_v17 = vrot.slane %v11665_v40, 4  ;;  %19125 = vmatmul.mubr.f32.vlgmr.msra.gmra.mrb[128].mxu0 %v11665_v40  ;;  %v11666_v61 = vmul.f32 %v22571_v10, %v26838_v13  ;;  %v12420_v13 = vld [vmem:[#allocation2] sm:$0xff] }
0x3fb6   :  { %22189 = vmatpush3.bf16.msra.mxu0 %v23530_v54  ;;  %19194 = vmatprep.mubr.msk.f32.mxu0 %vm22637_vm0, %v27284_v3 }
0x3fb7   :  { %v11684_v55 = vsel %vm1911_vm7, %v11683_v17, %v11682_v42  ;;  %19160 = vmatmul.mubr.f32.vlgmr.msra.gmra.mrb[138].mxu1 %v11666_v61  ;;  %22190 = vmatprep.subr.bf16.mxu0 %v27285_v51 }
0x3fb8   :  { %22213 = vmatpush3.bf16.msra.mxu1 %v23535_v20  ;;  %19229 = vmatprep.mubr.msk.f32.mxu1 %vm22637_vm0, %v27284_v3  ;;  %v27636_v20 = vld [vmem:[#allocation51_spill] sm:$0xff] }
0x3fb9   :  { %22214 = vmatprep.subr.bf16.mxu1 %v27285_v51 }
0x3fba   :  { %22192 = vmatpush3.bf16.msra.mxu0 %v27308_v24 }
0x3fbb   :  { %22193 = vmatprep.subr.bf16.mxu0 %v27285_v51 }
0x3fbc   :  { %22216 = vmatpush3.bf16.msra.mxu1 %v27309_v19 }
0x3fbd   :  { %22217 = vmatprep.subr.bf16.mxu1 %v27285_v51 }
0x3fbe   :  { %22195 = vmatpush3.bf16.msra.mxu0 %v27310_v28  ;;  %v11685_v28 = vrot.slane %v11666_v61, 3 }
0x3fbf   :  { %22196 = vmatprep.subr.bf16.mxu0 %v27285_v51 }
0x3fc0   :  { %22219 = vmatpush3.bf16.msra.mxu1 %v27311_v46  ;;  %v246_v46 = vld [vmem:[%s27049_s10 + $0x10] sm:$0xff]  ;;  %v11686_v37 = vsel %vm1914_vm8, %v11685_v28, %v11684_v55 }
0x3fc1   :  { %22220 = vmatprep.subr.bf16.mxu1 %v27285_v51  ;;  %v27644_v55 = vld [vmem:[#allocation45_spill] sm:$0xff] }
0x3fc2   :  { %22198 = vmatpush3.bf16.msra.mxu0 %v27312_v9  ;;  %v247_v9 = vld [vmem:[%s27049_s10 + $0x18] sm:$0xff] }
0x3fc3   :  { %22199 = vmatprep.subr.bf16.mxu0 %v27285_v51  ;;  %v22251_v4 = vpack.c.bf16 %v247_v9, %v246_v46 }
0x3fc4   :  { %22222 = vmatpush3.bf16.msra.mxu1 %v27313_v32 }
0x3fc5   :  { %22223 = vmatprep.subr.bf16.mxu1 %v27285_v51 }
0x3fc6   :  { %22201 = vmatpush3.bf16.msra.mxu0 %v27314_v56 }
0x3fc7   :  { %22202 = vmatprep.subr.bf16.mxu0 %v27285_v51 }
0x3fc8   :  { %22225 = vmatpush3.bf16.msra.mxu1 %v27315_v48 }
0x3fc9   :  { %22226 = vmatprep.subr.bf16.mxu1 %v27285_v51 }
0x3fca   :  { %22204 = vmatpush3.bf16.msra.mxu0 %v27636_v20  ;;  %v13477_v20 = vld [vmem:[%s27050_s11] ss:$0 sm:$0xff]  ;;  %s22642_s11 = smov [#allocation5]  }
0x3fcb   :  { %22205 = vmatprep.subr.bf16.mxu0 %v27285_v51  ;;  %s12569_s20 = sshll.u32 %s22642_s11, 4  ;;  %s12570_s20 = int_to_ptr.vmem [resolvable:$true] %s12569_s20 }
0x3fcc   :  { %22228 = vmatpush3.bf16.msra.mxu1 %v27637_v6  ;;  %s22588_s22 = scalar_lea.vmem %s12570_s20, 768  ;;  %p22593_p1 = scmp.lt.s32.totalorder %s12570_s20, %s12570_s20 }
0x3fcd   :  { %22229 = vmatprep.subr.bf16.mxu1 %v27285_v51  ;;  %p22589_p0 = scmp.ne.s32.totalorder %s12570_s20, %s22588_s22  ;;  %p22594_p2 = scmp.lt.s32.totalorder %s22588_s22, %s22588_s22 }
0x3fce   :  { %22207 = vmatpush3.bf16.msra.mxu0 %v27638_v41 }
0x3fcf   :  { %22208 = vmatprep.subr.bf16.mxu0 %v27285_v51  ;;  %p22595_p3 = por %p22594_p2, %p22593_p1 }
0x3fd0   :  { %22231 = vmatpush3.bf16.msra.mxu1 %v27639_v26 }
0x3fd1   :  { %22232 = vmatprep.subr.bf16.mxu1 %v27285_v51  ;;  %p22596_p4 = pnand %p22595_p3, %p22589_p0 }
0x3fd2   :  { %22210 = vmatpush3.bf16.msra.mxu0 %v27640_v23  ;;  %v27646_v23 = vld [vmem:[#allocation49_spill] sm:$0xff] }
0x3fd3   :  { %22235 = vmatprep.subr.bf16.mxu0 %v27285_v51 }
0x3fd4   :  { %22234 = vmatpush3.bf16.msra.mxu1 %v27641_v29 }
0x3fd5   :  { %22248 = vmatprep.subr.bf16.mxu1 %v22247_v43 }
0x3fe7   :  { %v11649_v54 = vpop.xlane.xlu1 %11648 }
0x3fe8   :  { %22572 = vrcp.f32 %v11649_v54 }
0x3fe9   :  { %v11652_v24 = vpop.xlane.xlu0 %11651 }
0x3fea   :  { %22574 = vrcp.f32 %v11652_v24 }
0x3ff2   :  { %v22573_v19 = vpop.eup %22572 }
0x3ff3   :  { %v11667_v32 = vmul.f32 %v22573_v19, %v26881_v49 }
0x3ff4   :  { %v22575_v56 = vpop.eup %22574 }
0x3ff5   :  { %v11687_v48 = vrot.slane %v11667_v32, 2  ;;  %19195 = vmatmul.mubr.f32.vlgmr.msra.gmra.mrb[130].mxu0 %v11667_v32  ;;  %v11668_v8 = vmul.f32 %v22575_v56, %v26885_v1 }
0x3ff6   :  { %22237 = vmatpush3.bf16.msra.mxu0 %v27642_v50  ;;  %19240 = vmatprep.mubr.msk.f32.mxu0 %vm22637_vm0, %v27284_v3 }
0x3ff7   :  { %v11688_v27 = vsel %vm1917_vm9, %v11687_v48, %v11686_v37  ;;  %v11689_v34 = vrot.slane %v11668_v8, 1  ;;  %19230 = vmatmul.mubr.f32.vlgmr.msra.gmra.mrb[140].mxu1 %v11668_v8  ;;  %22238 = vmatprep.subr.bf16.mxu0 %v27285_v51 }
0x3ff8   :  { %22250 = vmatpush3.bf16.msra.mxu1 %v22247_v43  ;;  %19262 = vmatprep.mubr.msk.f32.mxu1 %vm292_vm1, %v12420_v13 }
0x3ff9   :  { %v11690_v15 = vsel %vm1920_vm10, %v11689_v34, %v11688_v27  ;;  %22252 = vmatprep.subr.bf16.mxu1 %v22251_v4 }
0x3ffa   :  { %11693 = vst [vmem:[#allocation5 + $0x28] sm:$0xff] %v11690_v15  ;;  %22240 = vmatpush3.bf16.msra.mxu0 %v27643_v59 }
0x3ffb   :  { %22241 = vmatprep.subr.bf16.mxu0 %v27285_v51 }
0x3ffc   :  { %22254 = vmatpush3.bf16.msra.mxu1 %v22251_v4 }
0x3fff   :  { %19263 = vmatmul.mubr.msk.f32.vlgmr.msra.gmra.mrb[142].mxu1 %vm292_vm1, %v12421_v16 }
0x4000   :  { %19265 = vmatprep.mubr.msk.f32.mxu1 %vm292_vm1, %v12422_v5 }
0x4003   :  { %19266 = vmatmul.mubr.msk.f32.gmra.mrb[144].mxu1 %vm292_vm1, %v12423_v2 }
0x4004   :  { %19268 = vmatprep.mubr.msk.f32.mxu1 %vm292_vm1, %v12424_v12 }
0x4008   :  { %v11760_v53 = vpop.f32.mrb[124].mxu0 }
0x4009   :  { %v18986_v47 = vpop.f32.mrb[125].mxu0 }
0x400a   :  { %v11830_v38 = vpop.f32.mrb[134].mxu1 }
0x400b   :  { %v12262_v0 = vrot.slane %v11830_v38, 7  ;;  %v19021_v7 = vpop.f32.mrb[135].mxu1 }
0x400d   :  { %v12263_v22 = vsel %vm1902_vm4, %v12262_v0, %v11760_v53 }
0x4048   :  { %v11900_v25 = vpop.f32.mrb[126].mxu0 }
0x4049   :  { %v12264_v36 = vrot.slane %v11900_v25, 6  ;;  %v19056_v39 = vpop.f32.mrb[127].mxu0 }
0x404b   :  { %v12265_v49 = vsel %vm1905_vm5, %v12264_v36, %v12263_v22 }
0x404c   :  { %v11970_v52 = vpop.f32.mrb[136].mxu1 }
0x404d   :  { %v12266_v1 = vrot.slane %v11970_v52, 5  ;;  %v19091_v14 = vpop.f32.mrb[137].mxu1 }
0x404f   :  { %v12267_v30 = vsel %vm1908_vm6, %v12266_v1, %v12265_v49 }
0x4088   :  { %v12040_v31 = vpop.f32.mrb[128].mxu0 }
0x4089   :  { %v12268_v45 = vrot.slane %v12040_v31, 4  ;;  %v19126_v57 = vpop.f32.mrb[129].mxu0 }
0x408a   :  { %v12110_v18 = vpop.f32.mrb[138].mxu1 }
0x408b   :  { %v12269_v21 = vsel %vm1911_vm7, %v12268_v45, %v12267_v30  ;;  %v12270_v33 = vrot.slane %v12110_v18, 3  ;;  %v19161_v63 = vpop.f32.mrb[139].mxu1 }
0x408d   :  { %v12271_v62 = vsel %vm1914_vm8, %v12270_v33, %v12269_v21 }
0x40c8   :  { %v12180_v42 = vpop.f32.mrb[130].mxu0 }
0x40c9   :  { %v12272_v44 = vrot.slane %v12180_v42, 2  ;;  %v19196_v60 = vpop.f32.mrb[131].mxu0 }
0x40ca   :  { %v12250_v35 = vpop.f32.mrb[140].mxu1 }
0x40cb   :  { %v12273_v40 = vsel %vm1917_vm9, %v12272_v44, %v12271_v62  ;;  %v12274_v10 = vrot.slane %v12250_v35, 1  ;;  %v19231_v17 = vpop.f32.mrb[141].mxu1 }
0x40cd   :  { %v12275_v61 = vsel %vm1920_vm10, %v12274_v10, %v12273_v40 }
0x40ce   :  { %19241 = vmatmul.mubr.msk.f32.vlgmr.msra.gmra.mrb[132].mxu0 %vm292_vm1, %v12275_v61 }
0x40cf   :  { %22243 = vmatpush3.bf16.msra.mxu0 %v27644_v55  ;;  %19251 = vmatprep.mubr.msk.f32.mxu0 %vm22637_vm0, %v27284_v3 }
0x40d0   :  { %22244 = vmatprep.subr.bf16.mxu0 %v27285_v51 }
0x40d2   :  { %v19264_v6 = vpop.f32.mrb[142].mxu1 }
0x40d3   :  { %v12523_v41 = vadd.f32 %v19264_v6, %v13477_v20  ;;  %22246 = vmatpush3.bf16.msra.mxu0 %v27645_v58  ;;  %v12517_v11 = vpop.f32.mrb[143].mxu1 }
0x40d4   :  { %v12518_v26 = vadd.f32 %v13477_v20, %v12517_v11 }
0x40d5   :  { %12547 = vst [vmem:[#allocation3 + $0x8] sm:$0xff] %v12523_v41 }
0x40d6   :  { %12546 = vst [vmem:[#allocation3] sm:$0xff] %v12518_v26  ;;  %v19267_v43 = vpop.f32.mrb[144].mxu1  ;;  %19252 = vmatmul.mubr.msk.f32.vlgmr.msra.gmra.mrb[132].mxu0 %vm292_vm1, %v27646_v23 }
0x40d7   :  { %v12533_v29 = vadd.f32 %v19267_v43, %v13477_v20  ;;  %v12527_v3 = vpop.f32.mrb[145].mxu1 }
0x40d8   :  { %v12528_v54 = vadd.f32 %v13477_v20, %v12527_v3 }
0x40d9   :  { %12549 = vst [vmem:[#allocation3 + $0x18] sm:$0xff] %v12533_v29 }
0x40da   :  { %12548 = vst [vmem:[#allocation3 + $0x10] sm:$0xff] %v12528_v54 }
0x41a9   :  { %v12414_v51 = vpop.f32.mrb[132].mxu0 }
0x41aa   :  { %22576 = vtanh.f32 %v12414_v51  ;;  %v19253_v24 = vpop.f32.mrb[133].mxu0 }
0x41b4   :  { %v22577_v19 = vpop.eup %22576 }
0x41b5   :  { %12419 = vst.msk [vmem:[#allocation2 + $0x28] sm:$0xff] %vm292_vm1, %v22577_v19 }
0x41bc   :  { %v12425_v28 = vld [vmem:[#allocation2 + $0x28] sm:$0xff] }
0x41bd   :  { %19269 = vmatmul.mubr.msk.f32.gmra.mrb[146].mxu1 %vm292_vm1, %v12425_v28 }
0x41be   :  { %22599 = shalt.err (!%p22596_p4)
}
0x41bf   :  { %s22600_s25 = scalar_lea.hbm %s27052_s13, 768 }
0x41c0   :  { %p22601_p5 = scmp.ne.s32.totalorder %s27052_s13, %s22600_s25  ;;  %p22604_p6 = scmp.lt.u32.totalorder %s22600_s25, %s27052_s13 }
0x41c2   :  { %p22606_p7 = pnand %p22604_p6, %p22601_p5 }
0x41c4   :  { %22609 = shalt.err (!%p22606_p7)
}
0x41c5   :  { %s22643_s27 = smov 128   ;;  %s22644_s28 = smov 8  }
0x41c6   :  { %12575 = dma.vmem_to_hbm [thread:$0]  %s12570_s20, 768, %s27052_s13, [#allocation6], %s22643_s27, %s22643_s27, %s22644_s28  }
0x41c7   :  { %s22645_s29 = smov [#allocation3]  }
0x41c8   :  { %s12557_s0 = sshll.u32 %s22645_s29, 4  ;;  %s12558_s0 = int_to_ptr.vmem [resolvable:$true] %s12557_s0 }
0x41c9   :  { %s22610_s30 = scalar_lea.vmem %s12558_s0, 768  ;;  %p22615_p9 = scmp.lt.s32.totalorder %s12558_s0, %s12558_s0 }
0x41ca   :  { %p22611_p8 = scmp.ne.s32.totalorder %s12558_s0, %s22610_s30  ;;  %p22616_p10 = scmp.lt.s32.totalorder %s22610_s30, %s22610_s30 }
0x41cc   :  { %p22617_p11 = por %p22616_p10, %p22615_p9 }
0x41ce   :  { %p22618_p12 = pnand %p22617_p11, %p22611_p8 }
0x4290   :  { %v19270_v46 = vpop.f32.mrb[146].mxu1 }
0x4291   :  { %v12543_v9 = vadd.f32 %v19270_v46, %v13477_v20  ;;  %v12537_v32 = vpop.f32.mrb[147].mxu1 }
0x4292   :  { %v12538_v56 = vadd.f32 %v13477_v20, %v12537_v32 }
0x4293   :  { %12551 = vst [vmem:[#allocation3 + $0x28] sm:$0xff] %v12543_v9 }
0x4294   :  { %12550 = vst [vmem:[#allocation3 + $0x20] sm:$0xff] %v12538_v56 }
0x4295   :  { %22621 = shalt.err (!%p22618_p12)
}
0x4296   :  { %s22622_s13 = scalar_lea.hbm %s27051_s12, 768 }
0x4297   :  { %p22623_p13 = scmp.ne.s32.totalorder %s27051_s12, %s22622_s13  ;;  %p22626_p0 = scmp.lt.u32.totalorder %s22622_s13, %s27051_s12 }
0x4299   :  { %p22628_p1 = pnand %p22626_p0, %p22623_p13 }
0x429b   :  { %22631 = shalt.err (!%p22628_p1)
}
0x429c   :  { %12563 = dma.vmem_to_hbm [thread:$0]  %s12558_s0, 768, %s27051_s12, [#allocation4], %s22643_s27, %s22643_s27, %s22644_s28  }
0x429d   :  { %22632 = dma.done.wait [#allocation4], 768  }
0x429e   :  { %22633 = vsyncadd [#allocation4], 4294966528 }
0x429f   :  { %22634 = dma.done.wait [#allocation6], 768  }
0x42a0   :  { %22635 = vsyncadd [#allocation6], 4294966528 }
0x42a1   :  { %12582 = vsyncpa [#allocation4], 1 }
0x42a2   :  { %12583 = vsyncpa [#allocation6], 1 }

</bundles_post_ra>
